<compile_context>
chip_gen: v6e
topology: v6e:2x2x1
jax: 0.10.0
libtpu: 0.0.40
codegen_flags: <defaults>
</compile_context>

<pallas_src>
import jax
import jax.numpy as jnp
from jax import lax
from jax.experimental import pallas as pl
from jax.experimental.pallas import tpu as pltpu

HIDDEN = 32        # hidden_dim
MODEL_NUM = 2      # model_num -> input_logits feature dim = 11 * model_num = 22
EMB_DIM = 4096     # embeddings feature dim (hard-coded in the PyTorch module)
NUM_LABELS = 11
BATCH = 2
SEQ = 8
LANE = 128


def _round_up(x, m):
    return (x + m - 1) // m * m


# ------------------------------ fused kernel ---------------------------------
#
# Chain order (lane blocks of H=32): 0 = logits-LSTM fwd, 1 = embedding-LSTM fwd,
#                                    2 = logits-LSTM bwd, 3 = embedding-LSTM bwd
# Gate-major fused layout over the 512 gate columns:
#   columns [g*4H + j*H : g*4H + (j+1)*H] = gate g (PyTorch order i,f,g,o) of chain j.

def make_fused_kernel(T, Bp, H):
    G4 = 4 * H        # one gate block across the 4 chains  (= 128 lanes)
    NC = 16 * H       # all gates x all chains               (= 512 lanes)

    def kernel(xlog_ref, xemb_ref, wlog_ref, wemb_ref, ball_ref, whh_ref,
               w1_ref, b1_ref, w2_ref, b2_ref,
               out_ref, xproj_ref, feat_ref):
        # ---- input projections: one MXU pass per input operand ---------------
        xproj_ref[...] = (
            jnp.dot(xlog_ref[...], wlog_ref[...],
                    preferred_element_type=jnp.float32) + ball_ref[...])
        xe = jnp.dot(xemb_ref[...], wemb_ref[...],
                     preferred_element_type=jnp.float32)            # (T*Bp, 8H)
        # Scatter the embedding contribution into the emb_f / emb_b chain lanes
        # (static slices, once, outside the recurrence loop).
        for g in range(4):
            for je, j in ((0, 1), (1, 3)):                          # emb_f, emb_b
                src = g * 2 * H + je * H
                dst = g * G4 + j * H
                xproj_ref[:, dst:dst + H] = (
                    xproj_ref[:, dst:dst + H] + xe[:, src:src + H])

        # ---- interleaved recurrence over the four chains ---------------------
        lane = lax.broadcasted_iota(jnp.int32, (Bp, NC), 1)
        is_fwd = (lane % G4) < (2 * H)                 # chains 0,1 are forward

        h = jnp.zeros((Bp, 4 * H), jnp.float32)
        c = jnp.zeros((Bp, 4 * H), jnp.float32)
        for s in range(T):                             # fully unrolled, static offsets
            tb = T - 1 - s
            rf = xproj_ref[s * Bp:(s + 1) * Bp, :]     # fwd chains read timestep s
            rb = xproj_ref[tb * Bp:(tb + 1) * Bp, :]   # bwd chains read timestep T-1-s
            gates = jnp.where(is_fwd, rf, rb) + jnp.dot(
                h, whh_ref[...], preferred_element_type=jnp.float32)
            i_g = jax.nn.sigmoid(gates[:, 0 * G4:1 * G4])
            f_g = jax.nn.sigmoid(gates[:, 1 * G4:2 * G4])
            g_g = jnp.tanh(gates[:, 2 * G4:3 * G4])
            o_g = jax.nn.sigmoid(gates[:, 3 * G4:4 * G4])
            c = f_g * c + i_g * g_g
            h = o_g * jnp.tanh(c)
            # features layout: [log_f | emb_f | log_b | emb_b]; sublane-aligned stores
            feat_ref[s * Bp:(s + 1) * Bp, 0:2 * H] = h[:, 0:2 * H]
            feat_ref[tb * Bp:(tb + 1) * Bp, 2 * H:4 * H] = h[:, 2 * H:4 * H]

        # ---- head: Linear(4H,H) -> ReLU -> Linear(H, 128-padded labels) ------
        hid = jnp.dot(feat_ref[...], w1_ref[...],
                      preferred_element_type=jnp.float32) + b1_ref[...]
        hid = jnp.maximum(hid, 0.0)
        out_ref[...] = jnp.dot(hid, w2_ref[...],
                               preferred_element_type=jnp.float32) + b2_ref[...]

    return kernel


# ------------------------------- wrapper --------------------------------------

def ner_stacking_forward_fn(prepped, input_logits, embeddings):
    """forward(input_logits, embeddings, labels=None) -> (logits,)"""
    B, T, Dl = input_logits.shape
    H = HIDDEN
    Bp = max(_round_up(B, 8), 8)
    Dlp = prepped["Wlog"].shape[0]

    # Pad batch to a sublane multiple and flatten time-major; padded batch rows are
    # zero inputs -> independent, finite, and sliced off after the kernel.
    xl = jnp.pad(input_logits, ((0, Bp - B), (0, 0), (0, Dlp - Dl)))
    xl = jnp.transpose(xl, (1, 0, 2)).reshape(T * Bp, Dlp)
    xe = jnp.pad(embeddings, ((0, Bp - B), (0, 0), (0, 0)))
    xe = jnp.transpose(xe, (1, 0, 2)).reshape(T * Bp, EMB_DIM)

    vmem = pl.BlockSpec(memory_space=pltpu.MemorySpace.VMEM)
    out = pl.pallas_call(
        make_fused_kernel(T, Bp, H),
        out_shape=jax.ShapeDtypeStruct((T * Bp, LANE), jnp.float32),
        in_specs=[vmem] * 10,
        out_specs=vmem,
        scratch_shapes=[pltpu.VMEM((T * Bp, 16 * H), jnp.float32),   # fused gate proj
                        pltpu.VMEM((T * Bp, 4 * H), jnp.float32)],   # features
    )(xl, xe, prepped["Wlog"], prepped["Wemb"], prepped["b"], prepped["Whh"],
      prepped["w1"], prepped["b1"], prepped["w2"], prepped["b2"])

    # high_dropout is identity at inference, so mean of 5 identical samples == one pass.
    logits = out.reshape(T, Bp, LANE)[:, :B, :NUM_LABELS].transpose(1, 0, 2)
    return (logits,)


ner_stacking_forward = jax.jit(ner_stacking_forward_fn)


# ---------------------- parameter preparation (once, outside jit) --------------

def prepare_params(params, hidden_dim=HIDDEN):
    """Fuse/permute the raw PyTorch-style params into the kernel's layout."""
    H = hidden_dim
    plog = params["lstm"]
    pemb = params["embedding_lstm"]
    phead = params["head"]
    in_log = plog["wih_f"].shape[0]          # 11 * model_num
    Dlp = _round_up(in_log, LANE)

    # chain order: 0=log_f, 1=emb_f, 2=log_b, 3=emb_b
    # (wih rows multiplying input_logits, wih rows multiplying embeddings, whh, bias)
    chains = [
        (plog["wih_f"], None, plog["whh_f"], plog["b_f"]),
        (pemb["wih_f"][:in_log], pemb["wih_f"][in_log:], pemb["whh_f"], pemb["b_f"]),
        (plog["wih_b"], None, plog["whh_b"], plog["b_b"]),
        (pemb["wih_b"][:in_log], pemb["wih_b"][in_log:], pemb["whh_b"], pemb["b_b"]),
    ]
    emb_slot = {1: 0, 3: 1}

    Wlog = jnp.zeros((Dlp, 16 * H), jnp.float32)
    Wemb = jnp.zeros((EMB_DIM, 8 * H), jnp.float32)
    Whh = jnp.zeros((4 * H, 16 * H), jnp.float32)      # block-diagonal per chain
    ball = jnp.zeros((1, 16 * H), jnp.float32)

    for j, (w_l, w_e, whh, b) in enumerate(chains):
        for g in range(4):                              # PyTorch gate order i, f, g, o
            src = slice(g * H, (g + 1) * H)
            dst = slice(g * 4 * H + j * H, g * 4 * H + (j + 1) * H)
            Wlog = Wlog.at[:in_log, dst].set(w_l[:, src])
            Whh = Whh.at[j * H:(j + 1) * H, dst].set(whh[:, src])
            ball = ball.at[:, dst].set(b[:, src])
            if w_e is not None:
                je = emb_slot[j]
                dste = slice(g * 2 * H + je * H, g * 2 * H + (je + 1) * H)
                Wemb = Wemb.at[:, dste].set(w_e[:, src])

    # head: kernel feature layout is [log_f | emb_f | log_b | emb_b], original w1 rows
    # are ordered [log_f | log_b | emb_f | emb_b] -> permute rows once.
    w1 = phead["w1"]
    w1p = jnp.concatenate(
        [w1[0:H], w1[2 * H:3 * H], w1[H:2 * H], w1[3 * H:4 * H]], axis=0)
    w2p = jnp.zeros((H, LANE), jnp.float32).at[:, :NUM_LABELS].set(phead["w2"])
    b2p = jnp.zeros((1, LANE), jnp.float32).at[:, :NUM_LABELS].set(phead["b2"])

    return {"Wlog": Wlog, "Wemb": Wemb, "Whh": Whh, "b": ball,
            "w1": w1p, "b1": phead["b1"], "w2": w2p, "b2": b2p}


# -------------------------- parameters (deterministic) -------------------------

def init_params(key, hidden_dim, model_num):
    in_logits = 11 * model_num
    in_emb = EMB_DIM + in_logits
    keys = iter(jax.random.split(key, 20))
    k_lstm = hidden_dim ** -0.5

    def u(shape, scale):
        return jax.random.uniform(next(keys), shape, jnp.float32, -scale, scale)

    def lstm_params(in_dim):
        return {
            "wih_f": u((in_dim, 4 * hidden_dim), k_lstm),
            "whh_f": u((hidden_dim, 4 * hidden_dim), k_lstm),
            # PyTorch adds bias_ih + bias_hh -> fold into one bias per direction.
            "b_f": u((1, 4 * hidden_dim), k_lstm) + u((1, 4 * hidden_dim), k_lstm),
            "wih_b": u((in_dim, 4 * hidden_dim), k_lstm),
            "whh_b": u((hidden_dim, 4 * hidden_dim), k_lstm),
            "b_b": u((1, 4 * hidden_dim), k_lstm) + u((1, 4 * hidden_dim), k_lstm),
        }

    k1 = (4 * hidden_dim) ** -0.5
    k2 = hidden_dim ** -0.5
    return {
        "embedding_lstm": lstm_params(in_emb),
        "lstm": lstm_params(in_logits),
        "head": {
            "w1": u((4 * hidden_dim, hidden_dim), k1),
            "b1": u((1, hidden_dim), k1),
            "w2": u((hidden_dim, NUM_LABELS), k2),
            "b2": u((1, NUM_LABELS), k2),
        },
    }


# ------------------------------ pure-JAX reference -----------------------------

def _lstm_dir_ref(x, wih, whh, b, H, reverse):
    B = x.shape[0]

    def step(carry, xt):
        h, c = carry
        gates = xt @ wih + h @ whh + b[0]
        i = jax.nn.sigmoid(gates[:, 0:H])
        f = jax.nn.sigmoid(gates[:, H:2 * H])
        g = jnp.tanh(gates[:, 2 * H:3 * H])
        o = jax.nn.sigmoid(gates[:, 3 * H:4 * H])
        c = f * c + i * g
        h = o * jnp.tanh(c)
        return (h, c), h

    xs = jnp.transpose(x, (1, 0, 2))
    if reverse:
        xs = xs[::-1]
    init = (jnp.zeros((B, H), jnp.float32), jnp.zeros((B, H), jnp.float32))
    _, hs = lax.scan(step, init, xs)
    if reverse:
        hs = hs[::-1]
    return jnp.transpose(hs, (1, 0, 2))


def _bilstm_ref(x, p, H):
    fwd = _lstm_dir_ref(x, p["wih_f"], p["whh_f"], p["b_f"], H, False)
    bwd = _lstm_dir_ref(x, p["wih_b"], p["whh_b"], p["b_b"], H, True)
    return jnp.concatenate([fwd, bwd], axis=-1)


def forward_ref(params, input_logits, embeddings):
    concated = jnp.concatenate([input_logits, embeddings], axis=-1)
    embedding_out = _bilstm_ref(concated, params["embedding_lstm"], HIDDEN)
    logits_out = _bilstm_ref(input_logits, params["lstm"], HIDDEN)
    features = jnp.concatenate([logits_out, embedding_out], axis=-1)
    hp = params["head"]
    h = jnp.maximum(features @ hp["w1"] + hp["b1"][0], 0.0)
    return h @ hp["w2"] + hp["b2"][0]


# ----------------------------------- main ---------------------------------------

if __name__ == "__main__":
    key = jax.random.PRNGKey(0)
    kp, ki, ke = jax.random.split(key, 3)
    params = init_params(kp, HIDDEN, MODEL_NUM)
    prepped = prepare_params(params)

    input_logits = jax.random.normal(ki, (BATCH, SEQ, 11 * MODEL_NUM), jnp.float32)
    embeddings = jax.random.normal(ke, (BATCH, SEQ, EMB_DIM), jnp.float32)

    (logits,) = ner_stacking_forward(prepped, input_logits, embeddings)
    logits = jax.block_until_ready(logits)

    assert logits.shape == (BATCH, SEQ, NUM_LABELS), logits.shape
    assert bool(jnp.all(jnp.isfinite(logits)))

    ref = jax.block_until_ready(forward_ref(params, input_logits, embeddings))
    max_err = float(jnp.max(jnp.abs(logits - ref)))
    assert bool(jnp.allclose(logits, ref, rtol=1e-2, atol=1e-2)), max_err

    print("KERNEL_OK")
</pallas_src>

<mosaic_0001>
module attributes {stable_mosaic.version = 11 : i64} {
  func.func @kernel(%arg0: memref<64x128xf32, #tpu.memory_space<vmem>>, %arg1: memref<64x4096xf32, #tpu.memory_space<vmem>>, %arg2: memref<128x512xf32, #tpu.memory_space<vmem>>, %arg3: memref<4096x256xf32, #tpu.memory_space<vmem>>, %arg4: memref<1x512xf32, #tpu.memory_space<vmem>>, %arg5: memref<128x512xf32, #tpu.memory_space<vmem>>, %arg6: memref<128x32xf32, #tpu.memory_space<vmem>>, %arg7: memref<1x32xf32, #tpu.memory_space<vmem>>, %arg8: memref<32x128xf32, #tpu.memory_space<vmem>>, %arg9: memref<1x128xf32, #tpu.memory_space<vmem>>, %arg10: memref<64x128xf32, #tpu.memory_space<vmem>>, %arg11: memref<64x512xf32, #tpu.memory_space<vmem>>, %arg12: memref<64x128xf32, #tpu.memory_space<vmem>>) attributes {dimension_semantics = [], scalar_prefetch = 0 : i64, scratch_operands = 2 : i64, tpu.core_type = #tpu.core_type<tc>} {
    %c0 = arith.constant 0 : index
    %c0_0 = arith.constant 0 : index
    %0 = vector.load %arg0[%c0, %c0_0] : memref<64x128xf32, #tpu.memory_space<vmem>>, vector<64x128xf32>
    %c0_1 = arith.constant 0 : index
    %c0_2 = arith.constant 0 : index
    %1 = vector.load %arg2[%c0_1, %c0_2] : memref<128x512xf32, #tpu.memory_space<vmem>>, vector<128x512xf32>
    %cst = arith.constant dense<0.000000e+00> : vector<64x512xf32>
    %2 = tpu.matmul %0, %1, %cst {dimension_numbers = #tpu.dot_dimension_numbers<[1], [0], [0], [1], [0, 0, 1, 1], [], []>} : vector<64x128xf32>, vector<128x512xf32>, vector<64x512xf32> -> vector<64x512xf32>
    %c0_3 = arith.constant 0 : index
    %c0_4 = arith.constant 0 : index
    %3 = vector.load %arg4[%c0_3, %c0_4] : memref<1x512xf32, #tpu.memory_space<vmem>>, vector<1x512xf32>
    %4 = vector.broadcast %3 : vector<1x512xf32> to vector<64x512xf32>
    %5 = arith.addf %2, %4 : vector<64x512xf32>
    %c0_5 = arith.constant 0 : index
    %c0_6 = arith.constant 0 : index
    %6 = vector.load %arg11[%c0_5, %c0_6] : memref<64x512xf32, #tpu.memory_space<vmem>>, vector<64x512xf32>
    tpu.vector_store %arg11[%c0_5, %c0_6], %5 {strides = array<i32>} : memref<64x512xf32, #tpu.memory_space<vmem>>, vector<64x512xf32>,
    %c0_7 = arith.constant 0 : index
    %c0_8 = arith.constant 0 : index
    %7 = vector.load %arg1[%c0_7, %c0_8] : memref<64x4096xf32, #tpu.memory_space<vmem>>, vector<64x4096xf32>
    %c0_9 = arith.constant 0 : index
    %c0_10 = arith.constant 0 : index
    %8 = vector.load %arg3[%c0_9, %c0_10] : memref<4096x256xf32, #tpu.memory_space<vmem>>, vector<4096x256xf32>
    %cst_11 = arith.constant dense<0.000000e+00> : vector<64x256xf32>
    %9 = tpu.matmul %7, %8, %cst_11 {dimension_numbers = #tpu.dot_dimension_numbers<[1], [0], [0], [1], [0, 0, 1, 1], [], []>} : vector<64x4096xf32>, vector<4096x256xf32>, vector<64x256xf32> -> vector<64x256xf32>
    %c0_12 = arith.constant 0 : index
    %c32 = arith.constant 32 : index
    %10 = vector.load %arg11[%c0_12, %c32] : memref<64x512xf32, #tpu.memory_space<vmem>>, vector<64x32xf32>
    %11 = vector.extract_strided_slice %9 {offsets = [0, 0], sizes = [64, 32], strides = [1, 1]} : vector<64x256xf32> to vector<64x32xf32>
    %12 = arith.addf %10, %11 : vector<64x32xf32>
    %c0_13 = arith.constant 0 : index
    %c32_14 = arith.constant 32 : index
    %13 = vector.load %arg11[%c0_13, %c32_14] : memref<64x512xf32, #tpu.memory_space<vmem>>, vector<64x32xf32>
    tpu.vector_store %arg11[%c0_13, %c32_14], %12 {strides = array<i32>} : memref<64x512xf32, #tpu.memory_space<vmem>>, vector<64x32xf32>,
    %c0_15 = arith.constant 0 : index
    %c96 = arith.constant 96 : index
    %14 = vector.load %arg11[%c0_15, %c96] : memref<64x512xf32, #tpu.memory_space<vmem>>, vector<64x32xf32>
    %15 = vector.extract_strided_slice %9 {offsets = [0, 32], sizes = [64, 32], strides = [1, 1]} : vector<64x256xf32> to vector<64x32xf32>
    %16 = arith.addf %14, %15 : vector<64x32xf32>
    %c0_16 = arith.constant 0 : index
    %c96_17 = arith.constant 96 : index
    %17 = vector.load %arg11[%c0_16, %c96_17] : memref<64x512xf32, #tpu.memory_space<vmem>>, vector<64x32xf32>
    tpu.vector_store %arg11[%c0_16, %c96_17], %16 {strides = array<i32>} : memref<64x512xf32, #tpu.memory_space<vmem>>, vector<64x32xf32>,
    %c0_18 = arith.constant 0 : index
    %c160 = arith.constant 160 : index
    %18 = vector.load %arg11[%c0_18, %c160] : memref<64x512xf32, #tpu.memory_space<vmem>>, vector<64x32xf32>
    %19 = vector.extract_strided_slice %9 {offsets = [0, 64], sizes = [64, 32], strides = [1, 1]} : vector<64x256xf32> to vector<64x32xf32>
    %20 = arith.addf %18, %19 : vector<64x32xf32>
    %c0_19 = arith.constant 0 : index
    %c160_20 = arith.constant 160 : index
    %21 = vector.load %arg11[%c0_19, %c160_20] : memref<64x512xf32, #tpu.memory_space<vmem>>, vector<64x32xf32>
    tpu.vector_store %arg11[%c0_19, %c160_20], %20 {strides = array<i32>} : memref<64x512xf32, #tpu.memory_space<vmem>>, vector<64x32xf32>,
    %c0_21 = arith.constant 0 : index
    %c224 = arith.constant 224 : index
    %22 = vector.load %arg11[%c0_21, %c224] : memref<64x512xf32, #tpu.memory_space<vmem>>, vector<64x32xf32>
    %23 = vector.extract_strided_slice %9 {offsets = [0, 96], sizes = [64, 32], strides = [1, 1]} : vector<64x256xf32> to vector<64x32xf32>
    %24 = arith.addf %22, %23 : vector<64x32xf32>
    %c0_22 = arith.constant 0 : index
    %c224_23 = arith.constant 224 : index
    %25 = vector.load %arg11[%c0_22, %c224_23] : memref<64x512xf32, #tpu.memory_space<vmem>>, vector<64x32xf32>
    tpu.vector_store %arg11[%c0_22, %c224_23], %24 {strides = array<i32>} : memref<64x512xf32, #tpu.memory_space<vmem>>, vector<64x32xf32>,
    %c0_24 = arith.constant 0 : index
    %c288 = arith.constant 288 : index
    %26 = vector.load %arg11[%c0_24, %c288] : memref<64x512xf32, #tpu.memory_space<vmem>>, vector<64x32xf32>
    %27 = vector.extract_strided_slice %9 {offsets = [0, 128], sizes = [64, 32], strides = [1, 1]} : vector<64x256xf32> to vector<64x32xf32>
    %28 = arith.addf %26, %27 : vector<64x32xf32>
    %c0_25 = arith.constant 0 : index
    %c288_26 = arith.constant 288 : index
    %29 = vector.load %arg11[%c0_25, %c288_26] : memref<64x512xf32, #tpu.memory_space<vmem>>, vector<64x32xf32>
    tpu.vector_store %arg11[%c0_25, %c288_26], %28 {strides = array<i32>} : memref<64x512xf32, #tpu.memory_space<vmem>>, vector<64x32xf32>,
    %c0_27 = arith.constant 0 : index
    %c352 = arith.constant 352 : index
    %30 = vector.load %arg11[%c0_27, %c352] : memref<64x512xf32, #tpu.memory_space<vmem>>, vector<64x32xf32>
    %31 = vector.extract_strided_slice %9 {offsets = [0, 160], sizes = [64, 32], strides = [1, 1]} : vector<64x256xf32> to vector<64x32xf32>
    %32 = arith.addf %30, %31 : vector<64x32xf32>
    %c0_28 = arith.constant 0 : index
    %c352_29 = arith.constant 352 : index
    %33 = vector.load %arg11[%c0_28, %c352_29] : memref<64x512xf32, #tpu.memory_space<vmem>>, vector<64x32xf32>
    tpu.vector_store %arg11[%c0_28, %c352_29], %32 {strides = array<i32>} : memref<64x512xf32, #tpu.memory_space<vmem>>, vector<64x32xf32>,
    %c0_30 = arith.constant 0 : index
    %c416 = arith.constant 416 : index
    %34 = vector.load %arg11[%c0_30, %c416] : memref<64x512xf32, #tpu.memory_space<vmem>>, vector<64x32xf32>
    %35 = vector.extract_strided_slice %9 {offsets = [0, 192], sizes = [64, 32], strides = [1, 1]} : vector<64x256xf32> to vector<64x32xf32>
    %36 = arith.addf %34, %35 : vector<64x32xf32>
    %c0_31 = arith.constant 0 : index
    %c416_32 = arith.constant 416 : index
    %37 = vector.load %arg11[%c0_31, %c416_32] : memref<64x512xf32, #tpu.memory_space<vmem>>, vector<64x32xf32>
    tpu.vector_store %arg11[%c0_31, %c416_32], %36 {strides = array<i32>} : memref<64x512xf32, #tpu.memory_space<vmem>>, vector<64x32xf32>,
    %c0_33 = arith.constant 0 : index
    %c480 = arith.constant 480 : index
    %38 = vector.load %arg11[%c0_33, %c480] : memref<64x512xf32, #tpu.memory_space<vmem>>, vector<64x32xf32>
    %39 = vector.extract_strided_slice %9 {offsets = [0, 224], sizes = [64, 32], strides = [1, 1]} : vector<64x256xf32> to vector<64x32xf32>
    %40 = arith.addf %38, %39 : vector<64x32xf32>
    %c0_34 = arith.constant 0 : index
    %c480_35 = arith.constant 480 : index
    %41 = vector.load %arg11[%c0_34, %c480_35] : memref<64x512xf32, #tpu.memory_space<vmem>>, vector<64x32xf32>
    tpu.vector_store %arg11[%c0_34, %c480_35], %40 {strides = array<i32>} : memref<64x512xf32, #tpu.memory_space<vmem>>, vector<64x32xf32>,
    %42 = tpu.iota {dimensions = array<i32: 1>} : vector<8x512xi32>
    %c128_i32 = arith.constant 128 : i32
    %c0_i32 = arith.constant 0 : i32
    %43 = arith.cmpi eq, %c128_i32, %c0_i32 : i32
    %c1_i32 = arith.constant 1 : i32
    %44 = arith.select %43, %c1_i32, %c128_i32 : i32
    %45 = vector.broadcast %44 : i32 to vector<8x512xi32>
    %46 = arith.remsi %42, %45 : vector<8x512xi32>
    %c0_i32_36 = arith.constant 0 : i32
    %47 = vector.broadcast %c0_i32_36 : i32 to vector<8x512xi32>
    %48 = arith.cmpi ne, %46, %47 : vector<8x512xi32>
    %c0_i32_37 = arith.constant 0 : i32
    %49 = vector.broadcast %c0_i32_37 : i32 to vector<8x512xi32>
    %50 = arith.cmpi slt, %46, %49 : vector<8x512xi32>
    %c0_i32_38 = arith.constant 0 : i32
    %51 = arith.cmpi slt, %44, %c0_i32_38 : i32
    %52 = vector.broadcast %51 : i1 to vector<8x512xi1>
    %53 = vector.broadcast %52 : vector<8x512xi1> to vector<8x512xi1>
    %54 = arith.xori %50, %53 : vector<8x512xi1>
    %55 = arith.andi %54, %48 : vector<8x512xi1>
    %56 = vector.broadcast %44 : i32 to vector<8x512xi32>
    %57 = arith.addi %46, %56 : vector<8x512xi32>
    %58 = arith.select %55, %57, %46 : vector<8x512xi1>, vector<8x512xi32>
    %c64_i32 = arith.constant 64 : i32
    %59 = vector.broadcast %c64_i32 : i32 to vector<8x512xi32>
    %60 = arith.cmpi slt, %58, %59 : vector<8x512xi32>
    %cst_39 = arith.constant 0.000000e+00 : f32
    %61 = vector.broadcast %cst_39 : f32 to vector<8x128xf32>
    %cst_40 = arith.constant 0.000000e+00 : f32
    %62 = vector.broadcast %cst_40 : f32 to vector<8x128xf32>
    %c0_41 = arith.constant 0 : index
    %c0_42 = arith.constant 0 : index
    %63 = vector.load %arg11[%c0_41, %c0_42] : memref<64x512xf32, #tpu.memory_space<vmem>>, vector<8x512xf32>
    %c56 = arith.constant 56 : index
    %c0_43 = arith.constant 0 : index
    %64 = vector.load %arg11[%c56, %c0_43] : memref<64x512xf32, #tpu.memory_space<vmem>>, vector<8x512xf32>
    %65 = arith.select %60, %63, %64 : vector<8x512xi1>, vector<8x512xf32>
    %c0_44 = arith.constant 0 : index
    %c0_45 = arith.constant 0 : index
    %66 = vector.load %arg5[%c0_44, %c0_45] : memref<128x512xf32, #tpu.memory_space<vmem>>, vector<128x512xf32>
    %cst_46 = arith.constant dense<0.000000e+00> : vector<8x512xf32>
    %67 = tpu.matmul %61, %66, %cst_46 {dimension_numbers = #tpu.dot_dimension_numbers<[1], [0], [0], [1], [0, 0, 1, 1], [], []>} : vector<8x128xf32>, vector<128x512xf32>, vector<8x512xf32> -> vector<8x512xf32>
    %68 = arith.addf %65, %67 : vector<8x512xf32>
    %69 = vector.extract_strided_slice %68 {offsets = [0, 0], sizes = [8, 128], strides = [1, 1]} : vector<8x512xf32> to vector<8x128xf32>
    %70 = arith.negf %69 : vector<8x128xf32>
    %71 = math.exp %70 : vector<8x128xf32>
    %cst_47 = arith.constant 1.000000e+00 : f32
    %72 = vector.broadcast %cst_47 : f32 to vector<8x128xf32>
    %73 = arith.addf %72, %71 : vector<8x128xf32>
    %74 = arith.divf %72, %73 : vector<8x128xf32>
    %75 = vector.extract_strided_slice %68 {offsets = [0, 128], sizes = [8, 128], strides = [1, 1]} : vector<8x512xf32> to vector<8x128xf32>
    %76 = arith.negf %75 : vector<8x128xf32>
    %77 = math.exp %76 : vector<8x128xf32>
    %cst_48 = arith.constant 1.000000e+00 : f32
    %78 = vector.broadcast %cst_48 : f32 to vector<8x128xf32>
    %79 = arith.addf %78, %77 : vector<8x128xf32>
    %80 = arith.divf %78, %79 : vector<8x128xf32>
    %81 = vector.extract_strided_slice %68 {offsets = [0, 256], sizes = [8, 128], strides = [1, 1]} : vector<8x512xf32> to vector<8x128xf32>
    %82 = math.tanh %81 : vector<8x128xf32>
    %83 = vector.extract_strided_slice %68 {offsets = [0, 384], sizes = [8, 128], strides = [1, 1]} : vector<8x512xf32> to vector<8x128xf32>
    %84 = arith.negf %83 : vector<8x128xf32>
    %85 = math.exp %84 : vector<8x128xf32>
    %cst_49 = arith.constant 1.000000e+00 : f32
    %86 = vector.broadcast %cst_49 : f32 to vector<8x128xf32>
    %87 = arith.addf %86, %85 : vector<8x128xf32>
    %88 = arith.divf %86, %87 : vector<8x128xf32>
    %89 = arith.mulf %80, %62 : vector<8x128xf32>
    %90 = arith.mulf %74, %82 : vector<8x128xf32>
    %91 = arith.addf %89, %90 : vector<8x128xf32>
    %92 = math.tanh %91 : vector<8x128xf32>
    %93 = arith.mulf %88, %92 : vector<8x128xf32>
    %94 = vector.extract_strided_slice %93 {offsets = [0, 0], sizes = [8, 64], strides = [1, 1]} : vector<8x128xf32> to vector<8x64xf32>
    %c0_50 = arith.constant 0 : index
    %c0_51 = arith.constant 0 : index
    %95 = vector.load %arg12[%c0_50, %c0_51] : memref<64x128xf32, #tpu.memory_space<vmem>>, vector<8x64xf32>
    tpu.vector_store %arg12[%c0_50, %c0_51], %94 {strides = array<i32>} : memref<64x128xf32, #tpu.memory_space<vmem>>, vector<8x64xf32>,
    %96 = vector.extract_strided_slice %93 {offsets = [0, 64], sizes = [8, 64], strides = [1, 1]} : vector<8x128xf32> to vector<8x64xf32>
    %c56_52 = arith.constant 56 : index
    %c64 = arith.constant 64 : index
    %97 = vector.load %arg12[%c56_52, %c64] : memref<64x128xf32, #tpu.memory_space<vmem>>, vector<8x64xf32>
    tpu.vector_store %arg12[%c56_52, %c64], %96 {strides = array<i32>} : memref<64x128xf32, #tpu.memory_space<vmem>>, vector<8x64xf32>,
    %c8 = arith.constant 8 : index
    %c0_53 = arith.constant 0 : index
    %98 = vector.load %arg11[%c8, %c0_53] : memref<64x512xf32, #tpu.memory_space<vmem>>, vector<8x512xf32>
    %c48 = arith.constant 48 : index
    %c0_54 = arith.constant 0 : index
    %99 = vector.load %arg11[%c48, %c0_54] : memref<64x512xf32, #tpu.memory_space<vmem>>, vector<8x512xf32>
    %100 = arith.select %60, %98, %99 : vector<8x512xi1>, vector<8x512xf32>
    %c0_55 = arith.constant 0 : index
    %c0_56 = arith.constant 0 : index
    %101 = vector.load %arg5[%c0_55, %c0_56] : memref<128x512xf32, #tpu.memory_space<vmem>>, vector<128x512xf32>
    %cst_57 = arith.constant dense<0.000000e+00> : vector<8x512xf32>
    %102 = tpu.matmul %93, %101, %cst_57 {dimension_numbers = #tpu.dot_dimension_numbers<[1], [0], [0], [1], [0, 0, 1, 1], [], []>} : vector<8x128xf32>, vector<128x512xf32>, vector<8x512xf32> -> vector<8x512xf32>
    %103 = arith.addf %100, %102 : vector<8x512xf32>
    %104 = vector.extract_strided_slice %103 {offsets = [0, 0], sizes = [8, 128], strides = [1, 1]} : vector<8x512xf32> to vector<8x128xf32>
    %105 = arith.negf %104 : vector<8x128xf32>
    %106 = math.exp %105 : vector<8x128xf32>
    %cst_58 = arith.constant 1.000000e+00 : f32
    %107 = vector.broadcast %cst_58 : f32 to vector<8x128xf32>
    %108 = arith.addf %107, %106 : vector<8x128xf32>
    %109 = arith.divf %107, %108 : vector<8x128xf32>
    %110 = vector.extract_strided_slice %103 {offsets = [0, 128], sizes = [8, 128], strides = [1, 1]} : vector<8x512xf32> to vector<8x128xf32>
    %111 = arith.negf %110 : vector<8x128xf32>
    %112 = math.exp %111 : vector<8x128xf32>
    %cst_59 = arith.constant 1.000000e+00 : f32
    %113 = vector.broadcast %cst_59 : f32 to vector<8x128xf32>
    %114 = arith.addf %113, %112 : vector<8x128xf32>
    %115 = arith.divf %113, %114 : vector<8x128xf32>
    %116 = vector.extract_strided_slice %103 {offsets = [0, 256], sizes = [8, 128], strides = [1, 1]} : vector<8x512xf32> to vector<8x128xf32>
    %117 = math.tanh %116 : vector<8x128xf32>
    %118 = vector.extract_strided_slice %103 {offsets = [0, 384], sizes = [8, 128], strides = [1, 1]} : vector<8x512xf32> to vector<8x128xf32>
    %119 = arith.negf %118 : vector<8x128xf32>
    %120 = math.exp %119 : vector<8x128xf32>
    %cst_60 = arith.constant 1.000000e+00 : f32
    %121 = vector.broadcast %cst_60 : f32 to vector<8x128xf32>
    %122 = arith.addf %121, %120 : vector<8x128xf32>
    %123 = arith.divf %121, %122 : vector<8x128xf32>
    %124 = arith.mulf %115, %91 : vector<8x128xf32>
    %125 = arith.mulf %109, %117 : vector<8x128xf32>
    %126 = arith.addf %124, %125 : vector<8x128xf32>
    %127 = math.tanh %126 : vector<8x128xf32>
    %128 = arith.mulf %123, %127 : vector<8x128xf32>
    %129 = vector.extract_strided_slice %128 {offsets = [0, 0], sizes = [8, 64], strides = [1, 1]} : vector<8x128xf32> to vector<8x64xf32>
    %c8_61 = arith.constant 8 : index
    %c0_62 = arith.constant 0 : index
    %130 = vector.load %arg12[%c8_61, %c0_62] : memref<64x128xf32, #tpu.memory_space<vmem>>, vector<8x64xf32>
    tpu.vector_store %arg12[%c8_61, %c0_62], %129 {strides = array<i32>} : memref<64x128xf32, #tpu.memory_space<vmem>>, vector<8x64xf32>,
    %131 = vector.extract_strided_slice %128 {offsets = [0, 64], sizes = [8, 64], strides = [1, 1]} : vector<8x128xf32> to vector<8x64xf32>
    %c48_63 = arith.constant 48 : index
    %c64_64 = arith.constant 64 : index
    %132 = vector.load %arg12[%c48_63, %c64_64] : memref<64x128xf32, #tpu.memory_space<vmem>>, vector<8x64xf32>
    tpu.vector_store %arg12[%c48_63, %c64_64], %131 {strides = array<i32>} : memref<64x128xf32, #tpu.memory_space<vmem>>, vector<8x64xf32>,
    %c16 = arith.constant 16 : index
    %c0_65 = arith.constant 0 : index
    %133 = vector.load %arg11[%c16, %c0_65] : memref<64x512xf32, #tpu.memory_space<vmem>>, vector<8x512xf32>
    %c40 = arith.constant 40 : index
    %c0_66 = arith.constant 0 : index
    %134 = vector.load %arg11[%c40, %c0_66] : memref<64x512xf32, #tpu.memory_space<vmem>>, vector<8x512xf32>
    %135 = arith.select %60, %133, %134 : vector<8x512xi1>, vector<8x512xf32>
    %c0_67 = arith.constant 0 : index
    %c0_68 = arith.constant 0 : index
    %136 = vector.load %arg5[%c0_67, %c0_68] : memref<128x512xf32, #tpu.memory_space<vmem>>, vector<128x512xf32>
    %cst_69 = arith.constant dense<0.000000e+00> : vector<8x512xf32>
    %137 = tpu.matmul %128, %136, %cst_69 {dimension_numbers = #tpu.dot_dimension_numbers<[1], [0], [0], [1], [0, 0, 1, 1], [], []>} : vector<8x128xf32>, vector<128x512xf32>, vector<8x512xf32> -> vector<8x512xf32>
    %138 = arith.addf %135, %137 : vector<8x512xf32>
    %139 = vector.extract_strided_slice %138 {offsets = [0, 0], sizes = [8, 128], strides = [1, 1]} : vector<8x512xf32> to vector<8x128xf32>
    %140 = arith.negf %139 : vector<8x128xf32>
    %141 = math.exp %140 : vector<8x128xf32>
    %cst_70 = arith.constant 1.000000e+00 : f32
    %142 = vector.broadcast %cst_70 : f32 to vector<8x128xf32>
    %143 = arith.addf %142, %141 : vector<8x128xf32>
    %144 = arith.divf %142, %143 : vector<8x128xf32>
    %145 = vector.extract_strided_slice %138 {offsets = [0, 128], sizes = [8, 128], strides = [1, 1]} : vector<8x512xf32> to vector<8x128xf32>
    %146 = arith.negf %145 : vector<8x128xf32>
    %147 = math.exp %146 : vector<8x128xf32>
    %cst_71 = arith.constant 1.000000e+00 : f32
    %148 = vector.broadcast %cst_71 : f32 to vector<8x128xf32>
    %149 = arith.addf %148, %147 : vector<8x128xf32>
    %150 = arith.divf %148, %149 : vector<8x128xf32>
    %151 = vector.extract_strided_slice %138 {offsets = [0, 256], sizes = [8, 128], strides = [1, 1]} : vector<8x512xf32> to vector<8x128xf32>
    %152 = math.tanh %151 : vector<8x128xf32>
    %153 = vector.extract_strided_slice %138 {offsets = [0, 384], sizes = [8, 128], strides = [1, 1]} : vector<8x512xf32> to vector<8x128xf32>
    %154 = arith.negf %153 : vector<8x128xf32>
    %155 = math.exp %154 : vector<8x128xf32>
    %cst_72 = arith.constant 1.000000e+00 : f32
    %156 = vector.broadcast %cst_72 : f32 to vector<8x128xf32>
    %157 = arith.addf %156, %155 : vector<8x128xf32>
    %158 = arith.divf %156, %157 : vector<8x128xf32>
    %159 = arith.mulf %150, %126 : vector<8x128xf32>
    %160 = arith.mulf %144, %152 : vector<8x128xf32>
    %161 = arith.addf %159, %160 : vector<8x128xf32>
    %162 = math.tanh %161 : vector<8x128xf32>
    %163 = arith.mulf %158, %162 : vector<8x128xf32>
    %164 = vector.extract_strided_slice %163 {offsets = [0, 0], sizes = [8, 64], strides = [1, 1]} : vector<8x128xf32> to vector<8x64xf32>
    %c16_73 = arith.constant 16 : index
    %c0_74 = arith.constant 0 : index
    %165 = vector.load %arg12[%c16_73, %c0_74] : memref<64x128xf32, #tpu.memory_space<vmem>>, vector<8x64xf32>
    tpu.vector_store %arg12[%c16_73, %c0_74], %164 {strides = array<i32>} : memref<64x128xf32, #tpu.memory_space<vmem>>, vector<8x64xf32>,
    %166 = vector.extract_strided_slice %163 {offsets = [0, 64], sizes = [8, 64], strides = [1, 1]} : vector<8x128xf32> to vector<8x64xf32>
    %c40_75 = arith.constant 40 : index
    %c64_76 = arith.constant 64 : index
    %167 = vector.load %arg12[%c40_75, %c64_76] : memref<64x128xf32, #tpu.memory_space<vmem>>, vector<8x64xf32>
    tpu.vector_store %arg12[%c40_75, %c64_76], %166 {strides = array<i32>} : memref<64x128xf32, #tpu.memory_space<vmem>>, vector<8x64xf32>,
    %c24 = arith.constant 24 : index
    %c0_77 = arith.constant 0 : index
    %168 = vector.load %arg11[%c24, %c0_77] : memref<64x512xf32, #tpu.memory_space<vmem>>, vector<8x512xf32>
    %c32_78 = arith.constant 32 : index
    %c0_79 = arith.constant 0 : index
    %169 = vector.load %arg11[%c32_78, %c0_79] : memref<64x512xf32, #tpu.memory_space<vmem>>, vector<8x512xf32>
    %170 = arith.select %60, %168, %169 : vector<8x512xi1>, vector<8x512xf32>
    %c0_80 = arith.constant 0 : index
    %c0_81 = arith.constant 0 : index
    %171 = vector.load %arg5[%c0_80, %c0_81] : memref<128x512xf32, #tpu.memory_space<vmem>>, vector<128x512xf32>
    %cst_82 = arith.constant dense<0.000000e+00> : vector<8x512xf32>
    %172 = tpu.matmul %163, %171, %cst_82 {dimension_numbers = #tpu.dot_dimension_numbers<[1], [0], [0], [1], [0, 0, 1, 1], [], []>} : vector<8x128xf32>, vector<128x512xf32>, vector<8x512xf32> -> vector<8x512xf32>
    %173 = arith.addf %170, %172 : vector<8x512xf32>
    %174 = vector.extract_strided_slice %173 {offsets = [0, 0], sizes = [8, 128], strides = [1, 1]} : vector<8x512xf32> to vector<8x128xf32>
    %175 = arith.negf %174 : vector<8x128xf32>
    %176 = math.exp %175 : vector<8x128xf32>
    %cst_83 = arith.constant 1.000000e+00 : f32
    %177 = vector.broadcast %cst_83 : f32 to vector<8x128xf32>
    %178 = arith.addf %177, %176 : vector<8x128xf32>
    %179 = arith.divf %177, %178 : vector<8x128xf32>
    %180 = vector.extract_strided_slice %173 {offsets = [0, 128], sizes = [8, 128], strides = [1, 1]} : vector<8x512xf32> to vector<8x128xf32>
    %181 = arith.negf %180 : vector<8x128xf32>
    %182 = math.exp %181 : vector<8x128xf32>
    %cst_84 = arith.constant 1.000000e+00 : f32
    %183 = vector.broadcast %cst_84 : f32 to vector<8x128xf32>
    %184 = arith.addf %183, %182 : vector<8x128xf32>
    %185 = arith.divf %183, %184 : vector<8x128xf32>
    %186 = vector.extract_strided_slice %173 {offsets = [0, 256], sizes = [8, 128], strides = [1, 1]} : vector<8x512xf32> to vector<8x128xf32>
    %187 = math.tanh %186 : vector<8x128xf32>
    %188 = vector.extract_strided_slice %173 {offsets = [0, 384], sizes = [8, 128], strides = [1, 1]} : vector<8x512xf32> to vector<8x128xf32>
    %189 = arith.negf %188 : vector<8x128xf32>
    %190 = math.exp %189 : vector<8x128xf32>
    %cst_85 = arith.constant 1.000000e+00 : f32
    %191 = vector.broadcast %cst_85 : f32 to vector<8x128xf32>
    %192 = arith.addf %191, %190 : vector<8x128xf32>
    %193 = arith.divf %191, %192 : vector<8x128xf32>
    %194 = arith.mulf %185, %161 : vector<8x128xf32>
    %195 = arith.mulf %179, %187 : vector<8x128xf32>
    %196 = arith.addf %194, %195 : vector<8x128xf32>
    %197 = math.tanh %196 : vector<8x128xf32>
    %198 = arith.mulf %193, %197 : vector<8x128xf32>
    %199 = vector.extract_strided_slice %198 {offsets = [0, 0], sizes = [8, 64], strides = [1, 1]} : vector<8x128xf32> to vector<8x64xf32>
    %c24_86 = arith.constant 24 : index
    %c0_87 = arith.constant 0 : index
    %200 = vector.load %arg12[%c24_86, %c0_87] : memref<64x128xf32, #tpu.memory_space<vmem>>, vector<8x64xf32>
    tpu.vector_store %arg12[%c24_86, %c0_87], %199 {strides = array<i32>} : memref<64x128xf32, #tpu.memory_space<vmem>>, vector<8x64xf32>,
    %201 = vector.extract_strided_slice %198 {offsets = [0, 64], sizes = [8, 64], strides = [1, 1]} : vector<8x128xf32> to vector<8x64xf32>
    %c32_88 = arith.constant 32 : index
    %c64_89 = arith.constant 64 : index
    %202 = vector.load %arg12[%c32_88, %c64_89] : memref<64x128xf32, #tpu.memory_space<vmem>>, vector<8x64xf32>
    tpu.vector_store %arg12[%c32_88, %c64_89], %201 {strides = array<i32>} : memref<64x128xf32, #tpu.memory_space<vmem>>, vector<8x64xf32>,
    %c32_90 = arith.constant 32 : index
    %c0_91 = arith.constant 0 : index
    %203 = vector.load %arg11[%c32_90, %c0_91] : memref<64x512xf32, #tpu.memory_space<vmem>>, vector<8x512xf32>
    %c24_92 = arith.constant 24 : index
    %c0_93 = arith.constant 0 : index
    %204 = vector.load %arg11[%c24_92, %c0_93] : memref<64x512xf32, #tpu.memory_space<vmem>>, vector<8x512xf32>
    %205 = arith.select %60, %203, %204 : vector<8x512xi1>, vector<8x512xf32>
    %c0_94 = arith.constant 0 : index
    %c0_95 = arith.constant 0 : index
    %206 = vector.load %arg5[%c0_94, %c0_95] : memref<128x512xf32, #tpu.memory_space<vmem>>, vector<128x512xf32>
    %cst_96 = arith.constant dense<0.000000e+00> : vector<8x512xf32>
    %207 = tpu.matmul %198, %206, %cst_96 {dimension_numbers = #tpu.dot_dimension_numbers<[1], [0], [0], [1], [0, 0, 1, 1], [], []>} : vector<8x128xf32>, vector<128x512xf32>, vector<8x512xf32> -> vector<8x512xf32>
    %208 = arith.addf %205, %207 : vector<8x512xf32>
    %209 = vector.extract_strided_slice %208 {offsets = [0, 0], sizes = [8, 128], strides = [1, 1]} : vector<8x512xf32> to vector<8x128xf32>
    %210 = arith.negf %209 : vector<8x128xf32>
    %211 = math.exp %210 : vector<8x128xf32>
    %cst_97 = arith.constant 1.000000e+00 : f32
    %212 = vector.broadcast %cst_97 : f32 to vector<8x128xf32>
    %213 = arith.addf %212, %211 : vector<8x128xf32>
    %214 = arith.divf %212, %213 : vector<8x128xf32>
    %215 = vector.extract_strided_slice %208 {offsets = [0, 128], sizes = [8, 128], strides = [1, 1]} : vector<8x512xf32> to vector<8x128xf32>
    %216 = arith.negf %215 : vector<8x128xf32>
    %217 = math.exp %216 : vector<8x128xf32>
    %cst_98 = arith.constant 1.000000e+00 : f32
    %218 = vector.broadcast %cst_98 : f32 to vector<8x128xf32>
    %219 = arith.addf %218, %217 : vector<8x128xf32>
    %220 = arith.divf %218, %219 : vector<8x128xf32>
    %221 = vector.extract_strided_slice %208 {offsets = [0, 256], sizes = [8, 128], strides = [1, 1]} : vector<8x512xf32> to vector<8x128xf32>
    %222 = math.tanh %221 : vector<8x128xf32>
    %223 = vector.extract_strided_slice %208 {offsets = [0, 384], sizes = [8, 128], strides = [1, 1]} : vector<8x512xf32> to vector<8x128xf32>
    %224 = arith.negf %223 : vector<8x128xf32>
    %225 = math.exp %224 : vector<8x128xf32>
    %cst_99 = arith.constant 1.000000e+00 : f32
    %226 = vector.broadcast %cst_99 : f32 to vector<8x128xf32>
    %227 = arith.addf %226, %225 : vector<8x128xf32>
    %228 = arith.divf %226, %227 : vector<8x128xf32>
    %229 = arith.mulf %220, %196 : vector<8x128xf32>
    %230 = arith.mulf %214, %222 : vector<8x128xf32>
    %231 = arith.addf %229, %230 : vector<8x128xf32>
    %232 = math.tanh %231 : vector<8x128xf32>
    %233 = arith.mulf %228, %232 : vector<8x128xf32>
    %234 = vector.extract_strided_slice %233 {offsets = [0, 0], sizes = [8, 64], strides = [1, 1]} : vector<8x128xf32> to vector<8x64xf32>
    %c32_100 = arith.constant 32 : index
    %c0_101 = arith.constant 0 : index
    %235 = vector.load %arg12[%c32_100, %c0_101] : memref<64x128xf32, #tpu.memory_space<vmem>>, vector<8x64xf32>
    tpu.vector_store %arg12[%c32_100, %c0_101], %234 {strides = array<i32>} : memref<64x128xf32, #tpu.memory_space<vmem>>, vector<8x64xf32>,
    %236 = vector.extract_strided_slice %233 {offsets = [0, 64], sizes = [8, 64], strides = [1, 1]} : vector<8x128xf32> to vector<8x64xf32>
    %c24_102 = arith.constant 24 : index
    %c64_103 = arith.constant 64 : index
    %237 = vector.load %arg12[%c24_102, %c64_103] : memref<64x128xf32, #tpu.memory_space<vmem>>, vector<8x64xf32>
    tpu.vector_store %arg12[%c24_102, %c64_103], %236 {strides = array<i32>} : memref<64x128xf32, #tpu.memory_space<vmem>>, vector<8x64xf32>,
    %c40_104 = arith.constant 40 : index
    %c0_105 = arith.constant 0 : index
    %238 = vector.load %arg11[%c40_104, %c0_105] : memref<64x512xf32, #tpu.memory_space<vmem>>, vector<8x512xf32>
    %c16_106 = arith.constant 16 : index
    %c0_107 = arith.constant 0 : index
    %239 = vector.load %arg11[%c16_106, %c0_107] : memref<64x512xf32, #tpu.memory_space<vmem>>, vector<8x512xf32>
    %240 = arith.select %60, %238, %239 : vector<8x512xi1>, vector<8x512xf32>
    %c0_108 = arith.constant 0 : index
    %c0_109 = arith.constant 0 : index
    %241 = vector.load %arg5[%c0_108, %c0_109] : memref<128x512xf32, #tpu.memory_space<vmem>>, vector<128x512xf32>
    %cst_110 = arith.constant dense<0.000000e+00> : vector<8x512xf32>
    %242 = tpu.matmul %233, %241, %cst_110 {dimension_numbers = #tpu.dot_dimension_numbers<[1], [0], [0], [1], [0, 0, 1, 1], [], []>} : vector<8x128xf32>, vector<128x512xf32>, vector<8x512xf32> -> vector<8x512xf32>
    %243 = arith.addf %240, %242 : vector<8x512xf32>
    %244 = vector.extract_strided_slice %243 {offsets = [0, 0], sizes = [8, 128], strides = [1, 1]} : vector<8x512xf32> to vector<8x128xf32>
    %245 = arith.negf %244 : vector<8x128xf32>
    %246 = math.exp %245 : vector<8x128xf32>
    %cst_111 = arith.constant 1.000000e+00 : f32
    %247 = vector.broadcast %cst_111 : f32 to vector<8x128xf32>
    %248 = arith.addf %247, %246 : vector<8x128xf32>
    %249 = arith.divf %247, %248 : vector<8x128xf32>
    %250 = vector.extract_strided_slice %243 {offsets = [0, 128], sizes = [8, 128], strides = [1, 1]} : vector<8x512xf32> to vector<8x128xf32>
    %251 = arith.negf %250 : vector<8x128xf32>
    %252 = math.exp %251 : vector<8x128xf32>
    %cst_112 = arith.constant 1.000000e+00 : f32
    %253 = vector.broadcast %cst_112 : f32 to vector<8x128xf32>
    %254 = arith.addf %253, %252 : vector<8x128xf32>
    %255 = arith.divf %253, %254 : vector<8x128xf32>
    %256 = vector.extract_strided_slice %243 {offsets = [0, 256], sizes = [8, 128], strides = [1, 1]} : vector<8x512xf32> to vector<8x128xf32>
    %257 = math.tanh %256 : vector<8x128xf32>
    %258 = vector.extract_strided_slice %243 {offsets = [0, 384], sizes = [8, 128], strides = [1, 1]} : vector<8x512xf32> to vector<8x128xf32>
    %259 = arith.negf %258 : vector<8x128xf32>
    %260 = math.exp %259 : vector<8x128xf32>
    %cst_113 = arith.constant 1.000000e+00 : f32
    %261 = vector.broadcast %cst_113 : f32 to vector<8x128xf32>
    %262 = arith.addf %261, %260 : vector<8x128xf32>
    %263 = arith.divf %261, %262 : vector<8x128xf32>
    %264 = arith.mulf %255, %231 : vector<8x128xf32>
    %265 = arith.mulf %249, %257 : vector<8x128xf32>
    %266 = arith.addf %264, %265 : vector<8x128xf32>
    %267 = math.tanh %266 : vector<8x128xf32>
    %268 = arith.mulf %263, %267 : vector<8x128xf32>
    %269 = vector.extract_strided_slice %268 {offsets = [0, 0], sizes = [8, 64], strides = [1, 1]} : vector<8x128xf32> to vector<8x64xf32>
    %c40_114 = arith.constant 40 : index
    %c0_115 = arith.constant 0 : index
    %270 = vector.load %arg12[%c40_114, %c0_115] : memref<64x128xf32, #tpu.memory_space<vmem>>, vector<8x64xf32>
    tpu.vector_store %arg12[%c40_114, %c0_115], %269 {strides = array<i32>} : memref<64x128xf32, #tpu.memory_space<vmem>>, vector<8x64xf32>,
    %271 = vector.extract_strided_slice %268 {offsets = [0, 64], sizes = [8, 64], strides = [1, 1]} : vector<8x128xf32> to vector<8x64xf32>
    %c16_116 = arith.constant 16 : index
    %c64_117 = arith.constant 64 : index
    %272 = vector.load %arg12[%c16_116, %c64_117] : memref<64x128xf32, #tpu.memory_space<vmem>>, vector<8x64xf32>
    tpu.vector_store %arg12[%c16_116, %c64_117], %271 {strides = array<i32>} : memref<64x128xf32, #tpu.memory_space<vmem>>, vector<8x64xf32>,
    %c48_118 = arith.constant 48 : index
    %c0_119 = arith.constant 0 : index
    %273 = vector.load %arg11[%c48_118, %c0_119] : memref<64x512xf32, #tpu.memory_space<vmem>>, vector<8x512xf32>
    %c8_120 = arith.constant 8 : index
    %c0_121 = arith.constant 0 : index
    %274 = vector.load %arg11[%c8_120, %c0_121] : memref<64x512xf32, #tpu.memory_space<vmem>>, vector<8x512xf32>
    %275 = arith.select %60, %273, %274 : vector<8x512xi1>, vector<8x512xf32>
    %c0_122 = arith.constant 0 : index
    %c0_123 = arith.constant 0 : index
    %276 = vector.load %arg5[%c0_122, %c0_123] : memref<128x512xf32, #tpu.memory_space<vmem>>, vector<128x512xf32>
    %cst_124 = arith.constant dense<0.000000e+00> : vector<8x512xf32>
    %277 = tpu.matmul %268, %276, %cst_124 {dimension_numbers = #tpu.dot_dimension_numbers<[1], [0], [0], [1], [0, 0, 1, 1], [], []>} : vector<8x128xf32>, vector<128x512xf32>, vector<8x512xf32> -> vector<8x512xf32>
    %278 = arith.addf %275, %277 : vector<8x512xf32>
    %279 = vector.extract_strided_slice %278 {offsets = [0, 0], sizes = [8, 128], strides = [1, 1]} : vector<8x512xf32> to vector<8x128xf32>
    %280 = arith.negf %279 : vector<8x128xf32>
    %281 = math.exp %280 : vector<8x128xf32>
    %cst_125 = arith.constant 1.000000e+00 : f32
    %282 = vector.broadcast %cst_125 : f32 to vector<8x128xf32>
    %283 = arith.addf %282, %281 : vector<8x128xf32>
    %284 = arith.divf %282, %283 : vector<8x128xf32>
    %285 = vector.extract_strided_slice %278 {offsets = [0, 128], sizes = [8, 128], strides = [1, 1]} : vector<8x512xf32> to vector<8x128xf32>
    %286 = arith.negf %285 : vector<8x128xf32>
    %287 = math.exp %286 : vector<8x128xf32>
    %cst_126 = arith.constant 1.000000e+00 : f32
    %288 = vector.broadcast %cst_126 : f32 to vector<8x128xf32>
    %289 = arith.addf %288, %287 : vector<8x128xf32>
    %290 = arith.divf %288, %289 : vector<8x128xf32>
    %291 = vector.extract_strided_slice %278 {offsets = [0, 256], sizes = [8, 128], strides = [1, 1]} : vector<8x512xf32> to vector<8x128xf32>
    %292 = math.tanh %291 : vector<8x128xf32>
    %293 = vector.extract_strided_slice %278 {offsets = [0, 384], sizes = [8, 128], strides = [1, 1]} : vector<8x512xf32> to vector<8x128xf32>
    %294 = arith.negf %293 : vector<8x128xf32>
    %295 = math.exp %294 : vector<8x128xf32>
    %cst_127 = arith.constant 1.000000e+00 : f32
    %296 = vector.broadcast %cst_127 : f32 to vector<8x128xf32>
    %297 = arith.addf %296, %295 : vector<8x128xf32>
    %298 = arith.divf %296, %297 : vector<8x128xf32>
    %299 = arith.mulf %290, %266 : vector<8x128xf32>
    %300 = arith.mulf %284, %292 : vector<8x128xf32>
    %301 = arith.addf %299, %300 : vector<8x128xf32>
    %302 = math.tanh %301 : vector<8x128xf32>
    %303 = arith.mulf %298, %302 : vector<8x128xf32>
    %304 = vector.extract_strided_slice %303 {offsets = [0, 0], sizes = [8, 64], strides = [1, 1]} : vector<8x128xf32> to vector<8x64xf32>
    %c48_128 = arith.constant 48 : index
    %c0_129 = arith.constant 0 : index
    %305 = vector.load %arg12[%c48_128, %c0_129] : memref<64x128xf32, #tpu.memory_space<vmem>>, vector<8x64xf32>
    tpu.vector_store %arg12[%c48_128, %c0_129], %304 {strides = array<i32>} : memref<64x128xf32, #tpu.memory_space<vmem>>, vector<8x64xf32>,
    %306 = vector.extract_strided_slice %303 {offsets = [0, 64], sizes = [8, 64], strides = [1, 1]} : vector<8x128xf32> to vector<8x64xf32>
    %c8_130 = arith.constant 8 : index
    %c64_131 = arith.constant 64 : index
    %307 = vector.load %arg12[%c8_130, %c64_131] : memref<64x128xf32, #tpu.memory_space<vmem>>, vector<8x64xf32>
    tpu.vector_store %arg12[%c8_130, %c64_131], %306 {strides = array<i32>} : memref<64x128xf32, #tpu.memory_space<vmem>>, vector<8x64xf32>,
    %c56_132 = arith.constant 56 : index
    %c0_133 = arith.constant 0 : index
    %308 = vector.load %arg11[%c56_132, %c0_133] : memref<64x512xf32, #tpu.memory_space<vmem>>, vector<8x512xf32>
    %c0_134 = arith.constant 0 : index
    %c0_135 = arith.constant 0 : index
    %309 = vector.load %arg11[%c0_134, %c0_135] : memref<64x512xf32, #tpu.memory_space<vmem>>, vector<8x512xf32>
    %310 = arith.select %60, %308, %309 : vector<8x512xi1>, vector<8x512xf32>
    %c0_136 = arith.constant 0 : index
    %c0_137 = arith.constant 0 : index
    %311 = vector.load %arg5[%c0_136, %c0_137] : memref<128x512xf32, #tpu.memory_space<vmem>>, vector<128x512xf32>
    %cst_138 = arith.constant dense<0.000000e+00> : vector<8x512xf32>
    %312 = tpu.matmul %303, %311, %cst_138 {dimension_numbers = #tpu.dot_dimension_numbers<[1], [0], [0], [1], [0, 0, 1, 1], [], []>} : vector<8x128xf32>, vector<128x512xf32>, vector<8x512xf32> -> vector<8x512xf32>
    %313 = arith.addf %310, %312 : vector<8x512xf32>
    %314 = vector.extract_strided_slice %313 {offsets = [0, 0], sizes = [8, 128], strides = [1, 1]} : vector<8x512xf32> to vector<8x128xf32>
    %315 = arith.negf %314 : vector<8x128xf32>
    %316 = math.exp %315 : vector<8x128xf32>
    %cst_139 = arith.constant 1.000000e+00 : f32
    %317 = vector.broadcast %cst_139 : f32 to vector<8x128xf32>
    %318 = arith.addf %317, %316 : vector<8x128xf32>
    %319 = arith.divf %317, %318 : vector<8x128xf32>
    %320 = vector.extract_strided_slice %313 {offsets = [0, 128], sizes = [8, 128], strides = [1, 1]} : vector<8x512xf32> to vector<8x128xf32>
    %321 = arith.negf %320 : vector<8x128xf32>
    %322 = math.exp %321 : vector<8x128xf32>
    %cst_140 = arith.constant 1.000000e+00 : f32
    %323 = vector.broadcast %cst_140 : f32 to vector<8x128xf32>
    %324 = arith.addf %323, %322 : vector<8x128xf32>
    %325 = arith.divf %323, %324 : vector<8x128xf32>
    %326 = vector.extract_strided_slice %313 {offsets = [0, 256], sizes = [8, 128], strides = [1, 1]} : vector<8x512xf32> to vector<8x128xf32>
    %327 = math.tanh %326 : vector<8x128xf32>
    %328 = vector.extract_strided_slice %313 {offsets = [0, 384], sizes = [8, 128], strides = [1, 1]} : vector<8x512xf32> to vector<8x128xf32>
    %329 = arith.negf %328 : vector<8x128xf32>
    %330 = math.exp %329 : vector<8x128xf32>
    %cst_141 = arith.constant 1.000000e+00 : f32
    %331 = vector.broadcast %cst_141 : f32 to vector<8x128xf32>
    %332 = arith.addf %331, %330 : vector<8x128xf32>
    %333 = arith.divf %331, %332 : vector<8x128xf32>
    %334 = arith.mulf %325, %301 : vector<8x128xf32>
    %335 = arith.mulf %319, %327 : vector<8x128xf32>
    %336 = arith.addf %334, %335 : vector<8x128xf32>
    %337 = math.tanh %336 : vector<8x128xf32>
    %338 = arith.mulf %333, %337 : vector<8x128xf32>
    %339 = vector.extract_strided_slice %338 {offsets = [0, 0], sizes = [8, 64], strides = [1, 1]} : vector<8x128xf32> to vector<8x64xf32>
    %c56_142 = arith.constant 56 : index
    %c0_143 = arith.constant 0 : index
    %340 = vector.load %arg12[%c56_142, %c0_143] : memref<64x128xf32, #tpu.memory_space<vmem>>, vector<8x64xf32>
    tpu.vector_store %arg12[%c56_142, %c0_143], %339 {strides = array<i32>} : memref<64x128xf32, #tpu.memory_space<vmem>>, vector<8x64xf32>,
    %341 = vector.extract_strided_slice %338 {offsets = [0, 64], sizes = [8, 64], strides = [1, 1]} : vector<8x128xf32> to vector<8x64xf32>
    %c0_144 = arith.constant 0 : index
    %c64_145 = arith.constant 64 : index
    %342 = vector.load %arg12[%c0_144, %c64_145] : memref<64x128xf32, #tpu.memory_space<vmem>>, vector<8x64xf32>
    tpu.vector_store %arg12[%c0_144, %c64_145], %341 {strides = array<i32>} : memref<64x128xf32, #tpu.memory_space<vmem>>, vector<8x64xf32>,
    %c0_146 = arith.constant 0 : index
    %c0_147 = arith.constant 0 : index
    %343 = vector.load %arg12[%c0_146, %c0_147] : memref<64x128xf32, #tpu.memory_space<vmem>>, vector<64x128xf32>
    %c0_148 = arith.constant 0 : index
    %c0_149 = arith.constant 0 : index
    %344 = vector.load %arg6[%c0_148, %c0_149] : memref<128x32xf32, #tpu.memory_space<vmem>>, vector<128x32xf32>
    %cst_150 = arith.constant dense<0.000000e+00> : vector<64x32xf32>
    %345 = tpu.matmul %343, %344, %cst_150 {dimension_numbers = #tpu.dot_dimension_numbers<[1], [0], [0], [1], [0, 0, 1, 1], [], []>} : vector<64x128xf32>, vector<128x32xf32>, vector<64x32xf32> -> vector<64x32xf32>
    %c0_151 = arith.constant 0 : index
    %c0_152 = arith.constant 0 : index
    %346 = vector.load %arg7[%c0_151, %c0_152] : memref<1x32xf32, #tpu.memory_space<vmem>>, vector<1x32xf32>
    %347 = vector.broadcast %346 : vector<1x32xf32> to vector<64x32xf32>
    %348 = arith.addf %345, %347 : vector<64x32xf32>
    %cst_153 = arith.constant 0.000000e+00 : f32
    %349 = vector.broadcast %cst_153 : f32 to vector<64x32xf32>
    %350 = arith.maximumf %348, %349 : vector<64x32xf32>
    %c0_154 = arith.constant 0 : index
    %c0_155 = arith.constant 0 : index
    %351 = vector.load %arg8[%c0_154, %c0_155] : memref<32x128xf32, #tpu.memory_space<vmem>>, vector<32x128xf32>
    %cst_156 = arith.constant dense<0.000000e+00> : vector<64x128xf32>
    %352 = tpu.matmul %350, %351, %cst_156 {dimension_numbers = #tpu.dot_dimension_numbers<[1], [0], [0], [1], [0, 0, 1, 1], [], []>} : vector<64x32xf32>, vector<32x128xf32>, vector<64x128xf32> -> vector<64x128xf32>
    %c0_157 = arith.constant 0 : index
    %c0_158 = arith.constant 0 : index
    %353 = vector.load %arg9[%c0_157, %c0_158] : memref<1x128xf32, #tpu.memory_space<vmem>>, vector<1x128xf32>
    %354 = vector.broadcast %353 : vector<1x128xf32> to vector<64x128xf32>
    %355 = arith.addf %352, %354 : vector<64x128xf32>
    %c0_159 = arith.constant 0 : index
    %c0_160 = arith.constant 0 : index
    %356 = vector.load %arg10[%c0_159, %c0_160] : memref<64x128xf32, #tpu.memory_space<vmem>>, vector<64x128xf32>
    tpu.vector_store %arg10[%c0_159, %c0_160], %355 {strides = array<i32>} : memref<64x128xf32, #tpu.memory_space<vmem>>, vector<64x128xf32>,
    return
  }
}

</mosaic_0001>

<bundles_post_ra>
// kernel: ner_stacking_forward_fn.1
= control target key start
LH: loop header
LB: loop body
LE: loop exit
PB: predicated region body
PF: predicated region fallthrough
CT: control target
= control target key end

     0   :  { %15 = vsyncpa [#allocation5], 0  ;;  %s9397_s0 = inlined_call_operand.vmem [shape: f32[64,128], index: 0, kind: input, shape index: {}]   ;;  %s9398_s1 = inlined_call_operand.vmem [shape: f32[64,4096], index: 1, kind: input, shape index: {}]   ;;  %s9399_s2 = inlined_call_operand.hbm [shape: f32[128,512], index: 2, kind: input, shape index: {}]   ;;  %s9400_s3 = inlined_call_operand.hbm [shape: f32[4096,256], index: 3, kind: input, shape index: {}]   ;;  %s9401_s4 = inlined_call_operand.hbm [shape: f32[1,512], index: 4, kind: input, shape index: {}]   ;;  %s9402_s5 = inlined_call_operand.hbm [shape: f32[128,512], index: 5, kind: input, shape index: {}]   ;;  %s9403_s6 = inlined_call_operand.vmem [shape: f32[128,32], index: 6, kind: input, shape index: {}]   ;;  %s9404_s7 = inlined_call_operand.hbm [shape: f32[1,32], index: 7, kind: input, shape index: {}]   ;;  %s9405_s8 = inlined_call_operand.hbm [shape: f32[32,128], index: 8, kind: input, shape index: {}]   ;;  %s9406_s9 = inlined_call_operand.hbm [shape: f32[1,128], index: 9, kind: input, shape index: {}]   ;;  %s9407_s10 = inlined_call_operand.vmem [shape: f32[64,128], index: 10, kind: output, shape index: {}]  }
   0x1   :  { %16 = vsyncpa [#allocation7], 0 }
   0x2   :  { %17 = vsyncpa [#allocation10], 0 }
   0x3   :  { %18 = vsyncpa [#allocation13], 0  ;;  %s6694_s13 = smov [#allocation6]  }
   0x4   :  { %s40_s14 = sshll.u32 %s6694_s13, 4  ;;  %s41_s14 = int_to_ptr.vmem [resolvable:$true] %s40_s14 }
   0x5   :  { %s6554_s15 = scalar_lea.vmem %s41_s14, 131072  ;;  %p6559_p1 = scmp.lt.s32.totalorder %s41_s14, %s41_s14 }
   0x6   :  { %p6555_p0 = scmp.ne.s32.totalorder %s41_s14, %s6554_s15  ;;  %p6560_p2 = scmp.lt.s32.totalorder %s6554_s15, %s6554_s15 }
   0x8   :  { %p6561_p3 = por %p6560_p2, %p6559_p1 }
   0xa   :  { %p6562_p4 = pnand %p6561_p3, %p6555_p0 }
   0xc   :  { %6565 = shalt.err (!%p6562_p4)
}
   0xd   :  { %s6695_s16 = smov 256   ;;  %s6696_s17 = smov 16  }
   0xe   :  { %46 = dma.hbm_to_vmem [thread:$0]  %s9400_s3, 131072, %s41_s14, [#allocation7], %s6695_s16, %s6695_s16, %s6696_s17  }
   0xf   :  { %s6697_s20 = smov [#allocation9]   ;;  %s6698_s22 = smov [#allocation12]  }
  0x10   :  { %s62_s21 = sshll.u32 %s6697_s20, 4  ;;  %s86_s23 = sshll.u32 %s6698_s22, 4  ;;  %s63_s21 = int_to_ptr.vmem [resolvable:$true] %s62_s21  ;;  %s87_s23 = int_to_ptr.vmem [resolvable:$true] %s86_s23 }
  0x11   :  { %s6574_s24 = scalar_lea.vmem %s63_s21, 8192  ;;  %p6579_p6 = scmp.lt.s32.totalorder %s63_s21, %s63_s21 }
  0x12   :  { %p6575_p5 = scmp.ne.s32.totalorder %s63_s21, %s6574_s24  ;;  %p6580_p7 = scmp.lt.s32.totalorder %s6574_s24, %s6574_s24 }
  0x14   :  { %p6581_p8 = por %p6580_p7, %p6579_p6 }
  0x16   :  { %p6582_p9 = pnand %p6581_p8, %p6575_p5 }
  0x18   :  { %6585 = shalt.err (!%p6582_p9)
}
  0x19   :  { %s6699_s25 = smov 512   ;;  %s6700_s26 = smov 32  }
  0x1a   :  { %68 = dma.hbm_to_vmem [thread:$0]  %s9402_s5, 8192, %s63_s21, [#allocation10], %s6699_s25, %s6699_s25, %s6700_s26  }
  0x1b   :  { %s6594_s3 = scalar_lea.vmem %s87_s23, 512  ;;  %p6599_p11 = scmp.lt.s32.totalorder %s87_s23, %s87_s23 }
  0x1c   :  { %p6595_p10 = scmp.ne.s32.totalorder %s87_s23, %s6594_s3  ;;  %p6600_p12 = scmp.lt.s32.totalorder %s6594_s3, %s6594_s3 }
  0x1e   :  { %p6601_p13 = por %p6600_p12, %p6599_p11 }
  0x20   :  { %p6602_p0 = pnand %p6601_p13, %p6595_p10 }
  0x22   :  { %6605 = shalt.err (!%p6602_p0)
}
  0x23   :  { %s6701_s29 = smov 128   ;;  %s6702_s30 = smov 8  }
  0x24   :  { %92 = dma.hbm_to_vmem [thread:$0]  %s9405_s8, 512, %s87_s23, [#allocation13], %s6701_s29, %s6701_s29, %s6702_s30  }
  0x25   :  { %s6703_s13 = smov [#allocation4]   ;;  %s6704_s15 = smov [#allocation8]  }
  0x26   :  { %s28_s14 = sshll.u32 %s6703_s13, 4  ;;  %s53_s16 = sshll.u32 %s6704_s15, 4  ;;  %s29_s14 = int_to_ptr.vmem [resolvable:$true] %s28_s14  ;;  %s54_s16 = int_to_ptr.vmem [resolvable:$true] %s53_s16 }
  0x27   :  { %s6614_s5 = scalar_lea.vmem %s29_s14, 8192  ;;  %p6619_p2 = scmp.lt.s32.totalorder %s29_s14, %s29_s14 }
  0x28   :  { %p6615_p1 = scmp.ne.s32.totalorder %s29_s14, %s6614_s5  ;;  %p6620_p3 = scmp.lt.s32.totalorder %s6614_s5, %s6614_s5 }
  0x2a   :  { %p6621_p4 = por %p6620_p3, %p6619_p2 }
  0x2c   :  { %p6622_p5 = pnand %p6621_p4, %p6615_p1 }
  0x2e   :  { %6625 = shalt.err (!%p6622_p5)
}
  0x2f   :  { %34 = dma.hbm_to_vmem [thread:$0]  %s9399_s2, 8192, %s29_s14, [#allocation5], %s6699_s25, %s6699_s25, %s6700_s26  }
  0x30   :  { %s6634_s19 = scalar_lea.vmem %s54_s16, 64  ;;  %p6639_p7 = scmp.lt.s32.totalorder %s54_s16, %s54_s16 }
  0x31   :  { %p6635_p6 = scmp.ne.s32.totalorder %s54_s16, %s6634_s19  ;;  %p6640_p8 = scmp.lt.s32.totalorder %s6634_s19, %s6634_s19 }
  0x33   :  { %p6641_p9 = por %p6640_p8, %p6639_p7 }
  0x35   :  { %p6642_p10 = pnand %p6641_p9, %p6635_p6 }
  0x37   :  { %6645 = shalt.err (!%p6642_p10)
}
  0x38   :  { %56 = dma.hbm_to_vmem [thread:$0]  %s9401_s4, 64, %s54_s16, [#allocation7]  }
  0x39   :  { %s6705_s21 = smov [#allocation11]   ;;  %s6706_s23 = smov [#allocation14]  }
  0x3a   :  { %s77_s22 = sshll.u32 %s6705_s21, 4  ;;  %s99_s24 = sshll.u32 %s6706_s23, 4  ;;  %s78_s22 = int_to_ptr.vmem [resolvable:$true] %s77_s22  ;;  %s100_s24 = int_to_ptr.vmem [resolvable:$true] %s99_s24 }
  0x3b   :  { %s6654_s27 = scalar_lea.vmem %s78_s22, 16  ;;  %s6658_s2 = scalar_lea.vmem %s78_s22, 32 }
  0x3c   :  { %p6655_p11 = scmp.ne.s32.totalorder %s78_s22, %s6654_s27  ;;  %p6659_p12 = scmp.lt.s32.totalorder %s78_s22, %s78_s22 }
  0x3d   :  { %p6660_p13 = scmp.lt.s32.totalorder %s6658_s2, %s6654_s27 }
  0x3f   :  { %p6661_p0 = por %p6660_p13, %p6659_p12 }
  0x41   :  { %p6662_p1 = pnand %p6661_p0, %p6655_p11 }
  0x43   :  { %6665 = shalt.err (!%p6662_p1)
}
  0x44   :  { %80 = dma.hbm_to_vmem [thread:$0]  %s9404_s7, 16, %s78_s22, [#allocation10]  }
  0x45   :  { %s6674_s3 = scalar_lea.vmem %s100_s24, 16  ;;  %s6678_s4 = scalar_lea.vmem %s100_s24, 32 }
  0x46   :  { %p6675_p2 = scmp.ne.s32.totalorder %s100_s24, %s6674_s3  ;;  %p6679_p3 = scmp.lt.s32.totalorder %s100_s24, %s100_s24 }
  0x47   :  { %p6680_p4 = scmp.lt.s32.totalorder %s6678_s4, %s6674_s3 }
  0x49   :  { %p6681_p5 = por %p6680_p4, %p6679_p3 }
  0x4b   :  { %p6682_p6 = pnand %p6681_p5, %p6675_p2 }
  0x4d   :  { %6685 = shalt.err (!%p6682_p6)
}
  0x4e   :  { %102 = dma.hbm_to_vmem [thread:$0]  %s9406_s9, 16, %s100_s24, [#allocation13]  }
  0x4f   :  { %6686 = dma.done.wait [#allocation5], 8192  }
  0x50   :  { %6687 = vsyncadd [#allocation5], 4294959104 }
  0x51   :  { %6688 = dma.done.wait [#allocation7], 131136  }
  0x52   :  { %6689 = vsyncadd [#allocation7], 4294836160 }
  0x53   :  { %6690 = dma.done.wait [#allocation10], 8208  }
  0x54   :  { %6691 = vsyncadd [#allocation10], 4294959088 }
  0x55   :  { %6692 = dma.done.wait [#allocation13], 528  }
  0x56   :  { %6693 = vsyncadd [#allocation13], 4294966768  ;;  %v9409_v0 = vmov 0.0   ;;  %v193_v1 = vld [vmem:[#allocation4 + $0x1e8] sm:$0xff]  ;;  %v195_v2 = vld [vmem:[#allocation4 + $0x1f8] sm:$0xff]  ;;  %s6709_s22 = smov 64  }
  0x57   :  { %282 = vmatprep.mubr.f32.mxu0 %v9409_v0  ;;  %395 = vmatprep.mubr.f32.mxu1 %v9409_v0  ;;  %v192_v3 = vld [vmem:[#allocation4 + $0x1e0] sm:$0xff]  ;;  %v194_v4 = vld [vmem:[#allocation4 + $0x1f0] sm:$0xff]  ;;  %v189_v5 = vld [vmem:[#allocation4 + $0x1c8] sm:$0xff]  ;;  %vm3612_vm0 = vcmask 523520   ;;  %vm3661_vm1 = vcmask 1048320   ;;  %vm4221_vm6 = vcmask 523264  }
  0x58   :  { %218 = vmatprep.subr.mxu0 %v193_v1  ;;  %331 = vmatprep.subr.mxu1 %v195_v2  ;;  %v191_v6 = vld [vmem:[#allocation4 + $0x1d8] sm:$0xff]  ;;  %v188_v7 = vld [vmem:[#allocation4 + $0x1c0] sm:$0xff]  ;;  %v190_v8 = vld [vmem:[#allocation4 + $0x1d0] sm:$0xff]  ;;  %vm4223_vm7 = vcmask 1048064   ;;  %vm6116_vm8 = vcmask 261120  }
  0x59   :  { %219 = vmatpush1.msra.mxu0 %v192_v3  ;;  %332 = vmatpush1.msra.mxu1 %v194_v4  ;;  %v185_v9 = vld [vmem:[#allocation4 + $0x1a8] sm:$0xff]  ;;  %v187_v10 = vld [vmem:[#allocation4 + $0x1b8] sm:$0xff]  ;;  %v184_v11 = vld [vmem:[#allocation4 + $0x1a0] sm:$0xff] }
  0x5a   :  { %220 = vmatprep.subr.mxu0 %v189_v5  ;;  %333 = vmatprep.subr.mxu1 %v191_v6  ;;  %v186_v12 = vld [vmem:[#allocation4 + $0x1b0] sm:$0xff]  ;;  %v181_v13 = vld [vmem:[#allocation4 + $0x188] sm:$0xff]  ;;  %v183_v14 = vld [vmem:[#allocation4 + $0x198] sm:$0xff] }
  0x5b   :  { %221 = vmatpush1.msra.mxu0 %v188_v7  ;;  %334 = vmatpush1.msra.mxu1 %v190_v8  ;;  %v180_v15 = vld [vmem:[#allocation4 + $0x180] sm:$0xff]  ;;  %v182_v16 = vld [vmem:[#allocation4 + $0x190] sm:$0xff]  ;;  %v177_v17 = vld [vmem:[#allocation4 + $0x168] sm:$0xff] }
  0x5c   :  { %222 = vmatprep.subr.mxu0 %v185_v9  ;;  %335 = vmatprep.subr.mxu1 %v187_v10  ;;  %v179_v18 = vld [vmem:[#allocation4 + $0x178] sm:$0xff]  ;;  %v176_v19 = vld [vmem:[#allocation4 + $0x160] sm:$0xff]  ;;  %v178_v20 = vld [vmem:[#allocation4 + $0x170] sm:$0xff] }
  0x5d   :  { %223 = vmatpush1.msra.mxu0 %v184_v11  ;;  %336 = vmatpush1.msra.mxu1 %v186_v12  ;;  %v173_v21 = vld [vmem:[#allocation4 + $0x148] sm:$0xff]  ;;  %v175_v22 = vld [vmem:[#allocation4 + $0x158] sm:$0xff]  ;;  %v172_v23 = vld [vmem:[#allocation4 + $0x140] sm:$0xff] }
  0x5e   :  { %224 = vmatprep.subr.mxu0 %v181_v13  ;;  %337 = vmatprep.subr.mxu1 %v183_v14  ;;  %v174_v24 = vld [vmem:[#allocation4 + $0x150] sm:$0xff]  ;;  %v169_v25 = vld [vmem:[#allocation4 + $0x128] sm:$0xff]  ;;  %v171_v26 = vld [vmem:[#allocation4 + $0x138] sm:$0xff] }
  0x5f   :  { %225 = vmatpush1.msra.mxu0 %v180_v15  ;;  %338 = vmatpush1.msra.mxu1 %v182_v16  ;;  %v168_v27 = vld [vmem:[#allocation4 + $0x120] sm:$0xff]  ;;  %v170_v28 = vld [vmem:[#allocation4 + $0x130] sm:$0xff]  ;;  %v165_v29 = vld [vmem:[#allocation4 + $0x108] sm:$0xff] }
  0x60   :  { %226 = vmatprep.subr.mxu0 %v177_v17  ;;  %339 = vmatprep.subr.mxu1 %v179_v18  ;;  %v167_v30 = vld [vmem:[#allocation4 + $0x118] sm:$0xff]  ;;  %v164_v31 = vld [vmem:[#allocation4 + $0x100] sm:$0xff]  ;;  %v166_v32 = vld [vmem:[#allocation4 + $0x110] sm:$0xff] }
  0x61   :  { %227 = vmatpush1.msra.mxu0 %v176_v19  ;;  %340 = vmatpush1.msra.mxu1 %v178_v20  ;;  %v161_v33 = vld [vmem:[#allocation4 + $0xe8] sm:$0xff]  ;;  %v163_v34 = vld [vmem:[#allocation4 + $0xf8] sm:$0xff]  ;;  %v160_v35 = vld [vmem:[#allocation4 + $0xe0] sm:$0xff] }
  0x62   :  { %228 = vmatprep.subr.mxu0 %v173_v21  ;;  %341 = vmatprep.subr.mxu1 %v175_v22  ;;  %v162_v36 = vld [vmem:[#allocation4 + $0xf0] sm:$0xff]  ;;  %v157_v37 = vld [vmem:[#allocation4 + $0xc8] sm:$0xff]  ;;  %v159_v38 = vld [vmem:[#allocation4 + $0xd8] sm:$0xff] }
  0x63   :  { %229 = vmatpush1.msra.mxu0 %v172_v23  ;;  %342 = vmatpush1.msra.mxu1 %v174_v24  ;;  %v156_v39 = vld [vmem:[#allocation4 + $0xc0] sm:$0xff]  ;;  %v158_v40 = vld [vmem:[#allocation4 + $0xd0] sm:$0xff]  ;;  %v153_v41 = vld [vmem:[#allocation4 + $0xa8] sm:$0xff] }
  0x64   :  { %230 = vmatprep.subr.mxu0 %v169_v25  ;;  %343 = vmatprep.subr.mxu1 %v171_v26  ;;  %v155_v42 = vld [vmem:[#allocation4 + $0xb8] sm:$0xff]  ;;  %v152_v43 = vld [vmem:[#allocation4 + $0xa0] sm:$0xff]  ;;  %v154_v44 = vld [vmem:[#allocation4 + $0xb0] sm:$0xff] }
  0x65   :  { %231 = vmatpush1.msra.mxu0 %v168_v27  ;;  %344 = vmatpush1.msra.mxu1 %v170_v28  ;;  %v149_v45 = vld [vmem:[#allocation4 + $0x88] sm:$0xff]  ;;  %v151_v46 = vld [vmem:[#allocation4 + $0x98] sm:$0xff]  ;;  %v148_v47 = vld [vmem:[#allocation4 + $0x80] sm:$0xff] }
  0x66   :  { %232 = vmatprep.subr.mxu0 %v165_v29  ;;  %345 = vmatprep.subr.mxu1 %v167_v30  ;;  %v150_v48 = vld [vmem:[#allocation4 + $0x90] sm:$0xff]  ;;  %v145_v49 = vld [vmem:[#allocation4 + $0x68] sm:$0xff]  ;;  %v147_v50 = vld [vmem:[#allocation4 + $0x78] sm:$0xff] }
  0x67   :  { %233 = vmatpush1.msra.mxu0 %v164_v31  ;;  %346 = vmatpush1.msra.mxu1 %v166_v32  ;;  %v144_v51 = vld [vmem:[#allocation4 + $0x60] sm:$0xff]  ;;  %v146_v52 = vld [vmem:[#allocation4 + $0x70] sm:$0xff]  ;;  %v141_v53 = vld [vmem:[#allocation4 + $0x48] sm:$0xff] }
  0x68   :  { %234 = vmatprep.subr.mxu0 %v161_v33  ;;  %347 = vmatprep.subr.mxu1 %v163_v34  ;;  %v143_v54 = vld [vmem:[#allocation4 + $0x58] sm:$0xff]  ;;  %v140_v55 = vld [vmem:[#allocation4 + $0x40] sm:$0xff]  ;;  %v142_v56 = vld [vmem:[#allocation4 + $0x50] sm:$0xff] }
  0x69   :  { %235 = vmatpush1.msra.mxu0 %v160_v35  ;;  %348 = vmatpush1.msra.mxu1 %v162_v36  ;;  %v137_v57 = vld [vmem:[#allocation4 + $0x28] sm:$0xff]  ;;  %v139_v58 = vld [vmem:[#allocation4 + $0x38] sm:$0xff]  ;;  %v136_v59 = vld [vmem:[#allocation4 + $0x20] sm:$0xff] }
  0x6a   :  { %236 = vmatprep.subr.mxu0 %v157_v37  ;;  %349 = vmatprep.subr.mxu1 %v159_v38  ;;  %v138_v60 = vld [vmem:[#allocation4 + $0x30] sm:$0xff]  ;;  %v133_v61 = vld [vmem:[#allocation4 + $0x8] sm:$0xff]  ;;  %v135_v62 = vld [vmem:[#allocation4 + $0x18] sm:$0xff] }
  0x6b   :  { %237 = vmatpush1.msra.mxu0 %v156_v39  ;;  %350 = vmatpush1.msra.mxu1 %v158_v40  ;;  %v132_v63 = vld [vmem:[#allocation4] sm:$0xff]  ;;  %v134_v1 = vld [vmem:[#allocation4 + $0x10] sm:$0xff]  ;;  %v763_v3 = vld [vmem:[#allocation6 + $0xf8] sm:$0xff] }
  0x6c   :  { %238 = vmatprep.subr.mxu0 %v153_v41  ;;  %351 = vmatprep.subr.mxu1 %v155_v42  ;;  %v124_v2 = vld [vmem:[%s9397_s0] sm:$0xff]  ;;  %v827_v4 = vld [vmem:[#allocation6 + $0x2f8] sm:$0xff]  ;;  %v762_v5 = vld [vmem:[#allocation6 + $0xf0] sm:$0xff] }
  0x6d   :  { %239 = vmatpush1.msra.mxu0 %v152_v43  ;;  %352 = vmatpush1.msra.mxu1 %v154_v44  ;;  %v826_v6 = vld [vmem:[#allocation6 + $0x2f0] sm:$0xff]  ;;  %v761_v7 = vld [vmem:[#allocation6 + $0xe8] sm:$0xff]  ;;  %v760_v9 = vld [vmem:[#allocation6 + $0xe0] sm:$0xff] }
  0x6e   :  { %240 = vmatprep.subr.mxu0 %v149_v45  ;;  %353 = vmatprep.subr.mxu1 %v151_v46  ;;  %v825_v8 = vld [vmem:[#allocation6 + $0x2e8] sm:$0xff]  ;;  %v824_v10 = vld [vmem:[#allocation6 + $0x2e0] sm:$0xff]  ;;  %v759_v11 = vld [vmem:[#allocation6 + $0xd8] sm:$0xff] }
  0x6f   :  { %241 = vmatpush1.msra.mxu0 %v148_v47  ;;  %354 = vmatpush1.msra.mxu1 %v150_v48  ;;  %v823_v12 = vld [vmem:[#allocation6 + $0x2d8] sm:$0xff]  ;;  %v758_v13 = vld [vmem:[#allocation6 + $0xd0] sm:$0xff]  ;;  %v757_v15 = vld [vmem:[#allocation6 + $0xc8] sm:$0xff] }
  0x70   :  { %242 = vmatprep.subr.mxu0 %v145_v49  ;;  %355 = vmatprep.subr.mxu1 %v147_v50  ;;  %v822_v14 = vld [vmem:[#allocation6 + $0x2d0] sm:$0xff]  ;;  %v821_v16 = vld [vmem:[#allocation6 + $0x2c8] sm:$0xff]  ;;  %v756_v17 = vld [vmem:[#allocation6 + $0xc0] sm:$0xff] }
  0x71   :  { %243 = vmatpush1.msra.mxu0 %v144_v51  ;;  %356 = vmatpush1.msra.mxu1 %v146_v52  ;;  %v820_v18 = vld [vmem:[#allocation6 + $0x2c0] sm:$0xff]  ;;  %v755_v19 = vld [vmem:[#allocation6 + $0xb8] sm:$0xff]  ;;  %v754_v21 = vld [vmem:[#allocation6 + $0xb0] sm:$0xff] }
  0x72   :  { %244 = vmatprep.subr.mxu0 %v141_v53  ;;  %357 = vmatprep.subr.mxu1 %v143_v54  ;;  %v819_v20 = vld [vmem:[#allocation6 + $0x2b8] sm:$0xff]  ;;  %v818_v22 = vld [vmem:[#allocation6 + $0x2b0] sm:$0xff]  ;;  %v753_v23 = vld [vmem:[#allocation6 + $0xa8] sm:$0xff] }
  0x73   :  { %245 = vmatpush1.msra.mxu0 %v140_v55  ;;  %358 = vmatpush1.msra.mxu1 %v142_v56  ;;  %v817_v24 = vld [vmem:[#allocation6 + $0x2a8] sm:$0xff]  ;;  %v752_v25 = vld [vmem:[#allocation6 + $0xa0] sm:$0xff]  ;;  %v751_v27 = vld [vmem:[#allocation6 + $0x98] sm:$0xff] }
  0x74   :  { %246 = vmatprep.subr.mxu0 %v137_v57  ;;  %359 = vmatprep.subr.mxu1 %v139_v58  ;;  %v816_v26 = vld [vmem:[#allocation6 + $0x2a0] sm:$0xff]  ;;  %v815_v28 = vld [vmem:[#allocation6 + $0x298] sm:$0xff]  ;;  %v750_v29 = vld [vmem:[#allocation6 + $0x90] sm:$0xff] }
  0x75   :  { %247 = vmatpush1.msra.mxu0 %v136_v59  ;;  %360 = vmatpush1.msra.mxu1 %v138_v60  ;;  %v814_v30 = vld [vmem:[#allocation6 + $0x290] sm:$0xff]  ;;  %v749_v31 = vld [vmem:[#allocation6 + $0x88] sm:$0xff]  ;;  %v748_v33 = vld [vmem:[#allocation6 + $0x80] sm:$0xff] }
  0x76   :  { %248 = vmatprep.subr.mxu0 %v133_v61  ;;  %361 = vmatprep.subr.mxu1 %v135_v62  ;;  %v813_v32 = vld [vmem:[#allocation6 + $0x288] sm:$0xff]  ;;  %v812_v34 = vld [vmem:[#allocation6 + $0x280] sm:$0xff]  ;;  %v747_v35 = vld [vmem:[#allocation6 + $0x78] sm:$0xff] }
  0x77   :  { %249 = vmatpush1.msra.mxu0 %v132_v63  ;;  %362 = vmatpush1.msra.mxu1 %v134_v1  ;;  %v811_v36 = vld [vmem:[#allocation6 + $0x278] sm:$0xff]  ;;  %v746_v37 = vld [vmem:[#allocation6 + $0x70] sm:$0xff]  ;;  %v745_v39 = vld [vmem:[#allocation6 + $0x68] sm:$0xff] }
  0x78   :  { %283 = vmatmul.mubr.f32.vlgmr.msra.gmra.mxu0 %v124_v2  ;;  %1756 = vmatprep.subr.mxu0 %v763_v3  ;;  %v810_v38 = vld [vmem:[#allocation6 + $0x270] sm:$0xff]  ;;  %v809_v40 = vld [vmem:[#allocation6 + $0x268] sm:$0xff]  ;;  %v744_v41 = vld [vmem:[#allocation6 + $0x60] sm:$0xff] }
  0x79   :  { %1869 = vmatprep.subr.mxu1 %v827_v4  ;;  %396 = vmatmul.mubr.f32.vlgmr.msra.gmra.mxu1 %v124_v2  ;;  %v808_v42 = vld [vmem:[#allocation6 + $0x260] sm:$0xff]  ;;  %v743_v43 = vld [vmem:[#allocation6 + $0x58] sm:$0xff]  ;;  %v742_v45 = vld [vmem:[#allocation6 + $0x50] sm:$0xff] }
  0x7a   :  { %1757 = vmatpush1.msra.mxu0 %v762_v5  ;;  %1870 = vmatpush1.msra.mxu1 %v826_v6  ;;  %v807_v44 = vld [vmem:[#allocation6 + $0x258] sm:$0xff]  ;;  %v806_v46 = vld [vmem:[#allocation6 + $0x250] sm:$0xff]  ;;  %v741_v47 = vld [vmem:[#allocation6 + $0x48] sm:$0xff] }
  0x7b   :  { %1758 = vmatprep.subr.mxu0 %v761_v7  ;;  %1871 = vmatprep.subr.mxu1 %v825_v8  ;;  %v805_v48 = vld [vmem:[#allocation6 + $0x248] sm:$0xff]  ;;  %v740_v49 = vld [vmem:[#allocation6 + $0x40] sm:$0xff]  ;;  %v739_v51 = vld [vmem:[#allocation6 + $0x38] sm:$0xff] }
  0x7c   :  { %1759 = vmatpush1.msra.mxu0 %v760_v9  ;;  %1872 = vmatpush1.msra.mxu1 %v824_v10  ;;  %v804_v50 = vld [vmem:[#allocation6 + $0x240] sm:$0xff]  ;;  %v803_v52 = vld [vmem:[#allocation6 + $0x238] sm:$0xff]  ;;  %v738_v53 = vld [vmem:[#allocation6 + $0x30] sm:$0xff] }
  0x7d   :  { %1760 = vmatprep.subr.mxu0 %v759_v11  ;;  %1873 = vmatprep.subr.mxu1 %v823_v12  ;;  %v802_v54 = vld [vmem:[#allocation6 + $0x230] sm:$0xff]  ;;  %v737_v55 = vld [vmem:[#allocation6 + $0x28] sm:$0xff]  ;;  %v736_v57 = vld [vmem:[#allocation6 + $0x20] sm:$0xff] }
  0x7e   :  { %1761 = vmatpush1.msra.mxu0 %v758_v13  ;;  %1874 = vmatpush1.msra.mxu1 %v822_v14  ;;  %v801_v56 = vld [vmem:[#allocation6 + $0x228] sm:$0xff]  ;;  %v800_v58 = vld [vmem:[#allocation6 + $0x220] sm:$0xff]  ;;  %v735_v59 = vld [vmem:[#allocation6 + $0x18] sm:$0xff] }
  0x7f   :  { %1762 = vmatprep.subr.mxu0 %v757_v15  ;;  %1875 = vmatprep.subr.mxu1 %v821_v16  ;;  %v799_v60 = vld [vmem:[#allocation6 + $0x218] sm:$0xff]  ;;  %v734_v61 = vld [vmem:[#allocation6 + $0x10] sm:$0xff]  ;;  %v733_v63 = vld [vmem:[#allocation6 + $0x8] sm:$0xff] }
  0x80   :  { %1763 = vmatpush1.msra.mxu0 %v756_v17  ;;  %1876 = vmatpush1.msra.mxu1 %v820_v18  ;;  %v798_v62 = vld [vmem:[#allocation6 + $0x210] sm:$0xff]  ;;  %v797_v1 = vld [vmem:[#allocation6 + $0x208] sm:$0xff]  ;;  %v732_v2 = vld [vmem:[#allocation6] sm:$0xff] }
  0x81   :  { %1764 = vmatprep.subr.mxu0 %v755_v19  ;;  %1877 = vmatprep.subr.mxu1 %v819_v20  ;;  %v796_v3 = vld [vmem:[#allocation6 + $0x200] sm:$0xff]  ;;  %v795_v4 = vld [vmem:[#allocation6 + $0x1f8] sm:$0xff]  ;;  %v794_v6 = vld [vmem:[#allocation6 + $0x1f0] sm:$0xff] }
  0x82   :  { %1765 = vmatpush1.msra.mxu0 %v754_v21  ;;  %1878 = vmatpush1.msra.mxu1 %v818_v22  ;;  %v859_v5 = vld [vmem:[#allocation6 + $0x3f8] sm:$0xff]  ;;  %v858_v7 = vld [vmem:[#allocation6 + $0x3f0] sm:$0xff]  ;;  %v793_v8 = vld [vmem:[#allocation6 + $0x1e8] sm:$0xff] }
  0x83   :  { %1766 = vmatprep.subr.mxu0 %v753_v23  ;;  %1879 = vmatprep.subr.mxu1 %v817_v24  ;;  %v857_v9 = vld [vmem:[#allocation6 + $0x3e8] sm:$0xff]  ;;  %v792_v11 = vld [vmem:[#allocation6 + $0x1e0] sm:$0xff]  ;;  %v791_v13 = vld [vmem:[#allocation6 + $0x1d8] sm:$0xff] }
  0x84   :  { %1767 = vmatpush1.msra.mxu0 %v752_v25  ;;  %1880 = vmatpush1.msra.mxu1 %v816_v26  ;;  %v125_v10 = vld [vmem:[%s9397_s0 + $0x8] sm:$0xff]  ;;  %v856_v12 = vld [vmem:[#allocation6 + $0x3e0] sm:$0xff]  ;;  %v855_v14 = vld [vmem:[#allocation6 + $0x3d8] sm:$0xff] }
  0x85   :  { %1768 = vmatprep.subr.mxu0 %v751_v27  ;;  %1881 = vmatprep.subr.mxu1 %v815_v28  ;;  %v790_v15 = vld [vmem:[#allocation6 + $0x1d0] sm:$0xff]  ;;  %v789_v17 = vld [vmem:[#allocation6 + $0x1c8] sm:$0xff]  ;;  %v788_v20 = vld [vmem:[#allocation6 + $0x1c0] sm:$0xff] }
  0x86   :  { %1769 = vmatpush1.msra.mxu0 %v750_v29  ;;  %1882 = vmatpush1.msra.mxu1 %v814_v30  ;;  %v854_v16 = vld [vmem:[#allocation6 + $0x3d0] sm:$0xff]  ;;  %v853_v18 = vld [vmem:[#allocation6 + $0x3c8] sm:$0xff]  ;;  %v852_v21 = vld [vmem:[#allocation6 + $0x3c0] sm:$0xff] }
  0x87   :  { %1770 = vmatprep.subr.mxu0 %v749_v31  ;;  %1883 = vmatprep.subr.mxu1 %v813_v32  ;;  %v126_v19 = vld [vmem:[%s9397_s0 + $0x10] sm:$0xff]  ;;  %v787_v22 = vld [vmem:[#allocation6 + $0x1b8] sm:$0xff]  ;;  %v785_v26 = vld [vmem:[#allocation6 + $0x1a8] sm:$0xff] }
  0x88   :  { %1771 = vmatpush1.msra.mxu0 %v748_v33  ;;  %1884 = vmatpush1.msra.mxu1 %v812_v34  ;;  %v851_v23 = vld [vmem:[#allocation6 + $0x3b8] sm:$0xff]  ;;  %v786_v24 = vld [vmem:[#allocation6 + $0x1b0] sm:$0xff]  ;;  %v849_v27 = vld [vmem:[#allocation6 + $0x3a8] sm:$0xff] }
  0x89   :  { %1772 = vmatprep.subr.mxu0 %v747_v35  ;;  %1885 = vmatprep.subr.mxu1 %v811_v36  ;;  %v850_v25 = vld [vmem:[#allocation6 + $0x3b0] sm:$0xff]  ;;  %v127_v28 = vld [vmem:[%s9397_s0 + $0x18] sm:$0xff]  ;;  %v784_v29 = vld [vmem:[#allocation6 + $0x1a0] sm:$0xff] }
  0x8a   :  { %1773 = vmatpush1.msra.mxu0 %v746_v37  ;;  %1886 = vmatpush1.msra.mxu1 %v810_v38  ;;  %v848_v30 = vld [vmem:[#allocation6 + $0x3a0] sm:$0xff]  ;;  %v783_v31 = vld [vmem:[#allocation6 + $0x198] sm:$0xff]  ;;  %v782_v33 = vld [vmem:[#allocation6 + $0x190] sm:$0xff] }
  0x8b   :  { %1774 = vmatprep.subr.mxu0 %v745_v39  ;;  %1887 = vmatprep.subr.mxu1 %v809_v40  ;;  %v847_v32 = vld [vmem:[#allocation6 + $0x398] sm:$0xff]  ;;  %v846_v34 = vld [vmem:[#allocation6 + $0x390] sm:$0xff]  ;;  %v781_v35 = vld [vmem:[#allocation6 + $0x188] sm:$0xff] }
  0x8c   :  { %1775 = vmatpush1.msra.mxu0 %v744_v41  ;;  %1888 = vmatpush1.msra.mxu1 %v808_v42  ;;  %v845_v36 = vld [vmem:[#allocation6 + $0x388] sm:$0xff]  ;;  %v128_v37 = vld [vmem:[%s9397_s0 + $0x20] sm:$0xff]  ;;  %v779_v40 = vld [vmem:[#allocation6 + $0x178] sm:$0xff] }
  0x8d   :  { %1776 = vmatprep.subr.mxu0 %v743_v43  ;;  %1889 = vmatprep.subr.mxu1 %v807_v44  ;;  %v780_v38 = vld [vmem:[#allocation6 + $0x180] sm:$0xff]  ;;  %v843_v41 = vld [vmem:[#allocation6 + $0x378] sm:$0xff]  ;;  %v778_v42 = vld [vmem:[#allocation6 + $0x170] sm:$0xff] }
  0x8e   :  { %1777 = vmatpush1.msra.mxu0 %v742_v45  ;;  %1890 = vmatpush1.msra.mxu1 %v806_v46  ;;  %v844_v39 = vld [vmem:[#allocation6 + $0x380] sm:$0xff]  ;;  %v842_v43 = vld [vmem:[#allocation6 + $0x370] sm:$0xff]  ;;  %v777_v44 = vld [vmem:[#allocation6 + $0x168] sm:$0xff] }
  0x8f   :  { %1778 = vmatprep.subr.mxu0 %v741_v47  ;;  %1891 = vmatprep.subr.mxu1 %v805_v48  ;;  %v841_v45 = vld [vmem:[#allocation6 + $0x368] sm:$0xff]  ;;  %v776_v47 = vld [vmem:[#allocation6 + $0x160] sm:$0xff] }
  0x90   :  { %1779 = vmatpush1.msra.mxu0 %v740_v49  ;;  %1892 = vmatpush1.msra.mxu1 %v804_v50  ;;  %v129_v46 = vld [vmem:[%s9397_s0 + $0x28] sm:$0xff]  ;;  %v840_v48 = vld [vmem:[#allocation6 + $0x360] sm:$0xff]  ;;  %v775_v49 = vld [vmem:[#allocation6 + $0x158] sm:$0xff] }
  0x91   :  { %1780 = vmatprep.subr.mxu0 %v739_v51  ;;  %1893 = vmatprep.subr.mxu1 %v803_v52  ;;  %v839_v50 = vld [vmem:[#allocation6 + $0x358] sm:$0xff]  ;;  %v774_v51 = vld [vmem:[#allocation6 + $0x150] sm:$0xff] }
  0x92   :  { %1781 = vmatpush1.msra.mxu0 %v738_v53  ;;  %1894 = vmatpush1.msra.mxu1 %v802_v54  ;;  %v838_v52 = vld [vmem:[#allocation6 + $0x350] sm:$0xff]  ;;  %v773_v53 = vld [vmem:[#allocation6 + $0x148] sm:$0xff] }
  0x93   :  { %1782 = vmatprep.subr.mxu0 %v737_v55  ;;  %1895 = vmatprep.subr.mxu1 %v801_v56  ;;  %v837_v54 = vld [vmem:[#allocation6 + $0x348] sm:$0xff]  ;;  %v130_v55 = vld [vmem:[%s9397_s0 + $0x30] sm:$0xff]  ;;  %v772_v56 = vld [vmem:[#allocation6 + $0x140] sm:$0xff] }
  0x94   :  { %1783 = vmatpush1.msra.mxu0 %v736_v57  ;;  %1896 = vmatpush1.msra.mxu1 %v800_v58  ;;  %v836_v57 = vld [vmem:[#allocation6 + $0x340] sm:$0xff]  ;;  %v771_v58 = vld [vmem:[#allocation6 + $0x138] sm:$0xff] }
  0x95   :  { %1784 = vmatprep.subr.mxu0 %v735_v59  ;;  %1897 = vmatprep.subr.mxu1 %v799_v60  ;;  %v835_v59 = vld [vmem:[#allocation6 + $0x338] sm:$0xff]  ;;  %v770_v60 = vld [vmem:[#allocation6 + $0x130] sm:$0xff] }
  0x96   :  { %1785 = vmatpush1.msra.mxu0 %v734_v61  ;;  %1898 = vmatpush1.msra.mxu1 %v798_v62  ;;  %v834_v61 = vld [vmem:[#allocation6 + $0x330] sm:$0xff]  ;;  %v769_v62 = vld [vmem:[#allocation6 + $0x128] sm:$0xff] }
  0x97   :  { %1786 = vmatprep.subr.mxu0 %v733_v63  ;;  %1899 = vmatprep.subr.mxu1 %v797_v1  ;;  %v833_v63 = vld [vmem:[#allocation6 + $0x328] sm:$0xff]  ;;  %v131_v1 = vld [vmem:[%s9397_s0 + $0x38] sm:$0xff] }
  0x98   :  { %1787 = vmatpush1.msra.mxu0 %v732_v2  ;;  %1900 = vmatpush1.msra.mxu1 %v796_v3  ;;  %v768_v2 = vld [vmem:[#allocation6 + $0x120] sm:$0xff] }
  0x99   :  { %1788 = vmatprep.subr.mxu0 %v795_v4  ;;  %1901 = vmatprep.subr.mxu1 %v859_v5  ;;  %v832_v3 = vld [vmem:[#allocation6 + $0x320] sm:$0xff]  ;;  %v767_v4 = vld [vmem:[#allocation6 + $0x118] sm:$0xff] }
  0x9a   :  { %1789 = vmatpush2.msra.mxu0 %v794_v6  ;;  %1902 = vmatpush2.msra.mxu1 %v858_v7  ;;  %v831_v5 = vld [vmem:[#allocation6 + $0x318] sm:$0xff]  ;;  %v766_v6 = vld [vmem:[#allocation6 + $0x110] sm:$0xff] }
  0x9b   :  { %288 = vmatprep.mubr.f32.mxu0 %v9409_v0  ;;  %1790 = vmatprep.subr.mxu0 %v793_v8  ;;  %v830_v7 = vld [vmem:[#allocation6 + $0x310] sm:$0xff]  ;;  %v765_v8 = vld [vmem:[#allocation6 + $0x108] sm:$0xff] }
  0x9c   :  { %1903 = vmatprep.subr.mxu1 %v857_v9  ;;  %289 = vmatmul.mubr.f32.gmra.mxu0 %v125_v10  ;;  %v829_v9 = vld [vmem:[#allocation6 + $0x308] sm:$0xff] }
  0x9d   :  { %401 = vmatprep.mubr.f32.mxu1 %v9409_v0  ;;  %1791 = vmatpush2.msra.mxu0 %v792_v11  ;;  %v477_v11 = vld [vmem:[%s9398_s1 + $0x8] sm:$0xff] }
  0x9e   :  { %1904 = vmatpush2.msra.mxu1 %v856_v12  ;;  %1792 = vmatprep.subr.mxu0 %v791_v13  ;;  %v828_v12 = vld [vmem:[#allocation6 + $0x300] sm:$0xff]  ;;  %v479_v13 = vld [vmem:[%s9398_s1 + $0x18] sm:$0xff] }
  0x9f   :  { %402 = vmatmul.mubr.f32.gmra.mxu1 %v125_v10  ;;  %1905 = vmatprep.subr.mxu1 %v855_v14  ;;  %v764_v10 = vld [vmem:[#allocation6 + $0x100] sm:$0xff] }
  0xa0   :  { %1793 = vmatpush2.msra.mxu0 %v790_v15  ;;  %1906 = vmatpush2.msra.mxu1 %v854_v16  ;;  %v476_v14 = vld [vmem:[%s9398_s1] sm:$0xff]  ;;  %v478_v15 = vld [vmem:[%s9398_s1 + $0x10] sm:$0xff]  ;;  %v891_v16 = vld [vmem:[#allocation6 + $0x4f8] sm:$0xff] }
  0xa1   :  { %294 = vmatprep.mubr.f32.mxu0 %v9409_v0  ;;  %1794 = vmatprep.subr.mxu0 %v789_v17  ;;  %v955_v17 = vld [vmem:[#allocation6 + $0x6f8] sm:$0xff] }
  0xa2   :  { %1907 = vmatprep.subr.mxu1 %v853_v18  ;;  %295 = vmatmul.mubr.f32.gmra.mxu0 %v126_v19  ;;  %v890_v18 = vld [vmem:[#allocation6 + $0x4f0] sm:$0xff] }
  0xa3   :  { %407 = vmatprep.mubr.f32.mxu1 %v9409_v0  ;;  %1795 = vmatpush2.msra.mxu0 %v788_v20  ;;  %v889_v20 = vld [vmem:[#allocation6 + $0x4e8] sm:$0xff] }
  0xa4   :  { %1908 = vmatpush2.msra.mxu1 %v852_v21  ;;  %1796 = vmatprep.subr.mxu0 %v787_v22  ;;  %v953_v21 = vld [vmem:[#allocation6 + $0x6e8] sm:$0xff]  ;;  %v888_v22 = vld [vmem:[#allocation6 + $0x4e0] sm:$0xff] }
  0xa5   :  { %408 = vmatmul.mubr.f32.gmra.mxu1 %v126_v19  ;;  %1909 = vmatprep.subr.mxu1 %v851_v23  ;;  %v954_v19 = vld [vmem:[#allocation6 + $0x6f0] sm:$0xff]  ;;  %v952_v23 = vld [vmem:[#allocation6 + $0x6e0] sm:$0xff] }
  0xa6   :  { %1797 = vmatpush2.msra.mxu0 %v786_v24  ;;  %1910 = vmatpush2.msra.mxu1 %v850_v25  ;;  %v887_v24 = vld [vmem:[#allocation6 + $0x4d8] sm:$0xff] }
  0xa7   :  { %300 = vmatprep.mubr.f32.mxu0 %v9409_v0  ;;  %1798 = vmatprep.subr.mxu0 %v785_v26  ;;  %v951_v25 = vld [vmem:[#allocation6 + $0x6d8] sm:$0xff]  ;;  %v886_v26 = vld [vmem:[#allocation6 + $0x4d0] sm:$0xff] }
  0xa8   :  { %1911 = vmatprep.subr.mxu1 %v849_v27  ;;  %301 = vmatmul.mubr.f32.gmra.mxu0 %v127_v28  ;;  %v950_v27 = vld [vmem:[#allocation6 + $0x6d0] sm:$0xff] }
  0xa9   :  { %413 = vmatprep.mubr.f32.mxu1 %v9409_v0  ;;  %1799 = vmatpush2.msra.mxu0 %v784_v29  ;;  %v949_v29 = vld [vmem:[#allocation6 + $0x6c8] sm:$0xff] }
  0xaa   :  { %1912 = vmatpush2.msra.mxu1 %v848_v30  ;;  %1800 = vmatprep.subr.mxu0 %v783_v31  ;;  %v884_v30 = vld [vmem:[#allocation6 + $0x4c0] sm:$0xff] }
  0xab   :  { %414 = vmatmul.mubr.f32.gmra.mxu1 %v127_v28  ;;  %1913 = vmatprep.subr.mxu1 %v847_v32  ;;  %v885_v28 = vld [vmem:[#allocation6 + $0x4c8] sm:$0xff]  ;;  %v948_v31 = vld [vmem:[#allocation6 + $0x6c0] sm:$0xff]  ;;  %v883_v32 = vld [vmem:[#allocation6 + $0x4b8] sm:$0xff] }
  0xac   :  { %1801 = vmatpush2.msra.mxu0 %v782_v33  ;;  %1914 = vmatpush2.msra.mxu1 %v846_v34  ;;  %v947_v33 = vld [vmem:[#allocation6 + $0x6b8] sm:$0xff]  ;;  %v882_v34 = vld [vmem:[#allocation6 + $0x4b0] sm:$0xff] }
  0xad   :  { %306 = vmatprep.mubr.f32.mxu0 %v9409_v0  ;;  %1802 = vmatprep.subr.mxu0 %v781_v35  ;;  %v946_v35 = vld [vmem:[#allocation6 + $0x6b0] sm:$0xff] }
  0xae   :  { %1915 = vmatprep.subr.mxu1 %v845_v36  ;;  %307 = vmatmul.mubr.f32.gmra.mxu0 %v128_v37  ;;  %v881_v36 = vld [vmem:[#allocation6 + $0x4a8] sm:$0xff] }
  0xaf   :  { %419 = vmatprep.mubr.f32.mxu1 %v9409_v0  ;;  %1803 = vmatpush2.msra.mxu0 %v780_v38  ;;  %v880_v38 = vld [vmem:[#allocation6 + $0x4a0] sm:$0xff] }
  0xb0   :  { %1916 = vmatpush2.msra.mxu1 %v844_v39  ;;  %1804 = vmatprep.subr.mxu0 %v779_v40  ;;  %v944_v39 = vld [vmem:[#allocation6 + $0x6a0] sm:$0xff]  ;;  %v879_v40 = vld [vmem:[#allocation6 + $0x498] sm:$0xff] }
  0xb1   :  { %420 = vmatmul.mubr.f32.gmra.mxu1 %v128_v37  ;;  %1917 = vmatprep.subr.mxu1 %v843_v41  ;;  %v945_v37 = vld [vmem:[#allocation6 + $0x6a8] sm:$0xff]  ;;  %v943_v41 = vld [vmem:[#allocation6 + $0x698] sm:$0xff] }
  0xb2   :  { %1805 = vmatpush2.msra.mxu0 %v778_v42  ;;  %1918 = vmatpush2.msra.mxu1 %v842_v43  ;;  %v878_v42 = vld [vmem:[#allocation6 + $0x490] sm:$0xff] }
  0xb3   :  { %312 = vmatprep.mubr.f32.mxu0 %v9409_v0  ;;  %1806 = vmatprep.subr.mxu0 %v777_v44  ;;  %v942_v43 = vld [vmem:[#allocation6 + $0x690] sm:$0xff]  ;;  %v877_v44 = vld [vmem:[#allocation6 + $0x488] sm:$0xff] }
  0xb4   :  { %1919 = vmatprep.subr.mxu1 %v841_v45  ;;  %313 = vmatmul.mubr.f32.gmra.mxu0 %v129_v46  ;;  %v941_v45 = vld [vmem:[#allocation6 + $0x688] sm:$0xff] }
  0xb5   :  { %425 = vmatprep.mubr.f32.mxu1 %v9409_v0  ;;  %1807 = vmatpush2.msra.mxu0 %v776_v47  ;;  %v940_v47 = vld [vmem:[#allocation6 + $0x680] sm:$0xff] }
  0xb6   :  { %1920 = vmatpush2.msra.mxu1 %v840_v48  ;;  %1808 = vmatprep.subr.mxu0 %v775_v49  ;;  %v875_v48 = vld [vmem:[#allocation6 + $0x478] sm:$0xff] }
  0xb7   :  { %426 = vmatmul.mubr.f32.gmra.mxu1 %v129_v46  ;;  %1921 = vmatprep.subr.mxu1 %v839_v50  ;;  %v876_v46 = vld [vmem:[#allocation6 + $0x480] sm:$0xff]  ;;  %v939_v49 = vld [vmem:[#allocation6 + $0x678] sm:$0xff]  ;;  %v874_v50 = vld [vmem:[#allocation6 + $0x470] sm:$0xff] }
  0xb8   :  { %1809 = vmatpush2.msra.mxu0 %v774_v51  ;;  %1922 = vmatpush2.msra.mxu1 %v838_v52  ;;  %v938_v51 = vld [vmem:[#allocation6 + $0x670] sm:$0xff]  ;;  %v873_v52 = vld [vmem:[#allocation6 + $0x468] sm:$0xff] }
  0xb9   :  { %318 = vmatprep.mubr.f32.mxu0 %v9409_v0  ;;  %1810 = vmatprep.subr.mxu0 %v773_v53  ;;  %v937_v53 = vld [vmem:[#allocation6 + $0x668] sm:$0xff] }
  0xba   :  { %1923 = vmatprep.subr.mxu1 %v837_v54  ;;  %319 = vmatmul.mubr.f32.gmra.mxu0 %v130_v55  ;;  %v872_v54 = vld [vmem:[#allocation6 + $0x460] sm:$0xff] }
  0xbb   :  { %431 = vmatprep.mubr.f32.mxu1 %v9409_v0  ;;  %1811 = vmatpush2.msra.mxu0 %v772_v56  ;;  %v871_v56 = vld [vmem:[#allocation6 + $0x458] sm:$0xff] }
  0xbc   :  { %1924 = vmatpush2.msra.mxu1 %v836_v57  ;;  %1812 = vmatprep.subr.mxu0 %v771_v58  ;;  %v935_v57 = vld [vmem:[#allocation6 + $0x658] sm:$0xff]  ;;  %v870_v58 = vld [vmem:[#allocation6 + $0x450] sm:$0xff] }
  0xbd   :  { %432 = vmatmul.mubr.f32.gmra.mxu1 %v130_v55  ;;  %1925 = vmatprep.subr.mxu1 %v835_v59  ;;  %v936_v55 = vld [vmem:[#allocation6 + $0x660] sm:$0xff]  ;;  %v934_v59 = vld [vmem:[#allocation6 + $0x650] sm:$0xff] }
  0xbe   :  { %1813 = vmatpush2.msra.mxu0 %v770_v60  ;;  %1926 = vmatpush2.msra.mxu1 %v834_v61  ;;  %v869_v60 = vld [vmem:[#allocation6 + $0x448] sm:$0xff] }
  0xbf   :  { %324 = vmatprep.mubr.f32.mxu0 %v9409_v0  ;;  %1814 = vmatprep.subr.mxu0 %v769_v62  ;;  %v933_v61 = vld [vmem:[#allocation6 + $0x648] sm:$0xff]  ;;  %v868_v62 = vld [vmem:[#allocation6 + $0x440] sm:$0xff] }
  0xc0   :  { %1927 = vmatprep.subr.mxu1 %v833_v63  ;;  %325 = vmatmul.mubr.f32.gmra.mxu0 %v131_v1  ;;  %v932_v63 = vld [vmem:[#allocation6 + $0x640] sm:$0xff] }
  0xc1   :  { %437 = vmatprep.mubr.f32.mxu1 %v9409_v0  ;;  %1815 = vmatpush2.msra.mxu0 %v768_v2  ;;  %v931_v2 = vld [vmem:[#allocation6 + $0x638] sm:$0xff]  ;;  %v1485_v0 = vld [vmem:[#allocation6 + $0x1788] sm:$0xff] }
  0xc2   :  { %1928 = vmatpush2.msra.mxu1 %v832_v3  ;;  %1816 = vmatprep.subr.mxu0 %v767_v4  ;;  %v866_v3 = vld [vmem:[#allocation6 + $0x430] sm:$0xff] }
  0xc3   :  { %438 = vmatmul.mubr.f32.gmra.mxu1 %v131_v1  ;;  %1929 = vmatprep.subr.mxu1 %v831_v5  ;;  %v867_v1 = vld [vmem:[#allocation6 + $0x438] sm:$0xff]  ;;  %v930_v4 = vld [vmem:[#allocation6 + $0x630] sm:$0xff]  ;;  %v865_v5 = vld [vmem:[#allocation6 + $0x428] sm:$0xff] }
  0xc4   :  { %1817 = vmatpush2.msra.mxu0 %v766_v6  ;;  %1930 = vmatpush2.msra.mxu1 %v830_v7  ;;  %v929_v6 = vld [vmem:[#allocation6 + $0x628] sm:$0xff]  ;;  %v864_v7 = vld [vmem:[#allocation6 + $0x420] sm:$0xff] }
  0xc5   :  { %1818 = vmatprep.subr.mxu0 %v765_v8  ;;  %1931 = vmatprep.subr.mxu1 %v829_v9  ;;  %v928_v8 = vld [vmem:[#allocation6 + $0x620] sm:$0xff]  ;;  %v863_v9 = vld [vmem:[#allocation6 + $0x418] sm:$0xff] }
  0xc6   :  { %1819 = vmatpush2.msra.mxu0 %v764_v10  ;;  %1820 = vmatprep.mubr.f32.mxu0 %v477_v11  ;;  %v927_v10 = vld [vmem:[#allocation6 + $0x618] sm:$0xff]  ;;  %v862_v11 = vld [vmem:[#allocation6 + $0x410] sm:$0xff] }
  0xc7   :  { %1932 = vmatpush2.msra.mxu1 %v828_v12  ;;  %1933 = vmatprep.mubr.f32.mxu1 %v479_v13  ;;  %v926_v12 = vld [vmem:[#allocation6 + $0x610] sm:$0xff]  ;;  %v861_v13 = vld [vmem:[#allocation6 + $0x408] sm:$0xff] }
  0xc8   :  { %1821 = vmatmul.mubr.f32.vlgmr.msra.gmra.mxu0 %v476_v14  ;;  %1934 = vmatmul.mubr.f32.vlgmr.msra.gmra.mxu1 %v478_v15  ;;  %v925_v14 = vld [vmem:[#allocation6 + $0x608] sm:$0xff]  ;;  %v860_v15 = vld [vmem:[#allocation6 + $0x400] sm:$0xff] }
  0xc9   :  { %1982 = vmatprep.subr.mxu0 %v891_v16  ;;  %2095 = vmatprep.subr.mxu1 %v955_v17  ;;  %v924_v16 = vld [vmem:[#allocation6 + $0x600] sm:$0xff]  ;;  %v923_v17 = vld [vmem:[#allocation6 + $0x5f8] sm:$0xff] }
  0xca   :  { %1983 = vmatpush1.msra.mxu0 %v890_v18  ;;  %2096 = vmatpush1.msra.mxu1 %v954_v19  ;;  %v987_v18 = vld [vmem:[#allocation6 + $0x7f8] sm:$0xff]  ;;  %v922_v19 = vld [vmem:[#allocation6 + $0x5f0] sm:$0xff] }
  0xcb   :  { %1984 = vmatprep.subr.mxu0 %v889_v20  ;;  %2097 = vmatprep.subr.mxu1 %v953_v21  ;;  %v986_v20 = vld [vmem:[#allocation6 + $0x7f0] sm:$0xff]  ;;  %v509_v21 = vld [vmem:[%s9398_s1 + $0x108] sm:$0xff] }
  0xcc   :  { %1985 = vmatpush1.msra.mxu0 %v888_v22  ;;  %2098 = vmatpush1.msra.mxu1 %v952_v23  ;;  %v511_v22 = vld [vmem:[%s9398_s1 + $0x118] sm:$0xff]  ;;  %v921_v23 = vld [vmem:[#allocation6 + $0x5e8] sm:$0xff] }
  0xcd   :  { %1986 = vmatprep.subr.mxu0 %v887_v24  ;;  %2099 = vmatprep.subr.mxu1 %v951_v25  ;;  %v985_v24 = vld [vmem:[#allocation6 + $0x7e8] sm:$0xff]  ;;  %v508_v25 = vld [vmem:[%s9398_s1 + $0x100] sm:$0xff] }
  0xce   :  { %1987 = vmatpush1.msra.mxu0 %v886_v26  ;;  %2100 = vmatpush1.msra.mxu1 %v950_v27  ;;  %v510_v26 = vld [vmem:[%s9398_s1 + $0x110] sm:$0xff]  ;;  %v920_v27 = vld [vmem:[#allocation6 + $0x5e0] sm:$0xff] }
  0xcf   :  { %1988 = vmatprep.subr.mxu0 %v885_v28  ;;  %2101 = vmatprep.subr.mxu1 %v949_v29  ;;  %v984_v28 = vld [vmem:[#allocation6 + $0x7e0] sm:$0xff]  ;;  %v919_v29 = vld [vmem:[#allocation6 + $0x5d8] sm:$0xff] }
  0xd0   :  { %1989 = vmatpush1.msra.mxu0 %v884_v30  ;;  %2102 = vmatpush1.msra.mxu1 %v948_v31  ;;  %v983_v30 = vld [vmem:[#allocation6 + $0x7d8] sm:$0xff]  ;;  %v918_v31 = vld [vmem:[#allocation6 + $0x5d0] sm:$0xff] }
  0xd1   :  { %1990 = vmatprep.subr.mxu0 %v883_v32  ;;  %2103 = vmatprep.subr.mxu1 %v947_v33  ;;  %v982_v32 = vld [vmem:[#allocation6 + $0x7d0] sm:$0xff]  ;;  %v541_v33 = vld [vmem:[%s9398_s1 + $0x208] sm:$0xff] }
  0xd2   :  { %1991 = vmatpush1.msra.mxu0 %v882_v34  ;;  %2104 = vmatpush1.msra.mxu1 %v946_v35  ;;  %v543_v34 = vld [vmem:[%s9398_s1 + $0x218] sm:$0xff]  ;;  %v917_v35 = vld [vmem:[#allocation6 + $0x5c8] sm:$0xff] }
  0xd3   :  { %1992 = vmatprep.subr.mxu0 %v881_v36  ;;  %2105 = vmatprep.subr.mxu1 %v945_v37  ;;  %v981_v36 = vld [vmem:[#allocation6 + $0x7c8] sm:$0xff]  ;;  %v540_v37 = vld [vmem:[%s9398_s1 + $0x200] sm:$0xff] }
  0xd4   :  { %1993 = vmatpush1.msra.mxu0 %v880_v38  ;;  %2106 = vmatpush1.msra.mxu1 %v944_v39  ;;  %v542_v38 = vld [vmem:[%s9398_s1 + $0x210] sm:$0xff]  ;;  %v916_v39 = vld [vmem:[#allocation6 + $0x5c0] sm:$0xff] }
  0xd5   :  { %1994 = vmatprep.subr.mxu0 %v879_v40  ;;  %2107 = vmatprep.subr.mxu1 %v943_v41  ;;  %v980_v40 = vld [vmem:[#allocation6 + $0x7c0] sm:$0xff]  ;;  %v915_v41 = vld [vmem:[#allocation6 + $0x5b8] sm:$0xff] }
  0xd6   :  { %1995 = vmatpush1.msra.mxu0 %v878_v42  ;;  %2108 = vmatpush1.msra.mxu1 %v942_v43  ;;  %v979_v42 = vld [vmem:[#allocation6 + $0x7b8] sm:$0xff]  ;;  %v914_v43 = vld [vmem:[#allocation6 + $0x5b0] sm:$0xff] }
  0xd7   :  { %1996 = vmatprep.subr.mxu0 %v877_v44  ;;  %2109 = vmatprep.subr.mxu1 %v941_v45  ;;  %v978_v44 = vld [vmem:[#allocation6 + $0x7b0] sm:$0xff]  ;;  %v573_v45 = vld [vmem:[%s9398_s1 + $0x308] sm:$0xff] }
  0xd8   :  { %1997 = vmatpush1.msra.mxu0 %v876_v46  ;;  %2110 = vmatpush1.msra.mxu1 %v940_v47  ;;  %v575_v46 = vld [vmem:[%s9398_s1 + $0x318] sm:$0xff]  ;;  %v913_v47 = vld [vmem:[#allocation6 + $0x5a8] sm:$0xff] }
  0xd9   :  { %1998 = vmatprep.subr.mxu0 %v875_v48  ;;  %2111 = vmatprep.subr.mxu1 %v939_v49  ;;  %v977_v48 = vld [vmem:[#allocation6 + $0x7a8] sm:$0xff]  ;;  %v572_v49 = vld [vmem:[%s9398_s1 + $0x300] sm:$0xff] }
  0xda   :  { %1999 = vmatpush1.msra.mxu0 %v874_v50  ;;  %2112 = vmatpush1.msra.mxu1 %v938_v51  ;;  %v574_v50 = vld [vmem:[%s9398_s1 + $0x310] sm:$0xff]  ;;  %v912_v51 = vld [vmem:[#allocation6 + $0x5a0] sm:$0xff] }
  0xdb   :  { %2000 = vmatprep.subr.mxu0 %v873_v52  ;;  %2113 = vmatprep.subr.mxu1 %v937_v53  ;;  %v976_v52 = vld [vmem:[#allocation6 + $0x7a0] sm:$0xff]  ;;  %v911_v53 = vld [vmem:[#allocation6 + $0x598] sm:$0xff] }
  0xdc   :  { %2001 = vmatpush1.msra.mxu0 %v872_v54  ;;  %2114 = vmatpush1.msra.mxu1 %v936_v55  ;;  %v975_v54 = vld [vmem:[#allocation6 + $0x798] sm:$0xff]  ;;  %v910_v55 = vld [vmem:[#allocation6 + $0x590] sm:$0xff] }
  0xdd   :  { %2002 = vmatprep.subr.mxu0 %v871_v56  ;;  %2115 = vmatprep.subr.mxu1 %v935_v57  ;;  %v974_v56 = vld [vmem:[#allocation6 + $0x790] sm:$0xff]  ;;  %v605_v57 = vld [vmem:[%s9398_s1 + $0x408] sm:$0xff] }
  0xde   :  { %2003 = vmatpush1.msra.mxu0 %v870_v58  ;;  %2116 = vmatpush1.msra.mxu1 %v934_v59  ;;  %v607_v58 = vld [vmem:[%s9398_s1 + $0x418] sm:$0xff]  ;;  %v909_v59 = vld [vmem:[#allocation6 + $0x588] sm:$0xff] }
  0xdf   :  { %2004 = vmatprep.subr.mxu0 %v869_v60  ;;  %2117 = vmatprep.subr.mxu1 %v933_v61  ;;  %v973_v60 = vld [vmem:[#allocation6 + $0x788] sm:$0xff]  ;;  %v604_v61 = vld [vmem:[%s9398_s1 + $0x400] sm:$0xff] }
  0xe0   :  { %2005 = vmatpush1.msra.mxu0 %v868_v62  ;;  %2118 = vmatpush1.msra.mxu1 %v932_v63  ;;  %v606_v62 = vld [vmem:[%s9398_s1 + $0x410] sm:$0xff]  ;;  %v908_v63 = vld [vmem:[#allocation6 + $0x580] sm:$0xff] }
  0xe1   :  { %2006 = vmatprep.subr.mxu0 %v867_v1  ;;  %2119 = vmatprep.subr.mxu1 %v931_v2  ;;  %v972_v1 = vld [vmem:[#allocation6 + $0x780] sm:$0xff]  ;;  %v907_v2 = vld [vmem:[#allocation6 + $0x578] sm:$0xff] }
  0xe2   :  { %2007 = vmatpush1.msra.mxu0 %v866_v3  ;;  %2120 = vmatpush1.msra.mxu1 %v930_v4  ;;  %v971_v3 = vld [vmem:[#allocation6 + $0x778] sm:$0xff]  ;;  %v906_v4 = vld [vmem:[#allocation6 + $0x570] sm:$0xff] }
  0xe3   :  { %2008 = vmatprep.subr.mxu0 %v865_v5  ;;  %2121 = vmatprep.subr.mxu1 %v929_v6  ;;  %v970_v5 = vld [vmem:[#allocation6 + $0x770] sm:$0xff]  ;;  %v637_v6 = vld [vmem:[%s9398_s1 + $0x508] sm:$0xff] }
  0xe4   :  { %2009 = vmatpush1.msra.mxu0 %v864_v7  ;;  %2122 = vmatpush1.msra.mxu1 %v928_v8  ;;  %v639_v7 = vld [vmem:[%s9398_s1 + $0x518] sm:$0xff]  ;;  %v905_v8 = vld [vmem:[#allocation6 + $0x568] sm:$0xff] }
  0xe5   :  { %2010 = vmatprep.subr.mxu0 %v863_v9  ;;  %2123 = vmatprep.subr.mxu1 %v927_v10  ;;  %v969_v9 = vld [vmem:[#allocation6 + $0x768] sm:$0xff]  ;;  %v636_v10 = vld [vmem:[%s9398_s1 + $0x500] sm:$0xff] }
  0xe6   :  { %2011 = vmatpush1.msra.mxu0 %v862_v11  ;;  %2124 = vmatpush1.msra.mxu1 %v926_v12  ;;  %v638_v11 = vld [vmem:[%s9398_s1 + $0x510] sm:$0xff]  ;;  %v904_v12 = vld [vmem:[#allocation6 + $0x560] sm:$0xff] }
  0xe7   :  { %2012 = vmatprep.subr.mxu0 %v861_v13  ;;  %2125 = vmatprep.subr.mxu1 %v925_v14  ;;  %v968_v13 = vld [vmem:[#allocation6 + $0x760] sm:$0xff]  ;;  %v903_v14 = vld [vmem:[#allocation6 + $0x558] sm:$0xff] }
  0xe8   :  { %2013 = vmatpush1.msra.mxu0 %v860_v15  ;;  %2126 = vmatpush1.msra.mxu1 %v924_v16  ;;  %v967_v15 = vld [vmem:[#allocation6 + $0x758] sm:$0xff]  ;;  %v902_v16 = vld [vmem:[#allocation6 + $0x550] sm:$0xff] }
  0xe9   :  { %2014 = vmatprep.subr.mxu0 %v923_v17  ;;  %2127 = vmatprep.subr.mxu1 %v987_v18  ;;  %v966_v17 = vld [vmem:[#allocation6 + $0x750] sm:$0xff]  ;;  %v669_v18 = vld [vmem:[%s9398_s1 + $0x608] sm:$0xff] }
  0xea   :  { %2015 = vmatpush2.msra.mxu0 %v922_v19  ;;  %2128 = vmatpush2.msra.mxu1 %v986_v20  ;;  %v671_v19 = vld [vmem:[%s9398_s1 + $0x618] sm:$0xff]  ;;  %v901_v20 = vld [vmem:[#allocation6 + $0x548] sm:$0xff] }
  0xeb   :  { %1826 = vmatprep.mubr.f32.mxu0 %v509_v21  ;;  %1939 = vmatprep.mubr.f32.mxu1 %v511_v22  ;;  %v965_v21 = vld [vmem:[#allocation6 + $0x748] sm:$0xff]  ;;  %v668_v22 = vld [vmem:[%s9398_s1 + $0x600] sm:$0xff] }
  0xec   :  { %2016 = vmatprep.subr.mxu0 %v921_v23  ;;  %2129 = vmatprep.subr.mxu1 %v985_v24  ;;  %v670_v23 = vld [vmem:[%s9398_s1 + $0x610] sm:$0xff]  ;;  %v900_v24 = vld [vmem:[#allocation6 + $0x540] sm:$0xff] }
  0xed   :  { %1827 = vmatmul.mubr.f32.gmra.mxu0 %v508_v25  ;;  %1940 = vmatmul.mubr.f32.gmra.mxu1 %v510_v26  ;;  %v964_v25 = vld [vmem:[#allocation6 + $0x740] sm:$0xff]  ;;  %v899_v26 = vld [vmem:[#allocation6 + $0x538] sm:$0xff] }
  0xee   :  { %2017 = vmatpush2.msra.mxu0 %v920_v27  ;;  %2130 = vmatpush2.msra.mxu1 %v984_v28  ;;  %v963_v27 = vld [vmem:[#allocation6 + $0x738] sm:$0xff]  ;;  %v898_v28 = vld [vmem:[#allocation6 + $0x530] sm:$0xff] }
  0xef   :  { %2018 = vmatprep.subr.mxu0 %v919_v29  ;;  %2131 = vmatprep.subr.mxu1 %v983_v30  ;;  %v962_v29 = vld [vmem:[#allocation6 + $0x730] sm:$0xff]  ;;  %v701_v30 = vld [vmem:[%s9398_s1 + $0x708] sm:$0xff] }
  0xf0   :  { %2019 = vmatpush2.msra.mxu0 %v918_v31  ;;  %2132 = vmatpush2.msra.mxu1 %v982_v32  ;;  %v703_v31 = vld [vmem:[%s9398_s1 + $0x718] sm:$0xff]  ;;  %v897_v32 = vld [vmem:[#allocation6 + $0x528] sm:$0xff] }
  0xf1   :  { %1832 = vmatprep.mubr.f32.mxu0 %v541_v33  ;;  %1945 = vmatprep.mubr.f32.mxu1 %v543_v34  ;;  %v961_v33 = vld [vmem:[#allocation6 + $0x728] sm:$0xff]  ;;  %v700_v34 = vld [vmem:[%s9398_s1 + $0x700] sm:$0xff] }
  0xf2   :  { %2020 = vmatprep.subr.mxu0 %v917_v35  ;;  %2133 = vmatprep.subr.mxu1 %v981_v36  ;;  %v702_v35 = vld [vmem:[%s9398_s1 + $0x710] sm:$0xff]  ;;  %v896_v36 = vld [vmem:[#allocation6 + $0x520] sm:$0xff] }
  0xf3   :  { %1833 = vmatmul.mubr.f32.gmra.mxu0 %v540_v37  ;;  %1946 = vmatmul.mubr.f32.gmra.mxu1 %v542_v38  ;;  %v960_v37 = vld [vmem:[#allocation6 + $0x720] sm:$0xff]  ;;  %v895_v38 = vld [vmem:[#allocation6 + $0x518] sm:$0xff] }
  0xf4   :  { %2021 = vmatpush2.msra.mxu0 %v916_v39  ;;  %2134 = vmatpush2.msra.mxu1 %v980_v40  ;;  %v959_v39 = vld [vmem:[#allocation6 + $0x718] sm:$0xff]  ;;  %v894_v40 = vld [vmem:[#allocation6 + $0x510] sm:$0xff] }
  0xf5   :  { %2022 = vmatprep.subr.mxu0 %v915_v41  ;;  %2135 = vmatprep.subr.mxu1 %v979_v42  ;;  %v958_v41 = vld [vmem:[#allocation6 + $0x710] sm:$0xff]  ;;  %v893_v42 = vld [vmem:[#allocation6 + $0x508] sm:$0xff] }
  0xf6   :  { %2023 = vmatpush2.msra.mxu0 %v914_v43  ;;  %2136 = vmatpush2.msra.mxu1 %v978_v44  ;;  %v957_v43 = vld [vmem:[#allocation6 + $0x708] sm:$0xff]  ;;  %v892_v44 = vld [vmem:[#allocation6 + $0x500] sm:$0xff] }
  0xf7   :  { %1838 = vmatprep.mubr.f32.mxu0 %v573_v45  ;;  %1951 = vmatprep.mubr.f32.mxu1 %v575_v46  ;;  %v481_v45 = vld [vmem:[%s9398_s1 + $0x28] sm:$0xff]  ;;  %v956_v46 = vld [vmem:[#allocation6 + $0x700] sm:$0xff] }
  0xf8   :  { %2024 = vmatprep.subr.mxu0 %v913_v47  ;;  %2137 = vmatprep.subr.mxu1 %v977_v48  ;;  %v480_v47 = vld [vmem:[%s9398_s1 + $0x20] sm:$0xff]  ;;  %v483_v48 = vld [vmem:[%s9398_s1 + $0x38] sm:$0xff] }
  0xf9   :  { %1839 = vmatmul.mubr.f32.gmra.mxu0 %v572_v49  ;;  %1952 = vmatmul.mubr.f32.gmra.mxu1 %v574_v50  ;;  %v1019_v49 = vld [vmem:[#allocation6 + $0x8f8] sm:$0xff] }
  0xfa   :  { %2025 = vmatpush2.msra.mxu0 %v912_v51  ;;  %2138 = vmatpush2.msra.mxu1 %v976_v52  ;;  %v1083_v50 = vld [vmem:[#allocation6 + $0xaf8] sm:$0xff]  ;;  %v482_v51 = vld [vmem:[%s9398_s1 + $0x30] sm:$0xff] }
  0xfb   :  { %2026 = vmatprep.subr.mxu0 %v911_v53  ;;  %2139 = vmatprep.subr.mxu1 %v975_v54  ;;  %v1018_v52 = vld [vmem:[#allocation6 + $0x8f0] sm:$0xff]  ;;  %v1017_v54 = vld [vmem:[#allocation6 + $0x8e8] sm:$0xff] }
  0xfc   :  { %2027 = vmatpush2.msra.mxu0 %v910_v55  ;;  %2140 = vmatpush2.msra.mxu1 %v974_v56  ;;  %v1082_v53 = vld [vmem:[#allocation6 + $0xaf0] sm:$0xff]  ;;  %v1081_v55 = vld [vmem:[#allocation6 + $0xae8] sm:$0xff] }
  0xfd   :  { %1844 = vmatprep.mubr.f32.mxu0 %v605_v57  ;;  %1957 = vmatprep.mubr.f32.mxu1 %v607_v58  ;;  %v513_v56 = vld [vmem:[%s9398_s1 + $0x128] sm:$0xff]  ;;  %v1016_v57 = vld [vmem:[#allocation6 + $0x8e0] sm:$0xff] }
  0xfe   :  { %2028 = vmatprep.subr.mxu0 %v909_v59  ;;  %2141 = vmatprep.subr.mxu1 %v973_v60  ;;  %v1080_v58 = vld [vmem:[#allocation6 + $0xae0] sm:$0xff]  ;;  %v1015_v60 = vld [vmem:[#allocation6 + $0x8d8] sm:$0xff] }
  0xff   :  { %1845 = vmatmul.mubr.f32.gmra.mxu0 %v604_v61  ;;  %1958 = vmatmul.mubr.f32.gmra.mxu1 %v606_v62  ;;  %v512_v59 = vld [vmem:[%s9398_s1 + $0x120] sm:$0xff]  ;;  %v1079_v61 = vld [vmem:[#allocation6 + $0xad8] sm:$0xff] }
 0x100   :  { %2029 = vmatpush2.msra.mxu0 %v908_v63  ;;  %2142 = vmatpush2.msra.mxu1 %v972_v1  ;;  %v515_v62 = vld [vmem:[%s9398_s1 + $0x138] sm:$0xff]  ;;  %v1014_v63 = vld [vmem:[#allocation6 + $0x8d0] sm:$0xff] }
 0x101   :  { %2030 = vmatprep.subr.mxu0 %v907_v2  ;;  %2143 = vmatprep.subr.mxu1 %v971_v3  ;;  %v1078_v1 = vld [vmem:[#allocation6 + $0xad0] sm:$0xff]  ;;  %v1013_v2 = vld [vmem:[#allocation6 + $0x8c8] sm:$0xff] }
 0x102   :  { %2031 = vmatpush2.msra.mxu0 %v906_v4  ;;  %2144 = vmatpush2.msra.mxu1 %v970_v5  ;;  %v514_v3 = vld [vmem:[%s9398_s1 + $0x130] sm:$0xff]  ;;  %v1077_v4 = vld [vmem:[#allocation6 + $0xac8] sm:$0xff] }
 0x103   :  { %1850 = vmatprep.mubr.f32.mxu0 %v637_v6  ;;  %1963 = vmatprep.mubr.f32.mxu1 %v639_v7  ;;  %v545_v5 = vld [vmem:[%s9398_s1 + $0x228] sm:$0xff]  ;;  %v1012_v6 = vld [vmem:[#allocation6 + $0x8c0] sm:$0xff] }
 0x104   :  { %2032 = vmatprep.subr.mxu0 %v905_v8  ;;  %2145 = vmatprep.subr.mxu1 %v969_v9  ;;  %v1076_v7 = vld [vmem:[#allocation6 + $0xac0] sm:$0xff]  ;;  %v1011_v9 = vld [vmem:[#allocation6 + $0x8b8] sm:$0xff] }
 0x105   :  { %1851 = vmatmul.mubr.f32.gmra.mxu0 %v636_v10  ;;  %1964 = vmatmul.mubr.f32.gmra.mxu1 %v638_v11  ;;  %v544_v8 = vld [vmem:[%s9398_s1 + $0x220] sm:$0xff]  ;;  %v1075_v10 = vld [vmem:[#allocation6 + $0xab8] sm:$0xff] }
 0x106   :  { %2033 = vmatpush2.msra.mxu0 %v904_v12  ;;  %2146 = vmatpush2.msra.mxu1 %v968_v13  ;;  %v547_v11 = vld [vmem:[%s9398_s1 + $0x238] sm:$0xff]  ;;  %v1010_v12 = vld [vmem:[#allocation6 + $0x8b0] sm:$0xff] }
 0x107   :  { %2034 = vmatprep.subr.mxu0 %v903_v14  ;;  %2147 = vmatprep.subr.mxu1 %v967_v15  ;;  %v1074_v13 = vld [vmem:[#allocation6 + $0xab0] sm:$0xff]  ;;  %v1009_v14 = vld [vmem:[#allocation6 + $0x8a8] sm:$0xff] }
 0x108   :  { %2035 = vmatpush2.msra.mxu0 %v902_v16  ;;  %2148 = vmatpush2.msra.mxu1 %v966_v17  ;;  %v546_v15 = vld [vmem:[%s9398_s1 + $0x230] sm:$0xff]  ;;  %v1073_v16 = vld [vmem:[#allocation6 + $0xaa8] sm:$0xff] }
 0x109   :  { %1856 = vmatprep.mubr.f32.mxu0 %v669_v18  ;;  %1969 = vmatprep.mubr.f32.mxu1 %v671_v19  ;;  %v577_v17 = vld [vmem:[%s9398_s1 + $0x328] sm:$0xff]  ;;  %v1008_v18 = vld [vmem:[#allocation6 + $0x8a0] sm:$0xff] }
 0x10a   :  { %2036 = vmatprep.subr.mxu0 %v901_v20  ;;  %2149 = vmatprep.subr.mxu1 %v965_v21  ;;  %v1072_v19 = vld [vmem:[#allocation6 + $0xaa0] sm:$0xff]  ;;  %v1007_v21 = vld [vmem:[#allocation6 + $0x898] sm:$0xff] }
 0x10b   :  { %1857 = vmatmul.mubr.f32.gmra.mxu0 %v668_v22  ;;  %1970 = vmatmul.mubr.f32.gmra.mxu1 %v670_v23  ;;  %v576_v20 = vld [vmem:[%s9398_s1 + $0x320] sm:$0xff]  ;;  %v1071_v22 = vld [vmem:[#allocation6 + $0xa98] sm:$0xff] }
 0x10c   :  { %2037 = vmatpush2.msra.mxu0 %v900_v24  ;;  %2150 = vmatpush2.msra.mxu1 %v964_v25  ;;  %v579_v23 = vld [vmem:[%s9398_s1 + $0x338] sm:$0xff]  ;;  %v1006_v24 = vld [vmem:[#allocation6 + $0x890] sm:$0xff] }
 0x10d   :  { %2038 = vmatprep.subr.mxu0 %v899_v26  ;;  %2151 = vmatprep.subr.mxu1 %v963_v27  ;;  %v1070_v25 = vld [vmem:[#allocation6 + $0xa90] sm:$0xff]  ;;  %v1005_v26 = vld [vmem:[#allocation6 + $0x888] sm:$0xff]  ;;  %v9408_v27 = vlaneseq }
 0x10e   :  { %2039 = vmatpush2.msra.mxu0 %v898_v28  ;;  %2152 = vmatpush2.msra.mxu1 %v962_v29  ;;  %v578_v28 = vld [vmem:[%s9398_s1 + $0x330] sm:$0xff]  ;;  %v1069_v29 = vld [vmem:[#allocation6 + $0xa88] sm:$0xff] }
 0x10f   :  { %1862 = vmatprep.mubr.f32.mxu0 %v701_v30  ;;  %1975 = vmatprep.mubr.f32.mxu1 %v703_v31  ;;  %v609_v30 = vld [vmem:[%s9398_s1 + $0x428] sm:$0xff]  ;;  %v1004_v31 = vld [vmem:[#allocation6 + $0x880] sm:$0xff] }
 0x110   :  { %2040 = vmatprep.subr.mxu0 %v897_v32  ;;  %2153 = vmatprep.subr.mxu1 %v961_v33  ;;  %v1068_v32 = vld [vmem:[#allocation6 + $0xa80] sm:$0xff] }
 0x111   :  { %1863 = vmatmul.mubr.f32.gmra.mxu0 %v700_v34  ;;  %1976 = vmatmul.mubr.f32.gmra.mxu1 %v702_v35  ;;  %v608_v33 = vld [vmem:[%s9398_s1 + $0x420] sm:$0xff]  ;;  %v1003_v34 = vld [vmem:[#allocation6 + $0x878] sm:$0xff] }
 0x112   :  { %2041 = vmatpush2.msra.mxu0 %v896_v36  ;;  %2154 = vmatpush2.msra.mxu1 %v960_v37  ;;  %v1067_v35 = vld [vmem:[#allocation6 + $0xa78] sm:$0xff]  ;;  %v199_v36 = vshrl.u32 %v9408_v27, 7 }
 0x113   :  { %2042 = vmatprep.subr.mxu0 %v895_v38  ;;  %2155 = vmatprep.subr.mxu1 %v959_v39  ;;  %v611_v37 = vld [vmem:[%s9398_s1 + $0x438] sm:$0xff]  ;;  %v1002_v38 = vld [vmem:[#allocation6 + $0x870] sm:$0xff] }
 0x114   :  { %2043 = vmatpush2.msra.mxu0 %v894_v40  ;;  %2156 = vmatpush2.msra.mxu1 %v958_v41  ;;  %v1066_v39 = vld [vmem:[#allocation6 + $0xa70] sm:$0xff]  ;;  %v1001_v40 = vld [vmem:[#allocation6 + $0x868] sm:$0xff]  ;;  %v1491_v27 = vld [vmem:[#allocation6 + $0x17b8] sm:$0xff] }
 0x115   :  { %2044 = vmatprep.subr.mxu0 %v893_v42  ;;  %2157 = vmatprep.subr.mxu1 %v957_v43  ;;  %v610_v41 = vld [vmem:[%s9398_s1 + $0x430] sm:$0xff]  ;;  %v1065_v42 = vld [vmem:[#allocation6 + $0xa68] sm:$0xff] }
 0x116   :  { %2045 = vmatpush2.msra.mxu0 %v892_v44  ;;  %2046 = vmatprep.mubr.f32.mxu0 %v481_v45  ;;  %v641_v43 = vld [vmem:[%s9398_s1 + $0x528] sm:$0xff]  ;;  %v1000_v44 = vld [vmem:[#allocation6 + $0x860] sm:$0xff]  ;;  %v200_v45 = vsub.s32 0, %v199_v36 }
 0x117   :  { %2158 = vmatpush2.msra.mxu1 %v956_v46  ;;  %2047 = vmatmul.mubr.f32.vlgmr.msra.gmra.mxu0 %v480_v47  ;;  %v1064_v46 = vld [vmem:[#allocation6 + $0xa60] sm:$0xff] }
 0x118   :  { %2159 = vmatprep.mubr.f32.mxu1 %v483_v48  ;;  %2208 = vmatprep.subr.mxu0 %v1019_v49  ;;  %v640_v47 = vld [vmem:[%s9398_s1 + $0x520] sm:$0xff]  ;;  %v208_v49 = vsub.s32 2, %v199_v36 }
 0x119   :  { %2321 = vmatprep.subr.mxu1 %v1083_v50  ;;  %2160 = vmatmul.mubr.f32.vlgmr.msra.gmra.mxu1 %v482_v51  ;;  %v196_v48 = vld [vmem:[#allocation8] sm:$0xf]  ;;  %v999_v50 = vld [vmem:[#allocation6 + $0x858] sm:$0xff] }
 0x11a   :  { %2209 = vmatpush1.msra.mxu0 %v1018_v52  ;;  %2322 = vmatpush1.msra.mxu1 %v1082_v53  ;;  %v1063_v51 = vld [vmem:[#allocation6 + $0xa58] sm:$0xff]  ;;  %v204_v52 = vsub.s32 1, %v199_v36 }
 0x11b   :  { %2210 = vmatprep.subr.mxu0 %v1017_v54  ;;  %2323 = vmatprep.subr.mxu1 %v1081_v55  ;;  %v643_v53 = vld [vmem:[%s9398_s1 + $0x538] sm:$0xff]  ;;  %v998_v54 = vld [vmem:[#allocation6 + $0x850] sm:$0xff]  ;;  %v212_v55 = vsub.s32 3, %v199_v36 }
 0x11c   :  { %2052 = vmatprep.mubr.f32.mxu0 %v513_v56  ;;  %2211 = vmatpush1.msra.mxu0 %v1016_v57  ;;  %v1062_v56 = vld [vmem:[#allocation6 + $0xa50] sm:$0xff]  ;;  %v997_v57 = vld [vmem:[#allocation6 + $0x848] sm:$0xff]  ;;  %v1051_v36 = vld [vmem:[#allocation6 + $0x9f8] sm:$0xff] }
 0x11d   :  { %2324 = vmatpush1.msra.mxu1 %v1080_v58  ;;  %2053 = vmatmul.mubr.f32.gmra.mxu0 %v512_v59  ;;  %v6994_v58 = vrot.slane %v196_v48, %v200_v45  ;;  %v642_v59 = vld [vmem:[%s9398_s1 + $0x530] sm:$0xff]  ;;  %v1111_v45 = vld [vmem:[#allocation6 + $0xbd8] sm:$0xff] }
 0x11e   :  { %2212 = vmatprep.subr.mxu0 %v1015_v60  ;;  %2325 = vmatprep.subr.mxu1 %v1079_v61  ;;  %v1061_v60 = vld [vmem:[#allocation6 + $0xa48] sm:$0xff]  ;;  %v6999_v61 = vrot.slane %v196_v48, %v208_v49 }
 0x11f   :  { %2165 = vmatprep.mubr.f32.mxu1 %v515_v62  ;;  %2213 = vmatpush1.msra.mxu0 %v1014_v63  ;;  %v673_v62 = vld [vmem:[%s9398_s1 + $0x628] sm:$0xff]  ;;  %v996_v63 = vld [vmem:[#allocation6 + $0x840] sm:$0xff] }
 0x120   :  { %2326 = vmatpush1.msra.mxu1 %v1078_v1  ;;  %2214 = vmatprep.subr.mxu0 %v1013_v2  ;;  %v7004_v1 = vrot.slane %v196_v48, %v204_v52  ;;  %v1060_v2 = vld [vmem:[#allocation6 + $0xa40] sm:$0xff]  ;;  %v1109_v49 = vld [vmem:[#allocation6 + $0xbc8] sm:$0xff]  ;;  %v1043_v52 = vld [vmem:[#allocation6 + $0x9b8] sm:$0xff] }
 0x121   :  { %2166 = vmatmul.mubr.f32.gmra.mxu1 %v514_v3  ;;  %2327 = vmatprep.subr.mxu1 %v1077_v4  ;;  %v672_v3 = vld [vmem:[%s9398_s1 + $0x620] sm:$0xff] }
 0x122   :  { %2058 = vmatprep.mubr.f32.mxu0 %v545_v5  ;;  %2215 = vmatpush1.msra.mxu0 %v1012_v6  ;;  %v7009_v5 = vrot.slane %v196_v48, %v212_v55  ;;  %v995_v6 = vld [vmem:[#allocation6 + $0x838] sm:$0xff]  ;;  %v1045_v48 = vld [vmem:[#allocation6 + $0x9c8] sm:$0xff]  ;;  %v1106_v55 = vld [vmem:[#allocation6 + $0xbb0] sm:$0xff] }
 0x123   :  { %2328 = vmatpush1.msra.mxu1 %v1076_v7  ;;  %2059 = vmatmul.mubr.f32.gmra.mxu0 %v544_v8  ;;  %v1059_v7 = vld [vmem:[#allocation6 + $0xa38] sm:$0xff] }
 0x124   :  { %2216 = vmatprep.subr.mxu0 %v1011_v9  ;;  %2329 = vmatprep.subr.mxu1 %v1075_v10  ;;  %v675_v10 = vld [vmem:[%s9398_s1 + $0x638] sm:$0xff] }
 0x125   :  { %2171 = vmatprep.mubr.f32.mxu1 %v547_v11  ;;  %2217 = vmatpush1.msra.mxu0 %v1010_v12  ;;  %v994_v11 = vld [vmem:[#allocation6 + $0x830] sm:$0xff] }
 0x126   :  { %2330 = vmatpush1.msra.mxu1 %v1074_v13  ;;  %2218 = vmatprep.subr.mxu0 %v1009_v14  ;;  %v1058_v14 = vld [vmem:[#allocation6 + $0xa30] sm:$0xff] }
 0x127   :  { %2172 = vmatmul.mubr.f32.gmra.mxu1 %v546_v15  ;;  %2331 = vmatprep.subr.mxu1 %v1073_v16  ;;  %v993_v15 = vld [vmem:[#allocation6 + $0x828] sm:$0xff] }
 0x128   :  { %2064 = vmatprep.mubr.f32.mxu0 %v577_v17  ;;  %2219 = vmatpush1.msra.mxu0 %v1008_v18  ;;  %v674_v18 = vld [vmem:[%s9398_s1 + $0x630] sm:$0xff] }
 0x129   :  { %2332 = vmatpush1.msra.mxu1 %v1072_v19  ;;  %2065 = vmatmul.mubr.f32.gmra.mxu0 %v576_v20  ;;  %v1057_v19 = vld [vmem:[#allocation6 + $0xa28] sm:$0xff] }
 0x12a   :  { %2220 = vmatprep.subr.mxu0 %v1007_v21  ;;  %2333 = vmatprep.subr.mxu1 %v1071_v22  ;;  %v705_v21 = vld [vmem:[%s9398_s1 + $0x728] sm:$0xff]  ;;  %v992_v22 = vld [vmem:[#allocation6 + $0x820] sm:$0xff] }
 0x12b   :  { %2177 = vmatprep.mubr.f32.mxu1 %v579_v23  ;;  %2221 = vmatpush1.msra.mxu0 %v1006_v24  ;;  %v1056_v23 = vld [vmem:[#allocation6 + $0xa20] sm:$0xff] }
 0x12c   :  { %2334 = vmatpush1.msra.mxu1 %v1070_v25  ;;  %2222 = vmatprep.subr.mxu0 %v1005_v26  ;;  %v704_v24 = vld [vmem:[%s9398_s1 + $0x720] sm:$0xff]  ;;  %v991_v25 = vld [vmem:[#allocation6 + $0x818] sm:$0xff] }
 0x12d   :  { %2178 = vmatmul.mubr.f32.gmra.mxu1 %v578_v28  ;;  %2335 = vmatprep.subr.mxu1 %v1069_v29  ;;  %v1055_v26 = vld [vmem:[#allocation6 + $0xa18] sm:$0xff]  ;;  %v990_v29 = vld [vmem:[#allocation6 + $0x810] sm:$0xff] }
 0x12e   :  { %2070 = vmatprep.mubr.f32.mxu0 %v609_v30  ;;  %2223 = vmatpush1.msra.mxu0 %v1004_v31  ;;  %v707_v28 = vld [vmem:[%s9398_s1 + $0x738] sm:$0xff]  ;;  %v1054_v30 = vld [vmem:[#allocation6 + $0xa10] sm:$0xff]  ;;  %v989_v31 = vld [vmem:[#allocation6 + $0x808] sm:$0xff] }
 0x12f   :  { %2336 = vmatpush1.msra.mxu1 %v1068_v32  ;;  %2071 = vmatmul.mubr.f32.gmra.mxu0 %v608_v33  ;;  %v706_v32 = vld [vmem:[%s9398_s1 + $0x730] sm:$0xff]  ;;  %v1053_v33 = vld [vmem:[#allocation6 + $0xa08] sm:$0xff] }
 0x130   :  { %2224 = vmatprep.subr.mxu0 %v1003_v34  ;;  %2337 = vmatprep.subr.mxu1 %v1067_v35  ;;  %v988_v34 = vld [vmem:[#allocation6 + $0x800] sm:$0xff] }
 0x131   :  { %2183 = vmatprep.mubr.f32.mxu1 %v611_v37  ;;  %2225 = vmatpush1.msra.mxu0 %v1002_v38  ;;  %v1052_v35 = vld [vmem:[#allocation6 + $0xa00] sm:$0xff]  ;;  %v1115_v37 = vld [vmem:[#allocation6 + $0xbf8] sm:$0xff]  ;;  %v1050_v38 = vld [vmem:[#allocation6 + $0x9f0] sm:$0xff] }
 0x132   :  { %2338 = vmatpush1.msra.mxu1 %v1066_v39  ;;  %2226 = vmatprep.subr.mxu0 %v1001_v40  ;;  %v1114_v39 = vld [vmem:[#allocation6 + $0xbf0] sm:$0xff]  ;;  %v1049_v40 = vld [vmem:[#allocation6 + $0x9e8] sm:$0xff] }
 0x133   :  { %2184 = vmatmul.mubr.f32.gmra.mxu1 %v610_v41  ;;  %2339 = vmatprep.subr.mxu1 %v1065_v42  ;;  %v1113_v41 = vld [vmem:[#allocation6 + $0xbe8] sm:$0xff]  ;;  %v1048_v42 = vld [vmem:[#allocation6 + $0x9e0] sm:$0xff] }
 0x134   :  { %2076 = vmatprep.mubr.f32.mxu0 %v641_v43  ;;  %2227 = vmatpush1.msra.mxu0 %v1000_v44  ;;  %v1112_v43 = vld [vmem:[#allocation6 + $0xbe0] sm:$0xff]  ;;  %v1047_v44 = vld [vmem:[#allocation6 + $0x9d8] sm:$0xff] }
 0x135   :  { %2340 = vmatpush1.msra.mxu1 %v1064_v46  ;;  %2077 = vmatmul.mubr.f32.gmra.mxu0 %v640_v47  ;;  %v1046_v46 = vld [vmem:[#allocation6 + $0x9d0] sm:$0xff] }
 0x136   :  { %2228 = vmatprep.subr.mxu0 %v999_v50  ;;  %2341 = vmatprep.subr.mxu1 %v1063_v51  ;;  %v1110_v47 = vld [vmem:[#allocation6 + $0xbd0] sm:$0xff]  ;;  %v1044_v50 = vld [vmem:[#allocation6 + $0x9c0] sm:$0xff] }
 0x137   :  { %2189 = vmatprep.mubr.f32.mxu1 %v643_v53  ;;  %2229 = vmatpush1.msra.mxu0 %v998_v54  ;;  %v1108_v51 = vld [vmem:[#allocation6 + $0xbc0] sm:$0xff]  ;;  %v1107_v53 = vld [vmem:[#allocation6 + $0xbb8] sm:$0xff]  ;;  %v1042_v54 = vld [vmem:[#allocation6 + $0x9b0] sm:$0xff] }
 0x138   :  { %2342 = vmatpush1.msra.mxu1 %v1062_v56  ;;  %2230 = vmatprep.subr.mxu0 %v997_v57  ;;  %v284_v4 = vpop.f32.mrf.mxu0  ;;  %v1041_v56 = vld [vmem:[#allocation6 + $0x9a8] sm:$0xff] }
 0x139   :  { %2190 = vmatmul.mubr.f32.gmra.mxu1 %v642_v59  ;;  %2343 = vmatprep.subr.mxu1 %v1061_v60  ;;  %v285_v8 = vadd.f32 %v284_v4, %v6994_v58  ;;  %v397_v9 = vpop.f32.mrf.mxu1  ;;  %v1105_v57 = vld [vmem:[#allocation6 + $0xba8] sm:$0xff]  ;;  %v1040_v59 = vld [vmem:[#allocation6 + $0x9a0] sm:$0xff] }
 0x13a   :  { %2082 = vmatprep.mubr.f32.mxu0 %v673_v62  ;;  %2231 = vmatpush1.msra.mxu0 %v996_v63  ;;  %v398_v12 = vadd.f32 %v397_v9, %v6999_v61  ;;  %v286_v13 = vpop.f32.mrf.mxu0  ;;  %v1104_v60 = vld [vmem:[#allocation6 + $0xba0] sm:$0xff]  ;;  %v1039_v62 = vld [vmem:[#allocation6 + $0x998] sm:$0xff]  ;;  %v1037_v4 = vld [vmem:[#allocation6 + $0x988] sm:$0xff] }
 0x13b   :  { %2344 = vmatpush1.msra.mxu1 %v1060_v2  ;;  %2083 = vmatmul.mubr.f32.gmra.mxu0 %v672_v3  ;;  %444 = vst [vmem:[#allocation2] sm:$0xff] %v285_v8  ;;  %v287_v16 = vadd.f32 %v286_v13, %v7004_v1  ;;  %v399_v17 = vpop.f32.mrf.mxu1  ;;  %v1103_v63 = vld [vmem:[#allocation6 + $0xb98] sm:$0xff]  ;;  %v1038_v2 = vld [vmem:[#allocation6 + $0x990] sm:$0xff]  ;;  %v1100_v8 = vld [vmem:[#allocation6 + $0xb80] sm:$0xff] }
 0x13c   :  { %2232 = vmatprep.subr.mxu0 %v995_v6  ;;  %2345 = vmatprep.subr.mxu1 %v1059_v7  ;;  %446 = vst [vmem:[#allocation2 + $0x10] sm:$0xff] %v398_v12  ;;  %v400_v20 = vadd.f32 %v399_v17, %v7009_v5  ;;  %v1102_v3 = vld [vmem:[#allocation6 + $0xb90] sm:$0xff]  ;;  %v1101_v6 = vld [vmem:[#allocation6 + $0xb88] sm:$0xff]  ;;  %v1036_v7 = vld [vmem:[#allocation6 + $0x980] sm:$0xff] }
 0x13d   :  { %2195 = vmatprep.mubr.f32.mxu1 %v675_v10  ;;  %2233 = vmatpush1.msra.mxu0 %v994_v11  ;;  %445 = vst [vmem:[#allocation2 + $0x8] sm:$0xff] %v287_v16  ;;  %v1035_v9 = vld [vmem:[#allocation6 + $0x978] sm:$0xff]  ;;  %v1034_v11 = vld [vmem:[#allocation6 + $0x970] sm:$0xff]  ;;  %v1033_v13 = vld [vmem:[#allocation6 + $0x968] sm:$0xff] }
 0x13e   :  { %2346 = vmatpush1.msra.mxu1 %v1058_v14  ;;  %2234 = vmatprep.subr.mxu0 %v993_v15  ;;  %447 = vst [vmem:[#allocation2 + $0x18] sm:$0xff] %v400_v20  ;;  %v1099_v10 = vld [vmem:[#allocation6 + $0xb78] sm:$0xff]  ;;  %v1098_v12 = vld [vmem:[#allocation6 + $0xb70] sm:$0xff]  ;;  %v1097_v14 = vld [vmem:[#allocation6 + $0xb68] sm:$0xff] }
 0x13f   :  { %2196 = vmatmul.mubr.f32.gmra.mxu1 %v674_v18  ;;  %2347 = vmatprep.subr.mxu1 %v1057_v19  ;;  %v1032_v15 = vld [vmem:[#allocation6 + $0x960] sm:$0xff]  ;;  %v1031_v17 = vld [vmem:[#allocation6 + $0x958] sm:$0xff]  ;;  %v1030_v19 = vld [vmem:[#allocation6 + $0x950] sm:$0xff] }
 0x140   :  { %2088 = vmatprep.mubr.f32.mxu0 %v705_v21  ;;  %2235 = vmatpush1.msra.mxu0 %v992_v22  ;;  %v1096_v16 = vld [vmem:[#allocation6 + $0xb60] sm:$0xff]  ;;  %v1095_v18 = vld [vmem:[#allocation6 + $0xb58] sm:$0xff]  ;;  %v1094_v20 = vld [vmem:[#allocation6 + $0xb50] sm:$0xff] }
 0x141   :  { %2348 = vmatpush1.msra.mxu1 %v1056_v23  ;;  %2089 = vmatmul.mubr.f32.gmra.mxu0 %v704_v24  ;;  %v1029_v21 = vld [vmem:[#allocation6 + $0x948] sm:$0xff]  ;;  %v1028_v23 = vld [vmem:[#allocation6 + $0x940] sm:$0xff] }
 0x142   :  { %2236 = vmatprep.subr.mxu0 %v991_v25  ;;  %2349 = vmatprep.subr.mxu1 %v1055_v26  ;;  %v1093_v22 = vld [vmem:[#allocation6 + $0xb48] sm:$0xff]  ;;  %v1092_v24 = vld [vmem:[#allocation6 + $0xb40] sm:$0xff]  ;;  %v1027_v25 = vld [vmem:[#allocation6 + $0x938] sm:$0xff] }
 0x143   :  { %2201 = vmatprep.mubr.f32.mxu1 %v707_v28  ;;  %2237 = vmatpush1.msra.mxu0 %v990_v29  ;;  %v1091_v26 = vld [vmem:[#allocation6 + $0xb38] sm:$0xff]  ;;  %v1026_v29 = vld [vmem:[#allocation6 + $0x930] sm:$0xff] }
 0x144   :  { %2350 = vmatpush1.msra.mxu1 %v1054_v30  ;;  %2238 = vmatprep.subr.mxu0 %v989_v31  ;;  %v1090_v30 = vld [vmem:[#allocation6 + $0xb30] sm:$0xff] }
 0x145   :  { %2202 = vmatmul.mubr.f32.gmra.mxu1 %v706_v32  ;;  %2351 = vmatprep.subr.mxu1 %v1053_v33  ;;  %v1025_v32 = vld [vmem:[#allocation6 + $0x928] sm:$0xff] }
 0x146   :  { %2239 = vmatpush1.msra.mxu0 %v988_v34  ;;  %2352 = vmatpush1.msra.mxu1 %v1052_v35  ;;  %v1089_v33 = vld [vmem:[#allocation6 + $0xb28] sm:$0xff]  ;;  %v1024_v35 = vld [vmem:[#allocation6 + $0x920] sm:$0xff] }
 0x147   :  { %2240 = vmatprep.subr.mxu0 %v1051_v36  ;;  %2353 = vmatprep.subr.mxu1 %v1115_v37  ;;  %v1088_v36 = vld [vmem:[#allocation6 + $0xb20] sm:$0xff] }
 0x148   :  { %2241 = vmatpush2.msra.mxu0 %v1050_v38  ;;  %2354 = vmatpush2.msra.mxu1 %v1114_v39  ;;  %v1023_v39 = vld [vmem:[#allocation6 + $0x918] sm:$0xff] }
 0x149   :  { %2242 = vmatprep.subr.mxu0 %v1049_v40  ;;  %2355 = vmatprep.subr.mxu1 %v1113_v41  ;;  %v1087_v40 = vld [vmem:[#allocation6 + $0xb18] sm:$0xff] }
 0x14a   :  { %2243 = vmatpush2.msra.mxu0 %v1048_v42  ;;  %2356 = vmatpush2.msra.mxu1 %v1112_v43  ;;  %v1022_v42 = vld [vmem:[#allocation6 + $0x910] sm:$0xff] }
 0x14b   :  { %2244 = vmatprep.subr.mxu0 %v1047_v44  ;;  %2357 = vmatprep.subr.mxu1 %v1111_v45  ;;  %v1086_v43 = vld [vmem:[#allocation6 + $0xb10] sm:$0xff]  ;;  %v1021_v45 = vld [vmem:[#allocation6 + $0x908] sm:$0xff] }
 0x14c   :  { %2245 = vmatpush2.msra.mxu0 %v1046_v46  ;;  %2358 = vmatpush2.msra.mxu1 %v1110_v47  ;;  %v1085_v46 = vld [vmem:[#allocation6 + $0xb08] sm:$0xff] }
 0x14d   :  { %2246 = vmatprep.subr.mxu0 %v1045_v48  ;;  %2359 = vmatprep.subr.mxu1 %v1109_v49  ;;  %v1020_v49 = vld [vmem:[#allocation6 + $0x900] sm:$0xff] }
 0x14e   :  { %2247 = vmatpush2.msra.mxu0 %v1044_v50  ;;  %2360 = vmatpush2.msra.mxu1 %v1108_v51  ;;  %v485_v50 = vld [vmem:[%s9398_s1 + $0x48] sm:$0xff] }
 0x14f   :  { %2248 = vmatprep.subr.mxu0 %v1043_v52  ;;  %2361 = vmatprep.subr.mxu1 %v1107_v53  ;;  %v1084_v52 = vld [vmem:[#allocation6 + $0xb00] sm:$0xff] }
 0x150   :  { %2249 = vmatpush2.msra.mxu0 %v1042_v54  ;;  %2362 = vmatpush2.msra.mxu1 %v1106_v55  ;;  %v484_v53 = vld [vmem:[%s9398_s1 + $0x40] sm:$0xff]  ;;  %v487_v55 = vld [vmem:[%s9398_s1 + $0x58] sm:$0xff] }
 0x151   :  { %2250 = vmatprep.subr.mxu0 %v1041_v56  ;;  %2363 = vmatprep.subr.mxu1 %v1105_v57  ;;  %v1147_v56 = vld [vmem:[#allocation6 + $0xcf8] sm:$0xff] }
 0x152   :  { %2251 = vmatpush2.msra.mxu0 %v1040_v59  ;;  %2364 = vmatpush2.msra.mxu1 %v1104_v60  ;;  %v1211_v60 = vld [vmem:[#allocation6 + $0xef8] sm:$0xff] }
 0x153   :  { %2252 = vmatprep.subr.mxu0 %v1039_v62  ;;  %2365 = vmatprep.subr.mxu1 %v1103_v63  ;;  %v486_v62 = vld [vmem:[%s9398_s1 + $0x50] sm:$0xff] }
 0x154   :  { %2253 = vmatpush2.msra.mxu0 %v1038_v2  ;;  %2366 = vmatpush2.msra.mxu1 %v1102_v3  ;;  %v1146_v2 = vld [vmem:[#allocation6 + $0xcf0] sm:$0xff] }
 0x155   :  { %2254 = vmatprep.subr.mxu0 %v1037_v4  ;;  %2367 = vmatprep.subr.mxu1 %v1101_v6  ;;  %v1210_v3 = vld [vmem:[#allocation6 + $0xef0] sm:$0xff]  ;;  %v1145_v6 = vld [vmem:[#allocation6 + $0xce8] sm:$0xff] }
 0x156   :  { %2255 = vmatpush2.msra.mxu0 %v1036_v7  ;;  %2368 = vmatpush2.msra.mxu1 %v1100_v8  ;;  %v1209_v7 = vld [vmem:[#allocation6 + $0xee8] sm:$0xff] }
 0x157   :  { %2256 = vmatprep.subr.mxu0 %v1035_v9  ;;  %2369 = vmatprep.subr.mxu1 %v1099_v10  ;;  %v517_v10 = vld [vmem:[%s9398_s1 + $0x148] sm:$0xff] }
 0x158   :  { %2257 = vmatpush2.msra.mxu0 %v1034_v11  ;;  %2370 = vmatpush2.msra.mxu1 %v1098_v12  ;;  %v1144_v11 = vld [vmem:[#allocation6 + $0xce0] sm:$0xff] }
 0x159   :  { %2258 = vmatprep.subr.mxu0 %v1033_v13  ;;  %2371 = vmatprep.subr.mxu1 %v1097_v14  ;;  %v1208_v13 = vld [vmem:[#allocation6 + $0xee0] sm:$0xff] }
 0x15a   :  { %2259 = vmatpush2.msra.mxu0 %v1032_v15  ;;  %2372 = vmatpush2.msra.mxu1 %v1096_v16  ;;  %v516_v14 = vld [vmem:[%s9398_s1 + $0x140] sm:$0xff]  ;;  %v1143_v16 = vld [vmem:[#allocation6 + $0xcd8] sm:$0xff] }
 0x15b   :  { %2260 = vmatprep.subr.mxu0 %v1031_v17  ;;  %2373 = vmatprep.subr.mxu1 %v1095_v18  ;;  %v1207_v17 = vld [vmem:[#allocation6 + $0xed8] sm:$0xff] }
 0x15c   :  { %2261 = vmatpush2.msra.mxu0 %v1030_v19  ;;  %2374 = vmatpush2.msra.mxu1 %v1094_v20  ;;  %v290_v28 = vpop.f32.mrf.mxu0  ;;  %v519_v20 = vld [vmem:[%s9398_s1 + $0x158] sm:$0xff] }
 0x15d   :  { %2262 = vmatprep.subr.mxu0 %v1029_v21  ;;  %2375 = vmatprep.subr.mxu1 %v1093_v22  ;;  %v291_v31 = vadd.f32 %v290_v28, %v6994_v58  ;;  %v1142_v21 = vld [vmem:[#allocation6 + $0xcd0] sm:$0xff]  ;;  %v1205_v28 = vld [vmem:[#allocation6 + $0xec8] sm:$0xff] }
 0x15e   :  { %2263 = vmatpush2.msra.mxu0 %v1028_v23  ;;  %2376 = vmatpush2.msra.mxu1 %v1092_v24  ;;  %v292_v34 = vpop.f32.mrf.mxu0  ;;  %v1206_v23 = vld [vmem:[#allocation6 + $0xed0] sm:$0xff]  ;;  %v1141_v24 = vld [vmem:[#allocation6 + $0xcc8] sm:$0xff] }
 0x15f   :  { %2264 = vmatprep.subr.mxu0 %v1027_v25  ;;  %2377 = vmatprep.subr.mxu1 %v1091_v26  ;;  %448 = vst [vmem:[#allocation2 + $0x20] sm:$0xff] %v291_v31  ;;  %v403_v37 = vpop.f32.mrf.mxu1  ;;  %v293_v38 = vadd.f32 %v292_v34, %v7004_v1  ;;  %v518_v26 = vld [vmem:[%s9398_s1 + $0x150] sm:$0xff]  ;;  %v549_v31 = vld [vmem:[%s9398_s1 + $0x248] sm:$0xff]  ;;  %v1204_v34 = vld [vmem:[#allocation6 + $0xec0] sm:$0xff] }
 0x160   :  { %2265 = vmatpush2.msra.mxu0 %v1026_v29  ;;  %2378 = vmatpush2.msra.mxu1 %v1090_v30  ;;  %v404_v41 = vadd.f32 %v403_v37, %v6999_v61  ;;  %v1139_v37 = vld [vmem:[#allocation6 + $0xcb8] sm:$0xff] }
 0x161   :  { %2266 = vmatprep.subr.mxu0 %v1025_v32  ;;  %2379 = vmatprep.subr.mxu1 %v1089_v33  ;;  %449 = vst [vmem:[#allocation2 + $0x28] sm:$0xff] %v293_v38  ;;  %v405_v44 = vpop.f32.mrf.mxu1  ;;  %v1140_v32 = vld [vmem:[#allocation6 + $0xcc0] sm:$0xff]  ;;  %v1203_v38 = vld [vmem:[#allocation6 + $0xeb8] sm:$0xff] }
 0x162   :  { %2267 = vmatpush2.msra.mxu0 %v1024_v35  ;;  %2380 = vmatpush2.msra.mxu1 %v1088_v36  ;;  %450 = vst [vmem:[#allocation2 + $0x30] sm:$0xff] %v404_v41  ;;  %v406_v47 = vadd.f32 %v405_v44, %v7009_v5  ;;  %v296_v48 = vpop.f32.mrf.mxu0  ;;  %v548_v35 = vld [vmem:[%s9398_s1 + $0x240] sm:$0xff]  ;;  %v551_v41 = vld [vmem:[%s9398_s1 + $0x258] sm:$0xff]  ;;  %v1202_v44 = vld [vmem:[#allocation6 + $0xeb0] sm:$0xff] }
 0x163   :  { %2268 = vmatprep.subr.mxu0 %v1023_v39  ;;  %2381 = vmatprep.subr.mxu1 %v1087_v40  ;;  %v297_v51 = vadd.f32 %v296_v48, %v6994_v58  ;;  %v1201_v48 = vld [vmem:[#allocation6 + $0xea8] sm:$0xff] }
 0x164   :  { %2269 = vmatpush2.msra.mxu0 %v1022_v42  ;;  %2382 = vmatpush2.msra.mxu1 %v1086_v43  ;;  %451 = vst [vmem:[#allocation2 + $0x38] sm:$0xff] %v406_v47  ;;  %v298_v54 = vpop.f32.mrf.mxu0  ;;  %v1138_v42 = vld [vmem:[#allocation6 + $0xcb0] sm:$0xff] }
 0x165   :  { %2270 = vmatprep.subr.mxu0 %v1021_v45  ;;  %2383 = vmatprep.subr.mxu1 %v1085_v46  ;;  %452 = vst [vmem:[#allocation2 + $0x40] sm:$0xff] %v297_v51  ;;  %v409_v57 = vpop.f32.mrf.mxu1  ;;  %v299_v59 = vadd.f32 %v298_v54, %v7004_v1  ;;  %v1137_v45 = vld [vmem:[#allocation6 + $0xca8] sm:$0xff]  ;;  %v550_v47 = vld [vmem:[%s9398_s1 + $0x250] sm:$0xff]  ;;  %v1200_v54 = vld [vmem:[#allocation6 + $0xea0] sm:$0xff] }
 0x166   :  { %2271 = vmatpush2.msra.mxu0 %v1020_v49  ;;  %2272 = vmatprep.mubr.f32.mxu0 %v485_v50  ;;  %v410_v63 = vadd.f32 %v409_v57, %v6999_v61  ;;  %v581_v51 = vld [vmem:[%s9398_s1 + $0x348] sm:$0xff]  ;;  %v1135_v57 = vld [vmem:[#allocation6 + $0xc98] sm:$0xff] }
 0x167   :  { %2384 = vmatpush2.msra.mxu1 %v1084_v52  ;;  %2273 = vmatmul.mubr.f32.vlgmr.msra.gmra.mxu0 %v484_v53  ;;  %453 = vst [vmem:[#allocation2 + $0x48] sm:$0xff] %v299_v59  ;;  %v411_v4 = vpop.f32.mrf.mxu1  ;;  %v1136_v52 = vld [vmem:[#allocation6 + $0xca0] sm:$0xff]  ;;  %v1199_v59 = vld [vmem:[#allocation6 + $0xe98] sm:$0xff] }
 0x168   :  { %2385 = vmatprep.mubr.f32.mxu1 %v487_v55  ;;  %2434 = vmatprep.subr.mxu0 %v1147_v56  ;;  %454 = vst [vmem:[#allocation2 + $0x50] sm:$0xff] %v410_v63  ;;  %v412_v8 = vadd.f32 %v411_v4, %v7009_v5  ;;  %v302_v9 = vpop.f32.mrf.mxu0  ;;  %v580_v55 = vld [vmem:[%s9398_s1 + $0x340] sm:$0xff]  ;;  %v583_v63 = vld [vmem:[%s9398_s1 + $0x358] sm:$0xff]  ;;  %v1198_v4 = vld [vmem:[#allocation6 + $0xe90] sm:$0xff] }
 0x169   :  { %2547 = vmatprep.subr.mxu1 %v1211_v60  ;;  %2386 = vmatmul.mubr.f32.vlgmr.msra.gmra.mxu1 %v486_v62  ;;  %v303_v12 = vadd.f32 %v302_v9, %v6994_v58  ;;  %v1197_v9 = vld [vmem:[#allocation6 + $0xe88] sm:$0xff] }
 0x16a   :  { %2435 = vmatpush1.msra.mxu0 %v1146_v2  ;;  %2548 = vmatpush1.msra.mxu1 %v1210_v3  ;;  %455 = vst [vmem:[#allocation2 + $0x58] sm:$0xff] %v412_v8  ;;  %v304_v15 = vpop.f32.mrf.mxu0  ;;  %v1134_v2 = vld [vmem:[#allocation6 + $0xc90] sm:$0xff] }
 0x16b   :  { %2436 = vmatprep.subr.mxu0 %v1145_v6  ;;  %2549 = vmatprep.subr.mxu1 %v1209_v7  ;;  %456 = vst [vmem:[#allocation2 + $0x60] sm:$0xff] %v303_v12  ;;  %v415_v18 = vpop.f32.mrf.mxu1  ;;  %v305_v19 = vadd.f32 %v304_v15, %v7004_v1  ;;  %v1133_v6 = vld [vmem:[#allocation6 + $0xc88] sm:$0xff]  ;;  %v582_v8 = vld [vmem:[%s9398_s1 + $0x350] sm:$0xff]  ;;  %v1196_v15 = vld [vmem:[#allocation6 + $0xe80] sm:$0xff] }
 0x16c   :  { %2278 = vmatprep.mubr.f32.mxu0 %v517_v10  ;;  %2437 = vmatpush1.msra.mxu0 %v1144_v11  ;;  %v416_v22 = vadd.f32 %v415_v18, %v6999_v61  ;;  %v613_v12 = vld [vmem:[%s9398_s1 + $0x448] sm:$0xff]  ;;  %v1131_v18 = vld [vmem:[#allocation6 + $0xc78] sm:$0xff] }
 0x16d   :  { %2550 = vmatpush1.msra.mxu1 %v1208_v13  ;;  %2279 = vmatmul.mubr.f32.gmra.mxu0 %v516_v14  ;;  %457 = vst [vmem:[#allocation2 + $0x68] sm:$0xff] %v305_v19  ;;  %v417_v25 = vpop.f32.mrf.mxu1  ;;  %v1132_v13 = vld [vmem:[#allocation6 + $0xc80] sm:$0xff]  ;;  %v1195_v19 = vld [vmem:[#allocation6 + $0xe78] sm:$0xff] }
 0x16e   :  { %2438 = vmatprep.subr.mxu0 %v1143_v16  ;;  %2551 = vmatprep.subr.mxu1 %v1207_v17  ;;  %458 = vst [vmem:[#allocation2 + $0x70] sm:$0xff] %v416_v22  ;;  %v418_v29 = vadd.f32 %v417_v25, %v7009_v5  ;;  %v308_v30 = vpop.f32.mrf.mxu0  ;;  %v612_v16 = vld [vmem:[%s9398_s1 + $0x440] sm:$0xff]  ;;  %v615_v22 = vld [vmem:[%s9398_s1 + $0x458] sm:$0xff]  ;;  %v1194_v25 = vld [vmem:[#allocation6 + $0xe70] sm:$0xff] }
 0x16f   :  { %2391 = vmatprep.mubr.f32.mxu1 %v519_v20  ;;  %2439 = vmatpush1.msra.mxu0 %v1142_v21  ;;  %v309_v33 = vadd.f32 %v308_v30, %v6994_v58  ;;  %v1193_v30 = vld [vmem:[#allocation6 + $0xe68] sm:$0xff] }
 0x170   :  { %2552 = vmatpush1.msra.mxu1 %v1206_v23  ;;  %2440 = vmatprep.subr.mxu0 %v1141_v24  ;;  %459 = vst [vmem:[#allocation2 + $0x78] sm:$0xff] %v418_v29  ;;  %v310_v36 = vpop.f32.mrf.mxu0  ;;  %v1130_v23 = vld [vmem:[#allocation6 + $0xc70] sm:$0xff] }
 0x171   :  { %2392 = vmatmul.mubr.f32.gmra.mxu1 %v518_v26  ;;  %2553 = vmatprep.subr.mxu1 %v1205_v28  ;;  %460 = vst [vmem:[#allocation2 + $0x80] sm:$0xff] %v309_v33  ;;  %v421_v39 = vpop.f32.mrf.mxu1  ;;  %v311_v40 = vadd.f32 %v310_v36, %v7004_v1  ;;  %v1129_v26 = vld [vmem:[#allocation6 + $0xc68] sm:$0xff]  ;;  %v614_v29 = vld [vmem:[%s9398_s1 + $0x450] sm:$0xff]  ;;  %v1192_v36 = vld [vmem:[#allocation6 + $0xe60] sm:$0xff] }
 0x172   :  { %2284 = vmatprep.mubr.f32.mxu0 %v549_v31  ;;  %2441 = vmatpush1.msra.mxu0 %v1140_v32  ;;  %v422_v43 = vadd.f32 %v421_v39, %v6999_v61  ;;  %v645_v33 = vld [vmem:[%s9398_s1 + $0x548] sm:$0xff]  ;;  %v1127_v39 = vld [vmem:[#allocation6 + $0xc58] sm:$0xff] }
 0x173   :  { %2554 = vmatpush1.msra.mxu1 %v1204_v34  ;;  %2285 = vmatmul.mubr.f32.gmra.mxu0 %v548_v35  ;;  %461 = vst [vmem:[#allocation2 + $0x88] sm:$0xff] %v311_v40  ;;  %v423_v46 = vpop.f32.mrf.mxu1  ;;  %v1128_v34 = vld [vmem:[#allocation6 + $0xc60] sm:$0xff]  ;;  %v1191_v40 = vld [vmem:[#allocation6 + $0xe58] sm:$0xff] }
 0x174   :  { %2442 = vmatprep.subr.mxu0 %v1139_v37  ;;  %2555 = vmatprep.subr.mxu1 %v1203_v38  ;;  %462 = vst [vmem:[#allocation2 + $0x90] sm:$0xff] %v422_v43  ;;  %v424_v49 = vadd.f32 %v423_v46, %v7009_v5  ;;  %v314_v50 = vpop.f32.mrf.mxu0  ;;  %v644_v37 = vld [vmem:[%s9398_s1 + $0x540] sm:$0xff]  ;;  %v1126_v43 = vld [vmem:[#allocation6 + $0xc50] sm:$0xff]  ;;  %v1125_v46 = vld [vmem:[#allocation6 + $0xc48] sm:$0xff] }
 0x175   :  { %2397 = vmatprep.mubr.f32.mxu1 %v551_v41  ;;  %2443 = vmatpush1.msra.mxu0 %v1138_v42  ;;  %v315_v53 = vadd.f32 %v314_v50, %v6994_v58  ;;  %v1124_v50 = vld [vmem:[#allocation6 + $0xc40] sm:$0xff] }
 0x176   :  { %2556 = vmatpush1.msra.mxu1 %v1202_v44  ;;  %2444 = vmatprep.subr.mxu0 %v1137_v45  ;;  %463 = vst [vmem:[#allocation2 + $0x98] sm:$0xff] %v424_v49  ;;  %v316_v56 = vpop.f32.mrf.mxu0  ;;  %v1190_v45 = vld [vmem:[#allocation6 + $0xe50] sm:$0xff] }
 0x177   :  { %2398 = vmatmul.mubr.f32.gmra.mxu1 %v550_v47  ;;  %2557 = vmatprep.subr.mxu1 %v1201_v48  ;;  %464 = vst [vmem:[#allocation2 + $0xa0] sm:$0xff] %v315_v53  ;;  %v427_v60 = vpop.f32.mrf.mxu1  ;;  %v317_v62 = vadd.f32 %v316_v56, %v7004_v1  ;;  %v1189_v48 = vld [vmem:[#allocation6 + $0xe48] sm:$0xff] }
 0x178   :  { %2290 = vmatprep.mubr.f32.mxu0 %v581_v51  ;;  %2445 = vmatpush1.msra.mxu0 %v1136_v52  ;;  %v428_v3 = vadd.f32 %v427_v60, %v6999_v61  ;;  %v1188_v51 = vld [vmem:[#allocation6 + $0xe40] sm:$0xff]  ;;  %v1186_v60 = vld [vmem:[#allocation6 + $0xe30] sm:$0xff] }
 0x179   :  { %2558 = vmatpush1.msra.mxu1 %v1200_v54  ;;  %2291 = vmatmul.mubr.f32.gmra.mxu0 %v580_v55  ;;  %465 = vst [vmem:[#allocation2 + $0xa8] sm:$0xff] %v317_v62  ;;  %v429_v7 = vpop.f32.mrf.mxu1  ;;  %v676_v52 = vld [vmem:[%s9398_s1 + $0x640] sm:$0xff]  ;;  %v1187_v55 = vld [vmem:[#allocation6 + $0xe38] sm:$0xff]  ;;  %v1121_v62 = vld [vmem:[#allocation6 + $0xc28] sm:$0xff] }
 0x17a   :  { %2446 = vmatprep.subr.mxu0 %v1135_v57  ;;  %2559 = vmatprep.subr.mxu1 %v1199_v59  ;;  %466 = vst [vmem:[#allocation2 + $0xb0] sm:$0xff] %v428_v3  ;;  %v430_v10 = vadd.f32 %v429_v7, %v7009_v5  ;;  %v320_v11 = vpop.f32.mrf.mxu0  ;;  %v679_v57 = vld [vmem:[%s9398_s1 + $0x658] sm:$0xff]  ;;  %v1122_v59 = vld [vmem:[#allocation6 + $0xc30] sm:$0xff]  ;;  %v709_v3 = vld [vmem:[%s9398_s1 + $0x748] sm:$0xff] }
 0x17b   :  { %2403 = vmatprep.mubr.f32.mxu1 %v583_v63  ;;  %2447 = vmatpush1.msra.mxu0 %v1134_v2  ;;  %v321_v14 = vadd.f32 %v320_v11, %v6994_v58  ;;  %v678_v63 = vld [vmem:[%s9398_s1 + $0x650] sm:$0xff]  ;;  %v1185_v2 = vld [vmem:[#allocation6 + $0xe28] sm:$0xff]  ;;  %v708_v7 = vld [vmem:[%s9398_s1 + $0x740] sm:$0xff] }
 0x17c   :  { %2560 = vmatpush1.msra.mxu1 %v1198_v4  ;;  %2448 = vmatprep.subr.mxu0 %v1133_v6  ;;  %467 = vst [vmem:[#allocation2 + $0xb8] sm:$0xff] %v430_v10  ;;  %v322_v17 = vpop.f32.mrf.mxu0  ;;  %v1120_v4 = vld [vmem:[#allocation6 + $0xc20] sm:$0xff]  ;;  %v711_v10 = vld [vmem:[%s9398_s1 + $0x758] sm:$0xff]  ;;  %v1118_v11 = vld [vmem:[#allocation6 + $0xc10] sm:$0xff] }
 0x17d   :  { %2404 = vmatmul.mubr.f32.gmra.mxu1 %v582_v8  ;;  %2561 = vmatprep.subr.mxu1 %v1197_v9  ;;  %468 = vst [vmem:[#allocation2 + $0xc0] sm:$0xff] %v321_v14  ;;  %v433_v20 = vpop.f32.mrf.mxu1  ;;  %v323_v21 = vadd.f32 %v322_v17, %v7004_v1  ;;  %v1184_v6 = vld [vmem:[#allocation6 + $0xe20] sm:$0xff]  ;;  %v1119_v8 = vld [vmem:[#allocation6 + $0xc18] sm:$0xff]  ;;  %v710_v14 = vld [vmem:[%s9398_s1 + $0x750] sm:$0xff] }
 0x17e   :  { %2296 = vmatprep.mubr.f32.mxu0 %v613_v12  ;;  %2449 = vmatpush1.msra.mxu0 %v1132_v13  ;;  %v434_v24 = vadd.f32 %v433_v20, %v6999_v61  ;;  %v1183_v9 = vld [vmem:[#allocation6 + $0xe18] sm:$0xff]  ;;  %v1182_v12 = vld [vmem:[#allocation6 + $0xe10] sm:$0xff]  ;;  %v1117_v13 = vld [vmem:[#allocation6 + $0xc08] sm:$0xff] }
 0x17f   :  { %2562 = vmatpush1.msra.mxu1 %v1196_v15  ;;  %2297 = vmatmul.mubr.f32.gmra.mxu0 %v612_v16  ;;  %469 = vst [vmem:[#allocation2 + $0xc8] sm:$0xff] %v323_v21  ;;  %v435_v28 = vpop.f32.mrf.mxu1  ;;  %v1181_v15 = vld [vmem:[#allocation6 + $0xe08] sm:$0xff]  ;;  %v1116_v16 = vld [vmem:[#allocation6 + $0xc00] sm:$0xff]  ;;  %v1178_v20 = vld [vmem:[#allocation6 + $0xdf0] sm:$0xff] }
 0x180   :  { %2450 = vmatprep.subr.mxu0 %v1131_v18  ;;  %2563 = vmatprep.subr.mxu1 %v1195_v19  ;;  %470 = vst [vmem:[#allocation2 + $0xd0] sm:$0xff] %v434_v24  ;;  %v436_v31 = vadd.f32 %v435_v28, %v7009_v5  ;;  %v326_v32 = vpop.f32.mrf.mxu0  ;;  %v1180_v17 = vld [vmem:[#allocation6 + $0xe00] sm:$0xff]  ;;  %v1179_v18 = vld [vmem:[#allocation6 + $0xdf8] sm:$0xff]  ;;  %v1242_v21 = vld [vmem:[#allocation6 + $0xff0] sm:$0xff] }
 0x181   :  { %2409 = vmatprep.mubr.f32.mxu1 %v615_v22  ;;  %2451 = vmatpush1.msra.mxu0 %v1130_v23  ;;  %v327_v35 = vadd.f32 %v326_v32, %v6994_v58  ;;  %v647_v58 = vld [vmem:[%s9398_s1 + $0x558] sm:$0xff]  ;;  %v1177_v22 = vld [vmem:[#allocation6 + $0xde8] sm:$0xff]  ;;  %v1176_v24 = vld [vmem:[#allocation6 + $0xde0] sm:$0xff] }
 0x182   :  { %2564 = vmatpush1.msra.mxu1 %v1194_v25  ;;  %2452 = vmatprep.subr.mxu0 %v1129_v26  ;;  %471 = vst [vmem:[#allocation2 + $0xd8] sm:$0xff] %v436_v31  ;;  %v328_v38 = vpop.f32.mrf.mxu0  ;;  %v1243_v19 = vld [vmem:[#allocation6 + $0xff8] sm:$0xff]  ;;  %v1241_v23 = vld [vmem:[#allocation6 + $0xfe8] sm:$0xff]  ;;  %v1240_v25 = vld [vmem:[#allocation6 + $0xfe0] sm:$0xff] }
 0x183   :  { %2410 = vmatmul.mubr.f32.gmra.mxu1 %v614_v29  ;;  %2565 = vmatprep.subr.mxu1 %v1193_v30  ;;  %472 = vst [vmem:[#allocation2 + $0xe0] sm:$0xff] %v327_v35  ;;  %v439_v41 = vpop.f32.mrf.mxu1  ;;  %v329_v42 = vadd.f32 %v328_v38, %v7004_v1  ;;  %v646_v1 = vld [vmem:[%s9398_s1 + $0x550] sm:$0xff]  ;;  %v1175_v26 = vld [vmem:[#allocation6 + $0xdd8] sm:$0xff]  ;;  %v1173_v31 = vld [vmem:[#allocation6 + $0xdc8] sm:$0xff] }
 0x184   :  { %2302 = vmatprep.mubr.f32.mxu0 %v645_v33  ;;  %2453 = vmatpush1.msra.mxu0 %v1128_v34  ;;  %v440_v44 = vadd.f32 %v439_v41, %v6999_v61  ;;  %v677_v61 = vld [vmem:[%s9398_s1 + $0x648] sm:$0xff]  ;;  %v1239_v28 = vld [vmem:[#allocation6 + $0xfd8] sm:$0xff]  ;;  %v1174_v29 = vld [vmem:[#allocation6 + $0xdd0] sm:$0xff] }
 0x185   :  { %2566 = vmatpush1.msra.mxu1 %v1192_v36  ;;  %2303 = vmatmul.mubr.f32.gmra.mxu0 %v644_v37  ;;  %473 = vst [vmem:[#allocation2 + $0xe8] sm:$0xff] %v329_v42  ;;  %v441_v47 = vpop.f32.mrf.mxu1  ;;  %v1238_v30 = vld [vmem:[#allocation6 + $0xfd0] sm:$0xff]  ;;  %v1237_v32 = vld [vmem:[#allocation6 + $0xfc8] sm:$0xff]  ;;  %v1172_v33 = vld [vmem:[#allocation6 + $0xdc0] sm:$0xff] }
 0x186   :  { %2454 = vmatprep.subr.mxu0 %v1127_v39  ;;  %2567 = vmatprep.subr.mxu1 %v1191_v40  ;;  %474 = vst [vmem:[#allocation2 + $0xf0] sm:$0xff] %v440_v44  ;;  %v442_v49 = vadd.f32 %v441_v47, %v7009_v5  ;;  %v1123_v5 = vld [vmem:[#allocation6 + $0xc38] sm:$0xff]  ;;  %v1236_v34 = vld [vmem:[#allocation6 + $0xfc0] sm:$0xff]  ;;  %v1170_v37 = vld [vmem:[#allocation6 + $0xdb0] sm:$0xff] }
 0x187   :  { %2415 = vmatprep.mubr.f32.mxu1 %v647_v58  ;;  %2455 = vmatpush1.msra.mxu0 %v1126_v43  ;;  %v1171_v35 = vld [vmem:[#allocation6 + $0xdb8] sm:$0xff]  ;;  %v1234_v38 = vld [vmem:[#allocation6 + $0xfb0] sm:$0xff]  ;;  %v1169_v39 = vld [vmem:[#allocation6 + $0xda8] sm:$0xff] }
 0x188   :  { %2568 = vmatpush1.msra.mxu1 %v1190_v45  ;;  %2456 = vmatprep.subr.mxu0 %v1125_v46  ;;  %475 = vst [vmem:[#allocation2 + $0xf8] sm:$0xff] %v442_v49  ;;  %v1822_v53 = vpop.f32.mrf.mxu0  ;;  %v1935_v54 = vpop.f32.mrf.mxu1  ;;  %v1235_v36 = vld [vmem:[#allocation6 + $0xfb8] sm:$0xff]  ;;  %v1233_v40 = vld [vmem:[#allocation6 + $0xfa8] sm:$0xff]  ;;  %v1168_v41 = vld [vmem:[#allocation6 + $0xda0] sm:$0xff] }
 0x189   :  { %2416 = vmatmul.mubr.f32.gmra.mxu1 %v646_v1  ;;  %2569 = vmatprep.subr.mxu1 %v1189_v48  ;;  %v7139_v56 = vadd.f32 %v1935_v54, %v1822_v53  ;;  %v1232_v42 = vld [vmem:[#allocation6 + $0xfa0] sm:$0xff]  ;;  %v1167_v58 = vld [vmem:[#allocation6 + $0xd98] sm:$0xff]  ;;  %v1166_v44 = vld [vmem:[#allocation6 + $0xd90] sm:$0xff] }
 0x18a   :  { %2308 = vmatprep.mubr.f32.mxu0 %v677_v61  ;;  %2457 = vmatpush1.msra.mxu0 %v1124_v50  ;;  %v1231_v43 = vld [vmem:[#allocation6 + $0xf98] sm:$0xff]  ;;  %v1230_v45 = vld [vmem:[#allocation6 + $0xf90] sm:$0xff]  ;;  %v1165_v46 = vld [vmem:[#allocation6 + $0xd88] sm:$0xff] }
 0x18b   :  { %2570 = vmatpush1.msra.mxu1 %v1188_v51  ;;  %2309 = vmatmul.mubr.f32.gmra.mxu0 %v676_v52  ;;  %v1229_v47 = vld [vmem:[#allocation6 + $0xf88] sm:$0xff]  ;;  %v1164_v1 = vld [vmem:[#allocation6 + $0xd80] sm:$0xff]  ;;  %v1163_v49 = vld [vmem:[#allocation6 + $0xd78] sm:$0xff] }
 0x18c   :  { %2458 = vmatprep.subr.mxu0 %v1123_v5  ;;  %2571 = vmatprep.subr.mxu1 %v1187_v55  ;;  %v1228_v48 = vld [vmem:[#allocation6 + $0xf80] sm:$0xff]  ;;  %v1227_v61 = vld [vmem:[#allocation6 + $0xf78] sm:$0xff]  ;;  %v1162_v50 = vld [vmem:[#allocation6 + $0xd70] sm:$0xff] }
 0x18d   :  { %2421 = vmatprep.mubr.f32.mxu1 %v679_v57  ;;  %2459 = vmatpush1.msra.mxu0 %v1122_v59  ;;  %v1226_v51 = vld [vmem:[#allocation6 + $0xf70] sm:$0xff]  ;;  %v1161_v52 = vld [vmem:[#allocation6 + $0xd68] sm:$0xff]  ;;  %v1160_v54 = vld [vmem:[#allocation6 + $0xd60] sm:$0xff] }
 0x18e   :  { %2572 = vmatpush1.msra.mxu1 %v1186_v60  ;;  %2460 = vmatprep.subr.mxu0 %v1121_v62  ;;  %v1225_v53 = vld [vmem:[#allocation6 + $0xf68] sm:$0xff]  ;;  %v1224_v5 = vld [vmem:[#allocation6 + $0xf60] sm:$0xff]  ;;  %v1159_v55 = vld [vmem:[#allocation6 + $0xd58] sm:$0xff] }
 0x18f   :  { %2422 = vmatmul.mubr.f32.gmra.mxu1 %v678_v63  ;;  %2573 = vmatprep.subr.mxu1 %v1185_v2  ;;  %v1223_v57 = vld [vmem:[#allocation6 + $0xf58] sm:$0xff]  ;;  %v1158_v59 = vld [vmem:[#allocation6 + $0xd50] sm:$0xff]  ;;  %v1157_v62 = vld [vmem:[#allocation6 + $0xd48] sm:$0xff] }
 0x190   :  { %2314 = vmatprep.mubr.f32.mxu0 %v709_v3  ;;  %2461 = vmatpush1.msra.mxu0 %v1120_v4  ;;  %v1222_v60 = vld [vmem:[#allocation6 + $0xf50] sm:$0xff]  ;;  %v1221_v63 = vld [vmem:[#allocation6 + $0xf48] sm:$0xff]  ;;  %v1156_v2 = vld [vmem:[#allocation6 + $0xd40] sm:$0xff]  ;;  %v7159_v4 = vpop.f32.mrf.mxu0 }
 0x191   :  { %2574 = vmatpush1.msra.mxu1 %v1184_v6  ;;  %2315 = vmatmul.mubr.f32.gmra.mxu0 %v708_v7  ;;  %v1220_v3 = vld [vmem:[#allocation6 + $0xf40] sm:$0xff]  ;;  %v7161_v6 = vpop.f32.mrf.mxu1  ;;  %v1155_v7 = vld [vmem:[#allocation6 + $0xd38] sm:$0xff] }
 0x192   :  { %2462 = vmatprep.subr.mxu0 %v1119_v8  ;;  %2575 = vmatprep.subr.mxu1 %v1183_v9  ;;  %v1219_v8 = vld [vmem:[#allocation6 + $0xf38] sm:$0xff]  ;;  %v1154_v9 = vld [vmem:[#allocation6 + $0xd30] sm:$0xff] }
 0x193   :  { %2427 = vmatprep.mubr.f32.mxu1 %v711_v10  ;;  %2463 = vmatpush1.msra.mxu0 %v1118_v11  ;;  %v1218_v10 = vld [vmem:[#allocation6 + $0xf30] sm:$0xff] }
 0x194   :  { %2576 = vmatpush1.msra.mxu1 %v1182_v12  ;;  %2464 = vmatprep.subr.mxu0 %v1117_v13  ;;  %v1153_v13 = vld [vmem:[#allocation6 + $0xd28] sm:$0xff] }
 0x195   :  { %2428 = vmatmul.mubr.f32.gmra.mxu1 %v710_v14  ;;  %2577 = vmatprep.subr.mxu1 %v1181_v15  ;;  %v1217_v14 = vld [vmem:[#allocation6 + $0xf28] sm:$0xff] }
 0x196   :  { %2465 = vmatpush1.msra.mxu0 %v1116_v16  ;;  %2578 = vmatpush1.msra.mxu1 %v1180_v17  ;;  %v1152_v16 = vld [vmem:[#allocation6 + $0xd20] sm:$0xff] }
 0x197   :  { %2466 = vmatprep.subr.mxu0 %v1179_v18  ;;  %2579 = vmatprep.subr.mxu1 %v1243_v19  ;;  %v1216_v17 = vld [vmem:[#allocation6 + $0xf20] sm:$0xff] }
 0x198   :  { %2467 = vmatpush2.msra.mxu0 %v1178_v20  ;;  %2580 = vmatpush2.msra.mxu1 %v1242_v21  ;;  %v1151_v20 = vld [vmem:[#allocation6 + $0xd18] sm:$0xff] }
 0x199   :  { %2468 = vmatprep.subr.mxu0 %v1177_v22  ;;  %2581 = vmatprep.subr.mxu1 %v1241_v23  ;;  %v1215_v21 = vld [vmem:[#allocation6 + $0xf18] sm:$0xff]  ;;  %v1150_v22 = vld [vmem:[#allocation6 + $0xd10] sm:$0xff] }
 0x19a   :  { %2469 = vmatpush2.msra.mxu0 %v1176_v24  ;;  %2582 = vmatpush2.msra.mxu1 %v1240_v25  ;;  %v1214_v23 = vld [vmem:[#allocation6 + $0xf10] sm:$0xff]  ;;  %v1149_v24 = vld [vmem:[#allocation6 + $0xd08] sm:$0xff] }
 0x19b   :  { %2470 = vmatprep.subr.mxu0 %v1175_v26  ;;  %2583 = vmatprep.subr.mxu1 %v1239_v28  ;;  %v1213_v25 = vld [vmem:[#allocation6 + $0xf08] sm:$0xff]  ;;  %v1148_v26 = vld [vmem:[#allocation6 + $0xd00] sm:$0xff] }
 0x19c   :  { %2471 = vmatpush2.msra.mxu0 %v1174_v29  ;;  %2584 = vmatpush2.msra.mxu1 %v1238_v30  ;;  %v489_v28 = vld [vmem:[%s9398_s1 + $0x68] sm:$0xff] }
 0x19d   :  { %2472 = vmatprep.subr.mxu0 %v1173_v31  ;;  %2585 = vmatprep.subr.mxu1 %v1237_v32  ;;  %v1212_v31 = vld [vmem:[#allocation6 + $0xf00] sm:$0xff] }
 0x19e   :  { %2473 = vmatpush2.msra.mxu0 %v1172_v33  ;;  %2586 = vmatpush2.msra.mxu1 %v1236_v34  ;;  %v488_v32 = vld [vmem:[%s9398_s1 + $0x60] sm:$0xff]  ;;  %v491_v34 = vld [vmem:[%s9398_s1 + $0x78] sm:$0xff] }
 0x19f   :  { %2474 = vmatprep.subr.mxu0 %v1171_v35  ;;  %2587 = vmatprep.subr.mxu1 %v1235_v36  ;;  %v1275_v35 = vld [vmem:[#allocation6 + $0x10f8] sm:$0xff] }
 0x1a0   :  { %2475 = vmatpush2.msra.mxu0 %v1170_v37  ;;  %2588 = vmatpush2.msra.mxu1 %v1234_v38  ;;  %v1339_v38 = vld [vmem:[#allocation6 + $0x12f8] sm:$0xff] }
 0x1a1   :  { %2476 = vmatprep.subr.mxu0 %v1169_v39  ;;  %2589 = vmatprep.subr.mxu1 %v1233_v40  ;;  %v490_v39 = vld [vmem:[%s9398_s1 + $0x70] sm:$0xff] }
 0x1a2   :  { %2477 = vmatpush2.msra.mxu0 %v1168_v41  ;;  %2590 = vmatpush2.msra.mxu1 %v1232_v42  ;;  %v1274_v40 = vld [vmem:[#allocation6 + $0x10f0] sm:$0xff]  ;;  %v1273_v42 = vld [vmem:[#allocation6 + $0x10e8] sm:$0xff] }
 0x1a3   :  { %2478 = vmatprep.subr.mxu0 %v1167_v58  ;;  %2591 = vmatprep.subr.mxu1 %v1231_v43  ;;  %v1338_v41 = vld [vmem:[#allocation6 + $0x12f0] sm:$0xff]  ;;  %v1337_v58 = vld [vmem:[#allocation6 + $0x12e8] sm:$0xff] }
 0x1a4   :  { %2479 = vmatpush2.msra.mxu0 %v1166_v44  ;;  %2592 = vmatpush2.msra.mxu1 %v1230_v45  ;;  %v521_v43 = vld [vmem:[%s9398_s1 + $0x168] sm:$0xff]  ;;  %v1272_v44 = vld [vmem:[#allocation6 + $0x10e0] sm:$0xff] }
 0x1a5   :  { %2480 = vmatprep.subr.mxu0 %v1165_v46  ;;  %2593 = vmatprep.subr.mxu1 %v1229_v47  ;;  %v1336_v47 = vld [vmem:[#allocation6 + $0x12e0] sm:$0xff] }
 0x1a6   :  { %2481 = vmatpush2.msra.mxu0 %v1164_v1  ;;  %2594 = vmatpush2.msra.mxu1 %v1228_v48  ;;  %v520_v1 = vld [vmem:[%s9398_s1 + $0x160] sm:$0xff] }
 0x1a7   :  { %2482 = vmatprep.subr.mxu0 %v1163_v49  ;;  %2595 = vmatprep.subr.mxu1 %v1227_v61  ;;  %v1271_v49 = vld [vmem:[#allocation6 + $0x10d8] sm:$0xff] }
 0x1a8   :  { %2483 = vmatpush2.msra.mxu0 %v1162_v50  ;;  %2596 = vmatpush2.msra.mxu1 %v1226_v51  ;;  %v1335_v61 = vld [vmem:[#allocation6 + $0x12d8] sm:$0xff] }
 0x1a9   :  { %2484 = vmatprep.subr.mxu0 %v1161_v52  ;;  %2597 = vmatprep.subr.mxu1 %v1225_v53  ;;  %v523_v52 = vld [vmem:[%s9398_s1 + $0x178] sm:$0xff]  ;;  %v1270_v53 = vld [vmem:[#allocation6 + $0x10d0] sm:$0xff] }
 0x1aa   :  { %2485 = vmatpush2.msra.mxu0 %v1160_v54  ;;  %2598 = vmatpush2.msra.mxu1 %v1224_v5  ;;  %v1334_v54 = vld [vmem:[#allocation6 + $0x12d0] sm:$0xff]  ;;  %v1269_v5 = vld [vmem:[#allocation6 + $0x10c8] sm:$0xff] }
 0x1ab   :  { %2486 = vmatprep.subr.mxu0 %v1159_v55  ;;  %2599 = vmatprep.subr.mxu1 %v1223_v57  ;;  %v522_v55 = vld [vmem:[%s9398_s1 + $0x170] sm:$0xff]  ;;  %v1333_v57 = vld [vmem:[#allocation6 + $0x12c8] sm:$0xff] }
 0x1ac   :  { %2487 = vmatpush2.msra.mxu0 %v1158_v59  ;;  %2600 = vmatpush2.msra.mxu1 %v1222_v60  ;;  %v553_v59 = vld [vmem:[%s9398_s1 + $0x268] sm:$0xff]  ;;  %v1268_v60 = vld [vmem:[#allocation6 + $0x10c0] sm:$0xff] }
 0x1ad   :  { %2488 = vmatprep.subr.mxu0 %v1157_v62  ;;  %2601 = vmatprep.subr.mxu1 %v1221_v63  ;;  %v1828_v11 = vpop.f32.mrf.mxu0  ;;  %v1941_v12 = vpop.f32.mrf.mxu1 }
 0x1ae   :  { %2489 = vmatpush2.msra.mxu0 %v1156_v2  ;;  %2602 = vmatpush2.msra.mxu1 %v1220_v3  ;;  %v7163_v15 = vadd.f32 %v1941_v12, %v1828_v11  ;;  %v1332_v2 = vld [vmem:[#allocation6 + $0x12c0] sm:$0xff]  ;;  %v555_v12 = vld [vmem:[%s9398_s1 + $0x278] sm:$0xff] }
 0x1af   :  { %2490 = vmatprep.subr.mxu0 %v1155_v7  ;;  %2603 = vmatprep.subr.mxu1 %v1219_v8  ;;  %v7165_v18 = vpop.f32.mrf.mxu0  ;;  %v7167_v19 = vpop.f32.mrf.mxu1  ;;  %v552_v3 = vld [vmem:[%s9398_s1 + $0x260] sm:$0xff]  ;;  %v1267_v8 = vld [vmem:[#allocation6 + $0x10b8] sm:$0xff] }
 0x1b0   :  { %2491 = vmatpush2.msra.mxu0 %v1154_v9  ;;  %2604 = vmatpush2.msra.mxu1 %v1218_v10  ;;  %v1331_v9 = vld [vmem:[#allocation6 + $0x12b8] sm:$0xff] }
 0x1b1   :  { %2492 = vmatprep.subr.mxu0 %v1153_v13  ;;  %2605 = vmatprep.subr.mxu1 %v1217_v14  ;;  %v1266_v13 = vld [vmem:[#allocation6 + $0x10b0] sm:$0xff] }
 0x1b2   :  { %2493 = vmatpush2.msra.mxu0 %v1152_v16  ;;  %2606 = vmatpush2.msra.mxu1 %v1216_v17  ;;  %v1330_v14 = vld [vmem:[#allocation6 + $0x12b0] sm:$0xff]  ;;  %v1265_v16 = vld [vmem:[#allocation6 + $0x10a8] sm:$0xff] }
 0x1b3   :  { %2494 = vmatprep.subr.mxu0 %v1151_v20  ;;  %2607 = vmatprep.subr.mxu1 %v1215_v21  ;;  %v1834_v29 = vpop.f32.mrf.mxu0  ;;  %v1947_v30 = vpop.f32.mrf.mxu1  ;;  %v554_v17 = vld [vmem:[%s9398_s1 + $0x270] sm:$0xff]  ;;  %v1329_v20 = vld [vmem:[#allocation6 + $0x12a8] sm:$0xff] }
 0x1b4   :  { %2495 = vmatpush2.msra.mxu0 %v1150_v22  ;;  %2608 = vmatpush2.msra.mxu1 %v1214_v23  ;;  %v7175_v33 = vadd.f32 %v1947_v30, %v1834_v29  ;;  %v585_v21 = vld [vmem:[%s9398_s1 + $0x368] sm:$0xff]  ;;  %v1264_v22 = vld [vmem:[#allocation6 + $0x10a0] sm:$0xff]  ;;  %v1263_v29 = vld [vmem:[#allocation6 + $0x1098] sm:$0xff] }
 0x1b5   :  { %2496 = vmatprep.subr.mxu0 %v1149_v24  ;;  %2609 = vmatprep.subr.mxu1 %v1213_v25  ;;  %v7180_v36 = vpop.f32.mrf.mxu0  ;;  %v7182_v37 = vpop.f32.mrf.mxu1  ;;  %v1328_v25 = vld [vmem:[#allocation6 + $0x12a0] sm:$0xff]  ;;  %v1327_v30 = vld [vmem:[#allocation6 + $0x1298] sm:$0xff] }
 0x1b6   :  { %2497 = vmatpush2.msra.mxu0 %v1148_v26  ;;  %2498 = vmatprep.mubr.f32.mxu0 %v489_v28  ;;  %v584_v26 = vld [vmem:[%s9398_s1 + $0x360] sm:$0xff] }
 0x1b7   :  { %2610 = vmatpush2.msra.mxu1 %v1212_v31  ;;  %2499 = vmatmul.mubr.f32.vlgmr.msra.gmra.mxu0 %v488_v32 }
 0x1b8   :  { %2611 = vmatprep.mubr.f32.mxu1 %v491_v34  ;;  %2660 = vmatprep.subr.mxu0 %v1275_v35  ;;  %v587_v34 = vld [vmem:[%s9398_s1 + $0x378] sm:$0xff]  ;;  %v1262_v35 = vld [vmem:[#allocation6 + $0x1090] sm:$0xff] }
 0x1b9   :  { %2773 = vmatprep.subr.mxu1 %v1339_v38  ;;  %2612 = vmatmul.mubr.f32.vlgmr.msra.gmra.mxu1 %v490_v39  ;;  %v1840_v45 = vpop.f32.mrf.mxu0  ;;  %v1953_v46 = vpop.f32.mrf.mxu1  ;;  %v1326_v38 = vld [vmem:[#allocation6 + $0x1290] sm:$0xff]  ;;  %v1261_v39 = vld [vmem:[#allocation6 + $0x1088] sm:$0xff] }
 0x1ba   :  { %2661 = vmatpush1.msra.mxu0 %v1274_v40  ;;  %2774 = vmatpush1.msra.mxu1 %v1338_v41  ;;  %v7193_v48 = vadd.f32 %v1953_v46, %v1840_v45  ;;  %v586_v40 = vld [vmem:[%s9398_s1 + $0x370] sm:$0xff]  ;;  %v1325_v41 = vld [vmem:[#allocation6 + $0x1288] sm:$0xff]  ;;  %v1324_v45 = vld [vmem:[#allocation6 + $0x1280] sm:$0xff] }
 0x1bb   :  { %2662 = vmatprep.subr.mxu0 %v1273_v42  ;;  %2775 = vmatprep.subr.mxu1 %v1337_v58  ;;  %v7195_v50 = vpop.f32.mrf.mxu0  ;;  %v7197_v51 = vpop.f32.mrf.mxu1  ;;  %v617_v42 = vld [vmem:[%s9398_s1 + $0x468] sm:$0xff]  ;;  %v1260_v58 = vld [vmem:[#allocation6 + $0x1080] sm:$0xff] }
 0x1bc   :  { %2504 = vmatprep.mubr.f32.mxu0 %v521_v43  ;;  %2663 = vmatpush1.msra.mxu0 %v1272_v44  ;;  %v616_v46 = vld [vmem:[%s9398_s1 + $0x460] sm:$0xff] }
 0x1bd   :  { %2776 = vmatpush1.msra.mxu1 %v1336_v47  ;;  %2505 = vmatmul.mubr.f32.gmra.mxu0 %v520_v1  ;;  %v1259_v1 = vld [vmem:[#allocation6 + $0x1078] sm:$0xff] }
 0x1be   :  { %2664 = vmatprep.subr.mxu0 %v1271_v49  ;;  %2777 = vmatprep.subr.mxu1 %v1335_v61  ;;  %v1323_v49 = vld [vmem:[#allocation6 + $0x1278] sm:$0xff] }
 0x1bf   :  { %2617 = vmatprep.mubr.f32.mxu1 %v523_v52  ;;  %2665 = vmatpush1.msra.mxu0 %v1270_v53  ;;  %v1846_v62 = vpop.f32.mrf.mxu0  ;;  %v1959_v63 = vpop.f32.mrf.mxu1  ;;  %v619_v53 = vld [vmem:[%s9398_s1 + $0x478] sm:$0xff] }
 0x1c0   :  { %2778 = vmatpush1.msra.mxu1 %v1334_v54  ;;  %2666 = vmatprep.subr.mxu0 %v1269_v5  ;;  %v7211_v7 = vadd.f32 %v1959_v63, %v1846_v62  ;;  %v1258_v54 = vld [vmem:[#allocation6 + $0x1070] sm:$0xff]  ;;  %v1256_v62 = vld [vmem:[#allocation6 + $0x1060] sm:$0xff] }
 0x1c1   :  { %2618 = vmatmul.mubr.f32.gmra.mxu1 %v522_v55  ;;  %2779 = vmatprep.subr.mxu1 %v1333_v57  ;;  %v7213_v10 = vpop.f32.mrf.mxu0  ;;  %v7215_v11 = vpop.f32.mrf.mxu1  ;;  %v1322_v5 = vld [vmem:[#allocation6 + $0x1270] sm:$0xff]  ;;  %v1257_v55 = vld [vmem:[#allocation6 + $0x1068] sm:$0xff] }
 0x1c2   :  { %2510 = vmatprep.mubr.f32.mxu0 %v553_v59  ;;  %2667 = vmatpush1.msra.mxu0 %v1268_v60  ;;  %v618_v57 = vld [vmem:[%s9398_s1 + $0x470] sm:$0xff]  ;;  %v1321_v59 = vld [vmem:[#allocation6 + $0x1268] sm:$0xff] }
 0x1c3   :  { %2780 = vmatpush1.msra.mxu1 %v1332_v2  ;;  %2511 = vmatmul.mubr.f32.gmra.mxu0 %v552_v3  ;;  %v649_v60 = vld [vmem:[%s9398_s1 + $0x568] sm:$0xff]  ;;  %v1320_v3 = vld [vmem:[#allocation6 + $0x1260] sm:$0xff] }
 0x1c4   :  { %2668 = vmatprep.subr.mxu0 %v1267_v8  ;;  %2781 = vmatprep.subr.mxu1 %v1331_v9  ;;  %v648_v8 = vld [vmem:[%s9398_s1 + $0x560] sm:$0xff] }
 0x1c5   :  { %2623 = vmatprep.mubr.f32.mxu1 %v555_v12  ;;  %2669 = vmatpush1.msra.mxu0 %v1266_v13  ;;  %v1852_v23 = vpop.f32.mrf.mxu0  ;;  %v1965_v24 = vpop.f32.mrf.mxu1  ;;  %v1255_v12 = vld [vmem:[#allocation6 + $0x1058] sm:$0xff] }
 0x1c6   :  { %2782 = vmatpush1.msra.mxu1 %v1330_v14  ;;  %2670 = vmatprep.subr.mxu0 %v1265_v16  ;;  %v7229_v28 = vadd.f32 %v1965_v24, %v1852_v23  ;;  %v1319_v13 = vld [vmem:[#allocation6 + $0x1258] sm:$0xff]  ;;  %v1317_v23 = vld [vmem:[#allocation6 + $0x1248] sm:$0xff] }
 0x1c7   :  { %2624 = vmatmul.mubr.f32.gmra.mxu1 %v554_v17  ;;  %2783 = vmatprep.subr.mxu1 %v1329_v20  ;;  %v7231_v31 = vpop.f32.mrf.mxu0  ;;  %v7233_v32 = vpop.f32.mrf.mxu1  ;;  %v651_v16 = vld [vmem:[%s9398_s1 + $0x578] sm:$0xff]  ;;  %v1254_v17 = vld [vmem:[#allocation6 + $0x1050] sm:$0xff]  ;;  %v681_v24 = vld [vmem:[%s9398_s1 + $0x668] sm:$0xff] }
 0x1c8   :  { %2516 = vmatprep.mubr.f32.mxu0 %v585_v21  ;;  %2671 = vmatpush1.msra.mxu0 %v1264_v22  ;;  %v1318_v20 = vld [vmem:[#allocation6 + $0x1250] sm:$0xff]  ;;  %v1253_v21 = vld [vmem:[#allocation6 + $0x1048] sm:$0xff] }
 0x1c9   :  { %2784 = vmatpush1.msra.mxu1 %v1328_v25  ;;  %2517 = vmatmul.mubr.f32.gmra.mxu0 %v584_v26  ;;  %v650_v22 = vld [vmem:[%s9398_s1 + $0x570] sm:$0xff]  ;;  %v1252_v25 = vld [vmem:[#allocation6 + $0x1040] sm:$0xff] }
 0x1ca   :  { %2672 = vmatprep.subr.mxu0 %v1263_v29  ;;  %2785 = vmatprep.subr.mxu1 %v1327_v30  ;;  %v1316_v30 = vld [vmem:[#allocation6 + $0x1240] sm:$0xff] }
 0x1cb   :  { %2629 = vmatprep.mubr.f32.mxu1 %v587_v34  ;;  %2673 = vmatpush1.msra.mxu0 %v1262_v35  ;;  %v1858_v43 = vpop.f32.mrf.mxu0  ;;  %v1971_v44 = vpop.f32.mrf.mxu1  ;;  %v680_v34 = vld [vmem:[%s9398_s1 + $0x660] sm:$0xff] }
 0x1cc   :  { %2786 = vmatpush1.msra.mxu1 %v1326_v38  ;;  %2674 = vmatprep.subr.mxu0 %v1261_v39  ;;  %v7247_v47 = vadd.f32 %v1971_v44, %v1858_v43  ;;  %v1251_v38 = vld [vmem:[#allocation6 + $0x1038] sm:$0xff]  ;;  %v1314_v44 = vld [vmem:[#allocation6 + $0x1230] sm:$0xff] }
 0x1cd   :  { %2630 = vmatmul.mubr.f32.gmra.mxu1 %v586_v40  ;;  %2787 = vmatprep.subr.mxu1 %v1325_v41  ;;  %v7249_v61 = vpop.f32.mrf.mxu0  ;;  %v7251_v52 = vpop.f32.mrf.mxu1  ;;  %v1315_v39 = vld [vmem:[#allocation6 + $0x1238] sm:$0xff] }
 0x1ce   :  { %2522 = vmatprep.mubr.f32.mxu0 %v617_v42  ;;  %2675 = vmatpush1.msra.mxu0 %v1260_v58  ;;  %v683_v42 = vld [vmem:[%s9398_s1 + $0x678] sm:$0xff]  ;;  %v1250_v58 = vld [vmem:[#allocation6 + $0x1030] sm:$0xff] }
 0x1cf   :  { %2788 = vmatpush1.msra.mxu1 %v1324_v45  ;;  %2523 = vmatmul.mubr.f32.gmra.mxu0 %v616_v46  ;;  %v682_v45 = vld [vmem:[%s9398_s1 + $0x670] sm:$0xff]  ;;  %v1313_v46 = vld [vmem:[#allocation6 + $0x1228] sm:$0xff] }
 0x1d0   :  { %2676 = vmatprep.subr.mxu0 %v1259_v1  ;;  %2789 = vmatprep.subr.mxu1 %v1323_v49  ;;  %v713_v1 = vld [vmem:[%s9398_s1 + $0x768] sm:$0xff]  ;;  %v1248_v49 = vld [vmem:[#allocation6 + $0x1020] sm:$0xff] }
 0x1d1   :  { %2635 = vmatprep.mubr.f32.mxu1 %v619_v53  ;;  %2677 = vmatpush1.msra.mxu0 %v1258_v54  ;;  %v1864_v63 = vpop.f32.mrf.mxu0  ;;  %v1977_v2 = vpop.f32.mrf.mxu1 }
 0x1d2   :  { %2790 = vmatpush1.msra.mxu1 %v1322_v5  ;;  %2678 = vmatprep.subr.mxu0 %v1257_v55  ;;  %v7265_v9 = vadd.f32 %v1977_v2, %v1864_v63  ;;  %v1312_v5 = vld [vmem:[#allocation6 + $0x1220] sm:$0xff]  ;;  %v715_v63 = vld [vmem:[%s9398_s1 + $0x778] sm:$0xff]  ;;  %v1246_v2 = vld [vmem:[#allocation6 + $0x1010] sm:$0xff] }
 0x1d3   :  { %2636 = vmatmul.mubr.f32.gmra.mxu1 %v618_v57  ;;  %2791 = vmatprep.subr.mxu1 %v1321_v59  ;;  %v7267_v14 = vpop.f32.mrf.mxu0  ;;  %v7278_v26 = vpop.f32.mrf.mxu1  ;;  %v712_v55 = vld [vmem:[%s9398_s1 + $0x760] sm:$0xff]  ;;  %v1247_v59 = vld [vmem:[#allocation6 + $0x1018] sm:$0xff] }
 0x1d4   :  { %2528 = vmatprep.mubr.f32.mxu0 %v649_v60  ;;  %2679 = vmatpush1.msra.mxu0 %v1256_v62  ;;  %v1311_v60 = vld [vmem:[#allocation6 + $0x1218] sm:$0xff] }
 0x1d5   :  { %2792 = vmatpush1.msra.mxu1 %v1320_v3  ;;  %2529 = vmatmul.mubr.f32.gmra.mxu0 %v648_v8  ;;  %v1310_v3 = vld [vmem:[#allocation6 + $0x1210] sm:$0xff]  ;;  %v1245_v8 = vld [vmem:[#allocation6 + $0x1008] sm:$0xff] }
 0x1d6   :  { %2680 = vmatprep.subr.mxu0 %v1255_v12  ;;  %2793 = vmatprep.subr.mxu1 %v1319_v13  ;;  %v1309_v13 = vld [vmem:[#allocation6 + $0x1208] sm:$0xff] }
 0x1d7   :  { %2641 = vmatprep.mubr.f32.mxu1 %v651_v16  ;;  %2681 = vmatpush1.msra.mxu0 %v1254_v17  ;;  %v2048_v29 = vpop.f32.mrf.mxu0  ;;  %v1244_v17 = vld [vmem:[#allocation6 + $0x1000] sm:$0xff] }
 0x1d8   :  { %2794 = vmatpush1.msra.mxu1 %v1318_v20  ;;  %2682 = vmatprep.subr.mxu0 %v1253_v21  ;;  %v2049_v35 = vadd.f32 %v2048_v29, %v7139_v56  ;;  %v1249_v56 = vld [vmem:[#allocation6 + $0x1028] sm:$0xff]  ;;  %v1308_v20 = vld [vmem:[#allocation6 + $0x1200] sm:$0xff]  ;;  %v1306_v29 = vld [vmem:[#allocation6 + $0x11f0] sm:$0xff] }
 0x1d9   :  { %2642 = vmatmul.mubr.f32.gmra.mxu1 %v650_v22  ;;  %2795 = vmatprep.subr.mxu1 %v1317_v23  ;;  %v2161_v40 = vpop.f32.mrf.mxu1  ;;  %v7284_v41 = vpop.f32.mrf.mxu0  ;;  %v1307_v23 = vld [vmem:[#allocation6 + $0x11f8] sm:$0xff] }
 0x1da   :  { %2534 = vmatprep.mubr.f32.mxu0 %v681_v24  ;;  %2683 = vmatpush1.msra.mxu0 %v1252_v25  ;;  %v7289_v43 = vadd.f32 %v2161_v40, %v2049_v35  ;;  %v1371_v24 = vld [vmem:[#allocation6 + $0x13f8] sm:$0xff]  ;;  %v1305_v35 = vld [vmem:[#allocation6 + $0x11e8] sm:$0xff]  ;;  %v1368_v40 = vld [vmem:[#allocation6 + $0x13e0] sm:$0xff] }
 0x1db   :  { %2796 = vmatpush1.msra.mxu1 %v1316_v30  ;;  %2535 = vmatmul.mubr.f32.gmra.mxu0 %v680_v34  ;;  %v7297_v53 = vpop.f32.mrf.mxu1  ;;  %v1370_v30 = vld [vmem:[#allocation6 + $0x13f0] sm:$0xff] }
 0x1dc   :  { %2684 = vmatprep.subr.mxu0 %v1251_v38  ;;  %2797 = vmatprep.subr.mxu1 %v1315_v39  ;;  %v1369_v38 = vld [vmem:[#allocation6 + $0x13e8] sm:$0xff]  ;;  %v1304_v39 = vld [vmem:[#allocation6 + $0x11e0] sm:$0xff] }
 0x1dd   :  { %2647 = vmatprep.mubr.f32.mxu1 %v683_v42  ;;  %2685 = vmatpush1.msra.mxu0 %v1250_v58  ;;  %v2054_v54 = vpop.f32.mrf.mxu0  ;;  %v1303_v58 = vld [vmem:[#allocation6 + $0x11d8] sm:$0xff] }
 0x1de   :  { %2798 = vmatpush1.msra.mxu1 %v1314_v44  ;;  %2686 = vmatprep.subr.mxu0 %v1249_v56  ;;  %v2055_v57 = vadd.f32 %v2054_v54, %v7163_v15  ;;  %v714_v15 = vld [vmem:[%s9398_s1 + $0x770] sm:$0xff]  ;;  %v1367_v44 = vld [vmem:[#allocation6 + $0x13d8] sm:$0xff]  ;;  %v1365_v54 = vld [vmem:[#allocation6 + $0x13c8] sm:$0xff] }
 0x1df   :  { %2648 = vmatmul.mubr.f32.gmra.mxu1 %v682_v45  ;;  %2799 = vmatprep.subr.mxu1 %v1313_v46  ;;  %v7303_v62 = vpop.f32.mrf.mxu0  ;;  %v1302_v56 = vld [vmem:[#allocation6 + $0x11d0] sm:$0xff] }
 0x1e0   :  { %2540 = vmatprep.mubr.f32.mxu0 %v713_v1  ;;  %2687 = vmatpush1.msra.mxu0 %v1248_v49  ;;  %v1366_v45 = vld [vmem:[#allocation6 + $0x13d0] sm:$0xff]  ;;  %v1301_v49 = vld [vmem:[#allocation6 + $0x11c8] sm:$0xff] }
 0x1e1   :  { %2800 = vmatpush1.msra.mxu1 %v1312_v5  ;;  %2541 = vmatmul.mubr.f32.gmra.mxu0 %v712_v55  ;;  %v2167_v12 = vpop.f32.mrf.mxu1  ;;  %v1300_v55 = vld [vmem:[#allocation6 + $0x11c0] sm:$0xff] }
 0x1e2   :  { %2688 = vmatprep.subr.mxu0 %v1247_v59  ;;  %2801 = vmatprep.subr.mxu1 %v1311_v60  ;;  %v7311_v16 = vadd.f32 %v2167_v12, %v2055_v57  ;;  %v1364_v57 = vld [vmem:[#allocation6 + $0x13c0] sm:$0xff]  ;;  %v1299_v60 = vld [vmem:[#allocation6 + $0x11b8] sm:$0xff]  ;;  %v1297_v12 = vld [vmem:[#allocation6 + $0x11a8] sm:$0xff] }
 0x1e3   :  { %2653 = vmatprep.mubr.f32.mxu1 %v715_v63  ;;  %2689 = vmatpush1.msra.mxu0 %v1246_v2  ;;  %v2060_v21 = vpop.f32.mrf.mxu0  ;;  %v7313_v22 = vpop.f32.mrf.mxu1  ;;  %v1363_v63 = vld [vmem:[#allocation6 + $0x13b8] sm:$0xff]  ;;  %v1298_v2 = vld [vmem:[#allocation6 + $0x11b0] sm:$0xff] }
 0x1e4   :  { %2802 = vmatpush1.msra.mxu1 %v1310_v3  ;;  %2690 = vmatprep.subr.mxu0 %v1245_v8  ;;  %v2061_v25 = vadd.f32 %v2060_v21, %v7175_v33  ;;  %v1362_v3 = vld [vmem:[#allocation6 + $0x13b0] sm:$0xff] }
 0x1e5   :  { %2654 = vmatmul.mubr.f32.gmra.mxu1 %v714_v15  ;;  %2803 = vmatprep.subr.mxu1 %v1309_v13  ;;  %v7316_v34 = vpop.f32.mrf.mxu0  ;;  %v1361_v15 = vld [vmem:[#allocation6 + $0x13a8] sm:$0xff]  ;;  %v1296_v13 = vld [vmem:[#allocation6 + $0x11a0] sm:$0xff] }
 0x1e6   :  { %2691 = vmatpush1.msra.mxu0 %v1244_v17  ;;  %2804 = vmatpush1.msra.mxu1 %v1308_v20  ;;  %v1360_v17 = vld [vmem:[#allocation6 + $0x13a0] sm:$0xff] }
 0x1e7   :  { %2692 = vmatprep.subr.mxu0 %v1307_v23  ;;  %2805 = vmatprep.subr.mxu1 %v1371_v24  ;;  %v2173_v42 = vpop.f32.mrf.mxu1  ;;  %v1295_v23 = vld [vmem:[#allocation6 + $0x1198] sm:$0xff] }
 0x1e8   :  { %2693 = vmatpush2.msra.mxu0 %v1306_v29  ;;  %2806 = vmatpush2.msra.mxu1 %v1370_v30  ;;  %v7318_v33 = vadd.f32 %v2173_v42, %v2061_v25  ;;  %v1359_v24 = vld [vmem:[#allocation6 + $0x1398] sm:$0xff]  ;;  %v1294_v29 = vld [vmem:[#allocation6 + $0x1190] sm:$0xff]  ;;  %v1356_v42 = vld [vmem:[#allocation6 + $0x1380] sm:$0xff] }
 0x1e9   :  { %2694 = vmatprep.subr.mxu0 %v1305_v35  ;;  %2807 = vmatprep.subr.mxu1 %v1369_v38  ;;  %v2066_v46 = vpop.f32.mrf.mxu0  ;;  %v7320_v1 = vpop.f32.mrf.mxu1  ;;  %v1358_v30 = vld [vmem:[#allocation6 + $0x1390] sm:$0xff]  ;;  %v1293_v38 = vld [vmem:[#allocation6 + $0x1188] sm:$0xff] }
 0x1ea   :  { %2695 = vmatpush2.msra.mxu0 %v1304_v39  ;;  %2808 = vmatpush2.msra.mxu1 %v1368_v40  ;;  %v2067_v5 = vadd.f32 %v2066_v46, %v7193_v48  ;;  %v1357_v39 = vld [vmem:[#allocation6 + $0x1388] sm:$0xff]  ;;  %v1292_v40 = vld [vmem:[#allocation6 + $0x1180] sm:$0xff]  ;;  %v1354_v46 = vld [vmem:[#allocation6 + $0x1370] sm:$0xff] }
 0x1eb   :  { %2696 = vmatprep.subr.mxu0 %v1303_v58  ;;  %2809 = vmatprep.subr.mxu1 %v1367_v44  ;;  %v7323_v59 = vpop.f32.mrf.mxu0  ;;  %v1291_v44 = vld [vmem:[#allocation6 + $0x1178] sm:$0xff] }
 0x1ec   :  { %2697 = vmatpush2.msra.mxu0 %v1302_v56  ;;  %2810 = vmatpush2.msra.mxu1 %v1366_v45  ;;  %v1355_v56 = vld [vmem:[#allocation6 + $0x1378] sm:$0xff]  ;;  %v1290_v45 = vld [vmem:[#allocation6 + $0x1170] sm:$0xff] }
 0x1ed   :  { %2698 = vmatprep.subr.mxu0 %v1301_v49  ;;  %2811 = vmatprep.subr.mxu1 %v1365_v54  ;;  %v2179_v8 = vpop.f32.mrf.mxu1 }
 0x1ee   :  { %2699 = vmatpush2.msra.mxu0 %v1300_v55  ;;  %2812 = vmatpush2.msra.mxu1 %v1364_v57  ;;  %v7325_v48 = vadd.f32 %v2179_v8, %v2067_v5  ;;  %v1289_v5 = vld [vmem:[#allocation6 + $0x1168] sm:$0xff]  ;;  %v1351_v8 = vld [vmem:[#allocation6 + $0x1358] sm:$0xff] }
 0x1ef   :  { %2700 = vmatprep.subr.mxu0 %v1299_v60  ;;  %2813 = vmatprep.subr.mxu1 %v1363_v63  ;;  %v2072_v20 = vpop.f32.mrf.mxu0  ;;  %v7327_v21 = vpop.f32.mrf.mxu1  ;;  %v1353_v55 = vld [vmem:[#allocation6 + $0x1368] sm:$0xff]  ;;  %v1288_v60 = vld [vmem:[#allocation6 + $0x1160] sm:$0xff] }
 0x1f0   :  { %2701 = vmatpush2.msra.mxu0 %v1298_v2  ;;  %2814 = vmatpush2.msra.mxu1 %v1362_v3  ;;  %v2073_v25 = vadd.f32 %v2072_v20, %v7211_v7  ;;  %v1352_v63 = vld [vmem:[#allocation6 + $0x1360] sm:$0xff]  ;;  %v1287_v3 = vld [vmem:[#allocation6 + $0x1158] sm:$0xff]  ;;  %v1349_v20 = vld [vmem:[#allocation6 + $0x1348] sm:$0xff] }
 0x1f1   :  { %2702 = vmatprep.subr.mxu0 %v1297_v12  ;;  %2815 = vmatprep.subr.mxu1 %v1361_v15  ;;  %v7330_v35 = vpop.f32.mrf.mxu0  ;;  %v1286_v12 = vld [vmem:[#allocation6 + $0x1150] sm:$0xff] }
 0x1f2   :  { %2703 = vmatpush2.msra.mxu0 %v1296_v13  ;;  %2816 = vmatpush2.msra.mxu1 %v1360_v17  ;;  %v1350_v15 = vld [vmem:[#allocation6 + $0x1350] sm:$0xff]  ;;  %v1285_v17 = vld [vmem:[#allocation6 + $0x1148] sm:$0xff] }
 0x1f3   :  { %2704 = vmatprep.subr.mxu0 %v1295_v23  ;;  %2817 = vmatprep.subr.mxu1 %v1359_v24  ;;  %v2185_v58 = vpop.f32.mrf.mxu1  ;;  %v1284_v23 = vld [vmem:[#allocation6 + $0x1140] sm:$0xff] }
 0x1f4   :  { %2705 = vmatpush2.msra.mxu0 %v1294_v29  ;;  %2818 = vmatpush2.msra.mxu1 %v1358_v30  ;;  %v7332_v7 = vadd.f32 %v2185_v58, %v2073_v25  ;;  %v1348_v24 = vld [vmem:[#allocation6 + $0x1340] sm:$0xff]  ;;  %v1283_v30 = vld [vmem:[#allocation6 + $0x1138] sm:$0xff] }
 0x1f5   :  { %2706 = vmatprep.subr.mxu0 %v1293_v38  ;;  %2819 = vmatprep.subr.mxu1 %v1357_v39  ;;  %v2078_v49 = vpop.f32.mrf.mxu0  ;;  %v7334_v54 = vpop.f32.mrf.mxu1  ;;  %v1347_v38 = vld [vmem:[#allocation6 + $0x1338] sm:$0xff] }
 0x1f6   :  { %2707 = vmatpush2.msra.mxu0 %v1292_v40  ;;  %2820 = vmatpush2.msra.mxu1 %v1356_v42  ;;  %v2079_v57 = vadd.f32 %v2078_v49, %v7229_v28  ;;  %v1282_v40 = vld [vmem:[#allocation6 + $0x1130] sm:$0xff] }
 0x1f7   :  { %2708 = vmatprep.subr.mxu0 %v1291_v44  ;;  %2821 = vmatprep.subr.mxu1 %v1355_v56  ;;  %v7337_v2 = vpop.f32.mrf.mxu0  ;;  %v1346_v42 = vld [vmem:[#allocation6 + $0x1330] sm:$0xff]  ;;  %v1281_v44 = vld [vmem:[#allocation6 + $0x1128] sm:$0xff] }
 0x1f8   :  { %2709 = vmatpush2.msra.mxu0 %v1290_v45  ;;  %2822 = vmatpush2.msra.mxu1 %v1354_v46  ;;  %v1345_v56 = vld [vmem:[#allocation6 + $0x1328] sm:$0xff]  ;;  %v1280_v45 = vld [vmem:[#allocation6 + $0x1120] sm:$0xff] }
 0x1f9   :  { %2710 = vmatprep.subr.mxu0 %v1289_v5  ;;  %2823 = vmatprep.subr.mxu1 %v1353_v55  ;;  %v2191_v13 = vpop.f32.mrf.mxu1  ;;  %v1344_v46 = vld [vmem:[#allocation6 + $0x1320] sm:$0xff]  ;;  %v1279_v5 = vld [vmem:[#allocation6 + $0x1118] sm:$0xff] }
 0x1fa   :  { %2711 = vmatpush2.msra.mxu0 %v1288_v60  ;;  %2824 = vmatpush2.msra.mxu1 %v1352_v63  ;;  %v7339_v28 = vadd.f32 %v2191_v13, %v2079_v57  ;;  %v1343_v55 = vld [vmem:[#allocation6 + $0x1318] sm:$0xff]  ;;  %v1278_v57 = vld [vmem:[#allocation6 + $0x1110] sm:$0xff]  ;;  %v1276_v13 = vld [vmem:[#allocation6 + $0x1100] sm:$0xff] }
 0x1fb   :  { %2712 = vmatprep.subr.mxu0 %v1287_v3  ;;  %2825 = vmatprep.subr.mxu1 %v1351_v8  ;;  %v2084_v25 = vpop.f32.mrf.mxu0  ;;  %v7341_v29 = vpop.f32.mrf.mxu1  ;;  %v1342_v60 = vld [vmem:[#allocation6 + $0x1310] sm:$0xff]  ;;  %v1277_v8 = vld [vmem:[#allocation6 + $0x1108] sm:$0xff] }
 0x1fc   :  { %2713 = vmatpush2.msra.mxu0 %v1286_v12  ;;  %2826 = vmatpush2.msra.mxu1 %v1350_v15  ;;  %v2085_v39 = vadd.f32 %v2084_v25, %v7247_v47  ;;  %v1341_v12 = vld [vmem:[#allocation6 + $0x1308] sm:$0xff] }
 0x1fd   :  { %2714 = vmatprep.subr.mxu0 %v1285_v17  ;;  %2827 = vmatprep.subr.mxu1 %v1349_v20  ;;  %v7344_v58 = vpop.f32.mrf.mxu0  ;;  %v493_v17 = vld [vmem:[%s9398_s1 + $0x88] sm:$0xff]  ;;  %v1340_v20 = vld [vmem:[#allocation6 + $0x1300] sm:$0xff] }
 0x1fe   :  { %2715 = vmatpush2.msra.mxu0 %v1284_v23  ;;  %2828 = vmatpush2.msra.mxu1 %v1348_v24  ;;  %v492_v23 = vld [vmem:[%s9398_s1 + $0x80] sm:$0xff]  ;;  %v1403_v24 = vld [vmem:[#allocation6 + $0x14f8] sm:$0xff] }
 0x1ff   :  { %2716 = vmatprep.subr.mxu0 %v1283_v30  ;;  %2829 = vmatprep.subr.mxu1 %v1347_v38  ;;  %v2197_v49 = vpop.f32.mrf.mxu1  ;;  %v1467_v30 = vld [vmem:[#allocation6 + $0x16f8] sm:$0xff]  ;;  %v494_v38 = vld [vmem:[%s9398_s1 + $0x90] sm:$0xff] }
 0x200   :  { %2717 = vmatpush2.msra.mxu0 %v1282_v40  ;;  %2830 = vmatpush2.msra.mxu1 %v1346_v42  ;;  %v7346_v47 = vadd.f32 %v2197_v49, %v2085_v39  ;;  %v1402_v40 = vld [vmem:[#allocation6 + $0x14f0] sm:$0xff]  ;;  %v1464_v49 = vld [vmem:[#allocation6 + $0x16e0] sm:$0xff] }
 0x201   :  { %2718 = vmatprep.subr.mxu0 %v1281_v44  ;;  %2831 = vmatprep.subr.mxu1 %v1345_v56  ;;  %v2090_v63 = vpop.f32.mrf.mxu0  ;;  %v7348_v3 = vpop.f32.mrf.mxu1  ;;  %v1466_v42 = vld [vmem:[#allocation6 + $0x16f0] sm:$0xff]  ;;  %v1401_v44 = vld [vmem:[#allocation6 + $0x14e8] sm:$0xff] }
 0x202   :  { %2719 = vmatpush2.msra.mxu0 %v1280_v45  ;;  %2832 = vmatpush2.msra.mxu1 %v1344_v46  ;;  %v2091_v15 = vadd.f32 %v2090_v63, %v7265_v9  ;;  %v495_v9 = vld [vmem:[%s9398_s1 + $0x98] sm:$0xff]  ;;  %v1465_v56 = vld [vmem:[#allocation6 + $0x16e8] sm:$0xff]  ;;  %v1400_v46 = vld [vmem:[#allocation6 + $0x14e0] sm:$0xff] }
 0x203   :  { %2720 = vmatprep.subr.mxu0 %v1279_v5  ;;  %2833 = vmatprep.subr.mxu1 %v1343_v55  ;;  %v525_v45 = vld [vmem:[%s9398_s1 + $0x188] sm:$0xff]  ;;  %v524_v5 = vld [vmem:[%s9398_s1 + $0x180] sm:$0xff]  ;;  %v1399_v55 = vld [vmem:[#allocation6 + $0x14d8] sm:$0xff] }
 0x204   :  { %2721 = vmatpush2.msra.mxu0 %v1278_v57  ;;  %2834 = vmatpush2.msra.mxu1 %v1342_v60  ;;  %v1463_v57 = vld [vmem:[#allocation6 + $0x16d8] sm:$0xff]  ;;  %v1398_v63 = vld [vmem:[#allocation6 + $0x14d0] sm:$0xff] }
 0x205   :  { %2722 = vmatprep.subr.mxu0 %v1277_v8  ;;  %2835 = vmatprep.subr.mxu1 %v1341_v12  ;;  %v2203_v25 = vpop.f32.mrf.mxu1  ;;  %v527_v60 = vld [vmem:[%s9398_s1 + $0x198] sm:$0xff]  ;;  %v1462_v8 = vld [vmem:[#allocation6 + $0x16d0] sm:$0xff]  ;;  %v1397_v12 = vld [vmem:[#allocation6 + $0x14c8] sm:$0xff] }
 0x206   :  { %2723 = vmatpush2.msra.mxu0 %v1276_v13  ;;  %2724 = vmatprep.mubr.f32.mxu0 %v493_v17  ;;  %v7363_v39 = vadd.f32 %v2203_v25, %v2091_v15  ;;  %v526_v15 = vld [vmem:[%s9398_s1 + $0x190] sm:$0xff]  ;;  %v1461_v13 = vld [vmem:[#allocation6 + $0x16c8] sm:$0xff]  ;;  %v1459_v25 = vld [vmem:[#allocation6 + $0x16b8] sm:$0xff] }
 0x207   :  { %2836 = vmatpush2.msra.mxu1 %v1340_v20  ;;  %2725 = vmatmul.mubr.f32.vlgmr.msra.gmra.mxu0 %v492_v23  ;;  %v557_v17 = vld [vmem:[%s9398_s1 + $0x288] sm:$0xff]  ;;  %v1396_v20 = vld [vmem:[#allocation6 + $0x14c0] sm:$0xff] }
 0x208   :  { %2837 = vmatprep.mubr.f32.mxu1 %v495_v9  ;;  %2886 = vmatprep.subr.mxu0 %v1403_v24  ;;  %v1460_v23 = vld [vmem:[#allocation6 + $0x16c0] sm:$0xff]  ;;  %v1395_v24 = vld [vmem:[#allocation6 + $0x14b8] sm:$0xff] }
 0x209   :  { %2999 = vmatprep.subr.mxu1 %v1467_v30  ;;  %2838 = vmatmul.mubr.f32.vlgmr.msra.gmra.mxu1 %v494_v38  ;;  %v556_v9 = vld [vmem:[%s9398_s1 + $0x280] sm:$0xff]  ;;  %v559_v30 = vld [vmem:[%s9398_s1 + $0x298] sm:$0xff]  ;;  %v1394_v38 = vld [vmem:[#allocation6 + $0x14b0] sm:$0xff] }
 0x20a   :  { %2887 = vmatpush1.msra.mxu0 %v1402_v40  ;;  %3000 = vmatpush1.msra.mxu1 %v1466_v42  ;;  %v1458_v40 = vld [vmem:[#allocation6 + $0x16b0] sm:$0xff]  ;;  %v1393_v42 = vld [vmem:[#allocation6 + $0x14a8] sm:$0xff] }
 0x20b   :  { %2888 = vmatprep.subr.mxu0 %v1401_v44  ;;  %3001 = vmatprep.subr.mxu1 %v1465_v56  ;;  %v558_v44 = vld [vmem:[%s9398_s1 + $0x290] sm:$0xff]  ;;  %v1457_v56 = vld [vmem:[#allocation6 + $0x16a8] sm:$0xff] }
 0x20c   :  { %2730 = vmatprep.mubr.f32.mxu0 %v525_v45  ;;  %2889 = vmatpush1.msra.mxu0 %v1400_v46  ;;  %v589_v45 = vld [vmem:[%s9398_s1 + $0x388] sm:$0xff]  ;;  %v1392_v46 = vld [vmem:[#allocation6 + $0x14a0] sm:$0xff] }
 0x20d   :  { %3002 = vmatpush1.msra.mxu1 %v1464_v49  ;;  %2731 = vmatmul.mubr.f32.gmra.mxu0 %v524_v5  ;;  %v1456_v49 = vld [vmem:[#allocation6 + $0x16a0] sm:$0xff] }
 0x20e   :  { %2890 = vmatprep.subr.mxu0 %v1399_v55  ;;  %3003 = vmatprep.subr.mxu1 %v1463_v57  ;;  %v588_v5 = vld [vmem:[%s9398_s1 + $0x380] sm:$0xff]  ;;  %v1391_v55 = vld [vmem:[#allocation6 + $0x1498] sm:$0xff] }
 0x20f   :  { %2843 = vmatprep.mubr.f32.mxu1 %v527_v60  ;;  %2891 = vmatpush1.msra.mxu0 %v1398_v63  ;;  %v1455_v57 = vld [vmem:[#allocation6 + $0x1698] sm:$0xff]  ;;  %v1390_v63 = vld [vmem:[#allocation6 + $0x1490] sm:$0xff] }
 0x210   :  { %3004 = vmatpush1.msra.mxu1 %v1462_v8  ;;  %2892 = vmatprep.subr.mxu0 %v1397_v12  ;;  %v591_v60 = vld [vmem:[%s9398_s1 + $0x398] sm:$0xff]  ;;  %v1454_v8 = vld [vmem:[#allocation6 + $0x1690] sm:$0xff]  ;;  %v1389_v12 = vld [vmem:[#allocation6 + $0x1488] sm:$0xff] }
 0x211   :  { %2844 = vmatmul.mubr.f32.gmra.mxu1 %v526_v15  ;;  %3005 = vmatprep.subr.mxu1 %v1461_v13  ;;  %v590_v15 = vld [vmem:[%s9398_s1 + $0x390] sm:$0xff]  ;;  %v1453_v13 = vld [vmem:[#allocation6 + $0x1688] sm:$0xff] }
 0x212   :  { %2736 = vmatprep.mubr.f32.mxu0 %v557_v17  ;;  %2893 = vmatpush1.msra.mxu0 %v1396_v20  ;;  %v621_v17 = vld [vmem:[%s9398_s1 + $0x488] sm:$0xff]  ;;  %v1388_v20 = vld [vmem:[#allocation6 + $0x1480] sm:$0xff] }
 0x213   :  { %3006 = vmatpush1.msra.mxu1 %v1460_v23  ;;  %2737 = vmatmul.mubr.f32.gmra.mxu0 %v556_v9  ;;  %v1452_v23 = vld [vmem:[#allocation6 + $0x1680] sm:$0xff] }
 0x214   :  { %2894 = vmatprep.subr.mxu0 %v1395_v24  ;;  %3007 = vmatprep.subr.mxu1 %v1459_v25  ;;  %v620_v9 = vld [vmem:[%s9398_s1 + $0x480] sm:$0xff]  ;;  %v1387_v24 = vld [vmem:[#allocation6 + $0x1478] sm:$0xff] }
 0x215   :  { %2849 = vmatprep.mubr.f32.mxu1 %v559_v30  ;;  %2895 = vmatpush1.msra.mxu0 %v1394_v38  ;;  %v1451_v25 = vld [vmem:[#allocation6 + $0x1678] sm:$0xff]  ;;  %v1386_v38 = vld [vmem:[#allocation6 + $0x1470] sm:$0xff] }
 0x216   :  { %3008 = vmatpush1.msra.mxu1 %v1458_v40  ;;  %2896 = vmatprep.subr.mxu0 %v1393_v42  ;;  %v623_v30 = vld [vmem:[%s9398_s1 + $0x498] sm:$0xff]  ;;  %v1450_v40 = vld [vmem:[#allocation6 + $0x1670] sm:$0xff]  ;;  %v1385_v42 = vld [vmem:[#allocation6 + $0x1468] sm:$0xff] }
 0x217   :  { %2850 = vmatmul.mubr.f32.gmra.mxu1 %v558_v44  ;;  %3009 = vmatprep.subr.mxu1 %v1457_v56  ;;  %v622_v44 = vld [vmem:[%s9398_s1 + $0x490] sm:$0xff]  ;;  %v1449_v56 = vld [vmem:[#allocation6 + $0x1668] sm:$0xff] }
 0x218   :  { %2742 = vmatprep.mubr.f32.mxu0 %v589_v45  ;;  %2897 = vmatpush1.msra.mxu0 %v1392_v46  ;;  %v653_v45 = vld [vmem:[%s9398_s1 + $0x588] sm:$0xff]  ;;  %v1384_v46 = vld [vmem:[#allocation6 + $0x1460] sm:$0xff] }
 0x219   :  { %3010 = vmatpush1.msra.mxu1 %v1456_v49  ;;  %2743 = vmatmul.mubr.f32.gmra.mxu0 %v588_v5  ;;  %v1448_v49 = vld [vmem:[#allocation6 + $0x1660] sm:$0xff] }
 0x21a   :  { %2898 = vmatprep.subr.mxu0 %v1391_v55  ;;  %3011 = vmatprep.subr.mxu1 %v1455_v57  ;;  %v652_v5 = vld [vmem:[%s9398_s1 + $0x580] sm:$0xff]  ;;  %v1383_v55 = vld [vmem:[#allocation6 + $0x1458] sm:$0xff] }
 0x21b   :  { %2855 = vmatprep.mubr.f32.mxu1 %v591_v60  ;;  %2899 = vmatpush1.msra.mxu0 %v1390_v63  ;;  %v1447_v57 = vld [vmem:[#allocation6 + $0x1658] sm:$0xff]  ;;  %v1382_v63 = vld [vmem:[#allocation6 + $0x1450] sm:$0xff] }
 0x21c   :  { %3012 = vmatpush1.msra.mxu1 %v1454_v8  ;;  %2900 = vmatprep.subr.mxu0 %v1389_v12  ;;  %v655_v60 = vld [vmem:[%s9398_s1 + $0x598] sm:$0xff]  ;;  %v1446_v8 = vld [vmem:[#allocation6 + $0x1650] sm:$0xff]  ;;  %v1381_v12 = vld [vmem:[#allocation6 + $0x1448] sm:$0xff] }
 0x21d   :  { %2856 = vmatmul.mubr.f32.gmra.mxu1 %v590_v15  ;;  %3013 = vmatprep.subr.mxu1 %v1453_v13  ;;  %v7422_v15 = vpop.f32.mrf.mxu0  ;;  %v654_v13 = vld [vmem:[%s9398_s1 + $0x590] sm:$0xff] }
 0x21e   :  { %2748 = vmatprep.mubr.f32.mxu0 %v621_v17  ;;  %2901 = vmatpush1.msra.mxu0 %v1388_v20  ;;  %v1445_v17 = vld [vmem:[#allocation6 + $0x1648] sm:$0xff] }
 0x21f   :  { %3014 = vmatpush1.msra.mxu1 %v1452_v23  ;;  %2749 = vmatmul.mubr.f32.gmra.mxu0 %v620_v9  ;;  %v685_v20 = vld [vmem:[%s9398_s1 + $0x688] sm:$0xff]  ;;  %v1380_v23 = vld [vmem:[#allocation6 + $0x1440] sm:$0xff]  ;;  %v7430_v9 = vpop.f32.mrf.mxu1 }
 0x220   :  { %2902 = vmatprep.subr.mxu0 %v1387_v24  ;;  %3015 = vmatprep.subr.mxu1 %v1451_v25  ;;  %v1444_v25 = vld [vmem:[#allocation6 + $0x1640] sm:$0xff] }
 0x221   :  { %2861 = vmatprep.mubr.f32.mxu1 %v623_v30  ;;  %2903 = vmatpush1.msra.mxu0 %v1386_v38  ;;  %v684_v30 = vld [vmem:[%s9398_s1 + $0x680] sm:$0xff] }
 0x222   :  { %3016 = vmatpush1.msra.mxu1 %v1450_v40  ;;  %2904 = vmatprep.subr.mxu0 %v1385_v42  ;;  %v1379_v40 = vld [vmem:[#allocation6 + $0x1438] sm:$0xff] }
 0x223   :  { %2862 = vmatmul.mubr.f32.gmra.mxu1 %v622_v44  ;;  %3017 = vmatprep.subr.mxu1 %v1449_v56  ;;  %v1443_v42 = vld [vmem:[#allocation6 + $0x1638] sm:$0xff] }
 0x224   :  { %2754 = vmatprep.mubr.f32.mxu0 %v653_v45  ;;  %2905 = vmatpush1.msra.mxu0 %v1384_v46  ;;  %v687_v45 = vld [vmem:[%s9398_s1 + $0x698] sm:$0xff]  ;;  %v1378_v46 = vld [vmem:[#allocation6 + $0x1430] sm:$0xff] }
 0x225   :  { %3018 = vmatpush1.msra.mxu1 %v1448_v49  ;;  %2755 = vmatmul.mubr.f32.gmra.mxu0 %v652_v5  ;;  %v1442_v5 = vld [vmem:[#allocation6 + $0x1630] sm:$0xff] }
 0x226   :  { %2906 = vmatprep.subr.mxu0 %v1383_v55  ;;  %3019 = vmatprep.subr.mxu1 %v1447_v57  ;;  %v686_v55 = vld [vmem:[%s9398_s1 + $0x690] sm:$0xff]  ;;  %v1441_v57 = vld [vmem:[#allocation6 + $0x1628] sm:$0xff] }
 0x227   :  { %2867 = vmatprep.mubr.f32.mxu1 %v655_v60  ;;  %2907 = vmatpush1.msra.mxu0 %v1382_v63  ;;  %v2274_v24 = vpop.f32.mrf.mxu0  ;;  %v717_v60 = vld [vmem:[%s9398_s1 + $0x788] sm:$0xff]  ;;  %v1376_v63 = vld [vmem:[#allocation6 + $0x1420] sm:$0xff] }
 0x228   :  { %3020 = vmatpush1.msra.mxu1 %v1446_v8  ;;  %2908 = vmatprep.subr.mxu0 %v1381_v12  ;;  %v2275_v38 = vadd.f32 %v2274_v24, %v7289_v43  ;;  %v1377_v43 = vld [vmem:[#allocation6 + $0x1428] sm:$0xff]  ;;  %v1439_v24 = vld [vmem:[#allocation6 + $0x1618] sm:$0xff] }
 0x229   :  { %2868 = vmatmul.mubr.f32.gmra.mxu1 %v654_v13  ;;  %3021 = vmatprep.subr.mxu1 %v1445_v17  ;;  %v2387_v44 = vpop.f32.mrf.mxu1  ;;  %v7436_v56 = vpop.f32.mrf.mxu0  ;;  %v1440_v13 = vld [vmem:[#allocation6 + $0x1620] sm:$0xff] }
 0x22a   :  { %2760 = vmatprep.mubr.f32.mxu0 %v685_v20  ;;  %2909 = vmatpush1.msra.mxu0 %v1380_v23  ;;  %v7441_v49 = vadd.f32 %v2387_v44, %v2275_v38  ;;  %v716_v17 = vld [vmem:[%s9398_s1 + $0x780] sm:$0xff]  ;;  %v1375_v23 = vld [vmem:[#allocation6 + $0x1418] sm:$0xff]  ;;  %v1374_v38 = vld [vmem:[#allocation6 + $0x1410] sm:$0xff] }
 0x22b   :  { %3022 = vmatpush1.msra.mxu1 %v1444_v25  ;;  %2761 = vmatmul.mubr.f32.gmra.mxu0 %v684_v30  ;;  %v7449_v8 = vpop.f32.mrf.mxu1  ;;  %v719_v30 = vld [vmem:[%s9398_s1 + $0x798] sm:$0xff] }
 0x22c   :  { %2910 = vmatprep.subr.mxu0 %v1379_v40  ;;  %3023 = vmatprep.subr.mxu1 %v1443_v42  ;;  %v1438_v40 = vld [vmem:[#allocation6 + $0x1610] sm:$0xff]  ;;  %v1373_v42 = vld [vmem:[#allocation6 + $0x1408] sm:$0xff] }
 0x22d   :  { %2873 = vmatprep.mubr.f32.mxu1 %v687_v45  ;;  %2911 = vmatpush1.msra.mxu0 %v1378_v46  ;;  %v2280_v12 = vpop.f32.mrf.mxu0  ;;  %v1437_v45 = vld [vmem:[#allocation6 + $0x1608] sm:$0xff] }
 0x22e   :  { %3024 = vmatpush1.msra.mxu1 %v1442_v5  ;;  %2912 = vmatprep.subr.mxu0 %v1377_v43  ;;  %v2281_v20 = vadd.f32 %v2280_v12, %v7311_v16  ;;  %v718_v16 = vld [vmem:[%s9398_s1 + $0x790] sm:$0xff]  ;;  %v1372_v5 = vld [vmem:[#allocation6 + $0x1400] sm:$0xff] }
 0x22f   :  { %2874 = vmatmul.mubr.f32.gmra.mxu1 %v686_v55  ;;  %3025 = vmatprep.subr.mxu1 %v1441_v57  ;;  %v7455_v25 = vpop.f32.mrf.mxu0  ;;  %v1436_v43 = vld [vmem:[#allocation6 + $0x1600] sm:$0xff] }
 0x230   :  { %2766 = vmatprep.mubr.f32.mxu0 %v717_v60  ;;  %2913 = vmatpush1.msra.mxu0 %v1376_v63  ;;  %v1435_v60 = vld [vmem:[#allocation6 + $0x15f8] sm:$0xff] }
 0x231   :  { %3026 = vmatpush1.msra.mxu1 %v1440_v13  ;;  %2767 = vmatmul.mubr.f32.gmra.mxu0 %v716_v17  ;;  %v2393_v44 = vpop.f32.mrf.mxu1  ;;  %v1499_v63 = vld [vmem:[#allocation6 + $0x17f8] sm:$0xff]  ;;  %v1434_v13 = vld [vmem:[#allocation6 + $0x15f0] sm:$0xff] }
 0x232   :  { %2914 = vmatprep.subr.mxu0 %v1375_v23  ;;  %3027 = vmatprep.subr.mxu1 %v1439_v24  ;;  %v7463_v46 = vadd.f32 %v2393_v44, %v2281_v20  ;;  %v1498_v17 = vld [vmem:[#allocation6 + $0x17f0] sm:$0xff]  ;;  %v1433_v20 = vld [vmem:[#allocation6 + $0x15e8] sm:$0xff]  ;;  %v1495_v44 = vld [vmem:[#allocation6 + $0x17d8] sm:$0xff] }
 0x233   :  { %2879 = vmatprep.mubr.f32.mxu1 %v719_v30  ;;  %2915 = vmatpush1.msra.mxu0 %v1374_v38  ;;  %v2286_v55 = vpop.f32.mrf.mxu0  ;;  %v7465_v57 = vpop.f32.mrf.mxu1  ;;  %v1497_v24 = vld [vmem:[#allocation6 + $0x17e8] sm:$0xff]  ;;  %v1432_v30 = vld [vmem:[#allocation6 + $0x15e0] sm:$0xff] }
 0x234   :  { %3028 = vmatpush1.msra.mxu1 %v1438_v40  ;;  %2916 = vmatprep.subr.mxu0 %v1373_v42  ;;  %v2287_v12 = vadd.f32 %v2286_v55, %v7318_v33  ;;  %v1496_v38 = vld [vmem:[#allocation6 + $0x17e0] sm:$0xff]  ;;  %v1431_v42 = vld [vmem:[#allocation6 + $0x15d8] sm:$0xff] }
 0x235   :  { %2880 = vmatmul.mubr.f32.gmra.mxu1 %v718_v16  ;;  %3029 = vmatprep.subr.mxu1 %v1437_v45  ;;  %v7468_v23 = vpop.f32.mrf.mxu0  ;;  %v1430_v16 = vld [vmem:[#allocation6 + $0x15d0] sm:$0xff] }
 0x236   :  { %2917 = vmatpush1.msra.mxu0 %v1372_v5  ;;  %3030 = vmatpush1.msra.mxu1 %v1436_v43  ;;  %v1494_v45 = vld [vmem:[#allocation6 + $0x17d0] sm:$0xff]  ;;  %v1962_v43 = vadd.f32 %v7215_v11, %v7213_v10 }
 0x237   :  { %2918 = vmatprep.subr.mxu0 %v1435_v60  ;;  %3031 = vmatprep.subr.mxu1 %v1499_v63  ;;  %v2399_v40 = vpop.f32.mrf.mxu1  ;;  %v1429_v60 = vld [vmem:[#allocation6 + $0x15c8] sm:$0xff]  ;;  %v1426_v10 = vld [vmem:[#allocation6 + $0x15b0] sm:$0xff] }
 0x238   :  { %2919 = vmatpush2.msra.mxu0 %v1434_v13  ;;  %3032 = vmatpush2.msra.mxu1 %v1498_v17  ;;  %v7470_v33 = vadd.f32 %v2399_v40, %v2287_v12  ;;  %v1493_v63 = vld [vmem:[#allocation6 + $0x17c8] sm:$0xff]  ;;  %v1428_v12 = vld [vmem:[#allocation6 + $0x15c0] sm:$0xff]  ;;  %v1427_v40 = vld [vmem:[#allocation6 + $0x15b8] sm:$0xff] }
 0x239   :  { %2920 = vmatprep.subr.mxu0 %v1433_v20  ;;  %3033 = vmatprep.subr.mxu1 %v1497_v24  ;;  %v2292_v55 = vpop.f32.mrf.mxu0  ;;  %v7472_v5 = vpop.f32.mrf.mxu1  ;;  %v1492_v17 = vld [vmem:[#allocation6 + $0x17c0] sm:$0xff]  ;;  %v2075_v24 = vadd.f32 %v7330_v35, %v1962_v43  ;;  %v1490_v11 = vld [vmem:[#allocation6 + $0x17b0] sm:$0xff] }
 0x23a   :  { %2921 = vmatpush2.msra.mxu0 %v1432_v30  ;;  %3034 = vmatpush2.msra.mxu1 %v1496_v38  ;;  %v2293_v13 = vadd.f32 %v2292_v55, %v7325_v48  ;;  %v1425_v48 = vld [vmem:[#allocation6 + $0x15a8] sm:$0xff]  ;;  %v1488_v55 = vld [vmem:[#allocation6 + $0x17a0] sm:$0xff] }
 0x23b   :  { %2922 = vmatprep.subr.mxu0 %v1431_v42  ;;  %3035 = vmatprep.subr.mxu1 %v1495_v44  ;;  %v7477_v20 = vpop.f32.mrf.mxu0  ;;  %v1489_v38 = vld [vmem:[#allocation6 + $0x17a8] sm:$0xff]  ;;  %v1424_v44 = vld [vmem:[#allocation6 + $0x15a0] sm:$0xff]  ;;  %v2188_v43 = vadd.f32 %v7334_v54, %v2075_v24 }
 0x23c   :  { %2923 = vmatpush2.msra.mxu0 %v1430_v16  ;;  %3036 = vmatpush2.msra.mxu1 %v1494_v45  ;;  %v1968_v45 = vadd.f32 %v7233_v32, %v7231_v31  ;;  %v1420_v32 = vld [vmem:[#allocation6 + $0x1580] sm:$0xff] }
 0x23d   :  { %2924 = vmatprep.subr.mxu0 %v1429_v60  ;;  %3037 = vmatprep.subr.mxu1 %v1493_v63  ;;  %v2405_v30 = vpop.f32.mrf.mxu1  ;;  %v1423_v60 = vld [vmem:[#allocation6 + $0x1598] sm:$0xff]  ;;  %v1484_v54 = vld [vmem:[#allocation6 + $0x1780] sm:$0xff] }
 0x23e   :  { %2925 = vmatpush2.msra.mxu0 %v1428_v12  ;;  %3038 = vmatpush2.msra.mxu1 %v1492_v17  ;;  %v7480_v42 = vadd.f32 %v2405_v30, %v2293_v13  ;;  %v1487_v63 = vld [vmem:[#allocation6 + $0x1798] sm:$0xff]  ;;  %v1422_v13 = vld [vmem:[#allocation6 + $0x1590] sm:$0xff]  ;;  %v1421_v30 = vld [vmem:[#allocation6 + $0x1588] sm:$0xff] }
 0x23f   :  { %2926 = vmatprep.subr.mxu0 %v1427_v40  ;;  %3039 = vmatprep.subr.mxu1 %v1491_v27  ;;  %v2298_v35 = vpop.f32.mrf.mxu0  ;;  %v7482_v16 = vpop.f32.mrf.mxu1  ;;  %v1486_v27 = vld [vmem:[#allocation6 + $0x1790] sm:$0xff]  ;;  %v2081_v40 = vadd.f32 %v7337_v2, %v1968_v45  ;;  %v1417_v45 = vld [vmem:[#allocation6 + $0x1568] sm:$0xff] }
 0x240   :  { %2927 = vmatpush2.msra.mxu0 %v1426_v10  ;;  %3040 = vmatpush2.msra.mxu1 %v1490_v11  ;;  %v2299_v12 = vadd.f32 %v2298_v35, %v7332_v7  ;;  %v1419_v7 = vld [vmem:[#allocation6 + $0x1578] sm:$0xff]  ;;  %v1418_v2 = vld [vmem:[#allocation6 + $0x1570] sm:$0xff] }
 0x241   :  { %2928 = vmatprep.subr.mxu0 %v1425_v48  ;;  %3041 = vmatprep.subr.mxu1 %v1489_v38  ;;  %v2300_v17 = vpop.f32.mrf.mxu0  ;;  %v1483_v10 = vld [vmem:[#allocation6 + $0x1778] sm:$0xff]  ;;  %v1974_v48 = vadd.f32 %v7251_v52, %v7249_v61  ;;  %v1482_v38 = vld [vmem:[#allocation6 + $0x1770] sm:$0xff]  ;;  %v2194_v35 = vadd.f32 %v7341_v29, %v2081_v40  ;;  %v1480_v61 = vld [vmem:[#allocation6 + $0x1760] sm:$0xff] }
 0x242   :  { %2929 = vmatpush2.msra.mxu0 %v1424_v44  ;;  %3042 = vmatpush2.msra.mxu1 %v1488_v55  ;;  %v2301_v31 = vadd.f32 %v2300_v17, %v2188_v43  ;;  %v1481_v43 = vld [vmem:[#allocation6 + $0x1768] sm:$0xff]  ;;  %v1414_v17 = vld [vmem:[#allocation6 + $0x1550] sm:$0xff] }
 0x243   :  { %2930 = vmatprep.subr.mxu0 %v1423_v60  ;;  %3043 = vmatprep.subr.mxu1 %v1487_v63  ;;  %v2411_v24 = vpop.f32.mrf.mxu1  ;;  %v1478_v40 = vld [vmem:[#allocation6 + $0x1750] sm:$0xff] }
 0x244   :  { %2931 = vmatpush2.msra.mxu0 %v1422_v13  ;;  %3044 = vmatpush2.msra.mxu1 %v1486_v27  ;;  %v7489_v11 = vadd.f32 %v2411_v24, %v2299_v12  ;;  %v1416_v12 = vld [vmem:[#allocation6 + $0x1560] sm:$0xff]  ;;  %v1415_v13 = vld [vmem:[#allocation6 + $0x1558] sm:$0xff] }
 0x245   :  { %2932 = vmatprep.subr.mxu0 %v1421_v30  ;;  %3045 = vmatprep.subr.mxu1 %v1485_v0  ;;  %v2304_v44 = vpop.f32.mrf.mxu0  ;;  %v2413_v55 = vpop.f32.mrf.mxu1  ;;  %v2087_v0 = vadd.f32 %v7344_v58, %v1974_v48  ;;  %v1479_v27 = vld [vmem:[#allocation6 + $0x1758] sm:$0xff]  ;;  %v1412_v58 = vld [vmem:[#allocation6 + $0x1540] sm:$0xff] }
 0x246   :  { %2933 = vmatpush2.msra.mxu0 %v1420_v32  ;;  %3046 = vmatpush2.msra.mxu1 %v1484_v54  ;;  %v2305_v60 = vadd.f32 %v2304_v44, %v7339_v28  ;;  %v7495_v63 = vadd.f32 %v2413_v55, %v2301_v31  ;;  %v1413_v28 = vld [vmem:[#allocation6 + $0x1548] sm:$0xff]  ;;  %v1980_v54 = vadd.f32 %v7278_v26, %v7267_v14  ;;  %v1476_v24 = vld [vmem:[#allocation6 + $0x1740] sm:$0xff]  ;;  %v1474_v14 = vld [vmem:[#allocation6 + $0x1730] sm:$0xff] }
 0x247   :  { %2934 = vmatprep.subr.mxu0 %v1419_v7  ;;  %3047 = vmatprep.subr.mxu1 %v1483_v10  ;;  %v2306_v52 = vpop.f32.mrf.mxu0  ;;  %v1477_v31 = vld [vmem:[#allocation6 + $0x1748] sm:$0xff]  ;;  %v2200_v48 = vadd.f32 %v7348_v3, %v2087_v0  ;;  %v1471_v0 = vld [vmem:[#allocation6 + $0x1718] sm:$0xff] }
 0x248   :  { %2935 = vmatpush2.msra.mxu0 %v1418_v2  ;;  %3048 = vmatpush2.msra.mxu1 %v1482_v38  ;;  %v2307_v29 = vadd.f32 %v2306_v52, %v2194_v35  ;;  %v1411_v2 = vld [vmem:[#allocation6 + $0x1538] sm:$0xff]  ;;  %v1410_v35 = vld [vmem:[#allocation6 + $0x1530] sm:$0xff] }
 0x249   :  { %2936 = vmatprep.subr.mxu0 %v1417_v45  ;;  %3049 = vmatprep.subr.mxu1 %v1481_v43  ;;  %v2417_v30 = vpop.f32.mrf.mxu1  ;;  %v1475_v38 = vld [vmem:[#allocation6 + $0x1738] sm:$0xff]  ;;  %v2093_v45 = vadd.f32 %v7422_v15, %v1980_v54  ;;  %v1409_v43 = vld [vmem:[#allocation6 + $0x1528] sm:$0xff]  ;;  %v1470_v15 = vld [vmem:[#allocation6 + $0x1710] sm:$0xff] }
 0x24a   :  { %2937 = vmatpush2.msra.mxu0 %v1416_v12  ;;  %3050 = vmatpush2.msra.mxu1 %v1480_v61  ;;  %v7498_v32 = vadd.f32 %v2417_v30, %v2305_v60  ;;  %v1473_v60 = vld [vmem:[#allocation6 + $0x1728] sm:$0xff]  ;;  %v1408_v12 = vld [vmem:[#allocation6 + $0x1520] sm:$0xff] }
 0x24b   :  { %2938 = vmatprep.subr.mxu0 %v1415_v13  ;;  %3051 = vmatprep.subr.mxu1 %v1479_v27  ;;  %v2310_v7 = vpop.f32.mrf.mxu0  ;;  %v2419_v10 = vpop.f32.mrf.mxu1  ;;  %v1472_v61 = vld [vmem:[#allocation6 + $0x1720] sm:$0xff]  ;;  %v1406_v27 = vld [vmem:[#allocation6 + $0x1510] sm:$0xff]  ;;  %v1405_v30 = vld [vmem:[#allocation6 + $0x1508] sm:$0xff] }
 0x24c   :  { %2939 = vmatpush2.msra.mxu0 %v1414_v17  ;;  %3052 = vmatpush2.msra.mxu1 %v1478_v40  ;;  %v2311_v44 = vadd.f32 %v2310_v7, %v7346_v47  ;;  %v7504_v55 = vadd.f32 %v2419_v10, %v2307_v29  ;;  %v1407_v47 = vld [vmem:[#allocation6 + $0x1518] sm:$0xff]  ;;  %v2206_v40 = vadd.f32 %v7430_v9, %v2093_v45  ;;  %v1468_v10 = vld [vmem:[#allocation6 + $0x1700] sm:$0xff]  ;;  %v1594_v45 = vld [vmem:[#allocation6 + $0x1af0] sm:$0xff] }
 0x24d   :  { %2940 = vmatprep.subr.mxu0 %v1413_v28  ;;  %3053 = vmatprep.subr.mxu1 %v1477_v31  ;;  %v2312_v26 = vpop.f32.mrf.mxu0  ;;  %v1469_v28 = vld [vmem:[#allocation6 + $0x1708] sm:$0xff]  ;;  %v496_v9 = vld [vmem:[%s9398_s1 + $0xa0] sm:$0xff] }
 0x24e   :  { %2941 = vmatpush2.msra.mxu0 %v1412_v58  ;;  %3054 = vmatpush2.msra.mxu1 %v1476_v24  ;;  %v2313_v3 = vadd.f32 %v2312_v26, %v2200_v48  ;;  %v1404_v58 = vld [vmem:[#allocation6 + $0x1500] sm:$0xff]  ;;  %v497_v24 = vld [vmem:[%s9398_s1 + $0xa8] sm:$0xff]  ;;  %v1530_v26 = vld [vmem:[#allocation6 + $0x18f0] sm:$0xff] }
 0x24f   :  { %2942 = vmatprep.subr.mxu0 %v1411_v2  ;;  %3055 = vmatprep.subr.mxu1 %v1475_v38  ;;  %v2423_v52 = vpop.f32.mrf.mxu1  ;;  %v1531_v2 = vld [vmem:[#allocation6 + $0x18f8] sm:$0xff] }
 0x250   :  { %2943 = vmatpush2.msra.mxu0 %v1410_v35  ;;  %3056 = vmatpush2.msra.mxu1 %v1474_v14  ;;  %v7507_v13 = vadd.f32 %v2423_v52, %v2311_v44  ;;  %v1595_v44 = vld [vmem:[#allocation6 + $0x1af8] sm:$0xff]  ;;  %v498_v35 = vld [vmem:[%s9398_s1 + $0xb0] sm:$0xff]  ;;  %v1528_v52 = vld [vmem:[#allocation6 + $0x18e0] sm:$0xff] }
 0x251   :  { %2944 = vmatprep.subr.mxu0 %v1409_v43  ;;  %3057 = vmatprep.subr.mxu1 %v1473_v60  ;;  %v2316_v29 = vpop.f32.mrf.mxu0  ;;  %v2425_v17 = vpop.f32.mrf.mxu1  ;;  %v1529_v60 = vld [vmem:[#allocation6 + $0x18e8] sm:$0xff] }
 0x252   :  { %2945 = vmatpush2.msra.mxu0 %v1408_v12  ;;  %3058 = vmatpush2.msra.mxu1 %v1472_v61  ;;  %v2317_v31 = vadd.f32 %v2316_v29, %v7363_v39  ;;  %v7511_v54 = vadd.f32 %v2425_v17, %v2313_v3  ;;  %v499_v39 = vld [vmem:[%s9398_s1 + $0xb8] sm:$0xff]  ;;  %v1593_v3 = vld [vmem:[#allocation6 + $0x1ae8] sm:$0xff]  ;;  %v1526_v17 = vld [vmem:[#allocation6 + $0x18d0] sm:$0xff] }
 0x253   :  { %2946 = vmatprep.subr.mxu0 %v1407_v47  ;;  %3059 = vmatprep.subr.mxu1 %v1471_v0  ;;  %v2318_v7 = vpop.f32.mrf.mxu0  ;;  %v529_v61 = vld [vmem:[%s9398_s1 + $0x1a8] sm:$0xff]  ;;  %v1592_v47 = vld [vmem:[#allocation6 + $0x1ae0] sm:$0xff]  ;;  %v531_v29 = vld [vmem:[%s9398_s1 + $0x1b8] sm:$0xff] }
 0x254   :  { %2947 = vmatpush2.msra.mxu0 %v1406_v27  ;;  %3060 = vmatpush2.msra.mxu1 %v1470_v15  ;;  %v2319_v48 = vadd.f32 %v2318_v7, %v2206_v40  ;;  %v528_v0 = vld [vmem:[%s9398_s1 + $0x1a0] sm:$0xff]  ;;  %v1527_v27 = vld [vmem:[#allocation6 + $0x18d8] sm:$0xff]  ;;  %v1590_v40 = vld [vmem:[#allocation6 + $0x1ad0] sm:$0xff] }
 0x255   :  { %2948 = vmatprep.subr.mxu0 %v1405_v30  ;;  %3061 = vmatprep.subr.mxu1 %v1469_v28  ;;  %v2429_v38 = vpop.f32.mrf.mxu1  ;;  %v1591_v15 = vld [vmem:[#allocation6 + $0x1ad8] sm:$0xff]  ;;  %v1525_v30 = vld [vmem:[#allocation6 + $0x18c8] sm:$0xff]  ;;  %v530_v28 = vld [vmem:[%s9398_s1 + $0x1b0] sm:$0xff] }
 0x256   :  { %2949 = vmatpush2.msra.mxu0 %v1404_v58  ;;  %2950 = vmatprep.mubr.f32.mxu0 %v497_v24  ;;  %v7525_v14 = vadd.f32 %v2429_v38, %v2317_v31  ;;  %v1589_v31 = vld [vmem:[#allocation6 + $0x1ac8] sm:$0xff]  ;;  %v1524_v24 = vld [vmem:[#allocation6 + $0x18c0] sm:$0xff]  ;;  %v1586_v38 = vld [vmem:[#allocation6 + $0x1ab0] sm:$0xff] }
 0x257   :  { %3062 = vmatpush2.msra.mxu1 %v1468_v10  ;;  %2951 = vmatmul.mubr.f32.vlgmr.msra.gmra.mxu0 %v496_v9  ;;  %v2431_v43 = vpop.f32.mrf.mxu1  ;;  %v561_v58 = vld [vmem:[%s9398_s1 + $0x2a8] sm:$0xff]  ;;  %v1588_v7 = vld [vmem:[#allocation6 + $0x1ac0] sm:$0xff]  ;;  %v1523_v9 = vld [vmem:[#allocation6 + $0x18b8] sm:$0xff] }
 0x258   :  { %3063 = vmatprep.mubr.f32.mxu1 %v499_v39  ;;  %3112 = vmatprep.subr.mxu0 %v1531_v2  ;;  %v7527_v12 = vadd.f32 %v2431_v43, %v2319_v48  ;;  %v560_v10 = vld [vmem:[%s9398_s1 + $0x2a0] sm:$0xff]  ;;  %v1587_v48 = vld [vmem:[#allocation6 + $0x1ab8] sm:$0xff]  ;;  %v1522_v2 = vld [vmem:[#allocation6 + $0x18b0] sm:$0xff] }
 0x259   :  { %3225 = vmatprep.subr.mxu1 %v1595_v44  ;;  %3064 = vmatmul.mubr.f32.vlgmr.msra.gmra.mxu1 %v498_v35  ;;  %v563_v39 = vld [vmem:[%s9398_s1 + $0x2b8] sm:$0xff]  ;;  %v1521_v44 = vld [vmem:[#allocation6 + $0x18a8] sm:$0xff]  ;;  %v562_v35 = vld [vmem:[%s9398_s1 + $0x2b0] sm:$0xff] }
 0x25a   :  { %3113 = vmatpush1.msra.mxu0 %v1530_v26  ;;  %3226 = vmatpush1.msra.mxu1 %v1594_v45  ;;  %v1585_v26 = vld [vmem:[#allocation6 + $0x1aa8] sm:$0xff]  ;;  %v1520_v43 = vld [vmem:[#allocation6 + $0x18a0] sm:$0xff] }
 0x25b   :  { %3114 = vmatprep.subr.mxu0 %v1529_v60  ;;  %3227 = vmatprep.subr.mxu1 %v1593_v3  ;;  %v593_v45 = vld [vmem:[%s9398_s1 + $0x3a8] sm:$0xff]  ;;  %v1584_v60 = vld [vmem:[#allocation6 + $0x1aa0] sm:$0xff] }
 0x25c   :  { %2956 = vmatprep.mubr.f32.mxu0 %v529_v61  ;;  %3115 = vmatpush1.msra.mxu0 %v1528_v52  ;;  %v592_v3 = vld [vmem:[%s9398_s1 + $0x3a0] sm:$0xff]  ;;  %v1519_v61 = vld [vmem:[#allocation6 + $0x1898] sm:$0xff] }
 0x25d   :  { %3228 = vmatpush1.msra.mxu1 %v1592_v47  ;;  %2957 = vmatmul.mubr.f32.gmra.mxu0 %v528_v0  ;;  %v1583_v52 = vld [vmem:[#allocation6 + $0x1a98] sm:$0xff]  ;;  %v1518_v0 = vld [vmem:[#allocation6 + $0x1890] sm:$0xff] }
 0x25e   :  { %3116 = vmatprep.subr.mxu0 %v1527_v27  ;;  %3229 = vmatprep.subr.mxu1 %v1591_v15  ;;  %v595_v47 = vld [vmem:[%s9398_s1 + $0x3b8] sm:$0xff]  ;;  %v1582_v27 = vld [vmem:[#allocation6 + $0x1a90] sm:$0xff]  ;;  %v1517_v15 = vld [vmem:[#allocation6 + $0x1888] sm:$0xff] }
 0x25f   :  { %3069 = vmatprep.mubr.f32.mxu1 %v531_v29  ;;  %3117 = vmatpush1.msra.mxu0 %v1526_v17  ;;  %v594_v29 = vld [vmem:[%s9398_s1 + $0x3b0] sm:$0xff]  ;;  %v1581_v17 = vld [vmem:[#allocation6 + $0x1a88] sm:$0xff] }
 0x260   :  { %3230 = vmatpush1.msra.mxu1 %v1590_v40  ;;  %3118 = vmatprep.subr.mxu0 %v1525_v30  ;;  %v625_v40 = vld [vmem:[%s9398_s1 + $0x4a8] sm:$0xff]  ;;  %v1516_v30 = vld [vmem:[#allocation6 + $0x1880] sm:$0xff] }
 0x261   :  { %3070 = vmatmul.mubr.f32.gmra.mxu1 %v530_v28  ;;  %3231 = vmatprep.subr.mxu1 %v1589_v31  ;;  %v1938_v28 = vadd.f32 %v7161_v6, %v7159_v4  ;;  %v1580_v31 = vld [vmem:[#allocation6 + $0x1a80] sm:$0xff]  ;;  %v1514_v4 = vld [vmem:[#allocation6 + $0x1870] sm:$0xff] }
 0x262   :  { %2962 = vmatprep.mubr.f32.mxu0 %v561_v58  ;;  %3119 = vmatpush1.msra.mxu0 %v1524_v24  ;;  %v624_v58 = vld [vmem:[%s9398_s1 + $0x4a0] sm:$0xff]  ;;  %v1515_v24 = vld [vmem:[#allocation6 + $0x1878] sm:$0xff]  ;;  %v1578_v6 = vld [vmem:[#allocation6 + $0x1a70] sm:$0xff] }
 0x263   :  { %3232 = vmatpush1.msra.mxu1 %v1588_v7  ;;  %2963 = vmatmul.mubr.f32.gmra.mxu0 %v560_v10  ;;  %v1579_v7 = vld [vmem:[#allocation6 + $0x1a78] sm:$0xff]  ;;  %v2051_v10 = vadd.f32 %v7284_v41, %v1938_v28  ;;  %v657_v41 = vld [vmem:[%s9398_s1 + $0x5a8] sm:$0xff] }
 0x264   :  { %3120 = vmatprep.subr.mxu0 %v1523_v9  ;;  %3233 = vmatprep.subr.mxu1 %v1587_v48  ;;  %v627_v9 = vld [vmem:[%s9398_s1 + $0x4b8] sm:$0xff]  ;;  %v1513_v48 = vld [vmem:[#allocation6 + $0x1868] sm:$0xff] }
 0x265   :  { %3075 = vmatprep.mubr.f32.mxu1 %v563_v39  ;;  %3121 = vmatpush1.msra.mxu0 %v1522_v2  ;;  %v626_v39 = vld [vmem:[%s9398_s1 + $0x4b0] sm:$0xff]  ;;  %v1577_v2 = vld [vmem:[#allocation6 + $0x1a68] sm:$0xff]  ;;  %v1507_v28 = vld [vmem:[#allocation6 + $0x1838] sm:$0xff] }
 0x266   :  { %3234 = vmatpush1.msra.mxu1 %v1586_v38  ;;  %3122 = vmatprep.subr.mxu0 %v1521_v44  ;;  %v1512_v38 = vld [vmem:[#allocation6 + $0x1860] sm:$0xff]  ;;  %v1944_v44 = vadd.f32 %v7167_v19, %v7165_v18  ;;  %v659_v18 = vld [vmem:[%s9398_s1 + $0x5b8] sm:$0xff]  ;;  %v1510_v19 = vld [vmem:[#allocation6 + $0x1850] sm:$0xff] }
 0x267   :  { %3076 = vmatmul.mubr.f32.gmra.mxu1 %v562_v35  ;;  %3235 = vmatprep.subr.mxu1 %v1585_v26  ;;  %v2164_v35 = vadd.f32 %v7297_v53, %v2051_v10  ;;  %v1576_v26 = vld [vmem:[#allocation6 + $0x1a60] sm:$0xff]  ;;  %v1574_v53 = vld [vmem:[#allocation6 + $0x1a50] sm:$0xff] }
 0x268   :  { %2968 = vmatprep.mubr.f32.mxu0 %v593_v45  ;;  %3123 = vmatpush1.msra.mxu0 %v1520_v43  ;;  %v656_v45 = vld [vmem:[%s9398_s1 + $0x5a0] sm:$0xff]  ;;  %v1511_v43 = vld [vmem:[#allocation6 + $0x1858] sm:$0xff] }
 0x269   :  { %3236 = vmatpush1.msra.mxu1 %v1584_v60  ;;  %2969 = vmatmul.mubr.f32.gmra.mxu0 %v592_v3  ;;  %v1575_v60 = vld [vmem:[#allocation6 + $0x1a58] sm:$0xff]  ;;  %v2057_v3 = vadd.f32 %v7303_v62, %v1944_v44  ;;  %v1573_v62 = vld [vmem:[#allocation6 + $0x1a48] sm:$0xff] }
 0x26a   :  { %3124 = vmatprep.subr.mxu0 %v1519_v61  ;;  %3237 = vmatprep.subr.mxu1 %v1583_v52  ;;  %v2277_v61 = vadd.f32 %v7436_v56, %v2164_v35  ;;  %v1509_v52 = vld [vmem:[#allocation6 + $0x1848] sm:$0xff]  ;;  %v1950_v56 = vadd.f32 %v7182_v37, %v7180_v36 }
 0x26b   :  { %3081 = vmatprep.mubr.f32.mxu1 %v595_v47  ;;  %3125 = vmatpush1.msra.mxu0 %v1518_v0  ;;  %v658_v47 = vld [vmem:[%s9398_s1 + $0x5b0] sm:$0xff]  ;;  %v689_v0 = vld [vmem:[%s9398_s1 + $0x6a8] sm:$0xff] }
 0x26c   :  { %3238 = vmatpush1.msra.mxu1 %v1582_v27  ;;  %3126 = vmatprep.subr.mxu0 %v1517_v15  ;;  %v1508_v27 = vld [vmem:[#allocation6 + $0x1840] sm:$0xff]  ;;  %v2063_v37 = vadd.f32 %v7316_v34, %v1950_v56  ;;  %v1570_v34 = vld [vmem:[#allocation6 + $0x1a30] sm:$0xff] }
 0x26d   :  { %3082 = vmatmul.mubr.f32.gmra.mxu1 %v594_v29  ;;  %3239 = vmatprep.subr.mxu1 %v1581_v17  ;;  %v2170_v29 = vadd.f32 %v7313_v22, %v2057_v3  ;;  %v2390_v17 = vadd.f32 %v7449_v8, %v2277_v61  ;;  %v691_v8 = vld [vmem:[%s9398_s1 + $0x6b8] sm:$0xff]  ;;  %v1502_v61 = vld [vmem:[#allocation6 + $0x1810] sm:$0xff]  ;;  %v1564_v56 = vld [vmem:[#allocation6 + $0x1a00] sm:$0xff] }
 0x26e   :  { %2974 = vmatprep.mubr.f32.mxu0 %v625_v40  ;;  %3127 = vmatpush1.msra.mxu0 %v1516_v30  ;;  %v1572_v40 = vld [vmem:[#allocation6 + $0x1a40] sm:$0xff]  ;;  %v2176_v44 = vadd.f32 %v7320_v1, %v2063_v37 }
 0x26f   :  { %3240 = vmatpush1.msra.mxu1 %v1580_v31  ;;  %2975 = vmatmul.mubr.f32.gmra.mxu0 %v624_v58  ;;  %v688_v30 = vld [vmem:[%s9398_s1 + $0x6a0] sm:$0xff]  ;;  %v1571_v31 = vld [vmem:[#allocation6 + $0x1a38] sm:$0xff]  ;;  %v2283_v22 = vadd.f32 %v7455_v25, %v2170_v29  ;;  %v690_v25 = vld [vmem:[%s9398_s1 + $0x6b0] sm:$0xff] }
 0x270   :  { %3128 = vmatprep.subr.mxu0 %v1515_v24  ;;  %3241 = vmatprep.subr.mxu1 %v1579_v7  ;;  %v1506_v7 = vld [vmem:[#allocation6 + $0x1830] sm:$0xff]  ;;  %v2289_v1 = vadd.f32 %v7468_v23, %v2176_v44  ;;  %v1565_v23 = vld [vmem:[#allocation6 + $0x1a08] sm:$0xff]  ;;  %v1563_v29 = vld [vmem:[#allocation6 + $0x19f8] sm:$0xff] }
 0x271   :  { %3087 = vmatprep.mubr.f32.mxu1 %v627_v9  ;;  %3129 = vmatpush1.msra.mxu0 %v1514_v4  ;;  %v1505_v9 = vld [vmem:[#allocation6 + $0x1828] sm:$0xff]  ;;  %v2396_v35 = vadd.f32 %v7465_v57, %v2283_v22  ;;  %v723_v57 = vld [vmem:[%s9398_s1 + $0x7b8] sm:$0xff]  ;;  %v1624_v22 = vld [vmem:[#allocation6 + $0x1be0] sm:$0xff] }
 0x272   :  { %3242 = vmatpush1.msra.mxu1 %v1578_v6  ;;  %3130 = vmatprep.subr.mxu0 %v1513_v48  ;;  %v1569_v6 = vld [vmem:[#allocation6 + $0x1a28] sm:$0xff]  ;;  %v1620_v44 = vld [vmem:[#allocation6 + $0x1bc0] sm:$0xff] }
 0x273   :  { %3088 = vmatmul.mubr.f32.gmra.mxu1 %v626_v39  ;;  %3243 = vmatprep.subr.mxu1 %v1577_v2  ;;  %v1956_v39 = vadd.f32 %v7197_v51, %v7195_v50  ;;  %v721_v2 = vld [vmem:[%s9398_s1 + $0x7a8] sm:$0xff] }
 0x274   :  { %2980 = vmatprep.mubr.f32.mxu0 %v657_v41  ;;  %3131 = vmatpush1.msra.mxu0 %v1512_v38  ;;  %v1504_v41 = vld [vmem:[#allocation6 + $0x1820] sm:$0xff] }
 0x275   :  { %3244 = vmatpush1.msra.mxu1 %v1576_v26  ;;  %2981 = vmatmul.mubr.f32.gmra.mxu0 %v656_v45  ;;  %v1568_v26 = vld [vmem:[#allocation6 + $0x1a20] sm:$0xff]  ;;  %v2069_v51 = vadd.f32 %v7323_v59, %v1956_v39  ;;  %v1621_v39 = vld [vmem:[#allocation6 + $0x1bc8] sm:$0xff] }
 0x276   :  { %3132 = vmatprep.subr.mxu0 %v1511_v43  ;;  %3245 = vmatprep.subr.mxu1 %v1575_v60  ;;  %v720_v45 = vld [vmem:[%s9398_s1 + $0x7a0] sm:$0xff]  ;;  %v1503_v43 = vld [vmem:[#allocation6 + $0x1818] sm:$0xff] }
 0x277   :  { %3093 = vmatprep.mubr.f32.mxu1 %v659_v18  ;;  %3133 = vmatpush1.msra.mxu0 %v1510_v19  ;;  %v2500_v15 = vpop.f32.mrf.mxu0  ;;  %v1567_v60 = vld [vmem:[#allocation6 + $0x1a18] sm:$0xff]  ;;  %v1501_v19 = vld [vmem:[#allocation6 + $0x1808] sm:$0xff] }
 0x278   :  { %3246 = vmatpush1.msra.mxu1 %v1574_v53  ;;  %3134 = vmatprep.subr.mxu0 %v1509_v52  ;;  %v2501_v36 = vadd.f32 %v2500_v15, %v7441_v49  ;;  %v722_v53 = vld [vmem:[%s9398_s1 + $0x7b0] sm:$0xff]  ;;  %v2402_v15 = vadd.f32 %v7472_v5, %v2289_v1  ;;  %v1552_v1 = vld [vmem:[#allocation6 + $0x19a0] sm:$0xff] }
 0x279   :  { %3094 = vmatmul.mubr.f32.gmra.mxu1 %v658_v47  ;;  %3247 = vmatprep.subr.mxu1 %v1573_v62  ;;  %v2613_v58 = vpop.f32.mrf.mxu1  ;;  %v2502_v24 = vpop.f32.mrf.mxu0  ;;  %v2182_v47 = vadd.f32 %v7327_v21, %v2069_v51  ;;  %v1500_v62 = vld [vmem:[#allocation6 + $0x1800] sm:$0xff]  ;;  %v1626_v21 = vld [vmem:[#allocation6 + $0x1bf0] sm:$0xff] }
 0x27a   :  { %2986 = vmatprep.mubr.f32.mxu0 %v689_v0  ;;  %3135 = vmatpush1.msra.mxu0 %v1508_v27  ;;  %v7613_v10 = vadd.f32 %v2613_v58, %v2501_v36  ;;  %v2503_v49 = vadd.f32 %v2502_v24, %v2390_v17  ;;  %v1627_v17 = vld [vmem:[#allocation6 + $0x1bf8] sm:$0xff]  ;;  %v1562_v36 = vld [vmem:[#allocation6 + $0x19f0] sm:$0xff]  ;;  %v1625_v58 = vld [vmem:[#allocation6 + $0x1be8] sm:$0xff] }
 0x27b   :  { %3248 = vmatpush1.msra.mxu1 %v1572_v40  ;;  %2987 = vmatmul.mubr.f32.gmra.mxu0 %v688_v30  ;;  %v2615_v4 = vpop.f32.mrf.mxu1  ;;  %v1560_v24 = vld [vmem:[#allocation6 + $0x19e0] sm:$0xff]  ;;  %v1618_v51 = vld [vmem:[#allocation6 + $0x1bb0] sm:$0xff] }
 0x27c   :  { %3136 = vmatprep.subr.mxu0 %v1507_v28  ;;  %3249 = vmatprep.subr.mxu1 %v1571_v31  ;;  %v7618_v48 = vadd.f32 %v2615_v4, %v2503_v49  ;;  %v2295_v28 = vadd.f32 %v7477_v20, %v2182_v47  ;;  %v1561_v31 = vld [vmem:[#allocation6 + $0x19e8] sm:$0xff]  ;;  %v1622_v20 = vld [vmem:[#allocation6 + $0x1bd0] sm:$0xff] }
 0x27d   :  { %3099 = vmatprep.mubr.f32.mxu1 %v691_v8  ;;  %3137 = vmatpush1.msra.mxu0 %v1506_v7  ;;  %v2506_v38 = vpop.f32.mrf.mxu0  ;;  %v1623_v7 = vld [vmem:[#allocation6 + $0x1bd8] sm:$0xff]  ;;  %v1614_v47 = vld [vmem:[#allocation6 + $0x1b90] sm:$0xff] }
 0x27e   :  { %3250 = vmatpush1.msra.mxu1 %v1570_v34  ;;  %3138 = vmatprep.subr.mxu0 %v1505_v9  ;;  %v2507_v50 = vadd.f32 %v2506_v38, %v7463_v46  ;;  %v1566_v46 = vld [vmem:[#allocation6 + $0x1a10] sm:$0xff]  ;;  %v1556_v38 = vld [vmem:[#allocation6 + $0x19c0] sm:$0xff] }
 0x27f   :  { %3100 = vmatmul.mubr.f32.gmra.mxu1 %v690_v25  ;;  %3251 = vmatprep.subr.mxu1 %v1569_v6  ;;  %v2508_v3 = vpop.f32.mrf.mxu0  ;;  %v1558_v34 = vld [vmem:[#allocation6 + $0x19d0] sm:$0xff]  ;;  %v2408_v25 = vadd.f32 %v7482_v16, %v2295_v28  ;;  %v1557_v6 = vld [vmem:[#allocation6 + $0x19c8] sm:$0xff] }
 0x280   :  { %2992 = vmatprep.mubr.f32.mxu0 %v721_v2  ;;  %3139 = vmatpush1.msra.mxu0 %v1504_v41  ;;  %v2509_v18 = vadd.f32 %v2508_v3, %v2396_v35  ;;  %v1554_v16 = vld [vmem:[#allocation6 + $0x19b0] sm:$0xff] }
 0x281   :  { %3252 = vmatpush1.msra.mxu1 %v1568_v26  ;;  %2993 = vmatmul.mubr.f32.gmra.mxu0 %v720_v45  ;;  %v2619_v59 = vpop.f32.mrf.mxu1  ;;  %v1555_v26 = vld [vmem:[#allocation6 + $0x19b8] sm:$0xff] }
 0x282   :  { %3140 = vmatprep.subr.mxu0 %v1503_v43  ;;  %3253 = vmatprep.subr.mxu1 %v1567_v60  ;;  %v7639_v52 = vadd.f32 %v2619_v59, %v2507_v50  ;;  %v1619_v45 = vld [vmem:[#allocation6 + $0x1bb8] sm:$0xff]  ;;  %v1617_v60 = vld [vmem:[#allocation6 + $0x1ba8] sm:$0xff] }
 0x283   :  { %3105 = vmatprep.mubr.f32.mxu1 %v723_v57  ;;  %3141 = vmatpush1.msra.mxu0 %v1502_v61  ;;  %v2512_v0 = vpop.f32.mrf.mxu0  ;;  %v2621_v27 = vpop.f32.mrf.mxu1  ;;  %v1616_v57 = vld [vmem:[#allocation6 + $0x1ba0] sm:$0xff] }
 0x284   :  { %3254 = vmatpush1.msra.mxu1 %v1566_v46  ;;  %3142 = vmatprep.subr.mxu0 %v1501_v19  ;;  %v2513_v40 = vadd.f32 %v2512_v0, %v7470_v33  ;;  %v7644_v30 = vadd.f32 %v2621_v27, %v2509_v18  ;;  %v1559_v33 = vld [vmem:[#allocation6 + $0x19d8] sm:$0xff]  ;;  %v1613_v0 = vld [vmem:[#allocation6 + $0x1b88] sm:$0xff] }
 0x285   :  { %3106 = vmatmul.mubr.f32.gmra.mxu1 %v722_v53  ;;  %3255 = vmatprep.subr.mxu1 %v1565_v23  ;;  %v2514_v37 = vpop.f32.mrf.mxu0  ;;  %v1551_v46 = vld [vmem:[#allocation6 + $0x1998] sm:$0xff]  ;;  %v1550_v23 = vld [vmem:[#allocation6 + $0x1990] sm:$0xff] }
 0x286   :  { %3143 = vmatpush1.msra.mxu0 %v1500_v62  ;;  %3256 = vmatpush1.msra.mxu1 %v1564_v56  ;;  %v2515_v5 = vadd.f32 %v2514_v37, %v2402_v15  ;;  %v1615_v19 = vld [vmem:[#allocation6 + $0x1b98] sm:$0xff]  ;;  %v1549_v56 = vld [vmem:[#allocation6 + $0x1988] sm:$0xff]  ;;  %v1548_v15 = vld [vmem:[#allocation6 + $0x1980] sm:$0xff] }
 0x287   :  { %3144 = vmatprep.subr.mxu0 %v1563_v29  ;;  %3257 = vmatprep.subr.mxu1 %v1627_v17  ;;  %v2625_v8 = vpop.f32.mrf.mxu1  ;;  %v1612_v29 = vld [vmem:[#allocation6 + $0x1b80] sm:$0xff]  ;;  %v1610_v37 = vld [vmem:[#allocation6 + $0x1b70] sm:$0xff] }
 0x288   :  { %3145 = vmatpush2.msra.mxu0 %v1562_v36  ;;  %3258 = vmatpush2.msra.mxu1 %v1626_v21  ;;  %v7647_v49 = vadd.f32 %v2625_v8, %v2513_v40  ;;  %v1611_v40 = vld [vmem:[#allocation6 + $0x1b78] sm:$0xff]  ;;  %v1546_v21 = vld [vmem:[#allocation6 + $0x1970] sm:$0xff]  ;;  %v1608_v8 = vld [vmem:[#allocation6 + $0x1b60] sm:$0xff] }
 0x289   :  { %3146 = vmatprep.subr.mxu0 %v1561_v31  ;;  %3259 = vmatprep.subr.mxu1 %v1625_v58  ;;  %v2518_v9 = vpop.f32.mrf.mxu0  ;;  %v2627_v4 = vpop.f32.mrf.mxu1  ;;  %v1609_v58 = vld [vmem:[#allocation6 + $0x1b68] sm:$0xff] }
 0x28a   :  { %3147 = vmatpush2.msra.mxu0 %v1560_v24  ;;  %3260 = vmatpush2.msra.mxu1 %v1624_v22  ;;  %v2519_v2 = vadd.f32 %v2518_v9, %v7480_v42  ;;  %v7651_v41 = vadd.f32 %v2627_v4, %v2515_v5  ;;  %v1553_v42 = vld [vmem:[#allocation6 + $0x19a8] sm:$0xff]  ;;  %v1544_v22 = vld [vmem:[#allocation6 + $0x1960] sm:$0xff]  ;;  %v1542_v9 = vld [vmem:[#allocation6 + $0x1950] sm:$0xff] }
 0x28b   :  { %3148 = vmatprep.subr.mxu0 %v1559_v33  ;;  %3261 = vmatprep.subr.mxu1 %v1623_v7  ;;  %v2520_v35 = vpop.f32.mrf.mxu0  ;;  %v1543_v7 = vld [vmem:[#allocation6 + $0x1958] sm:$0xff]  ;;  %v1606_v4 = vld [vmem:[#allocation6 + $0x1b50] sm:$0xff] }
 0x28c   :  { %3149 = vmatpush2.msra.mxu0 %v1558_v34  ;;  %3262 = vmatpush2.msra.mxu1 %v1622_v20  ;;  %v2521_v50 = vadd.f32 %v2520_v35, %v2408_v25  ;;  %v1607_v34 = vld [vmem:[#allocation6 + $0x1b58] sm:$0xff] }
 0x28d   :  { %3150 = vmatprep.subr.mxu0 %v1557_v6  ;;  %3263 = vmatprep.subr.mxu1 %v1621_v39  ;;  %v2631_v43 = vpop.f32.mrf.mxu1  ;;  %v1605_v6 = vld [vmem:[#allocation6 + $0x1b48] sm:$0xff] }
 0x28e   :  { %3151 = vmatpush2.msra.mxu0 %v1556_v38  ;;  %3264 = vmatpush2.msra.mxu1 %v1620_v44  ;;  %v7653_v3 = vadd.f32 %v2631_v43, %v2519_v2  ;;  %v1540_v2 = vld [vmem:[#allocation6 + $0x1940] sm:$0xff] }
 0x28f   :  { %3152 = vmatprep.subr.mxu0 %v1555_v26  ;;  %3265 = vmatprep.subr.mxu1 %v1619_v45  ;;  %v2524_v61 = vpop.f32.mrf.mxu0  ;;  %v2633_v18 = vpop.f32.mrf.mxu1  ;;  %v1604_v38 = vld [vmem:[#allocation6 + $0x1b40] sm:$0xff]  ;;  %v1603_v26 = vld [vmem:[#allocation6 + $0x1b38] sm:$0xff] }
 0x290   :  { %3153 = vmatpush2.msra.mxu0 %v1554_v16  ;;  %3266 = vmatpush2.msra.mxu1 %v1618_v51  ;;  %v2525_v59 = vadd.f32 %v2524_v61, %v7489_v11  ;;  %v7656_v53 = vadd.f32 %v2633_v18, %v2521_v50  ;;  %v1547_v11 = vld [vmem:[#allocation6 + $0x1978] sm:$0xff]  ;;  %v1538_v16 = vld [vmem:[#allocation6 + $0x1930] sm:$0xff]  ;;  %v1600_v61 = vld [vmem:[#allocation6 + $0x1b20] sm:$0xff] }
 0x291   :  { %3154 = vmatprep.subr.mxu0 %v1553_v42  ;;  %3267 = vmatprep.subr.mxu1 %v1617_v60  ;;  %v2526_v62 = vpop.f32.mrf.mxu0  ;;  %v1602_v51 = vld [vmem:[#allocation6 + $0x1b30] sm:$0xff]  ;;  %v1537_v42 = vld [vmem:[#allocation6 + $0x1928] sm:$0xff] }
 0x292   :  { %3155 = vmatpush2.msra.mxu0 %v1552_v1  ;;  %3268 = vmatpush2.msra.mxu1 %v1616_v57  ;;  %v2527_v27 = vadd.f32 %v2526_v62, %v7495_v63  ;;  %v1545_v63 = vld [vmem:[#allocation6 + $0x1968] sm:$0xff]  ;;  %v1536_v57 = vld [vmem:[#allocation6 + $0x1920] sm:$0xff] }
 0x293   :  { %3156 = vmatprep.subr.mxu0 %v1551_v46  ;;  %3269 = vmatprep.subr.mxu1 %v1615_v19  ;;  %v2637_v17 = vpop.f32.mrf.mxu1  ;;  %v1601_v60 = vld [vmem:[#allocation6 + $0x1b28] sm:$0xff]  ;;  %v1599_v46 = vld [vmem:[#allocation6 + $0x1b18] sm:$0xff] }
 0x294   :  { %3157 = vmatpush2.msra.mxu0 %v1550_v23  ;;  %3270 = vmatpush2.msra.mxu1 %v1614_v47  ;;  %v7659_v36 = vadd.f32 %v2637_v17, %v2525_v59  ;;  %v1534_v59 = vld [vmem:[#allocation6 + $0x1910] sm:$0xff] }
 0x295   :  { %3158 = vmatprep.subr.mxu0 %v1549_v56  ;;  %3271 = vmatprep.subr.mxu1 %v1613_v0  ;;  %v2530_v28 = vpop.f32.mrf.mxu0  ;;  %v2639_v31 = vpop.f32.mrf.mxu1  ;;  %v1598_v23 = vld [vmem:[#allocation6 + $0x1b10] sm:$0xff]  ;;  %v1597_v56 = vld [vmem:[#allocation6 + $0x1b08] sm:$0xff] }
 0x296   :  { %3159 = vmatpush2.msra.mxu0 %v1548_v15  ;;  %3272 = vmatpush2.msra.mxu1 %v1612_v29  ;;  %v2531_v5 = vadd.f32 %v2530_v28, %v7498_v32  ;;  %v7662_v24 = vadd.f32 %v2639_v31, %v2527_v27  ;;  %v1541_v32 = vld [vmem:[#allocation6 + $0x1948] sm:$0xff]  ;;  %v1532_v15 = vld [vmem:[#allocation6 + $0x1900] sm:$0xff]  ;;  %v1723_v31 = vld [vmem:[#allocation6 + $0x1ef8] sm:$0xff] }
 0x297   :  { %3160 = vmatprep.subr.mxu0 %v1547_v11  ;;  %3273 = vmatprep.subr.mxu1 %v1611_v40  ;;  %v2532_v33 = vpop.f32.mrf.mxu0  ;;  %v501_v29 = vld [vmem:[%s9398_s1 + $0xc8] sm:$0xff]  ;;  %v1596_v11 = vld [vmem:[#allocation6 + $0x1b00] sm:$0xff] }
 0x298   :  { %3161 = vmatpush2.msra.mxu0 %v1546_v21  ;;  %3274 = vmatpush2.msra.mxu1 %v1610_v37  ;;  %v2533_v20 = vadd.f32 %v2532_v33, %v7504_v55  ;;  %v1539_v55 = vld [vmem:[#allocation6 + $0x1938] sm:$0xff]  ;;  %v500_v40 = vld [vmem:[%s9398_s1 + $0xc0] sm:$0xff]  ;;  %v1721_v33 = vld [vmem:[#allocation6 + $0x1ee8] sm:$0xff] }
 0x299   :  { %3162 = vmatprep.subr.mxu0 %v1545_v63  ;;  %3275 = vmatprep.subr.mxu1 %v1609_v58  ;;  %v2643_v25 = vpop.f32.mrf.mxu1  ;;  %v1659_v37 = vld [vmem:[#allocation6 + $0x1cf8] sm:$0xff]  ;;  %v502_v63 = vld [vmem:[%s9398_s1 + $0xd0] sm:$0xff] }
 0x29a   :  { %3163 = vmatpush2.msra.mxu0 %v1544_v22  ;;  %3276 = vmatpush2.msra.mxu1 %v1608_v8  ;;  %v7665_v39 = vadd.f32 %v2643_v25, %v2531_v5  ;;  %v1722_v5 = vld [vmem:[#allocation6 + $0x1ef0] sm:$0xff]  ;;  %v1657_v8 = vld [vmem:[#allocation6 + $0x1ce8] sm:$0xff]  ;;  %v1655_v25 = vld [vmem:[#allocation6 + $0x1cd8] sm:$0xff] }
 0x29b   :  { %3164 = vmatprep.subr.mxu0 %v1543_v7  ;;  %3277 = vmatprep.subr.mxu1 %v1607_v34  ;;  %v2536_v44 = vpop.f32.mrf.mxu0  ;;  %v2645_v35 = vpop.f32.mrf.mxu1  ;;  %v533_v34 = vld [vmem:[%s9398_s1 + $0x1c8] sm:$0xff] }
 0x29c   :  { %3165 = vmatpush2.msra.mxu0 %v1542_v9  ;;  %3278 = vmatpush2.msra.mxu1 %v1606_v4  ;;  %v2537_v45 = vadd.f32 %v2536_v44, %v7507_v13  ;;  %v7668_v50 = vadd.f32 %v2645_v35, %v2533_v20  ;;  %v1535_v13 = vld [vmem:[#allocation6 + $0x1918] sm:$0xff]  ;;  %v1656_v20 = vld [vmem:[#allocation6 + $0x1ce0] sm:$0xff]  ;;  %v1653_v44 = vld [vmem:[#allocation6 + $0x1cc8] sm:$0xff] }
 0x29d   :  { %3166 = vmatprep.subr.mxu0 %v1541_v32  ;;  %3279 = vmatprep.subr.mxu1 %v1605_v6  ;;  %v2538_v43 = vpop.f32.mrf.mxu0  ;;  %v1720_v9 = vld [vmem:[#allocation6 + $0x1ee0] sm:$0xff]  ;;  %v1719_v32 = vld [vmem:[#allocation6 + $0x1ed8] sm:$0xff]  ;;  %v534_v35 = vld [vmem:[%s9398_s1 + $0x1d0] sm:$0xff] }
 0x29e   :  { %3167 = vmatpush2.msra.mxu0 %v1540_v2  ;;  %3280 = vmatpush2.msra.mxu1 %v1604_v38  ;;  %v2539_v1 = vadd.f32 %v2538_v43, %v7511_v54  ;;  %v1533_v54 = vld [vmem:[#allocation6 + $0x1908] sm:$0xff]  ;;  %v532_v4 = vld [vmem:[%s9398_s1 + $0x1c0] sm:$0xff]  ;;  %v535_v6 = vld [vmem:[%s9398_s1 + $0x1d8] sm:$0xff] }
 0x29f   :  { %3168 = vmatprep.subr.mxu0 %v1539_v55  ;;  %3281 = vmatprep.subr.mxu1 %v1603_v26  ;;  %v2649_v18 = vpop.f32.mrf.mxu1  ;;  %v1654_v2 = vld [vmem:[#allocation6 + $0x1cd0] sm:$0xff]  ;;  %v1717_v55 = vld [vmem:[#allocation6 + $0x1ec8] sm:$0xff]  ;;  %v1651_v43 = vld [vmem:[#allocation6 + $0x1cb8] sm:$0xff] }
 0x2a0   :  { %3169 = vmatpush2.msra.mxu0 %v1538_v16  ;;  %3282 = vmatpush2.msra.mxu1 %v1602_v51  ;;  %v7671_v19 = vadd.f32 %v2649_v18, %v2537_v45  ;;  %v1718_v38 = vld [vmem:[#allocation6 + $0x1ed0] sm:$0xff]  ;;  %v565_v26 = vld [vmem:[%s9398_s1 + $0x2c8] sm:$0xff]  ;;  %v1652_v45 = vld [vmem:[#allocation6 + $0x1cc0] sm:$0xff] }
 0x2a1   :  { %3170 = vmatprep.subr.mxu0 %v1537_v42  ;;  %3283 = vmatprep.subr.mxu1 %v1601_v60  ;;  %v2542_v47 = vpop.f32.mrf.mxu0  ;;  %v2651_v62 = vpop.f32.mrf.mxu1  ;;  %v1716_v16 = vld [vmem:[#allocation6 + $0x1ec0] sm:$0xff]  ;;  %v1715_v42 = vld [vmem:[#allocation6 + $0x1eb8] sm:$0xff]  ;;  %v566_v18 = vld [vmem:[%s9398_s1 + $0x2d0] sm:$0xff] }
 0x2a2   :  { %3171 = vmatpush2.msra.mxu0 %v1536_v57  ;;  %3284 = vmatpush2.msra.mxu1 %v1600_v61  ;;  %v2543_v0 = vadd.f32 %v2542_v47, %v7525_v14  ;;  %v7674_v27 = vadd.f32 %v2651_v62, %v2539_v1  ;;  %v503_v14 = vld [vmem:[%s9398_s1 + $0xd8] sm:$0xff]  ;;  %v564_v51 = vld [vmem:[%s9398_s1 + $0x2c0] sm:$0xff]  ;;  %v1650_v1 = vld [vmem:[#allocation6 + $0x1cb0] sm:$0xff] }
 0x2a3   :  { %3172 = vmatprep.subr.mxu0 %v1535_v13  ;;  %3285 = vmatprep.subr.mxu1 %v1599_v46  ;;  %v2544_v17 = vpop.f32.mrf.mxu0  ;;  %v567_v60 = vld [vmem:[%s9398_s1 + $0x2d8] sm:$0xff]  ;;  %v1714_v57 = vld [vmem:[#allocation6 + $0x1eb0] sm:$0xff]  ;;  %v1649_v61 = vld [vmem:[#allocation6 + $0x1ca8] sm:$0xff] }
 0x2a4   :  { %3173 = vmatpush2.msra.mxu0 %v1534_v59  ;;  %3286 = vmatpush2.msra.mxu1 %v1598_v23  ;;  %v2545_v21 = vadd.f32 %v2544_v17, %v7527_v12  ;;  %v1658_v12 = vld [vmem:[#allocation6 + $0x1cf0] sm:$0xff]  ;;  %v1713_v13 = vld [vmem:[#allocation6 + $0x1ea8] sm:$0xff]  ;;  %v1648_v59 = vld [vmem:[#allocation6 + $0x1ca0] sm:$0xff] }
 0x2a5   :  { %3174 = vmatprep.subr.mxu0 %v1533_v54  ;;  %3287 = vmatprep.subr.mxu1 %v1597_v56  ;;  %v2655_v28 = vpop.f32.mrf.mxu1  ;;  %v597_v46 = vld [vmem:[%s9398_s1 + $0x3c8] sm:$0xff]  ;;  %v1712_v23 = vld [vmem:[#allocation6 + $0x1ea0] sm:$0xff]  ;;  %v1647_v62 = vld [vmem:[#allocation6 + $0x1c98] sm:$0xff] }
 0x2a6   :  { %3175 = vmatpush2.msra.mxu0 %v1532_v15  ;;  %3176 = vmatprep.mubr.f32.mxu0 %v501_v29  ;;  %v7689_v58 = vadd.f32 %v2655_v28, %v2543_v0  ;;  %v596_v47 = vld [vmem:[%s9398_s1 + $0x3c0] sm:$0xff]  ;;  %v1711_v54 = vld [vmem:[#allocation6 + $0x1e98] sm:$0xff]  ;;  %v1646_v0 = vld [vmem:[#allocation6 + $0x1c90] sm:$0xff] }
 0x2a7   :  { %3288 = vmatpush2.msra.mxu1 %v1596_v11  ;;  %3177 = vmatmul.mubr.f32.vlgmr.msra.gmra.mxu0 %v500_v40  ;;  %v2657_v22 = vpop.f32.mrf.mxu1  ;;  %v599_v56 = vld [vmem:[%s9398_s1 + $0x3d8] sm:$0xff]  ;;  %v1710_v15 = vld [vmem:[#allocation6 + $0x1e90] sm:$0xff]  ;;  %v1645_v29 = vld [vmem:[#allocation6 + $0x1c88] sm:$0xff] }
 0x2a8   :  { %3289 = vmatprep.mubr.f32.mxu1 %v503_v14  ;;  %3338 = vmatprep.subr.mxu0 %v1659_v37  ;;  %v7691_v7 = vadd.f32 %v2657_v22, %v2545_v21  ;;  %v598_v17 = vld [vmem:[%s9398_s1 + $0x3d0] sm:$0xff]  ;;  %v1709_v11 = vld [vmem:[#allocation6 + $0x1e88] sm:$0xff]  ;;  %v1644_v21 = vld [vmem:[#allocation6 + $0x1c80] sm:$0xff] }
 0x2a9   :  { %3451 = vmatprep.subr.mxu1 %v1723_v31  ;;  %3290 = vmatmul.mubr.f32.vlgmr.msra.gmra.mxu1 %v502_v63  ;;  %v629_v40 = vld [vmem:[%s9398_s1 + $0x4c8] sm:$0xff]  ;;  %v1708_v14 = vld [vmem:[#allocation6 + $0x1e80] sm:$0xff]  ;;  %v1643_v28 = vld [vmem:[#allocation6 + $0x1c78] sm:$0xff] }
 0x2aa   :  { %3339 = vmatpush1.msra.mxu0 %v1658_v12  ;;  %3452 = vmatpush1.msra.mxu1 %v1722_v5  ;;  %v628_v37 = vld [vmem:[%s9398_s1 + $0x4c0] sm:$0xff]  ;;  %v1707_v31 = vld [vmem:[#allocation6 + $0x1e78] sm:$0xff]  ;;  %v1642_v12 = vld [vmem:[#allocation6 + $0x1c70] sm:$0xff] }
 0x2ab   :  { %3340 = vmatprep.subr.mxu0 %v1657_v8  ;;  %3453 = vmatprep.subr.mxu1 %v1721_v33  ;;  %v631_v63 = vld [vmem:[%s9398_s1 + $0x4d8] sm:$0xff]  ;;  %v1706_v5 = vld [vmem:[#allocation6 + $0x1e70] sm:$0xff]  ;;  %v1641_v22 = vld [vmem:[#allocation6 + $0x1c68] sm:$0xff] }
 0x2ac   :  { %3182 = vmatprep.mubr.f32.mxu0 %v533_v34  ;;  %3341 = vmatpush1.msra.mxu0 %v1656_v20  ;;  %v630_v8 = vld [vmem:[%s9398_s1 + $0x4d0] sm:$0xff]  ;;  %v1705_v33 = vld [vmem:[#allocation6 + $0x1e68] sm:$0xff]  ;;  %v1640_v20 = vld [vmem:[#allocation6 + $0x1c60] sm:$0xff] }
 0x2ad   :  { %3454 = vmatpush1.msra.mxu1 %v1720_v9  ;;  %3183 = vmatmul.mubr.f32.gmra.mxu0 %v532_v4  ;;  %v661_v34 = vld [vmem:[%s9398_s1 + $0x5c8] sm:$0xff]  ;;  %v1704_v9 = vld [vmem:[#allocation6 + $0x1e60] sm:$0xff] }
 0x2ae   :  { %3342 = vmatprep.subr.mxu0 %v1655_v25  ;;  %3455 = vmatprep.subr.mxu1 %v1719_v32  ;;  %v660_v4 = vld [vmem:[%s9398_s1 + $0x5c0] sm:$0xff]  ;;  %v1639_v25 = vld [vmem:[#allocation6 + $0x1c58] sm:$0xff] }
 0x2af   :  { %3295 = vmatprep.mubr.f32.mxu1 %v535_v6  ;;  %3343 = vmatpush1.msra.mxu0 %v1654_v2  ;;  %v1703_v32 = vld [vmem:[#allocation6 + $0x1e58] sm:$0xff]  ;;  %v1638_v2 = vld [vmem:[#allocation6 + $0x1c50] sm:$0xff] }
 0x2b0   :  { %3456 = vmatpush1.msra.mxu1 %v1718_v38  ;;  %3344 = vmatprep.subr.mxu0 %v1653_v44  ;;  %v663_v6 = vld [vmem:[%s9398_s1 + $0x5d8] sm:$0xff]  ;;  %v1702_v38 = vld [vmem:[#allocation6 + $0x1e50] sm:$0xff]  ;;  %v1637_v44 = vld [vmem:[#allocation6 + $0x1c48] sm:$0xff] }
 0x2b1   :  { %3296 = vmatmul.mubr.f32.gmra.mxu1 %v534_v35  ;;  %3457 = vmatprep.subr.mxu1 %v1717_v55  ;;  %v662_v35 = vld [vmem:[%s9398_s1 + $0x5d0] sm:$0xff]  ;;  %v1701_v55 = vld [vmem:[#allocation6 + $0x1e48] sm:$0xff] }
 0x2b2   :  { %3188 = vmatprep.mubr.f32.mxu0 %v565_v26  ;;  %3345 = vmatpush1.msra.mxu0 %v1652_v45  ;;  %v693_v26 = vld [vmem:[%s9398_s1 + $0x6c8] sm:$0xff]  ;;  %v1636_v45 = vld [vmem:[#allocation6 + $0x1c40] sm:$0xff] }
 0x2b3   :  { %3458 = vmatpush1.msra.mxu1 %v1716_v16  ;;  %3189 = vmatmul.mubr.f32.gmra.mxu0 %v564_v51  ;;  %v1700_v51 = vld [vmem:[#allocation6 + $0x1e40] sm:$0xff] }
 0x2b4   :  { %3346 = vmatprep.subr.mxu0 %v1651_v43  ;;  %3459 = vmatprep.subr.mxu1 %v1715_v42  ;;  %v692_v43 = vld [vmem:[%s9398_s1 + $0x6c0] sm:$0xff] }
 0x2b5   :  { %3301 = vmatprep.mubr.f32.mxu1 %v567_v60  ;;  %3347 = vmatpush1.msra.mxu0 %v1650_v1  ;;  %v1635_v60 = vld [vmem:[#allocation6 + $0x1c38] sm:$0xff] }
 0x2b6   :  { %3460 = vmatpush1.msra.mxu1 %v1714_v57  ;;  %3348 = vmatprep.subr.mxu0 %v1649_v61  ;;  %v1699_v1 = vld [vmem:[#allocation6 + $0x1e38] sm:$0xff] }
 0x2b7   :  { %3302 = vmatmul.mubr.f32.gmra.mxu1 %v566_v18  ;;  %3461 = vmatprep.subr.mxu1 %v1713_v13  ;;  %v695_v18 = vld [vmem:[%s9398_s1 + $0x6d8] sm:$0xff]  ;;  %v1634_v13 = vld [vmem:[#allocation6 + $0x1c30] sm:$0xff] }
 0x2b8   :  { %3194 = vmatprep.mubr.f32.mxu0 %v597_v46  ;;  %3349 = vmatpush1.msra.mxu0 %v1648_v59 }
 0x2b9   :  { %3462 = vmatpush1.msra.mxu1 %v1712_v23  ;;  %3195 = vmatmul.mubr.f32.gmra.mxu0 %v596_v47  ;;  %v1633_v23 = vld [vmem:[#allocation6 + $0x1c28] sm:$0xff] }
 0x2ba   :  { %3350 = vmatprep.subr.mxu0 %v1647_v62  ;;  %3463 = vmatprep.subr.mxu1 %v1711_v54  ;;  %v694_v62 = vld [vmem:[%s9398_s1 + $0x6d0] sm:$0xff]  ;;  %v1697_v54 = vld [vmem:[#allocation6 + $0x1e28] sm:$0xff] }
 0x2bb   :  { %3307 = vmatprep.mubr.f32.mxu1 %v599_v56  ;;  %3351 = vmatpush1.msra.mxu0 %v1646_v0  ;;  %v1632_v0 = vld [vmem:[#allocation6 + $0x1c20] sm:$0xff] }
 0x2bc   :  { %3464 = vmatpush1.msra.mxu1 %v1710_v15  ;;  %3352 = vmatprep.subr.mxu0 %v1645_v29  ;;  %v1696_v29 = vld [vmem:[#allocation6 + $0x1e20] sm:$0xff] }
 0x2bd   :  { %3308 = vmatmul.mubr.f32.gmra.mxu1 %v598_v17  ;;  %3465 = vmatprep.subr.mxu1 %v1709_v11  ;;  %v724_v17 = vld [vmem:[%s9398_s1 + $0x7c0] sm:$0xff] }
 0x2be   :  { %3200 = vmatprep.mubr.f32.mxu0 %v629_v40  ;;  %3353 = vmatpush1.msra.mxu0 %v1644_v21  ;;  %v1631_v40 = vld [vmem:[#allocation6 + $0x1c18] sm:$0xff] }
 0x2bf   :  { %3466 = vmatpush1.msra.mxu1 %v1708_v14  ;;  %3201 = vmatmul.mubr.f32.gmra.mxu0 %v628_v37  ;;  %v1695_v21 = vld [vmem:[#allocation6 + $0x1e18] sm:$0xff] }
 0x2c0   :  { %3354 = vmatprep.subr.mxu0 %v1643_v28  ;;  %3467 = vmatprep.subr.mxu1 %v1707_v31  ;;  %v727_v37 = vld [vmem:[%s9398_s1 + $0x7d8] sm:$0xff]  ;;  %v1630_v28 = vld [vmem:[#allocation6 + $0x1c10] sm:$0xff] }
 0x2c1   :  { %3313 = vmatprep.mubr.f32.mxu1 %v631_v63  ;;  %3355 = vmatpush1.msra.mxu0 %v1642_v12  ;;  %v1694_v63 = vld [vmem:[#allocation6 + $0x1e10] sm:$0xff]  ;;  %v1629_v12 = vld [vmem:[#allocation6 + $0x1c08] sm:$0xff] }
 0x2c2   :  { %3468 = vmatpush1.msra.mxu1 %v1706_v5  ;;  %3356 = vmatprep.subr.mxu0 %v1641_v22  ;;  %v1693_v22 = vld [vmem:[#allocation6 + $0x1e08] sm:$0xff] }
 0x2c3   :  { %3314 = vmatmul.mubr.f32.gmra.mxu1 %v630_v8  ;;  %3469 = vmatprep.subr.mxu1 %v1705_v33  ;;  %v1628_v33 = vld [vmem:[#allocation6 + $0x1c00] sm:$0xff] }
 0x2c4   :  { %3206 = vmatprep.mubr.f32.mxu0 %v661_v34  ;;  %3357 = vmatpush1.msra.mxu0 %v1640_v20  ;;  %v1692_v34 = vld [vmem:[#allocation6 + $0x1e00] sm:$0xff] }
 0x2c5   :  { %3470 = vmatpush1.msra.mxu1 %v1704_v9  ;;  %3207 = vmatmul.mubr.f32.gmra.mxu0 %v660_v4  ;;  %v1691_v9 = vld [vmem:[#allocation6 + $0x1df8] sm:$0xff] }
 0x2c6   :  { %3358 = vmatprep.subr.mxu0 %v1639_v25  ;;  %3471 = vmatprep.subr.mxu1 %v1703_v32  ;;  %v1755_v4 = vld [vmem:[#allocation6 + $0x1ff8] sm:$0xff] }
 0x2c7   :  { %3319 = vmatprep.mubr.f32.mxu1 %v663_v6  ;;  %3359 = vmatpush1.msra.mxu0 %v1638_v2  ;;  %v2726_v16 = vpop.f32.mrf.mxu0  ;;  %v1690_v6 = vld [vmem:[#allocation6 + $0x1df0] sm:$0xff] }
 0x2c8   :  { %3472 = vmatpush1.msra.mxu1 %v1702_v38  ;;  %3360 = vmatprep.subr.mxu0 %v1637_v44  ;;  %v2727_v42 = vadd.f32 %v2726_v16, %v7613_v10  ;;  %v1698_v10 = vld [vmem:[#allocation6 + $0x1e30] sm:$0xff]  ;;  %v1689_v44 = vld [vmem:[#allocation6 + $0x1de8] sm:$0xff] }
 0x2c9   :  { %3320 = vmatmul.mubr.f32.gmra.mxu1 %v662_v35  ;;  %3473 = vmatprep.subr.mxu1 %v1701_v55  ;;  %v2839_v57 = vpop.f32.mrf.mxu1  ;;  %v2728_v61 = vpop.f32.mrf.mxu0  ;;  %v1754_v2 = vld [vmem:[#allocation6 + $0x1ff0] sm:$0xff]  ;;  %v1753_v35 = vld [vmem:[#allocation6 + $0x1fe8] sm:$0xff] }
 0x2ca   :  { %3212 = vmatprep.mubr.f32.mxu0 %v693_v26  ;;  %3361 = vmatpush1.msra.mxu0 %v1636_v45  ;;  %v7763_v46 = vadd.f32 %v2839_v57, %v2727_v42  ;;  %v2729_v59 = vadd.f32 %v2728_v61, %v7618_v48  ;;  %v725_v48 = vld [vmem:[%s9398_s1 + $0x7c8] sm:$0xff]  ;;  %v1688_v26 = vld [vmem:[#allocation6 + $0x1de0] sm:$0xff]  ;;  %v1686_v42 = vld [vmem:[#allocation6 + $0x1dd0] sm:$0xff] }
 0x2cb   :  { %3474 = vmatpush1.msra.mxu1 %v1700_v51  ;;  %3213 = vmatmul.mubr.f32.gmra.mxu0 %v692_v43  ;;  %v2841_v47 = vpop.f32.mrf.mxu1  ;;  %v1752_v45 = vld [vmem:[#allocation6 + $0x1fe0] sm:$0xff]  ;;  %v1751_v51 = vld [vmem:[#allocation6 + $0x1fd8] sm:$0xff]  ;;  %v1749_v61 = vld [vmem:[#allocation6 + $0x1fc8] sm:$0xff] }
 0x2cc   :  { %9524 = vst [vmem:[#allocation19_spill] sm:$0xff] %v7763_v46  ;;  %3362 = vmatprep.subr.mxu0 %v1635_v60  ;;  %3475 = vmatprep.subr.mxu1 %v1699_v1  ;;  %v7769_v56 = vadd.f32 %v2841_v47, %v2729_v59  ;;  %v1750_v60 = vld [vmem:[#allocation6 + $0x1fd0] sm:$0xff]  ;;  %v1684_v59 = vld [vmem:[#allocation6 + $0x1dc0] sm:$0xff]  ;;  %v1683_v47 = vld [vmem:[#allocation6 + $0x1db8] sm:$0xff] }
 0x2cd   :  { %3325 = vmatprep.mubr.f32.mxu1 %v695_v18  ;;  %3363 = vmatpush1.msra.mxu0 %v1634_v13  ;;  %v2732_v15 = vpop.f32.mrf.mxu0 }
 0x2ce   :  { %3476 = vmatpush1.msra.mxu1 %v1698_v10  ;;  %3364 = vmatprep.subr.mxu0 %v1633_v23  ;;  %v2733_v11 = vadd.f32 %v2732_v15, %v7639_v52  ;;  %v726_v52 = vld [vmem:[%s9398_s1 + $0x7d0] sm:$0xff]  ;;  %v1748_v10 = vld [vmem:[#allocation6 + $0x1fc0] sm:$0xff] }
 0x2cf   :  { %3326 = vmatmul.mubr.f32.gmra.mxu1 %v694_v62  ;;  %3477 = vmatprep.subr.mxu1 %v1697_v54  ;;  %v2734_v14 = vpop.f32.mrf.mxu0  ;;  %v1747_v62 = vld [vmem:[#allocation6 + $0x1fb8] sm:$0xff] }
 0x2d0   :  { %3218 = vmatprep.mubr.f32.mxu0 %v725_v48  ;;  %3365 = vmatpush1.msra.mxu0 %v1632_v0  ;;  %v2735_v31 = vadd.f32 %v2734_v14, %v7644_v30  ;;  %v1682_v48 = vld [vmem:[#allocation6 + $0x1db0] sm:$0xff] }
 0x2d1   :  { %3478 = vmatpush1.msra.mxu1 %v1696_v29  ;;  %3219 = vmatmul.mubr.f32.gmra.mxu0 %v724_v17  ;;  %v2845_v5 = vpop.f32.mrf.mxu1  ;;  %v1746_v0 = vld [vmem:[#allocation6 + $0x1fb0] sm:$0xff]  ;;  %v1745_v29 = vld [vmem:[#allocation6 + $0x1fa8] sm:$0xff] }
 0x2d2   :  { %3366 = vmatprep.subr.mxu0 %v1631_v40  ;;  %3479 = vmatprep.subr.mxu1 %v1695_v21  ;;  %v7785_v8 = vadd.f32 %v2845_v5, %v2733_v11  ;;  %v1680_v11 = vld [vmem:[#allocation6 + $0x1da0] sm:$0xff] }
 0x2d3   :  { %3331 = vmatprep.mubr.f32.mxu1 %v727_v37  ;;  %3367 = vmatpush1.msra.mxu0 %v1630_v28  ;;  %v2738_v20 = vpop.f32.mrf.mxu0  ;;  %v2847_v30 = vpop.f32.mrf.mxu1  ;;  %v1744_v40 = vld [vmem:[#allocation6 + $0x1fa0] sm:$0xff]  ;;  %v1743_v37 = vld [vmem:[#allocation6 + $0x1f98] sm:$0xff] }
 0x2d4   :  { %3480 = vmatpush1.msra.mxu1 %v1694_v63  ;;  %3368 = vmatprep.subr.mxu0 %v1629_v12  ;;  %v2739_v25 = vadd.f32 %v2738_v20, %v7647_v49  ;;  %v7788_v32 = vadd.f32 %v2847_v30, %v2735_v31  ;;  %v1687_v49 = vld [vmem:[#allocation6 + $0x1dd8] sm:$0xff]  ;;  %v1678_v63 = vld [vmem:[#allocation6 + $0x1d90] sm:$0xff]  ;;  %v1740_v20 = vld [vmem:[#allocation6 + $0x1f80] sm:$0xff] }
 0x2d5   :  { %3332 = vmatmul.mubr.f32.gmra.mxu1 %v726_v52  ;;  %3481 = vmatprep.subr.mxu1 %v1693_v22  ;;  %v2740_v38 = vpop.f32.mrf.mxu0  ;;  %v1742_v12 = vld [vmem:[#allocation6 + $0x1f90] sm:$0xff]  ;;  %v1677_v52 = vld [vmem:[#allocation6 + $0x1d88] sm:$0xff] }
 0x2d6   :  { %3369 = vmatpush1.msra.mxu0 %v1628_v33  ;;  %3482 = vmatpush1.msra.mxu1 %v1692_v34  ;;  %v2741_v55 = vadd.f32 %v2740_v38, %v7651_v41  ;;  %v1685_v41 = vld [vmem:[#allocation6 + $0x1dc8] sm:$0xff]  ;;  %v1676_v34 = vld [vmem:[#allocation6 + $0x1d80] sm:$0xff] }
 0x2d7   :  { %3370 = vmatprep.subr.mxu0 %v1691_v9  ;;  %3483 = vmatprep.subr.mxu1 %v1755_v4  ;;  %v2851_v16 = vpop.f32.mrf.mxu1  ;;  %v1741_v22 = vld [vmem:[#allocation6 + $0x1f88] sm:$0xff]  ;;  %v1739_v9 = vld [vmem:[#allocation6 + $0x1f78] sm:$0xff] }
 0x2d8   :  { %3371 = vmatpush2.msra.mxu0 %v1690_v6  ;;  %3484 = vmatpush2.msra.mxu1 %v1754_v2  ;;  %v7791_v43 = vadd.f32 %v2851_v16, %v2739_v25  ;;  %v1674_v25 = vld [vmem:[#allocation6 + $0x1d70] sm:$0xff] }
 0x2d9   :  { %3372 = vmatprep.subr.mxu0 %v1689_v44  ;;  %3485 = vmatprep.subr.mxu1 %v1753_v35  ;;  %v2744_v1 = vpop.f32.mrf.mxu0  ;;  %v2853_v57 = vpop.f32.mrf.mxu1  ;;  %v1738_v6 = vld [vmem:[#allocation6 + $0x1f70] sm:$0xff]  ;;  %v1737_v44 = vld [vmem:[#allocation6 + $0x1f68] sm:$0xff] }
 0x2da   :  { %3373 = vmatpush2.msra.mxu0 %v1688_v26  ;;  %3486 = vmatpush2.msra.mxu1 %v1752_v45  ;;  %v2745_v18 = vadd.f32 %v2744_v1, %v7653_v3  ;;  %v7794_v13 = vadd.f32 %v2853_v57, %v2741_v55  ;;  %v1681_v3 = vld [vmem:[#allocation6 + $0x1da8] sm:$0xff]  ;;  %v1672_v26 = vld [vmem:[#allocation6 + $0x1d60] sm:$0xff]  ;;  %v1734_v1 = vld [vmem:[#allocation6 + $0x1f50] sm:$0xff] }
 0x2db   :  { %3374 = vmatprep.subr.mxu0 %v1687_v49  ;;  %3487 = vmatprep.subr.mxu1 %v1751_v51  ;;  %v2746_v23 = vpop.f32.mrf.mxu0  ;;  %v1736_v45 = vld [vmem:[#allocation6 + $0x1f60] sm:$0xff]  ;;  %v1671_v49 = vld [vmem:[#allocation6 + $0x1d58] sm:$0xff] }
 0x2dc   :  { %3375 = vmatpush2.msra.mxu0 %v1686_v42  ;;  %3488 = vmatpush2.msra.mxu1 %v1750_v60  ;;  %v2747_v54 = vadd.f32 %v2746_v23, %v7656_v53  ;;  %v1679_v53 = vld [vmem:[#allocation6 + $0x1d98] sm:$0xff]  ;;  %v1670_v60 = vld [vmem:[#allocation6 + $0x1d50] sm:$0xff] }
 0x2dd   :  { %3376 = vmatprep.subr.mxu0 %v1685_v41  ;;  %3489 = vmatprep.subr.mxu1 %v1749_v61  ;;  %v2857_v15 = vpop.f32.mrf.mxu1  ;;  %v1735_v51 = vld [vmem:[#allocation6 + $0x1f58] sm:$0xff]  ;;  %v1733_v41 = vld [vmem:[#allocation6 + $0x1f48] sm:$0xff] }
 0x2de   :  { %3377 = vmatpush2.msra.mxu0 %v1684_v59  ;;  %3490 = vmatpush2.msra.mxu1 %v1748_v10  ;;  %v7797_v17 = vadd.f32 %v2857_v15, %v2745_v18  ;;  %v1668_v18 = vld [vmem:[#allocation6 + $0x1d40] sm:$0xff] }
 0x2df   :  { %3378 = vmatprep.subr.mxu0 %v1683_v47  ;;  %3491 = vmatprep.subr.mxu1 %v1747_v62  ;;  %v2750_v21 = vpop.f32.mrf.mxu0  ;;  %v2859_v14 = vpop.f32.mrf.mxu1  ;;  %v1732_v59 = vld [vmem:[#allocation6 + $0x1f40] sm:$0xff]  ;;  %v1731_v47 = vld [vmem:[#allocation6 + $0x1f38] sm:$0xff] }
 0x2e0   :  { %3379 = vmatpush2.msra.mxu0 %v1682_v48  ;;  %3492 = vmatpush2.msra.mxu1 %v1746_v0  ;;  %v2751_v28 = vadd.f32 %v2750_v21, %v7659_v36  ;;  %v7800_v31 = vadd.f32 %v2859_v14, %v2747_v54  ;;  %v1675_v36 = vld [vmem:[#allocation6 + $0x1d78] sm:$0xff]  ;;  %v1666_v48 = vld [vmem:[#allocation6 + $0x1d30] sm:$0xff]  ;;  %v1728_v21 = vld [vmem:[#allocation6 + $0x1f20] sm:$0xff] }
 0x2e1   :  { %3380 = vmatprep.subr.mxu0 %v1681_v3  ;;  %3493 = vmatprep.subr.mxu1 %v1745_v29  ;;  %v2752_v5 = vpop.f32.mrf.mxu0  ;;  %v1730_v0 = vld [vmem:[#allocation6 + $0x1f30] sm:$0xff]  ;;  %v1665_v3 = vld [vmem:[#allocation6 + $0x1d28] sm:$0xff] }
 0x2e2   :  { %3381 = vmatpush2.msra.mxu0 %v1680_v11  ;;  %3494 = vmatpush2.msra.mxu1 %v1744_v40  ;;  %v2753_v33 = vadd.f32 %v2752_v5, %v7662_v24  ;;  %v1673_v24 = vld [vmem:[#allocation6 + $0x1d68] sm:$0xff]  ;;  %v1664_v40 = vld [vmem:[#allocation6 + $0x1d20] sm:$0xff] }
 0x2e3   :  { %3382 = vmatprep.subr.mxu0 %v1679_v53  ;;  %3495 = vmatprep.subr.mxu1 %v1743_v37  ;;  %v2863_v30 = vpop.f32.mrf.mxu1  ;;  %v1729_v29 = vld [vmem:[#allocation6 + $0x1f28] sm:$0xff]  ;;  %v1727_v53 = vld [vmem:[#allocation6 + $0x1f18] sm:$0xff] }
 0x2e4   :  { %3383 = vmatpush2.msra.mxu0 %v1678_v63  ;;  %3496 = vmatpush2.msra.mxu1 %v1742_v12  ;;  %v7803_v4 = vadd.f32 %v2863_v30, %v2751_v28  ;;  %v1662_v28 = vld [vmem:[#allocation6 + $0x1d10] sm:$0xff] }
 0x2e5   :  { %3384 = vmatprep.subr.mxu0 %v1677_v52  ;;  %3497 = vmatprep.subr.mxu1 %v1741_v22  ;;  %v2756_v2 = vpop.f32.mrf.mxu0  ;;  %v2865_v38 = vpop.f32.mrf.mxu1  ;;  %v1726_v63 = vld [vmem:[#allocation6 + $0x1f10] sm:$0xff]  ;;  %v1725_v52 = vld [vmem:[#allocation6 + $0x1f08] sm:$0xff] }
 0x2e6   :  { %3385 = vmatpush2.msra.mxu0 %v1676_v34  ;;  %3498 = vmatpush2.msra.mxu1 %v1740_v20  ;;  %v2757_v35 = vadd.f32 %v2756_v2, %v7665_v39  ;;  %v7806_v55 = vadd.f32 %v2865_v38, %v2753_v33  ;;  %v1669_v39 = vld [vmem:[#allocation6 + $0x1d48] sm:$0xff]  ;;  %v1660_v34 = vld [vmem:[#allocation6 + $0x1d00] sm:$0xff] }
 0x2e7   :  { %3386 = vmatprep.subr.mxu0 %v1675_v36  ;;  %3499 = vmatprep.subr.mxu1 %v1739_v9  ;;  %v2758_v16 = vpop.f32.mrf.mxu0  ;;  %v505_v20 = vld [vmem:[%s9398_s1 + $0xe8] sm:$0xff]  ;;  %v1724_v36 = vld [vmem:[#allocation6 + $0x1f00] sm:$0xff]  ;;  %v507_v9 = vld [vmem:[%s9398_s1 + $0xf8] sm:$0xff] }
 0x2e8   :  { %3387 = vmatpush2.msra.mxu0 %v1674_v25  ;;  %3500 = vmatpush2.msra.mxu1 %v1738_v6  ;;  %v2759_v42 = vadd.f32 %v2758_v16, %v7668_v50  ;;  %v1667_v50 = vld [vmem:[#allocation6 + $0x1d38] sm:$0xff]  ;;  %v506_v6 = vld [vmem:[%s9398_s1 + $0xf0] sm:$0xff]  ;;  %v537_v38 = vld [vmem:[%s9398_s1 + $0x1e8] sm:$0xff] }
 0x2e9   :  { %3388 = vmatprep.subr.mxu0 %v1673_v24  ;;  %3501 = vmatprep.subr.mxu1 %v1737_v44  ;;  %v2869_v57 = vpop.f32.mrf.mxu1  ;;  %v536_v16 = vld [vmem:[%s9398_s1 + $0x1e0] sm:$0xff] }
 0x2ea   :  { %3389 = vmatpush2.msra.mxu0 %v1672_v26  ;;  %3502 = vmatpush2.msra.mxu1 %v1736_v45  ;;  %v7809_v61 = vadd.f32 %v2869_v57, %v2757_v35  ;;  %v7841_v35 = vld [vmem:[#allocation9 + $0x1e8] sm:$0xff]  ;;  %v7845_v45 = vld [vmem:[#allocation9 + $0x1e0] sm:$0xff] }
 0x2eb   :  { %3390 = vmatprep.subr.mxu0 %v1671_v49  ;;  %3503 = vmatprep.subr.mxu1 %v1735_v51  ;;  %v2762_v10 = vpop.f32.mrf.mxu0  ;;  %v2871_v23 = vpop.f32.mrf.mxu1  ;;  %v538_v49 = vld [vmem:[%s9398_s1 + $0x1f0] sm:$0xff]  ;;  %v569_v51 = vld [vmem:[%s9398_s1 + $0x2e8] sm:$0xff]  ;;  %v568_v57 = vld [vmem:[%s9398_s1 + $0x2e0] sm:$0xff] }
 0x2ec   :  { %3391 = vmatpush2.msra.mxu0 %v1670_v60  ;;  %3504 = vmatpush2.msra.mxu1 %v1734_v1  ;;  %v2763_v62 = vadd.f32 %v2762_v10, %v7671_v19  ;;  %v7812_v54 = vadd.f32 %v2871_v23, %v2759_v42  ;;  %v1663_v19 = vld [vmem:[#allocation6 + $0x1d18] sm:$0xff]  ;;  %v7861_v60 = vld [vmem:[#allocation9 + $0x1c8] sm:$0xff]  ;;  %v7863_v1 = vld [vmem:[#allocation9 + $0x1c0] sm:$0xff] }
 0x2ed   :  { %3392 = vmatprep.subr.mxu0 %v1669_v39  ;;  %3505 = vmatprep.subr.mxu1 %v1733_v41  ;;  %v2764_v15 = vpop.f32.mrf.mxu0  ;;  %v571_v42 = vld [vmem:[%s9398_s1 + $0x2f8] sm:$0xff]  ;;  %v570_v39 = vld [vmem:[%s9398_s1 + $0x2f0] sm:$0xff]  ;;  %v601_v41 = vld [vmem:[%s9398_s1 + $0x3e8] sm:$0xff] }
 0x2ee   :  { %3393 = vmatpush2.msra.mxu0 %v1668_v18  ;;  %3506 = vmatpush2.msra.mxu1 %v1732_v59  ;;  %v2765_v11 = vadd.f32 %v2764_v15, %v7674_v27  ;;  %v1661_v27 = vld [vmem:[#allocation6 + $0x1d08] sm:$0xff]  ;;  %v603_v18 = vld [vmem:[%s9398_s1 + $0x3f8] sm:$0xff] }
 0x2ef   :  { %3394 = vmatprep.subr.mxu0 %v1667_v50  ;;  %3507 = vmatprep.subr.mxu1 %v1731_v47  ;;  %v2875_v14 = vpop.f32.mrf.mxu1  ;;  %v7879_v59 = vld [vmem:[#allocation9 + $0x1a8] sm:$0xff]  ;;  %v7881_v10 = vld [vmem:[#allocation9 + $0x1a0] sm:$0xff]  ;;  %v7883_v23 = vld [vmem:[#allocation9 + $0x1f8] sm:$0xff] }
 0x2f0   :  { %3395 = vmatpush2.msra.mxu0 %v1666_v48  ;;  %3508 = vmatpush2.msra.mxu1 %v1730_v0  ;;  %v7815_v37 = vadd.f32 %v2875_v14, %v2763_v62  ;;  %v600_v50 = vld [vmem:[%s9398_s1 + $0x3e0] sm:$0xff]  ;;  %v602_v47 = vld [vmem:[%s9398_s1 + $0x3f0] sm:$0xff]  ;;  %v633_v48 = vld [vmem:[%s9398_s1 + $0x4e8] sm:$0xff] }
 0x2f1   :  { %3396 = vmatprep.subr.mxu0 %v1665_v3  ;;  %3509 = vmatprep.subr.mxu1 %v1729_v29  ;;  %v2768_v12 = vpop.f32.mrf.mxu0  ;;  %v2877_v5 = vpop.f32.mrf.mxu1  ;;  %v7891_v62 = vld [vmem:[#allocation9 + $0x1f0] sm:$0xff]  ;;  %v7902_v15 = vld [vmem:[#allocation9 + $0x188] sm:$0xff]  ;;  %v7905_v3 = vld [vmem:[#allocation9 + $0x180] sm:$0xff] }
 0x2f2   :  { %3397 = vmatpush2.msra.mxu0 %v1664_v40  ;;  %3510 = vmatpush2.msra.mxu1 %v1728_v21  ;;  %v2769_v22 = vadd.f32 %v2768_v12, %v7689_v58  ;;  %v7818_v33 = vadd.f32 %v2877_v5, %v2765_v11  ;;  %v504_v58 = vld [vmem:[%s9398_s1 + $0xe0] sm:$0xff]  ;;  %v635_v0 = vld [vmem:[%s9398_s1 + $0x4f8] sm:$0xff]  ;;  %v634_v40 = vld [vmem:[%s9398_s1 + $0x4f0] sm:$0xff] }
 0x2f3   :  { %3398 = vmatprep.subr.mxu0 %v1663_v19  ;;  %3511 = vmatprep.subr.mxu1 %v1727_v53  ;;  %v2770_v30 = vpop.f32.mrf.mxu0  ;;  %v7907_v29 = vld [vmem:[#allocation9 + $0x1d8] sm:$0xff]  ;;  %v7915_v21 = vld [vmem:[#allocation9 + $0x1d0] sm:$0xff]  ;;  %v665_v14 = vld [vmem:[%s9398_s1 + $0x5e8] sm:$0xff] }
 0x2f4   :  { %3399 = vmatpush2.msra.mxu0 %v1662_v28  ;;  %3512 = vmatpush2.msra.mxu1 %v1726_v63  ;;  %v2771_v25 = vadd.f32 %v2770_v30, %v7691_v7  ;;  %v539_v7 = vld [vmem:[%s9398_s1 + $0x1f8] sm:$0xff]  ;;  %v632_v11 = vld [vmem:[%s9398_s1 + $0x4e0] sm:$0xff]  ;;  %v7926_v53 = vld [vmem:[#allocation9 + $0x168] sm:$0xff] }
 0x2f5   :  { %3400 = vmatprep.subr.mxu0 %v1661_v27  ;;  %3513 = vmatprep.subr.mxu1 %v1725_v52  ;;  %v2881_v2 = vpop.f32.mrf.mxu1  ;;  %v667_v19 = vld [vmem:[%s9398_s1 + $0x5f8] sm:$0xff]  ;;  %v7931_v63 = vld [vmem:[#allocation9 + $0x160] sm:$0xff]  ;;  %v666_v27 = vld [vmem:[%s9398_s1 + $0x5f0] sm:$0xff] }
 0x2f6   :  { %3401 = vmatpush2.msra.mxu0 %v1660_v34  ;;  %3402 = vmatprep.mubr.f32.mxu0 %v505_v20  ;;  %v7839_v24 = vadd.f32 %v2881_v2, %v2769_v22  ;;  %v7929_v28 = vld [vmem:[#allocation9 + $0x1b8] sm:$0xff]  ;;  %v7933_v12 = vld [vmem:[#allocation9 + $0x1b0] sm:$0xff]  ;;  %v697_v52 = vld [vmem:[%s9398_s1 + $0x6e8] sm:$0xff] }
 0x2f7   :  { %3514 = vmatpush2.msra.mxu1 %v1724_v36  ;;  %3515 = vmatprep.mubr.f32.mxu1 %v507_v9  ;;  %v2883_v44 = vpop.f32.mrf.mxu1  ;;  %v664_v5 = vld [vmem:[%s9398_s1 + $0x5e0] sm:$0xff]  ;;  %v699_v22 = vld [vmem:[%s9398_s1 + $0x6f8] sm:$0xff]  ;;  %v7950_v34 = vld [vmem:[#allocation9 + $0x148] sm:$0xff] }
 0x2f8   :  { %9525 = vst [vmem:[#allocation20_spill] sm:$0xff] %v7839_v24  ;;  %3403 = vmatmul.mubr.f32.vlgmr.msra.gmra.mxu0 %v504_v58  ;;  %3516 = vmatmul.mubr.f32.vlgmr.msra.gmra.mxu1 %v506_v6  ;;  %v7843_v26 = vadd.f32 %v2883_v44, %v2771_v25  ;;  %v7953_v20 = vld [vmem:[#allocation9 + $0x198] sm:$0xff]  ;;  %v7955_v30 = vld [vmem:[#allocation9 + $0x140] sm:$0xff]  ;;  %v7957_v36 = vld [vmem:[#allocation9 + $0x190] sm:$0xff] }
 0x2f9   :  { %3408 = vmatprep.mubr.f32.mxu0 %v537_v38  ;;  %3521 = vmatprep.mubr.f32.mxu1 %v539_v7  ;;  %v696_v9 = vld [vmem:[%s9398_s1 + $0x6e0] sm:$0xff]  ;;  %v698_v25 = vld [vmem:[%s9398_s1 + $0x6f0] sm:$0xff]  ;;  %v729_v58 = vld [vmem:[%s9398_s1 + $0x7e8] sm:$0xff] }
 0x2fa   :  { %9526 = vst [vmem:[#allocation21_spill] sm:$0xff] %v7843_v26  ;;  %4051 = vmatprep.subr.mxu0 %v7841_v35  ;;  %4122 = vmatprep.subr.mxu1 %v7883_v23  ;;  %v731_v6 = vld [vmem:[%s9398_s1 + $0x7f8] sm:$0xff]  ;;  %v7974_v2 = vld [vmem:[#allocation9 + $0x128] sm:$0xff]  ;;  %v7979_v7 = vld [vmem:[#allocation9 + $0x120] sm:$0xff] }
 0x2fb   :  { %4052 = vmatpush1.msra.mxu0 %v7845_v45  ;;  %4123 = vmatpush1.msra.mxu1 %v7891_v62  ;;  %v7977_v38 = vld [vmem:[#allocation9 + $0x178] sm:$0xff]  ;;  %v7981_v44 = vld [vmem:[#allocation9 + $0x170] sm:$0xff]  ;;  %v8064_v24 = vld [vmem:[#allocation9 + $0x40] sm:$0xff] }
 0x2fc   :  { %3409 = vmatmul.mubr.f32.gmra.mxu0 %v536_v16  ;;  %3522 = vmatmul.mubr.f32.gmra.mxu1 %v538_v49  ;;  %v728_v16 = vld [vmem:[%s9398_s1 + $0x7e0] sm:$0xff]  ;;  %v730_v49 = vld [vmem:[%s9398_s1 + $0x7f0] sm:$0xff]  ;;  %9541 = vst [vmem:[#allocation35_spill] sm:$0xff] %v8064_v24  ;;  %s6708_s1 = smov 96  }
 0x2fd   :  { %3414 = vmatprep.mubr.f32.mxu0 %v569_v51  ;;  %3527 = vmatprep.mubr.f32.mxu1 %v571_v42  ;;  %v7990_v51 = vld [vmem:[#allocation9 + $0x108] sm:$0xff]  ;;  %v7993_v42 = vld [vmem:[#allocation9 + $0x158] sm:$0xff] }
 0x2fe   :  { %4053 = vmatprep.subr.mxu0 %v7861_v60  ;;  %4124 = vmatprep.subr.mxu1 %v7907_v29 }
 0x2ff   :  { %4054 = vmatpush1.msra.mxu0 %v7863_v1  ;;  %4125 = vmatpush1.msra.mxu1 %v7915_v21 }
 0x300   :  { %3415 = vmatmul.mubr.f32.gmra.mxu0 %v568_v57  ;;  %3528 = vmatmul.mubr.f32.gmra.mxu1 %v570_v39  ;;  %v7996_v57 = vld [vmem:[#allocation9 + $0x100] sm:$0xff]  ;;  %v7999_v39 = vld [vmem:[#allocation9 + $0x150] sm:$0xff] }
 0x301   :  { %3420 = vmatprep.mubr.f32.mxu0 %v601_v41  ;;  %3533 = vmatprep.mubr.f32.mxu1 %v603_v18  ;;  %v8001_v41 = vld [vmem:[#allocation9 + $0xe8] sm:$0xff]  ;;  %v8003_v18 = vld [vmem:[#allocation9 + $0x138] sm:$0xff] }
 0x302   :  { %4055 = vmatprep.subr.mxu0 %v7879_v59  ;;  %4126 = vmatprep.subr.mxu1 %v7929_v28 }
 0x303   :  { %4056 = vmatpush1.msra.mxu0 %v7881_v10  ;;  %4127 = vmatpush1.msra.mxu1 %v7933_v12 }
 0x304   :  { %3421 = vmatmul.mubr.f32.gmra.mxu0 %v600_v50  ;;  %3534 = vmatmul.mubr.f32.gmra.mxu1 %v602_v47  ;;  %v4015_v50 = vld [vmem:[#allocation9 + $0xe0] sm:$0xff]  ;;  %v8007_v47 = vld [vmem:[#allocation9 + $0x130] sm:$0xff] }
 0x305   :  { %3426 = vmatprep.mubr.f32.mxu0 %v633_v48  ;;  %3539 = vmatprep.mubr.f32.mxu1 %v635_v0  ;;  %v8010_v48 = vld [vmem:[#allocation9 + $0xc8] sm:$0xff]  ;;  %v8013_v0 = vld [vmem:[#allocation9 + $0x118] sm:$0xff] }
 0x306   :  { %4057 = vmatprep.subr.mxu0 %v7902_v15  ;;  %4128 = vmatprep.subr.mxu1 %v7953_v20  ;;  %9527 = vst [vmem:[#allocation22_spill] sm:$0xff] %v8010_v48 }
 0x307   :  { %4058 = vmatpush1.msra.mxu0 %v7905_v3  ;;  %4129 = vmatpush1.msra.mxu1 %v7957_v36 }
 0x308   :  { %3427 = vmatmul.mubr.f32.gmra.mxu0 %v632_v11  ;;  %3540 = vmatmul.mubr.f32.gmra.mxu1 %v634_v40  ;;  %v8018_v40 = vld [vmem:[#allocation9 + $0xc0] sm:$0xff] }
 0x309   :  { %3432 = vmatprep.mubr.f32.mxu0 %v665_v14  ;;  %3545 = vmatprep.mubr.f32.mxu1 %v667_v19  ;;  %9529 = vst [vmem:[#allocation24_spill] sm:$0xff] %v8018_v40  ;;  %v8021_v14 = vld [vmem:[#allocation9 + $0x110] sm:$0xff]  ;;  %v8023_v19 = vld [vmem:[#allocation9 + $0xa8] sm:$0xff] }
 0x30a   :  { %4059 = vmatprep.subr.mxu0 %v7926_v53  ;;  %4130 = vmatprep.subr.mxu1 %v7977_v38  ;;  %9530 = vst [vmem:[#allocation25_spill] sm:$0xff] %v8023_v19 }
 0x30b   :  { %4060 = vmatpush1.msra.mxu0 %v7931_v63  ;;  %4131 = vmatpush1.msra.mxu1 %v7981_v44 }
 0x30c   :  { %3433 = vmatmul.mubr.f32.gmra.mxu0 %v664_v5  ;;  %3546 = vmatmul.mubr.f32.gmra.mxu1 %v666_v27  ;;  %v8026_v5 = vld [vmem:[#allocation9 + $0xf8] sm:$0xff] }
 0x30d   :  { %3438 = vmatprep.mubr.f32.mxu0 %v697_v52  ;;  %3551 = vmatprep.mubr.f32.mxu1 %v699_v22  ;;  %v4007_v22 = vld [vmem:[#allocation9 + $0xa0] sm:$0xff] }
 0x30e   :  { %4061 = vmatprep.subr.mxu0 %v7950_v34  ;;  %4132 = vmatprep.subr.mxu1 %v7993_v42 }
 0x30f   :  { %4062 = vmatpush1.msra.mxu0 %v7955_v30  ;;  %4133 = vmatpush1.msra.mxu1 %v7999_v39 }
 0x310   :  { %3439 = vmatmul.mubr.f32.gmra.mxu0 %v696_v9  ;;  %3552 = vmatmul.mubr.f32.gmra.mxu1 %v698_v25  ;;  %v8032_v9 = vld [vmem:[#allocation9 + $0xf0] sm:$0xff] }
 0x311   :  { %3444 = vmatprep.mubr.f32.mxu0 %v729_v58  ;;  %3557 = vmatprep.mubr.f32.mxu1 %v731_v6  ;;  %v8036_v58 = vld [vmem:[#allocation9 + $0x88] sm:$0xff]  ;;  %v8039_v6 = vld [vmem:[#allocation9 + $0xd8] sm:$0xff] }
 0x312   :  { %4063 = vmatprep.subr.mxu0 %v7974_v2  ;;  %4134 = vmatprep.subr.mxu1 %v8003_v18  ;;  %9532 = vst [vmem:[#allocation27_spill] sm:$0xff] %v8036_v58 }
 0x313   :  { %4064 = vmatpush1.msra.mxu0 %v7979_v7  ;;  %4135 = vmatpush1.msra.mxu1 %v8007_v47 }
 0x314   :  { %3445 = vmatmul.mubr.f32.gmra.mxu0 %v728_v16  ;;  %3558 = vmatmul.mubr.f32.gmra.mxu1 %v730_v49  ;;  %v8042_v49 = vld [vmem:[#allocation9 + $0x80] sm:$0xff] }
 0x315   :  { %4065 = vmatprep.subr.mxu0 %v7990_v51  ;;  %4136 = vmatprep.subr.mxu1 %v8013_v0  ;;  %9533 = vst [vmem:[#allocation28_spill] sm:$0xff] %v8042_v49 }
 0x316   :  { %4066 = vmatpush1.msra.mxu0 %v7996_v57  ;;  %4137 = vmatpush1.msra.mxu1 %v8021_v14 }
 0x317   :  { %v8015_v11 = vpop.f32.mrf.mxu0  ;;  %4067 = vmatprep.subr.mxu0 %v8001_v41  ;;  %4138 = vmatprep.subr.mxu1 %v8026_v5 }
 0x318   :  { %9528 = vst [vmem:[#allocation23_spill] sm:$0xff] %v8015_v11  ;;  %4068 = vmatpush1.msra.mxu0 %v4015_v50  ;;  %4139 = vmatpush1.msra.mxu1 %v8032_v9  ;;  %v3991_v11 = vld [vmem:[#allocation9 + $0x20] sm:$0xff] }
 0x319   :  { %v8028_v27 = vpop.f32.mrf.mxu1  ;;  %v2954_v52 = vpop.f32.mrf.mxu0  ;;  %4069 = vmatprep.subr.mxu0 %v8010_v48  ;;  %v8047_v48 = vld [vmem:[#allocation9 + $0x68] sm:$0xff]  ;;  %4140 = vmatprep.subr.mxu1 %v8039_v6 }
 0x31a   :  { %9531 = vst [vmem:[#allocation26_spill] sm:$0xff] %v8028_v27  ;;  %v2955_v25 = vadd.f32 %v2954_v52, %v7769_v56  ;;  %4070 = vmatpush1.msra.mxu0 %v8018_v40  ;;  %9535 = vst [vmem:[#allocation30_spill] sm:$0xff] %v8047_v48  ;;  %v8050_v56 = vld [vmem:[#allocation9 + $0xd0] sm:$0xff]  ;;  %v3999_v40 = vld [vmem:[#allocation9 + $0x60] sm:$0xff] }
 0x31b   :  { %v3067_v16 = vpop.f32.mrf.mxu1  ;;  %4071 = vmatprep.subr.mxu0 %v8023_v19  ;;  %9536 = vst [vmem:[#allocation31_spill] sm:$0xff] %v8050_v56  ;;  %v8054_v19 = vld [vmem:[#allocation9 + $0xb8] sm:$0xff]  ;;  %4141 = vmatpush1.msra.mxu1 %v8050_v56  ;;  %v3987_v56 = vld [vmem:[#allocation9] sm:$0xff] }
 0x31c   :  { %v8045_v50 = vadd.f32 %v3067_v16, %v2955_v25  ;;  %4072 = vmatpush1.msra.mxu0 %v4007_v22  ;;  %9537 = vst [vmem:[#allocation32_spill] sm:$0xff] %v8054_v19  ;;  %v8058_v25 = vld [vmem:[#allocation9 + $0x48] sm:$0xff]  ;;  %v9539_v22 = vmov 0.0   ;;  %v8061_v16 = vld [vmem:[#allocation9 + $0xb0] sm:$0xff]  ;;  %4142 = vmatprep.subr.mxu1 %v8054_v19 }
 0x31d   :  { %v2958_v52 = vpop.f32.mrf.mxu0  ;;  %4073 = vmatprep.subr.mxu0 %v8036_v58  ;;  %9538 = vst [vmem:[#allocation33_spill] sm:$0xff] %v8058_v25  ;;  %4115 = vmatprep.mubr.f32.mxu0 %v9539_v22  ;;  %9540 = vst [vmem:[#allocation34_spill] sm:$0xff] %v8061_v16  ;;  %v8067_v58 = vld [vmem:[#allocation9 + $0x98] sm:$0xff] }
 0x31e   :  { %9534 = vst [vmem:[#allocation29_spill] sm:$0xff] %v8045_v50  ;;  %v2959_v26 = vadd.f32 %v2958_v52, %v7785_v8  ;;  %4074 = vmatpush1.msra.mxu0 %v8042_v49  ;;  %v8070_v8 = vld [vmem:[#allocation9 + $0x28] sm:$0xff]  ;;  %v8073_v52 = vld [vmem:[#allocation9 + $0x90] sm:$0xff]  ;;  %4143 = vmatpush1.msra.mxu1 %v8061_v16 }
 0x31f   :  { %v2960_v50 = vpop.f32.mrf.mxu0  ;;  %4075 = vmatprep.subr.mxu0 %v8047_v48  ;;  %9542 = vst [vmem:[#allocation36_spill] sm:$0xff] %v8070_v8  ;;  %9543 = vst [vmem:[#allocation37_spill] sm:$0xff] %v8073_v52  ;;  %v8077_v48 = vld [vmem:[#allocation9 + $0x78] sm:$0xff]  ;;  %4144 = vmatprep.subr.mxu1 %v8067_v58 }
 0x320   :  { %v2961_v27 = vadd.f32 %v2960_v50, %v7788_v32  ;;  %4076 = vmatpush1.msra.mxu0 %v3999_v40  ;;  %v3988_v32 = vld [vmem:[#allocation9 + $0x8] sm:$0xff]  ;;  %v8083_v40 = vld [vmem:[#allocation9 + $0x70] sm:$0xff]  ;;  %4145 = vmatpush1.msra.mxu1 %v8073_v52 }
 0x321   :  { %v3071_v49 = vpop.f32.mrf.mxu1  ;;  %4077 = vmatprep.subr.mxu0 %v8058_v25  ;;  %v8087_v25 = vld [vmem:[#allocation9 + $0x58] sm:$0xff]  ;;  %4146 = vmatprep.subr.mxu1 %v8077_v48  ;;  %v8100_v52 = vld [vmem:[#allocation9 + $0x30] sm:$0xff] }
 0x322   :  { %v8079_v46 = vadd.f32 %v3071_v49, %v2959_v26  ;;  %4078 = vmatpush1.msra.mxu0 %v8064_v24  ;;  %v8093_v49 = vld [vmem:[#allocation9 + $0x50] sm:$0xff]  ;;  %4147 = vmatpush1.msra.mxu1 %v8083_v40 }
 0x323   :  { %v2964_v50 = vpop.f32.mrf.mxu0  ;;  %v3073_v19 = vpop.f32.mrf.mxu1  ;;  %4079 = vmatprep.subr.mxu0 %v8070_v8  ;;  %4148 = vmatprep.subr.mxu1 %v8087_v25 }
 0x324   :  { %9544 = vst [vmem:[#allocation38_spill] sm:$0xff] %v8079_v46  ;;  %v2965_v16 = vadd.f32 %v2964_v50, %v7791_v43  ;;  %v8090_v26 = vadd.f32 %v3073_v19, %v2961_v27  ;;  %4080 = vmatpush1.msra.mxu0 %v3991_v11  ;;  %v8096_v46 = vld [vmem:[#allocation9 + $0x38] sm:$0xff]  ;;  %4149 = vmatpush1.msra.mxu1 %v8093_v49  ;;  %v8109_v27 = vld [vmem:[#allocation9 + $0x10] sm:$0xff] }
 0x325   :  { %v2966_v24 = vpop.f32.mrf.mxu0  ;;  %4081 = vmatprep.subr.mxu0 %v3988_v32  ;;  %v8104_v11 = vld [vmem:[#allocation9 + $0x18] sm:$0xff]  ;;  %4150 = vmatprep.subr.mxu1 %v8096_v46 }
 0x326   :  { %v2967_v8 = vadd.f32 %v2966_v24, %v7794_v13  ;;  %4082 = vmatpush1.msra.mxu0 %v3987_v56  ;;  %4186 = vmatprep.mubr.f32.mxu1 %v9539_v22 }
 0x327   :  { %v3077_v43 = vpop.f32.mrf.mxu1  ;;  %4116 = vmatmul.mubr.f32.vlgmr.msra.gmra.mxu0 %v9539_v22  ;;  %4151 = vmatpush1.msra.mxu1 %v8100_v52 }
 0x328   :  { %v8106_v19 = vadd.f32 %v3077_v43, %v2965_v16  ;;  %4301 = vmatprep.subr.mxu0 %v7841_v35  ;;  %4152 = vmatprep.subr.mxu1 %v8104_v11 }
 0x329   :  { %v2970_v13 = vpop.f32.mrf.mxu0  ;;  %v3079_v24 = vpop.f32.mrf.mxu1  ;;  %4302 = vmatpush1.msra.mxu0 %v7845_v45  ;;  %4153 = vmatpush1.msra.mxu1 %v8109_v27 }
 0x32a   :  { %v2971_v56 = vadd.f32 %v2970_v13, %v7797_v17  ;;  %v8115_v32 = vadd.f32 %v3079_v24, %v2967_v8  ;;  %4303 = vmatprep.subr.mxu0 %v7861_v60  ;;  %4187 = vmatmul.mubr.f32.vlgmr.msra.gmra.mxu1 %v9539_v22 }
 0x32b   :  { %v2972_v16 = vpop.f32.mrf.mxu0  ;;  %4372 = vmatprep.subr.mxu1 %v7883_v23  ;;  %4304 = vmatpush1.msra.mxu0 %v7863_v1 }
 0x32c   :  { %v2973_v50 = vadd.f32 %v2972_v16, %v7800_v31  ;;  %4373 = vmatpush1.msra.mxu1 %v7891_v62  ;;  %4305 = vmatprep.subr.mxu0 %v7879_v59 }
 0x32d   :  { %v3083_v35 = vpop.f32.mrf.mxu1  ;;  %4374 = vmatprep.subr.mxu1 %v7907_v29  ;;  %4306 = vmatpush1.msra.mxu0 %v7881_v10 }
 0x32e   :  { %v8126_v17 = vadd.f32 %v3083_v35, %v2971_v56  ;;  %4375 = vmatpush1.msra.mxu1 %v7915_v21  ;;  %4307 = vmatprep.subr.mxu0 %v7902_v15 }
 0x32f   :  { %v2976_v45 = vpop.f32.mrf.mxu0  ;;  %v3085_v8 = vpop.f32.mrf.mxu1  ;;  %4376 = vmatprep.subr.mxu1 %v7929_v28  ;;  %4308 = vmatpush1.msra.mxu0 %v7905_v3 }
 0x330   :  { %v2977_v31 = vadd.f32 %v2976_v45, %v7803_v4  ;;  %v8133_v60 = vadd.f32 %v3085_v8, %v2973_v50  ;;  %4377 = vmatpush1.msra.mxu1 %v7933_v12  ;;  %4309 = vmatprep.subr.mxu0 %v7926_v53 }
 0x331   :  { %v2978_v1 = vpop.f32.mrf.mxu0  ;;  %4378 = vmatprep.subr.mxu1 %v7953_v20  ;;  %4310 = vmatpush1.msra.mxu0 %v7931_v63 }
 0x332   :  { %v2979_v59 = vadd.f32 %v2978_v1, %v7806_v55  ;;  %4379 = vmatpush1.msra.mxu1 %v7957_v36  ;;  %4311 = vmatprep.subr.mxu0 %v7950_v34 }
 0x333   :  { %v3089_v10 = vpop.f32.mrf.mxu1  ;;  %4380 = vmatprep.subr.mxu1 %v7977_v38  ;;  %4312 = vmatpush1.msra.mxu0 %v7955_v30  ;;  %v9545_v30 = vld [vmem:[#allocation31_spill] sm:$0xff]  ;;  %v9547_v38 = vld [vmem:[#allocation34_spill] sm:$0xff] }
 0x334   :  { %v8144_v4 = vadd.f32 %v3089_v10, %v2977_v31  ;;  %4381 = vmatpush1.msra.mxu1 %v7981_v44  ;;  %4313 = vmatprep.subr.mxu0 %v7974_v2  ;;  %v9546_v2 = vld [vmem:[#allocation32_spill] sm:$0xff]  ;;  %v9548_v44 = vld [vmem:[#allocation37_spill] sm:$0xff] }
 0x335   :  { %v2982_v23 = vpop.f32.mrf.mxu0  ;;  %v3091_v62 = vpop.f32.mrf.mxu1  ;;  %4382 = vmatprep.subr.mxu1 %v7993_v42  ;;  %4314 = vmatpush1.msra.mxu0 %v7979_v7 }
 0x336   :  { %v2983_v55 = vadd.f32 %v2982_v23, %v7809_v61  ;;  %v8151_v15 = vadd.f32 %v3091_v62, %v2979_v59  ;;  %4383 = vmatpush1.msra.mxu1 %v7999_v39  ;;  %4315 = vmatprep.subr.mxu0 %v7990_v51 }
 0x337   :  { %v2984_v3 = vpop.f32.mrf.mxu0  ;;  %4384 = vmatprep.subr.mxu1 %v8003_v18  ;;  %4316 = vmatpush1.msra.mxu0 %v7996_v57 }
 0x338   :  { %v2985_v29 = vadd.f32 %v2984_v3, %v7812_v54  ;;  %4385 = vmatpush1.msra.mxu1 %v8007_v47  ;;  %4317 = vmatprep.subr.mxu0 %v8001_v41 }
 0x339   :  { %v3095_v21 = vpop.f32.mrf.mxu1  ;;  %4386 = vmatprep.subr.mxu1 %v8013_v0  ;;  %4365 = vmatprep.mubr.f32.mxu0 %v9539_v22 }
 0x33a   :  { %v8162_v61 = vadd.f32 %v3095_v21, %v2983_v55  ;;  %4387 = vmatpush1.msra.mxu1 %v8021_v14  ;;  %4436 = vmatprep.mubr.f32.mxu1 %v9539_v22 }
 0x33b   :  { %v2988_v53 = vpop.f32.mrf.mxu0  ;;  %v3097_v28 = vpop.f32.mrf.mxu1  ;;  %4388 = vmatprep.subr.mxu1 %v8026_v5 }
 0x33c   :  { %v2989_v54 = vadd.f32 %v2988_v53, %v7815_v37  ;;  %v8169_v63 = vadd.f32 %v3097_v28, %v2985_v29  ;;  %4389 = vmatpush1.msra.mxu1 %v8032_v9 }
 0x33d   :  { %v2990_v12 = vpop.f32.mrf.mxu0  ;;  %4390 = vmatprep.subr.mxu1 %v8039_v6 }
 0x33e   :  { %v2991_v34 = vadd.f32 %v2990_v12, %v7818_v33  ;;  %4391 = vmatpush1.msra.mxu1 %v9545_v30 }
 0x33f   :  { %v3101_v20 = vpop.f32.mrf.mxu1  ;;  %4392 = vmatprep.subr.mxu1 %v9546_v2  ;;  %v9552_v2 = vld [vmem:[#allocation26_spill] sm:$0xff] }
 0x340   :  { %v8177_v36 = vadd.f32 %v3101_v20, %v2989_v54  ;;  %4393 = vmatpush1.msra.mxu1 %v9547_v38 }
 0x341   :  { %v3103_v37 = vpop.f32.mrf.mxu1  ;;  %4394 = vmatprep.subr.mxu1 %v8067_v58  ;;  %v8193_v33 = vpop.f32.mrf.mxu0 }
 0x342   :  { %v8181_v7 = vadd.f32 %v3103_v37, %v2991_v34  ;;  %4395 = vmatpush1.msra.mxu1 %v9548_v44  ;;  %v9551_v34 = vld [vmem:[#allocation23_spill] sm:$0xff] }
 0x343   :  { %4396 = vmatprep.subr.mxu1 %v8077_v48  ;;  %v8197_v42 = vpop.f32.mrf.mxu0  ;;  %v9549_v48 = vld [vmem:[#allocation38_spill] sm:$0xff] }
 0x344   :  { %4397 = vmatpush1.msra.mxu1 %v8083_v40 }
 0x345   :  { %4398 = vmatprep.subr.mxu1 %v8087_v25  ;;  %v8195_v51 = vpop.f32.mrf.mxu1 }
 0x346   :  { %4399 = vmatpush1.msra.mxu1 %v8093_v49 }
 0x347   :  { %4400 = vmatprep.subr.mxu1 %v8096_v46  ;;  %v8199_v57 = vpop.f32.mrf.mxu1 }
 0x348   :  { %4401 = vmatpush1.msra.mxu1 %v8100_v52 }
 0x349   :  { %4402 = vmatprep.subr.mxu1 %v8104_v11 }
 0x34a   :  { %4403 = vmatpush1.msra.mxu1 %v8109_v27 }
 0x367   :  { %v3178_v39 = vpop.f32.mrf.mxu0 }
 0x369   :  { %v3291_v41 = vpop.f32.mrf.mxu1  ;;  %v8201_v18 = vpop.f32.mrf.mxu0 }
 0x36b   :  { %v8203_v47 = vpop.f32.mrf.mxu1 }
 0x36d   :  { %v3184_v46 = vpop.f32.mrf.mxu0 }
 0x36e   :  { %v3185_v0 = vadd.f32 %v3184_v46, %v9549_v48 }
 0x36f   :  { %v3186_v14 = vpop.f32.mrf.mxu0 }
 0x370   :  { %v3187_v5 = vadd.f32 %v3186_v14, %v8090_v26 }
 0x371   :  { %v3297_v9 = vpop.f32.mrf.mxu1 }
 0x372   :  { %v8207_v58 = vadd.f32 %v3297_v9, %v3185_v0 }
 0x373   :  { %v3190_v6 = vpop.f32.mrf.mxu0  ;;  %v3299_v25 = vpop.f32.mrf.mxu1 }
 0x374   :  { %v3191_v52 = vadd.f32 %v3190_v6, %v8106_v19  ;;  %v8210_v40 = vadd.f32 %v3299_v25, %v3187_v5 }
 0x375   :  { %v3192_v49 = vpop.f32.mrf.mxu0 }
 0x376   :  { %v3193_v43 = vadd.f32 %v3192_v49, %v8115_v32 }
 0x377   :  { %v3303_v11 = vpop.f32.mrf.mxu1 }
 0x378   :  { %v3304_v27 = vadd.f32 %v3303_v11, %v3191_v52 }
 0x379   :  { %v3196_v13 = vpop.f32.mrf.mxu0  ;;  %v3305_v24 = vpop.f32.mrf.mxu1 }
 0x37a   :  { %v3197_v56 = vadd.f32 %v3196_v13, %v8126_v17  ;;  %v3306_v16 = vadd.f32 %v3305_v24, %v3193_v43 }
 0x37b   :  { %v3198_v26 = vpop.f32.mrf.mxu0 }
 0x37c   :  { %v3199_v50 = vadd.f32 %v3198_v26, %v8133_v60 }
 0x37d   :  { %v3309_v35 = vpop.f32.mrf.mxu1 }
 0x37e   :  { %v3310_v45 = vadd.f32 %v3309_v35, %v3197_v56 }
 0x37f   :  { %v3202_v8 = vpop.f32.mrf.mxu0  ;;  %v3311_v31 = vpop.f32.mrf.mxu1 }
 0x380   :  { %v3203_v19 = vadd.f32 %v3202_v8, %v8144_v4  ;;  %v3312_v1 = vadd.f32 %v3311_v31, %v3199_v50 }
 0x381   :  { %v3204_v59 = vpop.f32.mrf.mxu0 }
 0x382   :  { %v3205_v32 = vadd.f32 %v3204_v59, %v8151_v15  ;;  %v9550_v15 = vld [vmem:[#allocation19_spill] sm:$0xff] }
 0x383   :  { %v3315_v10 = vpop.f32.mrf.mxu1  ;;  %v2953_v20 = vadd.f32 %v9551_v34, %v9550_v15 }
 0x384   :  { %v3316_v23 = vadd.f32 %v3315_v10, %v3203_v19 }
 0x385   :  { %v3208_v62 = vpop.f32.mrf.mxu0  ;;  %v3317_v55 = vpop.f32.mrf.mxu1  ;;  %v3066_v37 = vadd.f32 %v9552_v2, %v2953_v20 }
 0x386   :  { %v3209_v17 = vadd.f32 %v3208_v62, %v8162_v61  ;;  %v3318_v3 = vadd.f32 %v3317_v55, %v3205_v32 }
 0x387   :  { %v3210_v29 = vpop.f32.mrf.mxu0  ;;  %v3179_v44 = vadd.f32 %v3178_v39, %v3066_v37 }
 0x388   :  { %v3211_v60 = vadd.f32 %v3210_v29, %v8169_v63 }
 0x389   :  { %v3321_v21 = vpop.f32.mrf.mxu1  ;;  %v3292_v0 = vadd.f32 %v3291_v41, %v3179_v44 }
 0x38a   :  { %v8219_v53 = vadd.f32 %v3321_v21, %v3209_v17 }
 0x38b   :  { %v3323_v28 = vpop.f32.mrf.mxu1  ;;  %v8223_v4 = vpop.f32.mrf.mxu0 }
 0x38c   :  { %v8221_v54 = vadd.f32 %v3323_v28, %v3211_v60  ;;  %v9553_v60 = vld [vmem:[#allocation20_spill] sm:$0xff] }
 0x38d   :  { %v8229_v30 = vpop.f32.mrf.mxu0 }
 0x38f   :  { %v8225_v12 = vpop.f32.mrf.mxu1 }
 0x391   :  { %v8231_v61 = vpop.f32.mrf.mxu1  ;;  %v3220_v63 = vpop.f32.mrf.mxu0 }
 0x393   :  { %v3222_v46 = vpop.f32.mrf.mxu0 }
 0x395   :  { %v3333_v38 = vpop.f32.mrf.mxu1 }
 0x397   :  { %v3335_v48 = vpop.f32.mrf.mxu1 }
 0x3b8   :  { %v3404_v14 = vpop.f32.mrf.mxu0  ;;  %v3517_v5 = vpop.f32.mrf.mxu1 }
 0x3b9   :  { %v3405_v9 = vadd.f32 %v3404_v14, %v3292_v0 }
 0x3ba   :  { %v3406_v6 = vpop.f32.mrf.mxu0  ;;  %v8234_v25 = vpop.f32.mrf.mxu1 }
 0x3bb   :  { %v8236_v52 = vadd.f32 %v3517_v5, %v3405_v9 }
 0x3bc   :  { %v8238_v49 = vpop.f32.mrf.mxu0  ;;  %v8240_v43 = vpop.f32.mrf.mxu1 }
 0x3bd   :  { %3678 = vrot.lane.b32.xlu1 %v8236_v52, %s6708_s1  ;;  %3580 = vrot.lane.b32.xlu0 %v8236_v52, %s6700_s26 }
 0x3be   :  { %v8246_v39 = vpop.f32.mrf.mxu0  ;;  %v8248_v41 = vpop.f32.mrf.mxu1 }
 0x3c0   :  { %v3416_v11 = vpop.f32.mrf.mxu0  ;;  %v3529_v13 = vpop.f32.mrf.mxu1 }
 0x3c1   :  { %v3417_v24 = vadd.f32 %v3416_v11, %v3304_v27  ;;  %v2995_v27 = vadd.f32 %v8193_v33, %v9553_v60  ;;  %v9554_v33 = vld [vmem:[#allocation21_spill] sm:$0xff] }
 0x3c2   :  { %v3418_v56 = vpop.f32.mrf.mxu0  ;;  %v3531_v26 = vpop.f32.mrf.mxu1  ;;  %v2997_v14 = vadd.f32 %v8197_v42, %v9554_v33  ;;  %v3670_v33 = vld [vmem:[#allocation2 + $0x8] sm:$0xff] }
 0x3c3   :  { %v8250_v50 = vadd.f32 %v3529_v13, %v3417_v24  ;;  %v3419_v35 = vadd.f32 %v3418_v56, %v3306_v16  ;;  %v3108_v37 = vadd.f32 %v8195_v51, %v2995_v27  ;;  %v8383_v27 = vld [vmem:[#allocation9 + $0x60] sm:$0xff] }
 0x3c4   :  { %v3422_v8 = vpop.f32.mrf.mxu0  ;;  %v3535_v31 = vpop.f32.mrf.mxu1 }
 0x3c5   :  { %v8252_v19 = vadd.f32 %v3531_v26, %v3419_v35  ;;  %v3423_v59 = vadd.f32 %v3422_v8, %v3310_v45  ;;  %v9555_v26 = vld [vmem:[#allocation29_spill] sm:$0xff] }
 0x3c6   :  { %v3424_v32 = vpop.f32.mrf.mxu0  ;;  %v3537_v10 = vpop.f32.mrf.mxu1  ;;  %v3181_v51 = vadd.f32 %v8201_v18, %v9555_v26  ;;  %v3571_v26 = vld [vmem:[#allocation2 + $0xe0] sm:$0xff] }
 0x3c7   :  { %v8254_v62 = vadd.f32 %v3535_v31, %v3423_v59  ;;  %v3425_v55 = vadd.f32 %v3424_v32, %v3312_v1 }
 0x3c8   :  { %v3428_v17 = vpop.f32.mrf.mxu0  ;;  %v3541_v29 = vpop.f32.mrf.mxu1  ;;  %v3294_v42 = vadd.f32 %v8203_v47, %v3181_v51 }
 0x3c9   :  { %v8258_v21 = vadd.f32 %v3537_v10, %v3425_v55  ;;  %v3429_v28 = vadd.f32 %v3428_v17, %v3316_v23  ;;  %v3221_v23 = vadd.f32 %v3220_v63, %v3108_v37  ;;  %v9557_v55 = vld [vmem:[#allocation24_spill] sm:$0xff]  ;;  %v8367_v17 = vld [vmem:[#allocation9 + $0xa0] sm:$0xff] }
 0x3ca   :  { %v3430_v15 = vpop.f32.mrf.mxu0  ;;  %v3543_v16 = vpop.f32.mrf.mxu1  ;;  %v8397_v37 = vld [vmem:[#allocation9 + $0x8] sm:$0xff] }
 0x3cb   :  { %v8260_v34 = vadd.f32 %v3541_v29, %v3429_v28  ;;  %v3431_v20 = vadd.f32 %v3430_v15, %v3318_v3  ;;  %v3110_v3 = vadd.f32 %v8199_v57, %v2997_v14  ;;  %v3334_v24 = vadd.f32 %v3333_v38, %v3221_v23  ;;  %v9558_v29 = vld [vmem:[#allocation25_spill] sm:$0xff]  ;;  %v9560_v28 = vld [vmem:[#allocation28_spill] sm:$0xff]  ;;  %v9561_v15 = vld [vmem:[#allocation30_spill] sm:$0xff] }
 0x3cc   :  { %v3434_v2 = vpop.f32.mrf.mxu0  ;;  %v8262_v45 = vpop.f32.mrf.mxu1  ;;  %v3407_v57 = vadd.f32 %v3406_v6, %v3294_v42  ;;  %v3564_v23 = vld [vmem:[#allocation2] sm:$0xff] }
 0x3cd   :  { %v8265_v44 = vadd.f32 %v3543_v16, %v3431_v20  ;;  %v3223_v35 = vadd.f32 %v3222_v46, %v3110_v3  ;;  %v9562_v16 = vld [vmem:[#allocation33_spill] sm:$0xff]  ;;  %v9563_v20 = vld [vmem:[#allocation35_spill] sm:$0xff] }
 0x3ce   :  { %v8267_v1 = vpop.f32.mrf.mxu0  ;;  %v8269_v0 = vpop.f32.mrf.mxu1  ;;  %v8288_v46 = vadd.f32 %v8234_v25, %v3407_v57  ;;  %v3411_v25 = vadd.f32 %v8238_v49, %v8207_v58  ;;  %v3413_v49 = vadd.f32 %v8246_v39, %v8210_v40  ;;  %v3435_v40 = vadd.f32 %v3434_v2, %v8219_v53  ;;  %v8356_v39 = vld [vmem:[#allocation9 + $0xe0] sm:$0xff] }
 0x3cf   :  { %v3336_v63 = vadd.f32 %v3335_v48, %v3223_v35  ;;  %v3215_v48 = vadd.f32 %v8223_v4, %v8177_v36  ;;  %4318 = vmatpush1.msra.mxu0 %v8356_v39  ;;  %v3437_v53 = vadd.f32 %v8267_v1, %v8221_v54  ;;  %v9559_v54 = vld [vmem:[#allocation27_spill] sm:$0xff] }
 0x3d0   :  { %v3440_v5 = vpop.f32.mrf.mxu0  ;;  %v3553_v9 = vpop.f32.mrf.mxu1  ;;  %v8310_v36 = vadd.f32 %v8240_v43, %v3411_v25  ;;  %v8394_v2 = vld [vmem:[#allocation9 + $0x20] sm:$0xff] }
 0x3d1   :  { %v3328_v6 = vadd.f32 %v8225_v12, %v3215_v48  ;;  %v3217_v12 = vadd.f32 %v8229_v30, %v8181_v7  ;;  %v8332_v7 = vadd.f32 %v8248_v41, %v3413_v49  ;;  %v9556_v41 = vld [vmem:[#allocation22_spill] sm:$0xff]  ;;  %v8375_v60 = vadd.f32 %v8269_v0, %v3437_v53 }
 0x3d2   :  { %v3442_v11 = vpop.f32.mrf.mxu0  ;;  %v3555_v13 = vpop.f32.mrf.mxu1  ;;  %4319 = vmatprep.subr.mxu0 %v9556_v41  ;;  %v8403_v1 = vld [vmem:[#allocation9] sm:$0xff]  ;;  %v3853_v41 = vld [vmem:[#allocation2 + $0xf8] sm:$0xff] }
 0x3d3   :  { %v3441_v10 = vadd.f32 %v3440_v5, %v3328_v6  ;;  %v3330_v58 = vadd.f32 %v8231_v61, %v3217_v12  ;;  %v8350_v61 = vadd.f32 %v8262_v45, %v3435_v40  ;;  %4320 = vmatpush1.msra.mxu0 %v9557_v55  ;;  %v9564_v45 = vld [vmem:[#allocation36_spill] sm:$0xff]  ;;  %v3846_v40 = vld [vmem:[#allocation2 + $0x18] sm:$0xff] }
 0x3d4   :  { %v3446_v56 = vpop.f32.mrf.mxu0  ;;  %v3559_v31 = vpop.f32.mrf.mxu1  ;;  %4321 = vmatprep.subr.mxu0 %v9558_v29 }
 0x3d5   :  { %v3447_v8 = vadd.f32 %v3446_v56, %v3334_v24  ;;  %v8312_v4 = vadd.f32 %v3553_v9, %v3441_v10  ;;  %v3443_v43 = vadd.f32 %v3442_v11, %v3330_v58  ;;  %4322 = vmatpush1.msra.mxu0 %v8367_v17  ;;  %v3677_v24 = vld [vmem:[#allocation2 + $0xe8] sm:$0xff] }
 0x3d6   :  { %v3448_v32 = vpop.f32.mrf.mxu0  ;;  %v3561_v18 = vpop.f32.mrf.mxu1  ;;  %4323 = vmatprep.subr.mxu0 %v9559_v54 }
 0x3d7   :  { %v8276_v59 = vadd.f32 %v3559_v31, %v3447_v8  ;;  %v3449_v38 = vadd.f32 %v3448_v32, %v3336_v63  ;;  %v8334_v30 = vadd.f32 %v3555_v13, %v3443_v43  ;;  %4324 = vmatpush1.msra.mxu0 %v9560_v28  ;;  %v9565_v63 = vlaneseq }
 0x3d8   :  { %4325 = vmatprep.subr.mxu0 %v9561_v15 }
 0x3d9   :  { %3692 = vrot.lane.b32.xlu1 %v8276_v59, %s6708_s1  ;;  %3594 = vrot.lane.b32.xlu0 %v8276_v59, %s6700_s26  ;;  %v8290_v47 = vadd.f32 %v3561_v18, %v3449_v38  ;;  %v8439_v57 = vand.u32 127, %v9565_v63  ;;  %v3749_v18 = vld [vmem:[#allocation2 + $0xf0] sm:$0xff] }
 0x3da   :  { %4326 = vmatpush1.msra.mxu0 %v8383_v27 }
 0x3db   :  { %4327 = vmatprep.subr.mxu0 %v9562_v16  ;;  %9566 = vst [vmem:[#allocation31_spill] sm:$0xff] %v8439_v57  ;;  %v3920_v58 = vadd.s32 128, %v8439_v57  ;;  %vm3971_vm2 = vcmp.lt.s32.totalorder %v8439_v57, 64 }
 0x3dc   :  { %4328 = vmatpush1.msra.mxu0 %v9563_v20 }
 0x3dd   :  { %3643 = vrot.lane.b32.xlu1 %v8276_v59, %s6709_s22  ;;  %3629 = vrot.lane.b32.xlu0 %v8236_v52, %s6709_s22  ;;  %v3934_v28 = vand.u32 127, %v3920_v58  ;;  %v3671_v58 = vld [vmem:[#allocation2 + $0x28] sm:$0xff] }
 0x3de   :  { %4329 = vmatprep.subr.mxu0 %v9564_v45 }
 0x3df   :  { %4330 = vmatpush1.msra.mxu0 %v8394_v2  ;;  %vm8451_vm3 = vcmp.lt.s32.totalorder %v3934_v28, 64 }
 0x3e0   :  { %4331 = vmatprep.subr.mxu0 %v8397_v37 }
 0x3e1   :  { %3758 = vrot.lane.b32.xlu0 %v8288_v46, %s6700_s26  ;;  %3772 = vrot.lane.b32.xlu1 %v8290_v47, %s6700_s26 }
 0x3e2   :  { %4332 = vmatpush1.msra.mxu0 %v8403_v1 }
 0x3e5   :  { %3854 = vrot.lane.b32.xlu0 %v8288_v46, %s6708_s1  ;;  %3868 = vrot.lane.b32.xlu1 %v8290_v47, %s6708_s1 }
 0x3e7   :  { %v4117_v16 = vpop.f32.mrf.mxu0 }
 0x3e9   :  { %3806 = vrot.lane.b32.xlu0 %v8288_v46, %s6709_s22  ;;  %3820 = vrot.lane.b32.xlu1 %v8290_v47, %s6709_s22 }
 0x3ed   :  { %3582 = vrot.lane.b32.xlu0 %v8310_v36, %s6700_s26  ;;  %3592 = vrot.lane.b32.xlu1 %v8312_v4, %s6700_s26 }
 0x3f1   :  { %3680 = vrot.lane.b32.xlu0 %v8310_v36, %s6708_s1  ;;  %3690 = vrot.lane.b32.xlu1 %v8312_v4, %s6708_s1 }
 0x3f5   :  { %3631 = vrot.lane.b32.xlu0 %v8310_v36, %s6709_s22  ;;  %3641 = vrot.lane.b32.xlu1 %v8312_v4, %s6709_s22 }
 0x3f9   :  { %3760 = vrot.lane.b32.xlu0 %v8332_v7, %s6700_s26  ;;  %3770 = vrot.lane.b32.xlu1 %v8334_v30, %s6700_s26 }
 0x3fd   :  { %3856 = vrot.lane.b32.xlu0 %v8332_v7, %s6708_s1  ;;  %3866 = vrot.lane.b32.xlu1 %v8334_v30, %s6708_s1 }
 0x401   :  { %3808 = vrot.lane.b32.xlu0 %v8332_v7, %s6709_s22  ;;  %3818 = vrot.lane.b32.xlu1 %v8334_v30, %s6709_s22 }
 0x405   :  { %3584 = vrot.lane.b32.xlu0 %v8250_v50, %s6700_s26  ;;  %3590 = vrot.lane.b32.xlu1 %v8350_v61, %s6700_s26 }
 0x409   :  { %3682 = vrot.lane.b32.xlu0 %v8250_v50, %s6708_s1  ;;  %3688 = vrot.lane.b32.xlu1 %v8350_v61, %s6708_s1 }
 0x40d   :  { %3633 = vrot.lane.b32.xlu0 %v8250_v50, %s6709_s22  ;;  %3639 = vrot.lane.b32.xlu1 %v8350_v61, %s6709_s22 }
 0x411   :  { %3762 = vrot.lane.b32.xlu0 %v8252_v19, %s6700_s26  ;;  %3768 = vrot.lane.b32.xlu1 %v8375_v60, %s6700_s26 }
 0x415   :  { %3858 = vrot.lane.b32.xlu0 %v8252_v19, %s6708_s1  ;;  %3864 = vrot.lane.b32.xlu1 %v8375_v60, %s6708_s1 }
 0x419   :  { %3810 = vrot.lane.b32.xlu0 %v8252_v19, %s6709_s22  ;;  %3816 = vrot.lane.b32.xlu1 %v8375_v60, %s6709_s22 }
 0x41d   :  { %3586 = vrot.lane.b32.xlu0 %v8254_v62, %s6700_s26  ;;  %3588 = vrot.lane.b32.xlu1 %v8260_v34, %s6700_s26 }
 0x421   :  { %3684 = vrot.lane.b32.xlu0 %v8254_v62, %s6708_s1  ;;  %3686 = vrot.lane.b32.xlu1 %v8260_v34, %s6708_s1 }
 0x425   :  { %3635 = vrot.lane.b32.xlu0 %v8254_v62, %s6709_s22  ;;  %3637 = vrot.lane.b32.xlu1 %v8260_v34, %s6709_s22 }
 0x429   :  { %3764 = vrot.lane.b32.xlu0 %v8258_v21, %s6700_s26  ;;  %3766 = vrot.lane.b32.xlu1 %v8265_v44, %s6700_s26 }
 0x42d   :  { %3860 = vrot.lane.b32.xlu0 %v8258_v21, %s6708_s1  ;;  %3862 = vrot.lane.b32.xlu1 %v8265_v44, %s6708_s1 }
 0x42f   :  { %v3679_v0 = vpop.permute.xlu1 %3678  ;;  %v3581_v14 = vpop.permute.xlu0 %3580 }
 0x430   :  { %v3702_v5 = vadd.f32 %v3679_v0, %v3670_v33  ;;  %v3604_v9 = vadd.f32 %v3581_v14, %v3564_v23 }
 0x431   :  { %3812 = vrot.lane.b32.xlu0 %v8258_v21, %s6709_s22  ;;  %3814 = vrot.lane.b32.xlu1 %v8265_v44, %s6709_s22 }
 0x432   :  { %3710 = vst.msk [vmem:[#allocation2 + $0x8] sm:$0xff] %vm3612_vm0, %v3702_v5  ;;  %3613 = vst.msk [vmem:[#allocation2] sm:$0xff] %vm3612_vm0, %v3604_v9  ;;  %v3565_v5 = vld [vmem:[#allocation2 + $0x20] sm:$0xff] }
 0x433   :  { %v3570_v9 = vld [vmem:[#allocation2 + $0xc0] sm:$0xff] }
 0x439   :  { %v3718_v11 = vld [vmem:[#allocation2 + $0x8] sm:$0xff]  ;;  %v3621_v32 = vld [vmem:[#allocation2] sm:$0xff] }
 0x43a   :  { %v3726_v13 = vadd.f32 %v3718_v11, %v8236_v52  ;;  %v3742_v52 = vld [vmem:[#allocation2 + $0x10] sm:$0xff] }
 0x43c   :  { %3734 = vst.msk [vmem:[#allocation2 + $0x8] sm:$0xff] %vm3661_vm1, %v3726_v13 }
 0x443   :  { %v3976_v23 = vld [vmem:[#allocation2 + $0x8] sm:$0xff] }
 0x44b   :  { %v3693_v3 = vpop.permute.xlu1 %3692  ;;  %v3595_v56 = vpop.permute.xlu0 %3594 }
 0x44c   :  { %v3709_v51 = vadd.f32 %v3693_v3, %v3677_v24  ;;  %v3611_v35 = vadd.f32 %v3595_v56, %v3571_v26 }
 0x44e   :  { %3717 = vst.msk [vmem:[#allocation2 + $0xe8] sm:$0xff] %vm3612_vm0, %v3709_v51  ;;  %3620 = vst.msk [vmem:[#allocation2 + $0xe0] sm:$0xff] %vm3612_vm0, %v3611_v35  ;;  %v4119_v35 = vpop.f32.mrf.mxu0 }
 0x44f   :  { %v3644_v8 = vpop.permute.xlu1 %3643  ;;  %v3630_v31 = vpop.permute.xlu0 %3629 }
 0x450   :  { %v3653_v42 = vadd.f32 %v3630_v31, %v3621_v32 }
 0x452   :  { %3662 = vst.msk [vmem:[#allocation2] sm:$0xff] %vm3661_vm1, %v3653_v42 }
 0x453   :  { %v3759_v38 = vpop.permute.xlu0 %3758  ;;  %v3773_v48 = vpop.permute.xlu1 %3772 }
 0x454   :  { %v3782_v6 = vadd.f32 %v3759_v38, %v3742_v52  ;;  %v3789_v25 = vadd.f32 %v3773_v48, %v3749_v18  ;;  %v3922_v38 = vadd.s32 384, %v8439_v57 }
 0x455   :  { %v3725_v10 = vld [vmem:[#allocation2 + $0xe8] sm:$0xff]  ;;  %v3628_v12 = vld [vmem:[#allocation2 + $0xe0] sm:$0xff] }
 0x456   :  { %v3733_v49 = vadd.f32 %v3725_v10, %v8276_v59  ;;  %v3660_v43 = vadd.f32 %v3644_v8, %v3628_v12  ;;  %3790 = vst.msk [vmem:[#allocation2 + $0x10] sm:$0xff] %vm3612_vm0, %v3782_v6  ;;  %3797 = vst.msk [vmem:[#allocation2 + $0xf0] sm:$0xff] %vm3612_vm0, %v3789_v25  ;;  %v3921_v6 = vadd.s32 256, %v8439_v57 }
 0x457   :  { %v3855_v53 = vpop.permute.xlu0 %3854  ;;  %v3869_v55 = vpop.permute.xlu1 %3868 }
 0x458   :  { %3741 = vst.msk [vmem:[#allocation2 + $0xe8] sm:$0xff] %vm3661_vm1, %v3733_v49  ;;  %3669 = vst.msk [vmem:[#allocation2 + $0xe0] sm:$0xff] %vm3661_vm1, %v3660_v43  ;;  %v3878_v29 = vadd.f32 %v3855_v53, %v3846_v40  ;;  %v3885_v54 = vadd.f32 %v3869_v55, %v3853_v41  ;;  %v3676_v43 = vld [vmem:[#allocation2 + $0xc8] sm:$0xff]  ;;  %v3941_v53 = vand.u32 127, %v3921_v6 }
 0x459   :  { %v3975_v11 = vld [vmem:[#allocation2] sm:$0xff] }
 0x45a   :  { %3886 = vst.msk [vmem:[#allocation2 + $0x18] sm:$0xff] %vm3612_vm0, %v3878_v29  ;;  %3893 = vst.msk [vmem:[#allocation2 + $0xf8] sm:$0xff] %vm3612_vm0, %v3885_v54  ;;  %v4188_v29 = vpop.f32.mrf.mxu1  ;;  %vm8475_vm5 = vcmp.lt.s32.totalorder %v3941_v53, 64 }
 0x45b   :  { %v3807_v59 = vpop.permute.xlu0 %3806  ;;  %v3821_v15 = vpop.permute.xlu1 %3820 }
 0x45d   :  { %v3798_v20 = vld [vmem:[#allocation2 + $0x10] sm:$0xff] }
 0x45e   :  { %v3805_v45 = vld [vmem:[#allocation2 + $0xf0] sm:$0xff]  ;;  %v3830_v33 = vadd.f32 %v3807_v59, %v3798_v20  ;;  %v9569_v59 = vmov 0  ;;  %v9572_v20 = vmov 0 }
 0x45f   :  { %v3837_v14 = vadd.f32 %v3821_v15, %v3805_v45  ;;  %v3979_v13 = vld [vmem:[#allocation2 + $0xe0] sm:$0xff]  ;;  %v3980_v3 = vld [vmem:[#allocation2 + $0xe8] sm:$0xff]  ;;  %v3583_v24 = vpop.permute.xlu0 %3582  ;;  %v3593_v56 = vpop.permute.xlu1 %3592  ;;  %v9573_v20 = vsel %vm8475_vm5, 4294967295, %v9572_v20 }
 0x460   :  { %3838 = vst.msk [vmem:[#allocation2 + $0x10] sm:$0xff] %vm3661_vm1, %v3830_v33  ;;  %v3983_v26 = vsel %vm3971_vm2, %v3975_v11, %v3979_v13  ;;  %v3984_v51 = vsel %vm8451_vm3, %v3976_v23, %v3980_v3  ;;  %v3605_v8 = vadd.f32 %v3583_v24, %v3565_v5  ;;  %v3610_v31 = vadd.f32 %v3593_v56, %v3570_v9  ;;  %v4190_v23 = vpop.f32.mrf.mxu1  ;;  %v3748_v9 = vld [vmem:[#allocation2 + $0xd0] sm:$0xff] }
 0x461   :  { %3845 = vst.msk [vmem:[#allocation2 + $0xf0] sm:$0xff] %vm3661_vm1, %v3837_v14  ;;  %v3894_v32 = vld [vmem:[#allocation2 + $0x18] sm:$0xff]  ;;  %v4193_v63 = vadd.f32 %v4117_v16, %v3983_v26  ;;  %v4194_v52 = vadd.f32 %v4119_v35, %v3984_v51  ;;  %9574 = vst [vmem:[#allocation34_spill] sm:$0xff] %v9573_v20  ;;  %v3743_v14 = vld [vmem:[#allocation2 + $0x30] sm:$0xff] }
 0x462   :  { %v3901_v42 = vld [vmem:[#allocation2 + $0xf8] sm:$0xff]  ;;  %v3902_v18 = vadd.f32 %v3894_v32, %v8288_v46  ;;  %3614 = vst.msk [vmem:[#allocation2 + $0x20] sm:$0xff] %vm3612_vm0, %v3605_v8  ;;  %3619 = vst.msk [vmem:[#allocation2 + $0xc0] sm:$0xff] %vm3612_vm0, %v3610_v31 }
 0x463   :  { %v3909_v48 = vadd.f32 %v3901_v42, %v8290_v47  ;;  %v6262_v25 = vmul.f32 -1.442695, %v4193_v63  ;;  %v6263_v10 = vmul.f32 -1.442695, %v4194_v52  ;;  %v3681_v12 = vpop.permute.xlu0 %3680  ;;  %v3691_v49 = vpop.permute.xlu1 %3690  ;;  %v3948_v47 = vand.u32 127, %v3922_v38  ;;  %v3847_v52 = vld [vmem:[#allocation2 + $0x38] sm:$0xff] }
 0x464   :  { %3910 = vst.msk [vmem:[#allocation2 + $0x18] sm:$0xff] %vm3661_vm1, %v3902_v18  ;;  %v3703_v40 = vadd.f32 %v3681_v12, %v3671_v58  ;;  %v3708_v46 = vadd.f32 %v3691_v49, %v3676_v43  ;;  %v3852_v18 = vld [vmem:[#allocation2 + $0xd8] sm:$0xff] }
 0x465   :  { %3917 = vst.msk [vmem:[#allocation2 + $0xf8] sm:$0xff] %vm3661_vm1, %v3909_v48  ;;  %6412 = vpow2.f32 %v6262_v25  ;;  %vm8471_vm4 = vcmp.lt.s32.totalorder %v3948_v47, 64 }
 0x466   :  { %6414 = vpow2.f32 %v6263_v10  ;;  %3711 = vst.msk [vmem:[#allocation2 + $0x28] sm:$0xff] %vm3612_vm0, %v3703_v40  ;;  %3716 = vst.msk [vmem:[#allocation2 + $0xc8] sm:$0xff] %vm3612_vm0, %v3708_v46  ;;  %v9570_v59 = vsel %vm8471_vm4, 4294967295, %v9569_v59 }
 0x467   :  { %v3632_v41 = vpop.permute.xlu0 %3631  ;;  %v3642_v55 = vpop.permute.xlu1 %3641  ;;  %9571 = vst [vmem:[#allocation32_spill] sm:$0xff] %v9570_v59  ;;  %v3977_v45 = vld [vmem:[#allocation2 + $0x10] sm:$0xff] }
 0x468   :  { %v3981_v33 = vld [vmem:[#allocation2 + $0xf0] sm:$0xff] }
 0x469   :  { %v3622_v54 = vld [vmem:[#allocation2 + $0x20] sm:$0xff]  ;;  %v3985_v8 = vsel %vm8475_vm5, %v3977_v45, %v3981_v33 }
 0x46a   :  { %v3627_v28 = vld [vmem:[#allocation2 + $0xc0] sm:$0xff]  ;;  %v3654_v15 = vadd.f32 %v3632_v41, %v3622_v54  ;;  %v4195_v6 = vadd.f32 %v4188_v29, %v3985_v8 }
 0x46b   :  { %v3659_v16 = vadd.f32 %v3642_v55, %v3627_v28  ;;  %v3761_v5 = vpop.permute.xlu0 %3760  ;;  %v3771_v11 = vpop.permute.xlu1 %3770  ;;  %v3978_v13 = vld [vmem:[#allocation2 + $0x18] sm:$0xff]  ;;  %v3566_v55 = vld [vmem:[#allocation2 + $0x40] sm:$0xff] }
 0x46c   :  { %v3982_v3 = vld [vmem:[#allocation2 + $0xf8] sm:$0xff]  ;;  %3663 = vst.msk [vmem:[#allocation2 + $0x20] sm:$0xff] %vm3661_vm1, %v3654_v15  ;;  %v3783_v24 = vadd.f32 %v3761_v5, %v3743_v14  ;;  %v3788_v56 = vadd.f32 %v3771_v11, %v3748_v9  ;;  %v3569_v54 = vld [vmem:[#allocation2 + $0xa0] sm:$0xff]  ;;  %v3672_v5 = vld [vmem:[#allocation2 + $0x48] sm:$0xff] }
 0x46d   :  { %3668 = vst.msk [vmem:[#allocation2 + $0xc0] sm:$0xff] %vm3661_vm1, %v3659_v16  ;;  %v3986_v26 = vsel %vm8471_vm4, %v3978_v13, %v3982_v3  ;;  %v3719_v51 = vld [vmem:[#allocation2 + $0x28] sm:$0xff] }
 0x46e   :  { %v3724_v35 = vld [vmem:[#allocation2 + $0xc8] sm:$0xff]  ;;  %v4196_v31 = vadd.f32 %v4190_v23, %v3986_v26  ;;  %v3727_v32 = vadd.f32 %v3719_v51, %v8310_v36  ;;  %3791 = vst.msk [vmem:[#allocation2 + $0x30] sm:$0xff] %vm3612_vm0, %v3783_v24  ;;  %3796 = vst.msk [vmem:[#allocation2 + $0xd0] sm:$0xff] %vm3612_vm0, %v3788_v56 }
 0x46f   :  { %v3732_v42 = vadd.f32 %v3724_v35, %v8312_v4  ;;  %v3857_v38 = vpop.permute.xlu0 %3856  ;;  %v3867_v48 = vpop.permute.xlu1 %3866  ;;  %v3675_v11 = vld [vmem:[#allocation2 + $0xa8] sm:$0xff] }
 0x470   :  { %v6264_v63 = vmul.f32 -1.442695, %v4196_v31  ;;  %3735 = vst.msk [vmem:[#allocation2 + $0x28] sm:$0xff] %vm3661_vm1, %v3727_v32  ;;  %v3879_v25 = vadd.f32 %v3857_v38, %v3847_v52  ;;  %v3884_v10 = vadd.f32 %v3867_v48, %v3852_v18  ;;  %v3744_v52 = vld [vmem:[#allocation2 + $0x50] sm:$0xff] }
 0x471   :  { %3740 = vst.msk [vmem:[#allocation2 + $0xc8] sm:$0xff] %vm3661_vm1, %v3732_v42  ;;  %v3747_v18 = vld [vmem:[#allocation2 + $0xb0] sm:$0xff] }
 0x472   :  { %v6413_v12 = vpop.eup %6412  ;;  %3887 = vst.msk [vmem:[#allocation2 + $0x38] sm:$0xff] %vm3612_vm0, %v3879_v25  ;;  %3892 = vst.msk [vmem:[#allocation2 + $0xd8] sm:$0xff] %vm3612_vm0, %v3884_v10  ;;  %6416 = vpow2.f32 %v6264_v63 }
 0x473   :  { %v6415_v36 = vpop.eup %6414  ;;  %v4200_v4 = vadd.f32 1.0, %v6413_v12  ;;  %v3809_v58 = vpop.permute.xlu0 %3808  ;;  %6418 = vtanh.f32 %v4195_v6 }
 0x474   :  { %v3819_v49 = vpop.permute.xlu1 %3818  ;;  %v4206_v43 = vadd.f32 1.0, %v6415_v36 }
 0x475   :  { %6420 = vrcp.f32 %v4200_v4  ;;  %v3799_v40 = vld [vmem:[#allocation2 + $0x30] sm:$0xff] }
 0x476   :  { %v3804_v46 = vld [vmem:[#allocation2 + $0xd0] sm:$0xff]  ;;  %6422 = vrcp.f32 %v4206_v43  ;;  %v3831_v47 = vadd.f32 %v3809_v58, %v3799_v40  ;;  %v3848_v43 = vld [vmem:[#allocation2 + $0x58] sm:$0xff] }
 0x477   :  { %v3836_v53 = vadd.f32 %v3819_v49, %v3804_v46  ;;  %v3585_v41 = vpop.permute.xlu0 %3584  ;;  %v3851_v46 = vld [vmem:[#allocation2 + $0xb8] sm:$0xff] }
 0x478   :  { %v3591_v29 = vpop.permute.xlu1 %3590  ;;  %3839 = vst.msk [vmem:[#allocation2 + $0x30] sm:$0xff] %vm3661_vm1, %v3831_v47  ;;  %v3606_v28 = vadd.f32 %v3585_v41, %v3566_v55 }
 0x479   :  { %3844 = vst.msk [vmem:[#allocation2 + $0xd0] sm:$0xff] %vm3661_vm1, %v3836_v53  ;;  %v3609_v15 = vadd.f32 %v3591_v29, %v3569_v54  ;;  %v3895_v16 = vld [vmem:[#allocation2 + $0x38] sm:$0xff] }
 0x47a   :  { %v3900_v45 = vld [vmem:[#allocation2 + $0xd8] sm:$0xff]  ;;  %v3903_v33 = vadd.f32 %v3895_v16, %v8332_v7  ;;  %3615 = vst.msk [vmem:[#allocation2 + $0x40] sm:$0xff] %vm3612_vm0, %v3606_v28  ;;  %v3567_v16 = vld [vmem:[#allocation2 + $0x60] sm:$0xff] }
 0x47b   :  { %v3908_v14 = vadd.f32 %v3900_v45, %v8334_v30  ;;  %3618 = vst.msk [vmem:[#allocation2 + $0xa0] sm:$0xff] %vm3612_vm0, %v3609_v15  ;;  %v3683_v23 = vpop.permute.xlu0 %3682 }
 0x47c   :  { %v3689_v9 = vpop.permute.xlu1 %3688  ;;  %3911 = vst.msk [vmem:[#allocation2 + $0x38] sm:$0xff] %vm3661_vm1, %v3903_v33  ;;  %v3704_v13 = vadd.f32 %v3683_v23, %v3672_v5  ;;  %v3568_v33 = vld [vmem:[#allocation2 + $0x80] sm:$0xff] }
 0x47d   :  { %3916 = vst.msk [vmem:[#allocation2 + $0xd8] sm:$0xff] %vm3661_vm1, %v3908_v14  ;;  %v3707_v3 = vadd.f32 %v3689_v9, %v3675_v11 }
 0x47e   :  { %3712 = vst.msk [vmem:[#allocation2 + $0x48] sm:$0xff] %vm3612_vm0, %v3704_v13 }
 0x47f   :  { %3715 = vst.msk [vmem:[#allocation2 + $0xa8] sm:$0xff] %vm3612_vm0, %v3707_v3  ;;  %v3634_v7 = vpop.permute.xlu0 %3633  ;;  %v6417_v24 = vpop.eup %6416 }
 0x480   :  { %v3640_v30 = vpop.permute.xlu1 %3639  ;;  %v6419_v56 = vpop.eup %6418  ;;  %v4213_v63 = vadd.f32 1.0, %v6417_v24  ;;  %v3674_v24 = vld [vmem:[#allocation2 + $0x88] sm:$0xff] }
 0x481   :  { %v3623_v26 = vld [vmem:[#allocation2 + $0x40] sm:$0xff] }
 0x482   :  { %v3626_v51 = vld [vmem:[#allocation2 + $0xa0] sm:$0xff]  ;;  %v6421_v35 = vpop.eup %6420  ;;  %v3655_v8 = vadd.f32 %v3634_v7, %v3623_v26  ;;  %6424 = vrcp.f32 %v4213_v63  ;;  %v3673_v7 = vld [vmem:[#allocation2 + $0x68] sm:$0xff] }
 0x483   :  { %v3658_v31 = vadd.f32 %v3640_v30, %v3626_v51  ;;  %v6423_v32 = vpop.eup %6422  ;;  %v4217_v42 = vmul.f32 %v6421_v35, %v6419_v56  ;;  %v3763_v38 = vpop.permute.xlu0 %3762 }
 0x484   :  { %v3769_v48 = vpop.permute.xlu1 %3768  ;;  %v4216_v6 = vmul.f32 0.0, %v6423_v32  ;;  %3664 = vst.msk [vmem:[#allocation2 + $0x40] sm:$0xff] %vm3661_vm1, %v3655_v8  ;;  %v3784_v25 = vadd.f32 %v3763_v38, %v3744_v52  ;;  %v3745_v52 = vld [vmem:[#allocation2 + $0x70] sm:$0xff] }
 0x485   :  { %3667 = vst.msk [vmem:[#allocation2 + $0xa0] sm:$0xff] %vm3661_vm1, %v3658_v31  ;;  %v3787_v10 = vadd.f32 %v3769_v48, %v3747_v18  ;;  %v3720_v12 = vld [vmem:[#allocation2 + $0x48] sm:$0xff]  ;;  %v3746_v18 = vld [vmem:[#allocation2 + $0x90] sm:$0xff] }
 0x486   :  { %v3723_v36 = vld [vmem:[#allocation2 + $0xa8] sm:$0xff]  ;;  %v8505_v4 = vadd.f32 %v4217_v42, %v4216_v6  ;;  %v3728_v58 = vadd.f32 %v3720_v12, %v8250_v50  ;;  %3792 = vst.msk [vmem:[#allocation2 + $0x50] sm:$0xff] %vm3612_vm0, %v3784_v25 }
 0x487   :  { %v3731_v49 = vadd.f32 %v3723_v36, %v8350_v61  ;;  %3795 = vst.msk [vmem:[#allocation2 + $0xb0] sm:$0xff] %vm3612_vm0, %v3787_v10  ;;  %v3859_v40 = vpop.permute.xlu0 %3858 }
 0x488   :  { %v3865_v47 = vpop.permute.xlu1 %3864  ;;  %6426 = vtanh.f32 %v8505_v4  ;;  %3736 = vst.msk [vmem:[#allocation2 + $0x48] sm:$0xff] %vm3661_vm1, %v3728_v58  ;;  %v3880_v53 = vadd.f32 %v3859_v40, %v3848_v43  ;;  %v3850_v40 = vld [vmem:[#allocation2 + $0x98] sm:$0xff] }
 0x489   :  { %3739 = vst.msk [vmem:[#allocation2 + $0xa8] sm:$0xff] %vm3661_vm1, %v3731_v49  ;;  %v3883_v41 = vadd.f32 %v3865_v47, %v3851_v46  ;;  %v3849_v49 = vld [vmem:[#allocation2 + $0x78] sm:$0xff] }
 0x48a   :  { %3888 = vst.msk [vmem:[#allocation2 + $0x58] sm:$0xff] %vm3612_vm0, %v3880_v53 }
 0x48b   :  { %3891 = vst.msk [vmem:[#allocation2 + $0xb8] sm:$0xff] %vm3612_vm0, %v3883_v41  ;;  %v3811_v50 = vpop.permute.xlu0 %3810 }
 0x48c   :  { %v3817_v61 = vpop.permute.xlu1 %3816 }
 0x48d   :  { %v3800_v55 = vld [vmem:[#allocation2 + $0x50] sm:$0xff] }
 0x48e   :  { %v3803_v29 = vld [vmem:[#allocation2 + $0xb0] sm:$0xff]  ;;  %v3832_v54 = vadd.f32 %v3811_v50, %v3800_v55 }
 0x48f   :  { %v3835_v28 = vadd.f32 %v3817_v61, %v3803_v29  ;;  %v3587_v15 = vpop.permute.xlu0 %3586  ;;  %v6425_v56 = vpop.eup %6424 }
 0x490   :  { %v3589_v45 = vpop.permute.xlu1 %3588  ;;  %3840 = vst.msk [vmem:[#allocation2 + $0x50] sm:$0xff] %vm3661_vm1, %v3832_v54  ;;  %v3607_v14 = vadd.f32 %v3587_v15, %v3567_v16 }
 0x491   :  { %3843 = vst.msk [vmem:[#allocation2 + $0xb0] sm:$0xff] %vm3661_vm1, %v3835_v28  ;;  %v3608_v23 = vadd.f32 %v3589_v45, %v3568_v33  ;;  %v3896_v5 = vld [vmem:[#allocation2 + $0x58] sm:$0xff]  ;;  %v8704_v45 = vld [vmem:[#allocation9 + $0x88] sm:$0xff] }
 0x492   :  { %v3899_v9 = vld [vmem:[#allocation2 + $0xb8] sm:$0xff]  ;;  %v3904_v11 = vadd.f32 %v3896_v5, %v8252_v19  ;;  %3616 = vst.msk [vmem:[#allocation2 + $0x60] sm:$0xff] %vm3612_vm0, %v3607_v14  ;;  %9589 = vst [vmem:[#allocation33_spill] sm:$0xff] %v8704_v45 }
 0x493   :  { %v3907_v13 = vadd.f32 %v3899_v9, %v8375_v60  ;;  %3617 = vst.msk [vmem:[#allocation2 + $0x80] sm:$0xff] %vm3612_vm0, %v3608_v23  ;;  %v3685_v3 = vpop.permute.xlu0 %3684 }
 0x494   :  { %v3687_v30 = vpop.permute.xlu1 %3686  ;;  %3912 = vst.msk [vmem:[#allocation2 + $0x58] sm:$0xff] %vm3661_vm1, %v3904_v11  ;;  %v3705_v26 = vadd.f32 %v3685_v3, %v3673_v7 }
 0x495   :  { %3915 = vst.msk [vmem:[#allocation2 + $0xb8] sm:$0xff] %vm3661_vm1, %v3907_v13  ;;  %v3706_v51 = vadd.f32 %v3687_v30, %v3674_v24  ;;  %v6427_v35 = vpop.eup %6426  ;;  %v8582_v30 = vld [vmem:[#allocation9 + $0x1f8] sm:$0xff]  ;;  %v8586_v24 = vld [vmem:[#allocation9 + $0x1e0] sm:$0xff] }
 0x496   :  { %3713 = vst.msk [vmem:[#allocation2 + $0x68] sm:$0xff] %vm3612_vm0, %v3705_v26  ;;  %v4220_v19 = vmul.f32 %v6427_v35, %v6425_v56  ;;  %9585 = vst [vmem:[#allocation25_spill] sm:$0xff] %v8582_v30  ;;  %4620 = vmatprep.subr.mxu1 %v8582_v30  ;;  %v8588_v56 = vld [vmem:[#allocation9 + $0x1f0] sm:$0xff]  ;;  %v8592_v26 = vld [vmem:[#allocation9 + $0x1c8] sm:$0xff] }
 0x497   :  { %3714 = vst.msk [vmem:[#allocation2 + $0x88] sm:$0xff] %vm3612_vm0, %v3706_v51  ;;  %v3636_v60 = vpop.permute.xlu0 %3635  ;;  %v8594_v51 = vld [vmem:[#allocation9 + $0x1d8] sm:$0xff]  ;;  %v8598_v35 = vld [vmem:[#allocation9 + $0x1c0] sm:$0xff] }
 0x498   :  { %v3638_v8 = vpop.permute.xlu1 %3637  ;;  %4222 = vst.msk [vmem:[#allocation3] sm:$0xff] %vm4221_vm6, %v4220_v19  ;;  %4366 = vmatmul.mubr.f32.vlgmr.msra.gmra.mxu0 %v4220_v19  ;;  %4437 = vmatmul.mubr.f32.vlgmr.msra.gmra.mxu1 %v4220_v19  ;;  %v8696_v13 = vld [vmem:[#allocation9 + $0xb8] sm:$0xff] }
 0x499   :  { %4224 = vst.msk [vmem:[#allocation3 + $0x38] sm:$0xff] %vm4223_vm7, %v4220_v19  ;;  %v3624_v31 = vld [vmem:[#allocation2 + $0x60] sm:$0xff]  ;;  %4613 = vmatprep.mubr.f32.mxu0 %v9539_v22  ;;  %4684 = vmatprep.mubr.f32.mxu1 %v9539_v22  ;;  %v8600_v19 = vld [vmem:[#allocation9 + $0x1d0] sm:$0xff] }
 0x49a   :  { %v3625_v32 = vld [vmem:[#allocation2 + $0x80] sm:$0xff]  ;;  %v3656_v42 = vadd.f32 %v3636_v60, %v3624_v31  ;;  %4621 = vmatpush1.msra.mxu1 %v8588_v56  ;;  %v8604_v60 = vld [vmem:[#allocation9 + $0x1a8] sm:$0xff] }
 0x49b   :  { %v3657_v63 = vadd.f32 %v3638_v8, %v3625_v32  ;;  %v3765_v38 = vpop.permute.xlu0 %3764  ;;  %4622 = vmatprep.subr.mxu1 %v8594_v51  ;;  %v8606_v8 = vld [vmem:[#allocation9 + $0x1b8] sm:$0xff]  ;;  %v8610_v31 = vld [vmem:[#allocation9 + $0x1a0] sm:$0xff]  ;;  %v8612_v32 = vld [vmem:[#allocation9 + $0x1b0] sm:$0xff] }
 0x49c   :  { %v3767_v48 = vpop.permute.xlu1 %3766  ;;  %3665 = vst.msk [vmem:[#allocation2 + $0x60] sm:$0xff] %vm3661_vm1, %v3656_v42  ;;  %v3785_v6 = vadd.f32 %v3765_v38, %v3745_v52  ;;  %4623 = vmatpush1.msra.mxu1 %v8600_v19  ;;  %v8616_v42 = vld [vmem:[#allocation9 + $0x188] sm:$0xff]  ;;  %v8622_v52 = vld [vmem:[#allocation9 + $0x180] sm:$0xff]  ;;  %v8624_v38 = vld [vmem:[#allocation9 + $0x190] sm:$0xff] }
 0x49d   :  { %3666 = vst.msk [vmem:[#allocation2 + $0x80] sm:$0xff] %vm3661_vm1, %v3657_v63  ;;  %v3786_v25 = vadd.f32 %v3767_v48, %v3746_v18  ;;  %v3721_v10 = vld [vmem:[#allocation2 + $0x68] sm:$0xff]  ;;  %4624 = vmatprep.subr.mxu1 %v8606_v8  ;;  %v8618_v63 = vld [vmem:[#allocation9 + $0x198] sm:$0xff] }
 0x49e   :  { %v3722_v12 = vld [vmem:[#allocation2 + $0x88] sm:$0xff]  ;;  %v3729_v36 = vadd.f32 %v3721_v10, %v8254_v62  ;;  %3793 = vst.msk [vmem:[#allocation2 + $0x70] sm:$0xff] %vm3612_vm0, %v3785_v6  ;;  %4625 = vmatpush1.msra.mxu1 %v8612_v32  ;;  %v8630_v48 = vld [vmem:[#allocation9 + $0x178] sm:$0xff] }
 0x49f   :  { %v3730_v58 = vadd.f32 %v3722_v12, %v8260_v34  ;;  %3794 = vst.msk [vmem:[#allocation2 + $0x90] sm:$0xff] %vm3612_vm0, %v3786_v25  ;;  %v3861_v43 = vpop.permute.xlu0 %3860  ;;  %4626 = vmatprep.subr.mxu1 %v8618_v63  ;;  %v8628_v18 = vld [vmem:[#allocation9 + $0x168] sm:$0xff]  ;;  %v8634_v6 = vld [vmem:[#allocation9 + $0x160] sm:$0xff]  ;;  %v8636_v25 = vld [vmem:[#allocation9 + $0x170] sm:$0xff] }
 0x4a0   :  { %v3863_v46 = vpop.permute.xlu1 %3862  ;;  %3737 = vst.msk [vmem:[#allocation2 + $0x68] sm:$0xff] %vm3661_vm1, %v3729_v36  ;;  %v3881_v47 = vadd.f32 %v3861_v43, %v3849_v49  ;;  %4627 = vmatpush1.msra.mxu1 %v8624_v38  ;;  %v8640_v10 = vld [vmem:[#allocation9 + $0x148] sm:$0xff]  ;;  %v8642_v12 = vld [vmem:[#allocation9 + $0x158] sm:$0xff]  ;;  %v8646_v36 = vld [vmem:[#allocation9 + $0x140] sm:$0xff] }
 0x4a1   :  { %3738 = vst.msk [vmem:[#allocation2 + $0x88] sm:$0xff] %vm3661_vm1, %v3730_v58  ;;  %v3882_v53 = vadd.f32 %v3863_v46, %v3850_v40  ;;  %4628 = vmatprep.subr.mxu1 %v8630_v48  ;;  %v8648_v58 = vld [vmem:[#allocation9 + $0x150] sm:$0xff]  ;;  %v8652_v49 = vld [vmem:[#allocation9 + $0x128] sm:$0xff]  ;;  %v8654_v43 = vld [vmem:[#allocation9 + $0x138] sm:$0xff] }
 0x4a2   :  { %3889 = vst.msk [vmem:[#allocation2 + $0x78] sm:$0xff] %vm3612_vm0, %v3881_v47  ;;  %4629 = vmatpush1.msra.mxu1 %v8636_v25  ;;  %v8658_v40 = vld [vmem:[#allocation9 + $0x120] sm:$0xff]  ;;  %v8660_v46 = vld [vmem:[#allocation9 + $0x130] sm:$0xff]  ;;  %v8664_v47 = vld [vmem:[#allocation9 + $0x108] sm:$0xff] }
 0x4a3   :  { %3890 = vst.msk [vmem:[#allocation2 + $0x98] sm:$0xff] %vm3612_vm0, %v3882_v53  ;;  %v8540_v62 = vld [vmem:[#allocation2 + $0x60] sm:$0xff]  ;;  %v3813_v61 = vpop.permute.xlu0 %3812  ;;  %4630 = vmatprep.subr.mxu1 %v8642_v12 }
 0x4a4   :  { %9575 = vst [vmem:[#allocation37_spill] sm:$0xff] %v8540_v62  ;;  %v8542_v34 = vld [vmem:[#allocation2 + $0x80] sm:$0xff]  ;;  %v3815_v29 = vpop.permute.xlu1 %3814  ;;  %4631 = vmatpush1.msra.mxu1 %v8648_v58 }
 0x4a5   :  { %9576 = vst [vmem:[#allocation38_spill] sm:$0xff] %v8542_v34  ;;  %v8548_v41 = vsel %vm3971_vm2, %v8542_v34, %v8540_v62  ;;  %v3801_v50 = vld [vmem:[#allocation2 + $0x70] sm:$0xff]  ;;  %4632 = vmatprep.subr.mxu1 %v8654_v43  ;;  %v8666_v53 = vld [vmem:[#allocation9 + $0x118] sm:$0xff] }
 0x4a6   :  { %9577 = vst [vmem:[#allocation19_spill] sm:$0xff] %v8548_v41  ;;  %v3802_v55 = vld [vmem:[#allocation2 + $0x90] sm:$0xff]  ;;  %v3833_v54 = vadd.f32 %v3813_v61, %v3801_v50  ;;  %4633 = vmatpush1.msra.mxu1 %v8660_v46  ;;  %v8670_v50 = vld [vmem:[#allocation9 + $0x100] sm:$0xff]  ;;  %v8740_v22 = vld [vmem:[#allocation9 + $0x38] sm:$0xff] }
 0x4a7   :  { %v3834_v28 = vadd.f32 %v3815_v29, %v3802_v55  ;;  %v8550_v15 = vld [vmem:[#allocation2 + $0x68] sm:$0xff]  ;;  %4634 = vmatprep.subr.mxu1 %v8666_v53  ;;  %v8672_v61 = vld [vmem:[#allocation9 + $0x110] sm:$0xff]  ;;  %v8678_v29 = vld [vmem:[#allocation9 + $0xf8] sm:$0xff]  ;;  %9600 = vst [vmem:[#allocation47_spill] sm:$0xff] %v8740_v22 }
 0x4a8   :  { %9578 = vst [vmem:[#allocation23_spill] sm:$0xff] %v8550_v15  ;;  %v8552_v16 = vld [vmem:[#allocation2 + $0x88] sm:$0xff]  ;;  %3841 = vst.msk [vmem:[#allocation2 + $0x70] sm:$0xff] %vm3661_vm1, %v3833_v54  ;;  %4635 = vmatpush1.msra.mxu1 %v8672_v61  ;;  %v8680_v54 = vld [vmem:[#allocation9 + $0xf0] sm:$0xff] }
 0x4a9   :  { %9579 = vst [vmem:[#allocation26_spill] sm:$0xff] %v8552_v16  ;;  %3842 = vst.msk [vmem:[#allocation2 + $0x90] sm:$0xff] %vm3661_vm1, %v3834_v28  ;;  %v3897_v33 = vld [vmem:[#allocation2 + $0x78] sm:$0xff]  ;;  %v8676_v55 = vld [vmem:[#allocation9 + $0xe8] sm:$0xff]  ;;  %4636 = vmatprep.subr.mxu1 %v8678_v29 }
 0x4aa   :  { %v3898_v14 = vld [vmem:[#allocation2 + $0x98] sm:$0xff]  ;;  %v3905_v23 = vadd.f32 %v3897_v33, %v8258_v21  ;;  %v8684_v28 = vld [vmem:[#allocation9 + $0xc8] sm:$0xff]  ;;  %4637 = vmatpush1.msra.mxu1 %v8680_v54  ;;  %v8710_v41 = vld [vmem:[#allocation9 + $0x80] sm:$0xff] }
 0x4ab   :  { %v3906_v5 = vadd.f32 %v3898_v14, %v8265_v44  ;;  %v8580_v44 = vld [vmem:[#allocation9 + $0x1e8] sm:$0xff]  ;;  %9586 = vst [vmem:[#allocation27_spill] sm:$0xff] %v8684_v28  ;;  %v8686_v33 = vld [vmem:[#allocation9 + $0xd8] sm:$0xff]  ;;  %v8688_v14 = vld [vmem:[#allocation9 + $0xc0] sm:$0xff] }
 0x4ac   :  { %3913 = vst.msk [vmem:[#allocation2 + $0x78] sm:$0xff] %vm3661_vm1, %v3905_v23  ;;  %9584 = vst [vmem:[#allocation24_spill] sm:$0xff] %v8580_v44  ;;  %4549 = vmatprep.subr.mxu0 %v8580_v44  ;;  %v8692_v23 = vld [vmem:[#allocation9 + $0xd0] sm:$0xff]  ;;  %4638 = vmatprep.subr.mxu1 %v8686_v33  ;;  %v8726_v15 = vld [vmem:[#allocation9 + $0x48] sm:$0xff] }
 0x4ad   :  { %3914 = vst.msk [vmem:[#allocation2 + $0x98] sm:$0xff] %vm3661_vm1, %v3906_v5  ;;  %4550 = vmatpush1.msra.mxu0 %v8586_v24  ;;  %9587 = vst [vmem:[#allocation28_spill] sm:$0xff] %v8688_v14  ;;  %v8694_v5 = vld [vmem:[#allocation9 + $0xa8] sm:$0xff]  ;;  %v8700_v21 = vld [vmem:[#allocation9 + $0xb0] sm:$0xff]  ;;  %4639 = vmatpush1.msra.mxu1 %v8692_v23 }
 0x4ae   :  { %4551 = vmatprep.subr.mxu0 %v8592_v26  ;;  %9588 = vst [vmem:[#allocation30_spill] sm:$0xff] %v8694_v5  ;;  %4640 = vmatprep.subr.mxu1 %v8696_v13  ;;  %9590 = vst [vmem:[#allocation35_spill] sm:$0xff] %v8710_v41  ;;  %v8728_v16 = vld [vmem:[#allocation9 + $0x58] sm:$0xff]  ;;  %v8734_v62 = vld [vmem:[#allocation9 + $0x50] sm:$0xff] }
 0x4af   :  { %v8564_v9 = vld [vmem:[#allocation2 + $0x70] sm:$0xff]  ;;  %4552 = vmatpush1.msra.mxu0 %v8598_v35  ;;  %4641 = vmatpush1.msra.mxu1 %v8700_v21  ;;  %9595 = vst [vmem:[#allocation42_spill] sm:$0xff] %v8726_v15  ;;  %9596 = vst [vmem:[#allocation43_spill] sm:$0xff] %v8728_v16 }
 0x4b0   :  { %9580 = vst [vmem:[#allocation20_spill] sm:$0xff] %v8564_v9  ;;  %v8566_v11 = vld [vmem:[#allocation2 + $0x90] sm:$0xff]  ;;  %4553 = vmatprep.subr.mxu0 %v8604_v60  ;;  %9598 = vst [vmem:[#allocation45_spill] sm:$0xff] %v8734_v62 }
 0x4b1   :  { %9581 = vst [vmem:[#allocation21_spill] sm:$0xff] %v8566_v11  ;;  %4554 = vmatpush1.msra.mxu0 %v8610_v31  ;;  %v8712_v9 = vld [vmem:[#allocation9 + $0x90] sm:$0xff]  ;;  %v8716_v11 = vld [vmem:[#allocation9 + $0x68] sm:$0xff] }
 0x4b2   :  { %4555 = vmatprep.subr.mxu0 %v8616_v42  ;;  %9591 = vst [vmem:[#allocation36_spill] sm:$0xff] %v8712_v9  ;;  %9592 = vst [vmem:[#allocation39_spill] sm:$0xff] %v8716_v11  ;;  %v8738_v34 = vld [vmem:[#allocation9 + $0x28] sm:$0xff] }
 0x4b3   :  { %v8572_v3 = vld [vmem:[#allocation2 + $0x78] sm:$0xff]  ;;  %4556 = vmatpush1.msra.mxu0 %v8622_v52  ;;  %9599 = vst [vmem:[#allocation46_spill] sm:$0xff] %v8738_v34 }
 0x4b4   :  { %9582 = vst [vmem:[#allocation29_spill] sm:$0xff] %v8572_v3  ;;  %v8574_v7 = vld [vmem:[#allocation2 + $0x98] sm:$0xff]  ;;  %4557 = vmatprep.subr.mxu0 %v8628_v18 }
 0x4b5   :  { %9583 = vst [vmem:[#allocation22_spill] sm:$0xff] %v8574_v7  ;;  %4558 = vmatpush1.msra.mxu0 %v8634_v6  ;;  %v8718_v3 = vld [vmem:[#allocation9 + $0x78] sm:$0xff]  ;;  %v8722_v7 = vld [vmem:[#allocation9 + $0x70] sm:$0xff] }
 0x4b6   :  { %4559 = vmatprep.subr.mxu0 %v8640_v10  ;;  %9593 = vst [vmem:[#allocation40_spill] sm:$0xff] %v8718_v3  ;;  %9594 = vst [vmem:[#allocation41_spill] sm:$0xff] %v8722_v7 }
 0x4b7   :  { %4560 = vmatpush1.msra.mxu0 %v8646_v36 }
 0x4b8   :  { %4561 = vmatprep.subr.mxu0 %v8652_v49 }
 0x4b9   :  { %4562 = vmatpush1.msra.mxu0 %v8658_v40 }
 0x4ba   :  { %4563 = vmatprep.subr.mxu0 %v8664_v47 }
 0x4bb   :  { %4564 = vmatpush1.msra.mxu0 %v8670_v50 }
 0x4bc   :  { %4565 = vmatprep.subr.mxu0 %v8676_v55 }
 0x4bd   :  { %4566 = vmatpush1.msra.mxu0 %v8356_v39  ;;  %v8706_v39 = vld [vmem:[#allocation9 + $0x98] sm:$0xff] }
 0x4be   :  { %4567 = vmatprep.subr.mxu0 %v8684_v28  ;;  %4642 = vmatprep.subr.mxu1 %v8706_v39 }
 0x4bf   :  { %4568 = vmatpush1.msra.mxu0 %v8688_v14  ;;  %4643 = vmatpush1.msra.mxu1 %v8712_v9  ;;  %v8744_v9 = vld [vmem:[#allocation9 + $0x30] sm:$0xff] }
 0x4c0   :  { %4569 = vmatprep.subr.mxu0 %v8694_v5  ;;  %4644 = vmatprep.subr.mxu1 %v8718_v3  ;;  %9601 = vst [vmem:[#allocation48_spill] sm:$0xff] %v8744_v9  ;;  %v8748_v3 = vld [vmem:[#allocation9 + $0x18] sm:$0xff] }
 0x4c1   :  { %4570 = vmatpush1.msra.mxu0 %v8367_v17  ;;  %v8732_v17 = vld [vmem:[#allocation9 + $0x40] sm:$0xff]  ;;  %4645 = vmatpush1.msra.mxu1 %v8722_v7  ;;  %9602 = vst [vmem:[#allocation49_spill] sm:$0xff] %v8748_v3  ;;  %v4232_v7 = vld [vmem:[#allocation2 + $0xd8] sm:$0xff] }
 0x4c2   :  { %4571 = vmatprep.subr.mxu0 %v8704_v45  ;;  %9597 = vst [vmem:[#allocation44_spill] sm:$0xff] %v8732_v17  ;;  %4646 = vmatprep.subr.mxu1 %v8728_v16 }
 0x4c3   :  { %4572 = vmatpush1.msra.mxu0 %v8710_v41  ;;  %4647 = vmatpush1.msra.mxu1 %v8734_v62  ;;  %v4226_v62 = vld [vmem:[#allocation2 + $0x28] sm:$0xff] }
 0x4c4   :  { %4573 = vmatprep.subr.mxu0 %v8716_v11  ;;  %4648 = vmatprep.subr.mxu1 %v8740_v22  ;;  %v4229_v22 = vld [vmem:[#allocation2 + $0xc0] sm:$0xff] }
 0x4c5   :  { %4574 = vmatpush1.msra.mxu0 %v8383_v27  ;;  %v8752_v27 = vld [vmem:[#allocation9 + $0x10] sm:$0xff]  ;;  %4649 = vmatpush1.msra.mxu1 %v8744_v9 }
 0x4c6   :  { %4575 = vmatprep.subr.mxu0 %v8726_v15  ;;  %9603 = vst [vmem:[#allocation50_spill] sm:$0xff] %v8752_v27  ;;  %4650 = vmatprep.subr.mxu1 %v8748_v3 }
 0x4c7   :  { %4576 = vmatpush1.msra.mxu0 %v8732_v17  ;;  %4651 = vmatpush1.msra.mxu1 %v8752_v27  ;;  %v4230_v17 = vld [vmem:[#allocation2 + $0xc8] sm:$0xff] }
 0x4c8   :  { %4577 = vmatprep.subr.mxu0 %v8738_v34  ;;  %4868 = vmatprep.subr.mxu1 %v8582_v30  ;;  %v4225_v34 = vld [vmem:[#allocation2 + $0x20] sm:$0xff]  ;;  %v4228_v30 = vld [vmem:[#allocation2 + $0x38] sm:$0xff] }
 0x4c9   :  { %4578 = vmatpush1.msra.mxu0 %v8394_v2  ;;  %v4233_v2 = vsel %vm3971_vm2, %v4225_v34, %v4229_v22  ;;  %v4236_v41 = vsel %vm8471_vm4, %v4228_v30, %v4232_v7  ;;  %v4227_v22 = vld [vmem:[#allocation2 + $0x30] sm:$0xff] }
 0x4ca   :  { %4579 = vmatprep.subr.mxu0 %v8397_v37  ;;  %v4234_v37 = vsel %vm8451_vm3, %v4226_v62, %v4230_v17  ;;  %v4231_v34 = vld [vmem:[#allocation2 + $0xd0] sm:$0xff] }
 0x4cb   :  { %4580 = vmatpush1.msra.mxu0 %v8403_v1  ;;  %v4235_v62 = vsel %vm8475_vm5, %v4227_v22, %v4231_v34 }
 0x4cc   :  { %4797 = vmatprep.subr.mxu0 %v8580_v44 }
 0x558   :  { %v4367_v9 = vpop.f32.mrf.mxu0  ;;  %v4438_v27 = vpop.f32.mrf.mxu1 }
 0x559   :  { %v4443_v16 = vadd.f32 %v4367_v9, %v4233_v2 }
 0x55a   :  { %v4369_v3 = vpop.f32.mrf.mxu0  ;;  %v4440_v11 = vpop.f32.mrf.mxu1 }
 0x55b   :  { %v6265_v1 = vmul.f32 -1.442695, %v4443_v16  ;;  %v4444_v15 = vadd.f32 %v4369_v3, %v4234_v37  ;;  %v4446_v57 = vadd.f32 %v4440_v11, %v4236_v41  ;;  %v4445_v16 = vadd.f32 %v4438_v27, %v4235_v62  ;;  %v9604_v62 = vld [vmem:[#allocation35_spill] sm:$0xff] }
 0x55d   :  { %6428 = vpow2.f32 %v6265_v1  ;;  %v6266_v44 = vmul.f32 -1.442695, %v4444_v15  ;;  %v6267_v9 = vmul.f32 -1.442695, %v4446_v57 }
 0x55f   :  { %6430 = vpow2.f32 %v6266_v44 }
 0x560   :  { %6432 = vpow2.f32 %v6267_v9  ;;  %v6541_v9 = vld [vmem:[#allocation9 + $0xa0] sm:$0xff] }
 0x56a   :  { %v6429_v17 = vpop.eup %6428 }
 0x56b   :  { %v4450_v3 = vadd.f32 1.0, %v6429_v17  ;;  %v9605_v17 = vld [vmem:[#allocation36_spill] sm:$0xff] }
 0x56c   :  { %v6431_v2 = vpop.eup %6430 }
 0x56d   :  { %6434 = vrcp.f32 %v4450_v3  ;;  %v4456_v15 = vadd.f32 1.0, %v6431_v2  ;;  %v6433_v44 = vpop.eup %6432  ;;  %v9607_v3 = vld [vmem:[#allocation40_spill] sm:$0xff]  ;;  %v6542_v2 = vld [vmem:[#allocation9 + $0x60] sm:$0xff] }
 0x56e   :  { %6436 = vtanh.f32 %v4445_v16  ;;  %v4463_v41 = vadd.f32 1.0, %v6433_v44  ;;  %v9606_v16 = vld [vmem:[#allocation39_spill] sm:$0xff]  ;;  %v9609_v44 = vld [vmem:[#allocation42_spill] sm:$0xff] }
 0x56f   :  { %6438 = vrcp.f32 %v4456_v15  ;;  %v9608_v15 = vld [vmem:[#allocation41_spill] sm:$0xff] }
 0x570   :  { %6440 = vrcp.f32 %v4463_v41  ;;  %v9613_v41 = vld [vmem:[#allocation46_spill] sm:$0xff] }
 0x57a   :  { %v6435_v37 = vpop.eup %6434 }
 0x57b   :  { %v6437_v1 = vpop.eup %6436 }
 0x57c   :  { %v6439_v7 = vpop.eup %6438  ;;  %v4467_v11 = vmul.f32 %v6437_v1, %v6435_v37  ;;  %v9610_v37 = vld [vmem:[#allocation43_spill] sm:$0xff]  ;;  %v9611_v1 = vld [vmem:[#allocation44_spill] sm:$0xff] }
 0x57d   :  { %v4466_v57 = vmul.f32 %v6439_v7, %v8505_v4  ;;  %v6441_v27 = vpop.eup %6440  ;;  %v6540_v4 = vld [vmem:[#allocation9 + $0xe0] sm:$0xff]  ;;  %v9612_v7 = vld [vmem:[#allocation45_spill] sm:$0xff] }
 0x57f   :  { %v8771_v30 = vadd.f32 %v4467_v11, %v4466_v57  ;;  %v9614_v11 = vld [vmem:[#allocation47_spill] sm:$0xff] }
 0x580   :  { %v6543_v57 = vld [vmem:[#allocation9 + $0x20] sm:$0xff] }
 0x581   :  { %6442 = vtanh.f32 %v8771_v30 }
 0x58e   :  { %v6443_v22 = vpop.eup %6442 }
 0x58f   :  { %v4470_v34 = vmul.f32 %v6443_v22, %v6441_v27  ;;  %v9615_v27 = vld [vmem:[#allocation48_spill] sm:$0xff] }
 0x590   :  { %v6544_v22 = vld [vmem:[#allocation9 + $0x8] sm:$0xff] }
 0x591   :  { %4471 = vst.msk [vmem:[#allocation3 + $0x8] sm:$0xff] %vm4221_vm6, %v4470_v34  ;;  %4614 = vmatmul.mubr.f32.vlgmr.msra.gmra.mxu0 %v4470_v34  ;;  %4685 = vmatmul.mubr.f32.vlgmr.msra.gmra.mxu1 %v4470_v34 }
 0x592   :  { %4472 = vst.msk [vmem:[#allocation3 + $0x30] sm:$0xff] %vm4223_vm7, %v4470_v34  ;;  %4798 = vmatpush1.msra.mxu0 %v8586_v24  ;;  %4869 = vmatpush1.msra.mxu1 %v8588_v56  ;;  %v9616_v34 = vld [vmem:[#allocation49_spill] sm:$0xff] }
 0x593   :  { %4799 = vmatprep.subr.mxu0 %v8592_v26  ;;  %4870 = vmatprep.subr.mxu1 %v8594_v51 }
 0x594   :  { %4800 = vmatpush1.msra.mxu0 %v8598_v35  ;;  %4871 = vmatpush1.msra.mxu1 %v8600_v19 }
 0x595   :  { %4801 = vmatprep.subr.mxu0 %v8604_v60  ;;  %4872 = vmatprep.subr.mxu1 %v8606_v8 }
 0x596   :  { %4802 = vmatpush1.msra.mxu0 %v8610_v31  ;;  %4873 = vmatpush1.msra.mxu1 %v8612_v32 }
 0x597   :  { %4803 = vmatprep.subr.mxu0 %v8616_v42  ;;  %4874 = vmatprep.subr.mxu1 %v8618_v63 }
 0x598   :  { %4804 = vmatpush1.msra.mxu0 %v8622_v52  ;;  %4875 = vmatpush1.msra.mxu1 %v8624_v38 }
 0x599   :  { %4805 = vmatprep.subr.mxu0 %v8628_v18  ;;  %4876 = vmatprep.subr.mxu1 %v8630_v48 }
 0x59a   :  { %4806 = vmatpush1.msra.mxu0 %v8634_v6  ;;  %4877 = vmatpush1.msra.mxu1 %v8636_v25 }
 0x59b   :  { %4807 = vmatprep.subr.mxu0 %v8640_v10  ;;  %4878 = vmatprep.subr.mxu1 %v8642_v12 }
 0x59c   :  { %4808 = vmatpush1.msra.mxu0 %v8646_v36  ;;  %4879 = vmatpush1.msra.mxu1 %v8648_v58 }
 0x59d   :  { %4809 = vmatprep.subr.mxu0 %v8652_v49  ;;  %4880 = vmatprep.subr.mxu1 %v8654_v43 }
 0x59e   :  { %4810 = vmatpush1.msra.mxu0 %v8658_v40  ;;  %4881 = vmatpush1.msra.mxu1 %v8660_v46 }
 0x59f   :  { %4811 = vmatprep.subr.mxu0 %v8664_v47  ;;  %4882 = vmatprep.subr.mxu1 %v8666_v53 }
 0x5a0   :  { %4812 = vmatpush1.msra.mxu0 %v8670_v50  ;;  %4883 = vmatpush1.msra.mxu1 %v8672_v61 }
 0x5a1   :  { %4813 = vmatprep.subr.mxu0 %v8676_v55  ;;  %4884 = vmatprep.subr.mxu1 %v8678_v29 }
 0x5a2   :  { %4814 = vmatpush1.msra.mxu0 %v6540_v4  ;;  %4885 = vmatpush1.msra.mxu1 %v8680_v54  ;;  %v6545_v4 = vld [vmem:[#allocation9] sm:$0xff] }
 0x5a3   :  { %4815 = vmatprep.subr.mxu0 %v8684_v28  ;;  %4886 = vmatprep.subr.mxu1 %v8686_v33 }
 0x5a4   :  { %4816 = vmatpush1.msra.mxu0 %v8688_v14  ;;  %4887 = vmatpush1.msra.mxu1 %v8692_v23 }
 0x5a5   :  { %4817 = vmatprep.subr.mxu0 %v8694_v5  ;;  %4888 = vmatprep.subr.mxu1 %v8696_v13 }
 0x5a6   :  { %4818 = vmatpush1.msra.mxu0 %v6541_v9  ;;  %4889 = vmatpush1.msra.mxu1 %v8700_v21  ;;  %v9617_v9 = vmov 0.0  }
 0x5a7   :  { %4819 = vmatprep.subr.mxu0 %v8704_v45  ;;  %4890 = vmatprep.subr.mxu1 %v8706_v39 }
 0x5a8   :  { %4820 = vmatpush1.msra.mxu0 %v9604_v62  ;;  %4891 = vmatpush1.msra.mxu1 %v9605_v17  ;;  %v4478_v62 = vld [vmem:[#allocation2 + $0xa8] sm:$0xff] }
 0x5a9   :  { %4821 = vmatprep.subr.mxu0 %v9606_v16  ;;  %4892 = vmatprep.subr.mxu1 %v9607_v3  ;;  %v4474_v16 = vld [vmem:[#allocation2 + $0x48] sm:$0xff] }
 0x5aa   :  { %4822 = vmatpush1.msra.mxu0 %v6542_v2  ;;  %4893 = vmatpush1.msra.mxu1 %v9608_v15  ;;  %v9618_v2 = vld [vmem:[#allocation50_spill] sm:$0xff] }
 0x5ab   :  { %4823 = vmatprep.subr.mxu0 %v9609_v44  ;;  %4894 = vmatprep.subr.mxu1 %v9610_v37  ;;  %v4473_v44 = vld [vmem:[#allocation2 + $0x40] sm:$0xff] }
 0x5ac   :  { %4824 = vmatpush1.msra.mxu0 %v9611_v1  ;;  %4895 = vmatpush1.msra.mxu1 %v9612_v7  ;;  %v9619_v1 = vld [vmem:[#allocation24_spill] sm:$0xff] }
 0x5ad   :  { %4825 = vmatprep.subr.mxu0 %v9613_v41  ;;  %4896 = vmatprep.subr.mxu1 %v9614_v11  ;;  %v9620_v41 = vld [vmem:[#allocation25_spill] sm:$0xff] }
 0x5ae   :  { %4826 = vmatpush1.msra.mxu0 %v6543_v57  ;;  %4897 = vmatpush1.msra.mxu1 %v9615_v27  ;;  %v4477_v57 = vld [vmem:[#allocation2 + $0xa0] sm:$0xff]  ;;  %v4480_v11 = vld [vmem:[#allocation2 + $0xb8] sm:$0xff] }
 0x5af   :  { %4827 = vmatprep.subr.mxu0 %v6544_v22  ;;  %4898 = vmatprep.subr.mxu1 %v9616_v34  ;;  %v4481_v22 = vsel %vm3971_vm2, %v4473_v44, %v4477_v57  ;;  %v4475_v44 = vld [vmem:[#allocation2 + $0x50] sm:$0xff] }
 0x5b0   :  { %4828 = vmatpush1.msra.mxu0 %v6545_v4  ;;  %4861 = vmatprep.mubr.f32.mxu0 %v9617_v9  ;;  %v4482_v4 = vsel %vm8451_vm3, %v4474_v16, %v4478_v62  ;;  %v4479_v57 = vld [vmem:[#allocation2 + $0xb0] sm:$0xff] }
 0x5b1   :  { %4899 = vmatpush1.msra.mxu1 %v9618_v2  ;;  %4932 = vmatprep.mubr.f32.mxu1 %v9617_v9  ;;  %v4483_v62 = vsel %vm8475_vm5, %v4475_v44, %v4479_v57 }
 0x5b2   :  { %5045 = vmatprep.subr.mxu0 %v9619_v1  ;;  %5116 = vmatprep.subr.mxu1 %v9620_v41  ;;  %v4476_v41 = vld [vmem:[#allocation2 + $0x58] sm:$0xff] }
 0x5b3   :  { %v4484_v37 = vsel %vm8471_vm4, %v4476_v41, %v4480_v11 }
 0x651   :  { %v4615_v5 = vpop.f32.mrf.mxu0  ;;  %v4686_v27 = vpop.f32.mrf.mxu1 }
 0x652   :  { %v4691_v14 = vadd.f32 %v4615_v5, %v4481_v22 }
 0x653   :  { %v4617_v28 = vpop.f32.mrf.mxu0  ;;  %v4688_v7 = vpop.f32.mrf.mxu1 }
 0x654   :  { %v6268_v2 = vmul.f32 -1.442695, %v4691_v14  ;;  %v4692_v34 = vadd.f32 %v4617_v28, %v4482_v4  ;;  %v4694_v45 = vadd.f32 %v4688_v7, %v4484_v37  ;;  %v4693_v14 = vadd.f32 %v4686_v27, %v4483_v62 }
 0x656   :  { %6444 = vpow2.f32 %v6268_v2  ;;  %v6269_v1 = vmul.f32 -1.442695, %v4692_v34  ;;  %v6270_v5 = vmul.f32 -1.442695, %v4694_v45 }
 0x658   :  { %6446 = vpow2.f32 %v6269_v1 }
 0x659   :  { %6448 = vpow2.f32 %v6270_v5  ;;  %v9648_v5 = vld [vmem:[#allocation20_spill] sm:$0xff] }
 0x663   :  { %v6445_v16 = vpop.eup %6444 }
 0x664   :  { %v4698_v28 = vadd.f32 1.0, %v6445_v16 }
 0x665   :  { %v6447_v2 = vpop.eup %6446 }
 0x666   :  { %6450 = vrcp.f32 %v4698_v28  ;;  %v4704_v34 = vadd.f32 1.0, %v6447_v2  ;;  %v6449_v22 = vpop.eup %6448 }
 0x667   :  { %6452 = vtanh.f32 %v4693_v14  ;;  %v4711_v37 = vadd.f32 1.0, %v6449_v22 }
 0x668   :  { %6454 = vrcp.f32 %v4704_v34 }
 0x669   :  { %6456 = vrcp.f32 %v4711_v37 }
 0x673   :  { %v6451_v4 = vpop.eup %6450 }
 0x674   :  { %v6453_v1 = vpop.eup %6452 }
 0x675   :  { %v6455_v11 = vpop.eup %6454  ;;  %v4715_v7 = vmul.f32 %v6453_v1, %v6451_v4 }
 0x676   :  { %v4714_v45 = vmul.f32 %v6455_v11, %v8771_v30  ;;  %v6457_v27 = vpop.eup %6456 }
 0x678   :  { %v8845_v41 = vadd.f32 %v4715_v7, %v4714_v45 }
 0x67a   :  { %6458 = vtanh.f32 %v8845_v41 }
 0x687   :  { %v6459_v44 = vpop.eup %6458 }
 0x688   :  { %v4718_v57 = vmul.f32 %v6459_v44, %v6457_v27 }
 0x68a   :  { %4719 = vst.msk [vmem:[#allocation3 + $0x10] sm:$0xff] %vm4221_vm6, %v4718_v57  ;;  %4862 = vmatmul.mubr.f32.vlgmr.msra.gmra.mxu0 %v4718_v57  ;;  %4933 = vmatmul.mubr.f32.vlgmr.msra.gmra.mxu1 %v4718_v57 }
 0x68b   :  { %4720 = vst.msk [vmem:[#allocation3 + $0x28] sm:$0xff] %vm4223_vm7, %v4718_v57  ;;  %5046 = vmatpush1.msra.mxu0 %v8586_v24  ;;  %5117 = vmatpush1.msra.mxu1 %v8588_v56  ;;  %v9622_v24 = vld [vmem:[#allocation43_spill] sm:$0xff]  ;;  %v9623_v56 = vld [vmem:[#allocation45_spill] sm:$0xff] }
 0x68c   :  { %5047 = vmatprep.subr.mxu0 %v8592_v26  ;;  %5118 = vmatprep.subr.mxu1 %v8594_v51  ;;  %v9624_v26 = vld [vmem:[#allocation47_spill] sm:$0xff]  ;;  %v9625_v51 = vld [vmem:[#allocation48_spill] sm:$0xff] }
 0x68d   :  { %5048 = vmatpush1.msra.mxu0 %v8598_v35  ;;  %5119 = vmatpush1.msra.mxu1 %v8600_v19  ;;  %v9626_v35 = vld [vmem:[#allocation49_spill] sm:$0xff]  ;;  %v9628_v19 = vld [vmem:[#allocation27_spill] sm:$0xff] }
 0x68e   :  { %5049 = vmatprep.subr.mxu0 %v8604_v60  ;;  %5120 = vmatprep.subr.mxu1 %v8606_v8  ;;  %v8903_v60 = vld [vmem:[#allocation9 + $0xa0] sm:$0xff]  ;;  %v9630_v8 = vld [vmem:[#allocation28_spill] sm:$0xff] }
 0x68f   :  { %5050 = vmatpush1.msra.mxu0 %v8610_v31  ;;  %5121 = vmatpush1.msra.mxu1 %v8612_v32  ;;  %9629 = vst [vmem:[#allocation36_spill] sm:$0xff] %v8903_v60  ;;  %v9631_v31 = vld [vmem:[#allocation30_spill] sm:$0xff]  ;;  %v9632_v32 = vld [vmem:[#allocation33_spill] sm:$0xff] }
 0x690   :  { %5051 = vmatprep.subr.mxu0 %v8616_v42  ;;  %5122 = vmatprep.subr.mxu1 %v8618_v63  ;;  %v8909_v42 = vld [vmem:[#allocation9 + $0x60] sm:$0xff] }
 0x691   :  { %5052 = vmatpush1.msra.mxu0 %v8622_v52  ;;  %5123 = vmatpush1.msra.mxu1 %v8624_v38  ;;  %v9633_v63 = vld [vmem:[#allocation35_spill] sm:$0xff]  ;;  %v9635_v38 = vld [vmem:[#allocation42_spill] sm:$0xff] }
 0x692   :  { %5053 = vmatprep.subr.mxu0 %v8628_v18  ;;  %5124 = vmatprep.subr.mxu1 %v8630_v48  ;;  %v9634_v52 = vld [vmem:[#allocation39_spill] sm:$0xff]  ;;  %v9636_v48 = vld [vmem:[#allocation44_spill] sm:$0xff] }
 0x693   :  { %5054 = vmatpush1.msra.mxu0 %v8634_v6  ;;  %5125 = vmatpush1.msra.mxu1 %v8636_v25  ;;  %v8915_v18 = vld [vmem:[#allocation9 + $0x20] sm:$0xff]  ;;  %v8918_v6 = vld [vmem:[#allocation9 + $0x8] sm:$0xff] }
 0x694   :  { %5055 = vmatprep.subr.mxu0 %v8640_v10  ;;  %5126 = vmatprep.subr.mxu1 %v8642_v12  ;;  %9637 = vst [vmem:[#allocation40_spill] sm:$0xff] %v8918_v6  ;;  %v9638_v25 = vld [vmem:[#allocation46_spill] sm:$0xff] }
 0x695   :  { %5056 = vmatpush1.msra.mxu0 %v8646_v36  ;;  %5127 = vmatpush1.msra.mxu1 %v8648_v58  ;;  %v8921_v10 = vld [vmem:[#allocation9] sm:$0xff]  ;;  %v9641_v36 = vld [vmem:[#allocation37_spill] sm:$0xff]  ;;  %v9086_v58 = vld [vmem:[#allocation9 + $0x68] sm:$0xff] }
 0x696   :  { %5057 = vmatprep.subr.mxu0 %v8652_v49  ;;  %5128 = vmatprep.subr.mxu1 %v8654_v43  ;;  %9639 = vst [vmem:[#allocation41_spill] sm:$0xff] %v8921_v10  ;;  %v9640_v12 = vld [vmem:[#allocation38_spill] sm:$0xff]  ;;  %9661 = vst [vmem:[#allocation35_spill] sm:$0xff] %v9086_v58 }
 0x697   :  { %5058 = vmatpush1.msra.mxu0 %v8658_v40  ;;  %5129 = vmatpush1.msra.mxu1 %v8660_v46  ;;  %v4729_v49 = vsel %vm3971_vm2, %v9641_v36, %v9640_v12  ;;  %v9643_v46 = vld [vmem:[#allocation26_spill] sm:$0xff]  ;;  %v8994_v12 = vld [vmem:[#allocation9 + $0x190] sm:$0xff]  ;;  %v8998_v36 = vld [vmem:[#allocation9 + $0x168] sm:$0xff] }
 0x698   :  { %5059 = vmatprep.subr.mxu0 %v8664_v47  ;;  %5130 = vmatprep.subr.mxu1 %v8666_v53  ;;  %v9644_v47 = vld [vmem:[#allocation23_spill] sm:$0xff] }
 0x699   :  { %5060 = vmatpush1.msra.mxu0 %v8670_v50  ;;  %5131 = vmatpush1.msra.mxu1 %v8672_v61  ;;  %v4730_v53 = vsel %vm8451_vm3, %v9644_v47, %v9643_v46 }
 0x69a   :  { %5061 = vmatprep.subr.mxu0 %v8676_v55  ;;  %5132 = vmatprep.subr.mxu1 %v8678_v29 }
 0x69b   :  { %5133 = vmatpush1.msra.mxu1 %v8680_v54  ;;  %5109 = vmatprep.mubr.f32.mxu0 %v9617_v9 }
 0x69c   :  { %5134 = vmatprep.subr.mxu1 %v8686_v33  ;;  %5180 = vmatprep.mubr.f32.mxu1 %v9617_v9 }
 0x69d   :  { %5135 = vmatpush1.msra.mxu1 %v8692_v23  ;;  %v9645_v23 = vld [vmem:[#allocation22_spill] sm:$0xff] }
 0x69e   :  { %5136 = vmatprep.subr.mxu1 %v8696_v13  ;;  %v9627_v13 = vld [vmem:[#allocation50_spill] sm:$0xff] }
 0x69f   :  { %5137 = vmatpush1.msra.mxu1 %v8700_v21  ;;  %v8899_v21 = vld [vmem:[#allocation9 + $0xe0] sm:$0xff] }
 0x6a0   :  { %5138 = vmatprep.subr.mxu1 %v8706_v39  ;;  %5062 = vmatpush1.msra.mxu0 %v8899_v21  ;;  %v9646_v39 = vld [vmem:[#allocation29_spill] sm:$0xff] }
 0x6a1   :  { %5139 = vmatpush1.msra.mxu1 %v9605_v17  ;;  %5063 = vmatprep.subr.mxu0 %v9628_v19  ;;  %v4732_v30 = vsel %vm8471_vm4, %v9646_v39, %v9645_v23  ;;  %v8968_v19 = vld [vmem:[#allocation9 + $0x1c0] sm:$0xff] }
 0x6a2   :  { %5140 = vmatprep.subr.mxu1 %v9607_v3  ;;  %5064 = vmatpush1.msra.mxu0 %v9630_v8  ;;  %v8970_v8 = vld [vmem:[#allocation9 + $0x1d0] sm:$0xff] }
 0x6a3   :  { %5141 = vmatpush1.msra.mxu1 %v9608_v15  ;;  %5065 = vmatprep.subr.mxu0 %v9631_v31  ;;  %v9647_v15 = vld [vmem:[#allocation21_spill] sm:$0xff]  ;;  %v8974_v31 = vld [vmem:[#allocation9 + $0x1a8] sm:$0xff] }
 0x6a4   :  { %5142 = vmatprep.subr.mxu1 %v9622_v24  ;;  %5066 = vmatpush1.msra.mxu0 %v8903_v60  ;;  %v4731_v62 = vsel %vm8475_vm5, %v9648_v5, %v9647_v15 }
 0x6a5   :  { %5143 = vmatpush1.msra.mxu1 %v9623_v56  ;;  %5067 = vmatprep.subr.mxu0 %v9632_v32  ;;  %v8950_v56 = vld [vmem:[#allocation9 + $0x1e8] sm:$0xff]  ;;  %v8976_v32 = vld [vmem:[#allocation9 + $0x1b8] sm:$0xff] }
 0x6a6   :  { %5144 = vmatprep.subr.mxu1 %v9624_v26  ;;  %5068 = vmatpush1.msra.mxu0 %v9633_v63  ;;  %9649 = vst [vmem:[#allocation24_spill] sm:$0xff] %v8950_v56  ;;  %v8956_v26 = vld [vmem:[#allocation9 + $0x1e0] sm:$0xff] }
 0x6a7   :  { %5145 = vmatpush1.msra.mxu1 %v9625_v51  ;;  %5069 = vmatprep.subr.mxu0 %v9634_v52  ;;  %v8958_v51 = vld [vmem:[#allocation9 + $0x1f0] sm:$0xff]  ;;  %v8980_v63 = vld [vmem:[#allocation9 + $0x1a0] sm:$0xff] }
 0x6a8   :  { %5146 = vmatprep.subr.mxu1 %v9626_v35  ;;  %5070 = vmatpush1.msra.mxu0 %v8909_v42  ;;  %v8962_v35 = vld [vmem:[#allocation9 + $0x1c8] sm:$0xff]  ;;  %v8982_v52 = vld [vmem:[#allocation9 + $0x1b0] sm:$0xff] }
 0x6a9   :  { %5147 = vmatpush1.msra.mxu1 %v9627_v13  ;;  %5071 = vmatprep.subr.mxu0 %v9635_v38  ;;  %v8964_v13 = vld [vmem:[#allocation9 + $0x1d8] sm:$0xff]  ;;  %v8986_v38 = vld [vmem:[#allocation9 + $0x188] sm:$0xff] }
 0x6aa   :  { %5072 = vmatpush1.msra.mxu0 %v9636_v48  ;;  %v8988_v48 = vld [vmem:[#allocation9 + $0x198] sm:$0xff] }
 0x6ab   :  { %5073 = vmatprep.subr.mxu0 %v9638_v25  ;;  %v8992_v25 = vld [vmem:[#allocation9 + $0x180] sm:$0xff] }
 0x6ac   :  { %5074 = vmatpush1.msra.mxu0 %v8915_v18 }
 0x6ad   :  { %5075 = vmatprep.subr.mxu0 %v8918_v6 }
 0x6ae   :  { %5076 = vmatpush1.msra.mxu0 %v8921_v10 }
 0x6af   :  { %5293 = vmatprep.subr.mxu0 %v8950_v56 }
 0x74a   :  { %v4863_v43 = vpop.f32.mrf.mxu0  ;;  %v4934_v29 = vpop.f32.mrf.mxu1 }
 0x74b   :  { %v4939_v40 = vadd.f32 %v4863_v43, %v4729_v49  ;;  %v4941_v14 = vadd.f32 %v4934_v29, %v4731_v62  ;;  %v9000_v49 = vld [vmem:[#allocation9 + $0x178] sm:$0xff]  ;;  %v9004_v43 = vld [vmem:[#allocation9 + $0x160] sm:$0xff]  ;;  %v9022_v29 = vld [vmem:[#allocation9 + $0x128] sm:$0xff] }
 0x74c   :  { %v4865_v50 = vpop.f32.mrf.mxu0  ;;  %v4936_v33 = vpop.f32.mrf.mxu1  ;;  %v9040_v62 = vld [vmem:[#allocation9 + $0x100] sm:$0xff] }
 0x74d   :  { %v6271_v61 = vmul.f32 -1.442695, %v4939_v40  ;;  %v4940_v55 = vadd.f32 %v4865_v50, %v4730_v53  ;;  %v4942_v17 = vadd.f32 %v4936_v33, %v4732_v30  ;;  %v9006_v40 = vld [vmem:[#allocation9 + $0x170] sm:$0xff]  ;;  %v9010_v53 = vld [vmem:[#allocation9 + $0x148] sm:$0xff]  ;;  %v9012_v50 = vld [vmem:[#allocation9 + $0x158] sm:$0xff] }
 0x74e   :  { %v9028_v33 = vld [vmem:[#allocation9 + $0x120] sm:$0xff]  ;;  %v9030_v30 = vld [vmem:[#allocation9 + $0x130] sm:$0xff] }
 0x74f   :  { %6460 = vpow2.f32 %v6271_v61  ;;  %v6272_v54 = vmul.f32 -1.442695, %v4940_v55  ;;  %v6273_v3 = vmul.f32 -1.442695, %v4942_v17  ;;  %v9016_v61 = vld [vmem:[#allocation9 + $0x140] sm:$0xff]  ;;  %v9018_v55 = vld [vmem:[#allocation9 + $0x150] sm:$0xff] }
 0x750   :  { %v9034_v17 = vld [vmem:[#allocation9 + $0x108] sm:$0xff] }
 0x751   :  { %6462 = vpow2.f32 %v6272_v54  ;;  %v9024_v54 = vld [vmem:[#allocation9 + $0x138] sm:$0xff] }
 0x752   :  { %6464 = vpow2.f32 %v6273_v3  ;;  %v9036_v3 = vld [vmem:[#allocation9 + $0x118] sm:$0xff] }
 0x75c   :  { %v6461_v16 = vpop.eup %6460 }
 0x75d   :  { %v4946_v28 = vadd.f32 1.0, %v6461_v16  ;;  %v9042_v16 = vld [vmem:[#allocation9 + $0x110] sm:$0xff] }
 0x75e   :  { %v6463_v2 = vpop.eup %6462 }
 0x75f   :  { %6466 = vrcp.f32 %v4946_v28  ;;  %v4952_v34 = vadd.f32 1.0, %v6463_v2  ;;  %v6465_v22 = vpop.eup %6464  ;;  %v9048_v28 = vld [vmem:[#allocation9 + $0xf8] sm:$0xff]  ;;  %v9050_v2 = vld [vmem:[#allocation9 + $0xf0] sm:$0xff] }
 0x760   :  { %6468 = vtanh.f32 %v4941_v14  ;;  %v4959_v37 = vadd.f32 1.0, %v6465_v22  ;;  %v9046_v14 = vld [vmem:[#allocation9 + $0xe8] sm:$0xff]  ;;  %v9056_v22 = vld [vmem:[#allocation9 + $0xd8] sm:$0xff] }
 0x761   :  { %6470 = vrcp.f32 %v4952_v34  ;;  %v9054_v34 = vld [vmem:[#allocation9 + $0xc8] sm:$0xff] }
 0x762   :  { %6472 = vrcp.f32 %v4959_v37  ;;  %9651 = vst [vmem:[#allocation43_spill] sm:$0xff] %v9054_v34  ;;  %v9066_v37 = vld [vmem:[#allocation9 + $0xb8] sm:$0xff] }
 0x763   :  { %9655 = vst [vmem:[#allocation49_spill] sm:$0xff] %v9066_v37 }
 0x76c   :  { %v6467_v4 = vpop.eup %6466 }
 0x76d   :  { %v6469_v1 = vpop.eup %6468 }
 0x76e   :  { %v6471_v11 = vpop.eup %6470  ;;  %v4963_v7 = vmul.f32 %v6469_v1, %v6467_v4  ;;  %v9058_v4 = vld [vmem:[#allocation9 + $0xc0] sm:$0xff]  ;;  %v9062_v1 = vld [vmem:[#allocation9 + $0xd0] sm:$0xff] }
 0x76f   :  { %v4962_v45 = vmul.f32 %v6471_v11, %v8845_v41  ;;  %v6473_v44 = vpop.eup %6472  ;;  %v8952_v41 = vld [vmem:[#allocation9 + $0x1f8] sm:$0xff]  ;;  %9652 = vst [vmem:[#allocation45_spill] sm:$0xff] %v9058_v4  ;;  %9653 = vst [vmem:[#allocation47_spill] sm:$0xff] %v9062_v1  ;;  %v9064_v11 = vld [vmem:[#allocation9 + $0xa8] sm:$0xff] }
 0x770   :  { %9650 = vst [vmem:[#allocation25_spill] sm:$0xff] %v8952_v41  ;;  %5364 = vmatprep.subr.mxu1 %v8952_v41  ;;  %9654 = vst [vmem:[#allocation48_spill] sm:$0xff] %v9064_v11 }
 0x771   :  { %v8943_v27 = vadd.f32 %v4963_v7, %v4962_v45  ;;  %v9070_v7 = vld [vmem:[#allocation9 + $0xb0] sm:$0xff]  ;;  %v9074_v45 = vld [vmem:[#allocation9 + $0x88] sm:$0xff] }
 0x772   :  { %9656 = vst [vmem:[#allocation50_spill] sm:$0xff] %v9070_v7  ;;  %9657 = vst [vmem:[#allocation27_spill] sm:$0xff] %v9074_v45 }
 0x773   :  { %6474 = vtanh.f32 %v8943_v27 }
 0x780   :  { %v6475_v57 = vpop.eup %6474 }
 0x781   :  { %v4966_v24 = vmul.f32 %v6475_v57, %v6473_v44  ;;  %v9076_v44 = vld [vmem:[#allocation9 + $0x98] sm:$0xff]  ;;  %v9080_v57 = vld [vmem:[#allocation9 + $0x80] sm:$0xff] }
 0x782   :  { %9658 = vst [vmem:[#allocation28_spill] sm:$0xff] %v9076_v44  ;;  %9659 = vst [vmem:[#allocation30_spill] sm:$0xff] %v9080_v57 }
 0x783   :  { %4967 = vst.msk [vmem:[#allocation3 + $0x18] sm:$0xff] %vm4221_vm6, %v4966_v24  ;;  %5110 = vmatmul.mubr.f32.vlgmr.msra.gmra.mxu0 %v4966_v24  ;;  %5181 = vmatmul.mubr.f32.vlgmr.msra.gmra.mxu1 %v4966_v24 }
 0x784   :  { %4968 = vst.msk [vmem:[#allocation3 + $0x20] sm:$0xff] %vm4223_vm7, %v4966_v24  ;;  %5357 = vmatprep.mubr.f32.mxu0 %v9617_v9  ;;  %5428 = vmatprep.mubr.f32.mxu1 %v9617_v9  ;;  %v9082_v24 = vld [vmem:[#allocation9 + $0x90] sm:$0xff]  ;;  %v9088_v9 = vld [vmem:[#allocation9 + $0x78] sm:$0xff] }
 0x785   :  { %5294 = vmatpush1.msra.mxu0 %v8956_v26  ;;  %5365 = vmatpush1.msra.mxu1 %v8958_v51  ;;  %9660 = vst [vmem:[#allocation33_spill] sm:$0xff] %v9082_v24  ;;  %9662 = vst [vmem:[#allocation39_spill] sm:$0xff] %v9088_v9 }
 0x786   :  { %5295 = vmatprep.subr.mxu0 %v8962_v35  ;;  %5366 = vmatprep.subr.mxu1 %v8964_v13 }
 0x787   :  { %5296 = vmatpush1.msra.mxu0 %v8968_v19  ;;  %5367 = vmatpush1.msra.mxu1 %v8970_v8 }
 0x788   :  { %5297 = vmatprep.subr.mxu0 %v8974_v31  ;;  %5368 = vmatprep.subr.mxu1 %v8976_v32 }
 0x789   :  { %5298 = vmatpush1.msra.mxu0 %v8980_v63  ;;  %5369 = vmatpush1.msra.mxu1 %v8982_v52 }
 0x78a   :  { %5299 = vmatprep.subr.mxu0 %v8986_v38  ;;  %5370 = vmatprep.subr.mxu1 %v8988_v48 }
 0x78b   :  { %5300 = vmatpush1.msra.mxu0 %v8992_v25  ;;  %5371 = vmatpush1.msra.mxu1 %v8994_v12 }
 0x78c   :  { %5301 = vmatprep.subr.mxu0 %v8998_v36  ;;  %5372 = vmatprep.subr.mxu1 %v9000_v49 }
 0x78d   :  { %5302 = vmatpush1.msra.mxu0 %v9004_v43  ;;  %5373 = vmatpush1.msra.mxu1 %v9006_v40 }
 0x78e   :  { %5303 = vmatprep.subr.mxu0 %v9010_v53  ;;  %5374 = vmatprep.subr.mxu1 %v9012_v50 }
 0x78f   :  { %5304 = vmatpush1.msra.mxu0 %v9016_v61  ;;  %5375 = vmatpush1.msra.mxu1 %v9018_v55 }
 0x790   :  { %5305 = vmatprep.subr.mxu0 %v9022_v29  ;;  %5376 = vmatprep.subr.mxu1 %v9024_v54 }
 0x791   :  { %5306 = vmatpush1.msra.mxu0 %v9028_v33  ;;  %5377 = vmatpush1.msra.mxu1 %v9030_v30 }
 0x792   :  { %5307 = vmatprep.subr.mxu0 %v9034_v17  ;;  %5378 = vmatprep.subr.mxu1 %v9036_v3 }
 0x793   :  { %5308 = vmatpush1.msra.mxu0 %v9040_v62  ;;  %5379 = vmatpush1.msra.mxu1 %v9042_v16 }
 0x794   :  { %5309 = vmatprep.subr.mxu0 %v9046_v14  ;;  %5380 = vmatprep.subr.mxu1 %v9048_v28 }
 0x795   :  { %5310 = vmatpush1.msra.mxu0 %v8899_v21  ;;  %5381 = vmatpush1.msra.mxu1 %v9050_v2 }
 0x796   :  { %5311 = vmatprep.subr.mxu0 %v9054_v34  ;;  %5382 = vmatprep.subr.mxu1 %v9056_v22 }
 0x797   :  { %5312 = vmatpush1.msra.mxu0 %v9058_v4  ;;  %5383 = vmatpush1.msra.mxu1 %v9062_v1  ;;  %v9092_v1 = vld [vmem:[#allocation9 + $0x70] sm:$0xff] }
 0x798   :  { %5313 = vmatprep.subr.mxu0 %v9064_v11  ;;  %5384 = vmatprep.subr.mxu1 %v9066_v37  ;;  %9663 = vst [vmem:[#allocation42_spill] sm:$0xff] %v9092_v1  ;;  %v9096_v37 = vld [vmem:[#allocation9 + $0x48] sm:$0xff]  ;;  %v9098_v11 = vld [vmem:[#allocation9 + $0x58] sm:$0xff] }
 0x799   :  { %5314 = vmatpush1.msra.mxu0 %v8903_v60  ;;  %5385 = vmatpush1.msra.mxu1 %v9070_v7  ;;  %9664 = vst [vmem:[#allocation44_spill] sm:$0xff] %v9096_v37  ;;  %9665 = vst [vmem:[#allocation46_spill] sm:$0xff] %v9098_v11  ;;  %v9102_v7 = vld [vmem:[#allocation9 + $0x40] sm:$0xff]  ;;  %v9104_v60 = vld [vmem:[#allocation9 + $0x50] sm:$0xff] }
 0x79a   :  { %5315 = vmatprep.subr.mxu0 %v9074_v45  ;;  %5386 = vmatprep.subr.mxu1 %v9076_v44  ;;  %9666 = vst [vmem:[#allocation38_spill] sm:$0xff] %v9102_v7  ;;  %9667 = vst [vmem:[#allocation37_spill] sm:$0xff] %v9104_v60  ;;  %v9108_v44 = vld [vmem:[#allocation9 + $0x28] sm:$0xff] }
 0x79b   :  { %5316 = vmatpush1.msra.mxu0 %v9080_v57  ;;  %5387 = vmatpush1.msra.mxu1 %v9082_v24  ;;  %9668 = vst [vmem:[#allocation26_spill] sm:$0xff] %v9108_v44  ;;  %v9110_v57 = vld [vmem:[#allocation9 + $0x38] sm:$0xff]  ;;  %v9114_v24 = vld [vmem:[#allocation9 + $0x30] sm:$0xff] }
 0x79c   :  { %5317 = vmatprep.subr.mxu0 %v9086_v58  ;;  %5388 = vmatprep.subr.mxu1 %v9088_v9  ;;  %9669 = vst [vmem:[#allocation23_spill] sm:$0xff] %v9110_v57  ;;  %9670 = vst [vmem:[#allocation22_spill] sm:$0xff] %v9114_v24  ;;  %v9118_v9 = vld [vmem:[#allocation9 + $0x18] sm:$0xff] }
 0x79d   :  { %5318 = vmatpush1.msra.mxu0 %v8909_v42  ;;  %5389 = vmatpush1.msra.mxu1 %v9092_v1  ;;  %9671 = vst [vmem:[#allocation29_spill] sm:$0xff] %v9118_v9  ;;  %v9122_v1 = vld [vmem:[#allocation9 + $0x10] sm:$0xff] }
 0x79e   :  { %5319 = vmatprep.subr.mxu0 %v9096_v37  ;;  %5390 = vmatprep.subr.mxu1 %v9098_v11  ;;  %9672 = vst [vmem:[#allocation21_spill] sm:$0xff] %v9122_v1 }
 0x79f   :  { %5320 = vmatpush1.msra.mxu0 %v9102_v7  ;;  %5391 = vmatpush1.msra.mxu1 %v9104_v60 }
 0x7a0   :  { %5321 = vmatprep.subr.mxu0 %v9108_v44  ;;  %5392 = vmatprep.subr.mxu1 %v9110_v57  ;;  %v9673_v57 = vld [vmem:[#allocation19_spill] sm:$0xff] }
 0x7a1   :  { %5322 = vmatpush1.msra.mxu0 %v8915_v18  ;;  %5393 = vmatpush1.msra.mxu1 %v9114_v24 }
 0x7a2   :  { %5323 = vmatprep.subr.mxu0 %v8918_v6  ;;  %5394 = vmatprep.subr.mxu1 %v9118_v9  ;;  %v9674_v6 = vsel %vm8451_vm3, %v9643_v46, %v9644_v47 }
 0x7a3   :  { %5324 = vmatpush1.msra.mxu0 %v8921_v10  ;;  %5395 = vmatpush1.msra.mxu1 %v9122_v1 }
 0x7a4   :  { %5541 = vmatprep.subr.mxu0 %v8950_v56  ;;  %5612 = vmatprep.subr.mxu1 %v8952_v41  ;;  %v9675_v41 = vsel %vm8471_vm4, %v9645_v23, %v9646_v39 }
 0x843   :  { %v5111_v44 = vpop.f32.mrf.mxu0  ;;  %v5182_v9 = vpop.f32.mrf.mxu1 }
 0x844   :  { %v5187_v60 = vadd.f32 %v5111_v44, %v9673_v57 }
 0x845   :  { %v5113_v7 = vpop.f32.mrf.mxu0  ;;  %v5184_v1 = vpop.f32.mrf.mxu1 }
 0x846   :  { %v6274_v11 = vmul.f32 -1.442695, %v5187_v60  ;;  %v5188_v24 = vadd.f32 %v5113_v7, %v9674_v6  ;;  %v5190_v56 = vadd.f32 %v5184_v1, %v9675_v41  ;;  %v9676_v60 = vsel %vm8475_vm5, %v9647_v15, %v9648_v5 }
 0x847   :  { %v5189_v44 = vadd.f32 %v5182_v9, %v9676_v60  ;;  %v9679_v60 = vld [vmem:[#allocation49_spill] sm:$0xff] }
 0x848   :  { %6476 = vpow2.f32 %v6274_v11  ;;  %v6275_v10 = vmul.f32 -1.442695, %v5188_v24  ;;  %v6276_v57 = vmul.f32 -1.442695, %v5190_v56  ;;  %v9678_v56 = vld [vmem:[#allocation48_spill] sm:$0xff] }
 0x84a   :  { %6478 = vpow2.f32 %v6275_v10 }
 0x84b   :  { %6480 = vtanh.f32 %v5189_v44  ;;  %v9680_v44 = vld [vmem:[#allocation36_spill] sm:$0xff] }
 0x84c   :  { %6482 = vpow2.f32 %v6276_v57  ;;  %v9681_v57 = vld [vmem:[#allocation50_spill] sm:$0xff] }
 0x855   :  { %v6477_v46 = vpop.eup %6476 }
 0x856   :  { %v5194_v6 = vadd.f32 1.0, %v6477_v46  ;;  %v9683_v46 = vld [vmem:[#allocation30_spill] sm:$0xff] }
 0x857   :  { %v6479_v47 = vpop.eup %6478 }
 0x858   :  { %6484 = vrcp.f32 %v5194_v6  ;;  %v5200_v10 = vadd.f32 1.0, %v6479_v47  ;;  %v6481_v11 = vpop.eup %6480  ;;  %v9684_v6 = vld [vmem:[#allocation33_spill] sm:$0xff]  ;;  %v9685_v47 = vld [vmem:[#allocation39_spill] sm:$0xff] }
 0x859   :  { %v6483_v7 = vpop.eup %6482 }
 0x85a   :  { %6486 = vrcp.f32 %v5200_v10  ;;  %v5207_v41 = vadd.f32 1.0, %v6483_v7  ;;  %v9686_v10 = vld [vmem:[#allocation42_spill] sm:$0xff] }
 0x85b   :  { %v9688_v7 = vld [vmem:[#allocation38_spill] sm:$0xff] }
 0x85c   :  { %6488 = vrcp.f32 %v5207_v41  ;;  %v9692_v41 = vld [vmem:[#allocation22_spill] sm:$0xff] }
 0x865   :  { %v6485_v24 = vpop.eup %6484 }
 0x866   :  { %v5211_v23 = vmul.f32 %v6485_v24, %v6481_v11  ;;  %v9687_v11 = vld [vmem:[#allocation46_spill] sm:$0xff]  ;;  %v9689_v24 = vld [vmem:[#allocation37_spill] sm:$0xff] }
 0x867   :  { %v6487_v39 = vpop.eup %6486 }
 0x868   :  { %v5210_v1 = vmul.f32 %v6487_v39, %v8943_v27  ;;  %v9677_v27 = vld [vmem:[#allocation47_spill] sm:$0xff] }
 0x869   :  { %v6489_v9 = vpop.eup %6488  ;;  %v9691_v39 = vld [vmem:[#allocation23_spill] sm:$0xff] }
 0x86a   :  { %v9149_v20 = vadd.f32 %v5211_v23, %v5210_v1  ;;  %v9690_v23 = vld [vmem:[#allocation26_spill] sm:$0xff]  ;;  %v9693_v1 = vld [vmem:[#allocation40_spill] sm:$0xff] }
 0x86c   :  { %6490 = vtanh.f32 %v9149_v20 }
 0x879   :  { %v6491_v15 = vpop.eup %6490 }
 0x87a   :  { %v5214_v5 = vmul.f32 %v6491_v15, %v6489_v9  ;;  %v9695_v9 = vld [vmem:[#allocation41_spill] sm:$0xff]  ;;  %v9696_v15 = vmov 0.0  }
 0x87c   :  { %5215 = vst.msk [vmem:[#allocation3 + $0x20] sm:$0xff] %vm4221_vm6, %v5214_v5  ;;  %5358 = vmatmul.mubr.f32.vlgmr.msra.gmra.mxu0 %v5214_v5  ;;  %5429 = vmatmul.mubr.f32.vlgmr.msra.gmra.mxu1 %v5214_v5 }
 0x87d   :  { %5216 = vst.msk [vmem:[#allocation3 + $0x18] sm:$0xff] %vm4223_vm7, %v5214_v5  ;;  %5542 = vmatpush1.msra.mxu0 %v8956_v26  ;;  %5613 = vmatpush1.msra.mxu1 %v8958_v51  ;;  %v9697_v5 = vld [vmem:[#allocation21_spill] sm:$0xff] }
 0x87e   :  { %5543 = vmatprep.subr.mxu0 %v8962_v35  ;;  %5614 = vmatprep.subr.mxu1 %v8964_v13 }
 0x87f   :  { %5544 = vmatpush1.msra.mxu0 %v8968_v19  ;;  %5615 = vmatpush1.msra.mxu1 %v8970_v8 }
 0x880   :  { %5545 = vmatprep.subr.mxu0 %v8974_v31  ;;  %5616 = vmatprep.subr.mxu1 %v8976_v32 }
 0x881   :  { %5546 = vmatpush1.msra.mxu0 %v8980_v63  ;;  %5617 = vmatpush1.msra.mxu1 %v8982_v52 }
 0x882   :  { %5547 = vmatprep.subr.mxu0 %v8986_v38  ;;  %5618 = vmatprep.subr.mxu1 %v8988_v48 }
 0x883   :  { %5548 = vmatpush1.msra.mxu0 %v8992_v25  ;;  %5619 = vmatpush1.msra.mxu1 %v8994_v12 }
 0x884   :  { %5549 = vmatprep.subr.mxu0 %v8998_v36  ;;  %5620 = vmatprep.subr.mxu1 %v9000_v49 }
 0x885   :  { %5550 = vmatpush1.msra.mxu0 %v9004_v43  ;;  %5621 = vmatpush1.msra.mxu1 %v9006_v40 }
 0x886   :  { %5551 = vmatprep.subr.mxu0 %v9010_v53  ;;  %5622 = vmatprep.subr.mxu1 %v9012_v50 }
 0x887   :  { %5552 = vmatpush1.msra.mxu0 %v9016_v61  ;;  %5623 = vmatpush1.msra.mxu1 %v9018_v55 }
 0x888   :  { %5553 = vmatprep.subr.mxu0 %v9022_v29  ;;  %5624 = vmatprep.subr.mxu1 %v9024_v54 }
 0x889   :  { %5554 = vmatpush1.msra.mxu0 %v9028_v33  ;;  %5625 = vmatpush1.msra.mxu1 %v9030_v30 }
 0x88a   :  { %5555 = vmatprep.subr.mxu0 %v9034_v17  ;;  %5626 = vmatprep.subr.mxu1 %v9036_v3 }
 0x88b   :  { %5556 = vmatpush1.msra.mxu0 %v9040_v62  ;;  %5627 = vmatpush1.msra.mxu1 %v9042_v16 }
 0x88c   :  { %5557 = vmatprep.subr.mxu0 %v9046_v14  ;;  %5628 = vmatprep.subr.mxu1 %v9048_v28 }
 0x88d   :  { %5558 = vmatpush1.msra.mxu0 %v8899_v21  ;;  %5629 = vmatpush1.msra.mxu1 %v9050_v2  ;;  %v9682_v21 = vld [vmem:[#allocation28_spill] sm:$0xff] }
 0x88e   :  { %5559 = vmatprep.subr.mxu0 %v9054_v34  ;;  %5630 = vmatprep.subr.mxu1 %v9056_v22 }
 0x88f   :  { %5560 = vmatpush1.msra.mxu0 %v9058_v4  ;;  %5631 = vmatpush1.msra.mxu1 %v9677_v27 }
 0x890   :  { %5561 = vmatprep.subr.mxu0 %v9678_v56  ;;  %5632 = vmatprep.subr.mxu1 %v9679_v60 }
 0x891   :  { %5562 = vmatpush1.msra.mxu0 %v9680_v44  ;;  %5633 = vmatpush1.msra.mxu1 %v9681_v57  ;;  %v9698_v44 = vld [vmem:[#allocation24_spill] sm:$0xff] }
 0x892   :  { %5563 = vmatprep.subr.mxu0 %v9074_v45  ;;  %5634 = vmatprep.subr.mxu1 %v9682_v21 }
 0x893   :  { %5564 = vmatpush1.msra.mxu0 %v9683_v46  ;;  %5635 = vmatpush1.msra.mxu1 %v9684_v6 }
 0x894   :  { %5565 = vmatprep.subr.mxu0 %v9086_v58  ;;  %5636 = vmatprep.subr.mxu1 %v9685_v47  ;;  %v5222_v58 = vld [vmem:[#allocation2 + $0x48] sm:$0xff] }
 0x895   :  { %5566 = vmatpush1.msra.mxu0 %v8909_v42  ;;  %5637 = vmatpush1.msra.mxu1 %v9686_v10  ;;  %v9694_v42 = vld [vmem:[#allocation29_spill] sm:$0xff] }
 0x896   :  { %5567 = vmatprep.subr.mxu0 %v9096_v37  ;;  %5638 = vmatprep.subr.mxu1 %v9687_v11  ;;  %v5218_v37 = vld [vmem:[#allocation2 + $0xa8] sm:$0xff] }
 0x897   :  { %5568 = vmatpush1.msra.mxu0 %v9688_v7  ;;  %5639 = vmatpush1.msra.mxu1 %v9689_v24  ;;  %v5217_v7 = vld [vmem:[#allocation2 + $0xa0] sm:$0xff] }
 0x898   :  { %5569 = vmatprep.subr.mxu0 %v9690_v23  ;;  %5640 = vmatprep.subr.mxu1 %v9691_v39  ;;  %v9699_v23 = vld [vmem:[#allocation25_spill] sm:$0xff] }
 0x899   :  { %5570 = vmatpush1.msra.mxu0 %v8915_v18  ;;  %5641 = vmatpush1.msra.mxu1 %v9692_v41  ;;  %v5221_v18 = vld [vmem:[#allocation2 + $0x40] sm:$0xff]  ;;  %v5224_v41 = vld [vmem:[#allocation2 + $0x58] sm:$0xff] }
 0x89a   :  { %5571 = vmatprep.subr.mxu0 %v9693_v1  ;;  %5642 = vmatprep.subr.mxu1 %v9694_v42  ;;  %v5225_v1 = vsel %vm3971_vm2, %v5217_v7, %v5221_v18  ;;  %v5219_v7 = vld [vmem:[#allocation2 + $0xb0] sm:$0xff] }
 0x89b   :  { %5572 = vmatpush1.msra.mxu0 %v9695_v9  ;;  %5605 = vmatprep.mubr.f32.mxu0 %v9696_v15  ;;  %v5226_v9 = vsel %vm8451_vm3, %v5218_v37, %v5222_v58  ;;  %v5223_v18 = vld [vmem:[#allocation2 + $0x50] sm:$0xff] }
 0x89c   :  { %5643 = vmatpush1.msra.mxu1 %v9697_v5  ;;  %5676 = vmatprep.mubr.f32.mxu1 %v9696_v15  ;;  %v5227_v58 = vsel %vm8475_vm5, %v5219_v7, %v5223_v18 }
 0x89d   :  { %5789 = vmatprep.subr.mxu0 %v9698_v44  ;;  %5860 = vmatprep.subr.mxu1 %v9699_v23  ;;  %v5220_v23 = vld [vmem:[#allocation2 + $0xb8] sm:$0xff] }
 0x89e   :  { %v5228_v24 = vsel %vm8471_vm4, %v5220_v23, %v5224_v41 }
 0x93c   :  { %v5359_v45 = vpop.f32.mrf.mxu0  ;;  %v5430_v42 = vpop.f32.mrf.mxu1 }
 0x93d   :  { %v5435_v56 = vadd.f32 %v5359_v45, %v5225_v1 }
 0x93e   :  { %v5361_v4 = vpop.f32.mrf.mxu0  ;;  %v5432_v39 = vpop.f32.mrf.mxu1 }
 0x93f   :  { %v6277_v34 = vmul.f32 -1.442695, %v5435_v56  ;;  %v5436_v5 = vadd.f32 %v5361_v4, %v5226_v9  ;;  %v5438_v46 = vadd.f32 %v5432_v39, %v5228_v24  ;;  %v5437_v56 = vadd.f32 %v5430_v42, %v5227_v58 }
 0x941   :  { %6492 = vpow2.f32 %v6277_v34  ;;  %v6278_v44 = vmul.f32 -1.442695, %v5436_v5  ;;  %v6279_v45 = vmul.f32 -1.442695, %v5438_v46 }
 0x943   :  { %6494 = vpow2.f32 %v6278_v44 }
 0x944   :  { %6496 = vpow2.f32 %v6279_v45 }
 0x94e   :  { %v6493_v37 = vpop.eup %6492 }
 0x94f   :  { %v5442_v4 = vadd.f32 1.0, %v6493_v37 }
 0x950   :  { %v6495_v34 = vpop.eup %6494 }
 0x951   :  { %6498 = vrcp.f32 %v5442_v4  ;;  %v5448_v5 = vadd.f32 1.0, %v6495_v34  ;;  %v6497_v9 = vpop.eup %6496 }
 0x952   :  { %6500 = vtanh.f32 %v5437_v56  ;;  %v5455_v24 = vadd.f32 1.0, %v6497_v9 }
 0x953   :  { %6502 = vrcp.f32 %v5448_v5 }
 0x954   :  { %6504 = vrcp.f32 %v5455_v24 }
 0x95e   :  { %v6499_v44 = vpop.eup %6498 }
 0x95f   :  { %v6501_v59 = vpop.eup %6500 }
 0x960   :  { %v6503_v41 = vpop.eup %6502  ;;  %v5459_v39 = vmul.f32 %v6501_v59, %v6499_v44  ;;  %v9702_v59 = vld [vmem:[#allocation37_spill] sm:$0xff] }
 0x961   :  { %v5458_v46 = vmul.f32 %v6503_v41, %v9149_v20  ;;  %v6505_v42 = vpop.eup %6504  ;;  %v9703_v20 = vld [vmem:[#allocation23_spill] sm:$0xff] }
 0x963   :  { %v9229_v23 = vadd.f32 %v5459_v39, %v5458_v46 }
 0x965   :  { %6506 = vtanh.f32 %v9229_v23 }
 0x972   :  { %v6507_v7 = vpop.eup %6506 }
 0x973   :  { %v5462_v18 = vmul.f32 %v6507_v7, %v6505_v42 }
 0x975   :  { %5463 = vst.msk [vmem:[#allocation3 + $0x28] sm:$0xff] %vm4221_vm6, %v5462_v18  ;;  %5606 = vmatmul.mubr.f32.vlgmr.msra.gmra.mxu0 %v5462_v18  ;;  %5677 = vmatmul.mubr.f32.vlgmr.msra.gmra.mxu1 %v5462_v18 }
 0x976   :  { %5464 = vst.msk [vmem:[#allocation3 + $0x10] sm:$0xff] %vm4223_vm7, %v5462_v18  ;;  %5790 = vmatpush1.msra.mxu0 %v8956_v26  ;;  %5861 = vmatpush1.msra.mxu1 %v8958_v51  ;;  %v9704_v26 = vld [vmem:[#allocation22_spill] sm:$0xff]  ;;  %v9705_v51 = vld [vmem:[#allocation29_spill] sm:$0xff] }
 0x977   :  { %5791 = vmatprep.subr.mxu0 %v8962_v35  ;;  %5862 = vmatprep.subr.mxu1 %v8964_v13  ;;  %v9706_v35 = vld [vmem:[#allocation21_spill] sm:$0xff]  ;;  %v5753_v13 = vld [vmem:[#allocation9 + $0xe0] sm:$0xff] }
 0x978   :  { %5792 = vmatpush1.msra.mxu0 %v8968_v19  ;;  %5863 = vmatpush1.msra.mxu1 %v8970_v8  ;;  %v9707_v19 = vld [vmem:[#allocation43_spill] sm:$0xff]  ;;  %v5984_v18 = vld [vmem:[%s9403_s6 + $0x78] sm:$0xff] }
 0x979   :  { %5793 = vmatprep.subr.mxu0 %v8974_v31  ;;  %5864 = vmatprep.subr.mxu1 %v8976_v32  ;;  %v5745_v8 = vld [vmem:[#allocation9 + $0xa0] sm:$0xff]  ;;  %v9708_v31 = vld [vmem:[#allocation45_spill] sm:$0xff]  ;;  %v9709_v32 = vld [vmem:[#allocation48_spill] sm:$0xff] }
 0x97a   :  { %5794 = vmatpush1.msra.mxu0 %v8980_v63  ;;  %5865 = vmatpush1.msra.mxu1 %v8982_v52  ;;  %v9710_v63 = vld [vmem:[#allocation27_spill] sm:$0xff] }
 0x97b   :  { %5795 = vmatprep.subr.mxu0 %v8986_v38  ;;  %5866 = vmatprep.subr.mxu1 %v8988_v48  ;;  %v5737_v52 = vld [vmem:[#allocation9 + $0x60] sm:$0xff] }
 0x97c   :  { %5796 = vmatpush1.msra.mxu0 %v8992_v25  ;;  %5867 = vmatpush1.msra.mxu1 %v8994_v12  ;;  %v9711_v38 = vld [vmem:[#allocation30_spill] sm:$0xff]  ;;  %v9712_v48 = vld [vmem:[#allocation35_spill] sm:$0xff]  ;;  %v9713_v25 = vld [vmem:[#allocation44_spill] sm:$0xff] }
 0x97d   :  { %5797 = vmatprep.subr.mxu0 %v8998_v36  ;;  %5868 = vmatprep.subr.mxu1 %v9000_v49  ;;  %v5729_v12 = vld [vmem:[#allocation9 + $0x20] sm:$0xff]  ;;  %v5726_v49 = vld [vmem:[#allocation9 + $0x8] sm:$0xff] }
 0x97e   :  { %5798 = vmatpush1.msra.mxu0 %v9004_v43  ;;  %5869 = vmatpush1.msra.mxu1 %v9006_v40  ;;  %v9714_v36 = vld [vmem:[#allocation38_spill] sm:$0xff] }
 0x97f   :  { %5799 = vmatprep.subr.mxu0 %v9010_v53  ;;  %5870 = vmatprep.subr.mxu1 %v9012_v50  ;;  %v9715_v43 = vld [vmem:[#allocation26_spill] sm:$0xff] }
 0x980   :  { %5800 = vmatpush1.msra.mxu0 %v9016_v61  ;;  %5871 = vmatpush1.msra.mxu1 %v9018_v55  ;;  %v5725_v40 = vld [vmem:[#allocation9] sm:$0xff] }
 0x981   :  { %5801 = vmatprep.subr.mxu0 %v9022_v29  ;;  %5872 = vmatprep.subr.mxu1 %v9024_v54  ;;  %v5465_v53 = vld [vmem:[#allocation2 + $0xc0] sm:$0xff]  ;;  %v5466_v61 = vld [vmem:[#allocation2 + $0xc8] sm:$0xff] }
 0x982   :  { %5802 = vmatpush1.msra.mxu0 %v9028_v33  ;;  %5873 = vmatpush1.msra.mxu1 %v9030_v30  ;;  %v5469_v50 = vld [vmem:[#allocation2 + $0x20] sm:$0xff]  ;;  %v5470_v55 = vld [vmem:[#allocation2 + $0x28] sm:$0xff] }
 0x983   :  { %5803 = vmatprep.subr.mxu0 %v9034_v17  ;;  %5874 = vmatprep.subr.mxu1 %v9036_v3  ;;  %v5473_v54 = vsel %vm3971_vm2, %v5465_v53, %v5469_v50  ;;  %v5474_v17 = vsel %vm8451_vm3, %v5466_v61, %v5470_v55  ;;  %v5718_v53 = vld [vmem:[#allocation2 + $0x8] sm:$0xff] }
 0x984   :  { %5804 = vmatpush1.msra.mxu0 %v9040_v62  ;;  %5875 = vmatpush1.msra.mxu1 %v9042_v16 }
 0x985   :  { %5805 = vmatprep.subr.mxu0 %v9046_v14  ;;  %5876 = vmatprep.subr.mxu1 %v9048_v28 }
 0x986   :  { %5877 = vmatpush1.msra.mxu1 %v9050_v2  ;;  %5853 = vmatprep.mubr.f32.mxu0 %v9696_v15  ;;  %v5468_v2 = vld [vmem:[#allocation2 + $0xd8] sm:$0xff] }
 0x987   :  { %5878 = vmatprep.subr.mxu1 %v9056_v22  ;;  %5924 = vmatprep.mubr.f32.mxu1 %v9696_v15  ;;  %v5472_v22 = vld [vmem:[#allocation2 + $0x38] sm:$0xff] }
 0x988   :  { %5879 = vmatpush1.msra.mxu1 %v9677_v27  ;;  %5806 = vmatpush1.msra.mxu0 %v5753_v13  ;;  %v5977_v13 = vld [vmem:[%s9403_s6 + $0x40] sm:$0xff] }
 0x989   :  { %5880 = vmatprep.subr.mxu1 %v9679_v60  ;;  %5807 = vmatprep.subr.mxu0 %v9707_v19  ;;  %v5976_v19 = vld [vmem:[%s9403_s6 + $0x38] sm:$0xff] }
 0x98a   :  { %5881 = vmatpush1.msra.mxu1 %v9681_v57  ;;  %5808 = vmatpush1.msra.mxu0 %v9708_v31  ;;  %v5476_v57 = vsel %vm8471_vm4, %v5468_v2, %v5472_v22  ;;  %v5974_v31 = vld [vmem:[%s9403_s6 + $0x28] sm:$0xff] }
 0x98b   :  { %5882 = vmatprep.subr.mxu1 %v9682_v21  ;;  %5809 = vmatprep.subr.mxu0 %v9709_v32  ;;  %v5973_v32 = vld [vmem:[%s9403_s6 + $0x20] sm:$0xff] }
 0x98c   :  { %5883 = vmatpush1.msra.mxu1 %v9684_v6  ;;  %5810 = vmatpush1.msra.mxu0 %v5745_v8  ;;  %v5467_v6 = vld [vmem:[#allocation2 + $0xd0] sm:$0xff] }
 0x98d   :  { %5884 = vmatprep.subr.mxu1 %v9685_v47  ;;  %5811 = vmatprep.subr.mxu0 %v9710_v63  ;;  %v5471_v47 = vld [vmem:[#allocation2 + $0x30] sm:$0xff]  ;;  %v5972_v63 = vld [vmem:[%s9403_s6 + $0x18] sm:$0xff] }
 0x98e   :  { %5885 = vmatpush1.msra.mxu1 %v9686_v10  ;;  %5812 = vmatpush1.msra.mxu0 %v9711_v38  ;;  %v5975_v8 = vld [vmem:[%s9403_s6 + $0x30] sm:$0xff]  ;;  %v5970_v38 = vld [vmem:[%s9403_s6 + $0x8] sm:$0xff] }
 0x98f   :  { %5886 = vmatprep.subr.mxu1 %v9687_v11  ;;  %5813 = vmatprep.subr.mxu0 %v9712_v48  ;;  %v5475_v11 = vsel %vm8475_vm5, %v5467_v6, %v5471_v47  ;;  %v5969_v48 = vld [vmem:[%s9403_s6] sm:$0xff] }
 0x990   :  { %5887 = vmatpush1.msra.mxu1 %v9702_v59  ;;  %5814 = vmatpush1.msra.mxu0 %v5737_v52  ;;  %v5982_v59 = vld [vmem:[%s9403_s6 + $0x68] sm:$0xff]  ;;  %v5971_v52 = vld [vmem:[%s9403_s6 + $0x10] sm:$0xff] }
 0x991   :  { %5888 = vmatprep.subr.mxu1 %v9703_v20  ;;  %5815 = vmatprep.subr.mxu0 %v9713_v25  ;;  %v5981_v20 = vld [vmem:[%s9403_s6 + $0x60] sm:$0xff] }
 0x992   :  { %5889 = vmatpush1.msra.mxu1 %v9704_v26  ;;  %5816 = vmatpush1.msra.mxu0 %v9714_v36  ;;  %v5980_v26 = vld [vmem:[%s9403_s6 + $0x58] sm:$0xff]  ;;  %v5713_v25 = vld [vmem:[#allocation2 + $0xe0] sm:$0xff]  ;;  %v5714_v36 = vld [vmem:[#allocation2 + $0xe8] sm:$0xff] }
 0x993   :  { %5890 = vmatprep.subr.mxu1 %v9705_v51  ;;  %5817 = vmatprep.subr.mxu0 %v9715_v43  ;;  %v5979_v51 = vld [vmem:[%s9403_s6 + $0x50] sm:$0xff]  ;;  %v5722_v50 = vsel %vm8451_vm3, %v5714_v36, %v5718_v53 }
 0x994   :  { %5891 = vmatpush1.msra.mxu1 %v9706_v35  ;;  %5818 = vmatpush1.msra.mxu0 %v5729_v12  ;;  %v5978_v35 = vld [vmem:[%s9403_s6 + $0x48] sm:$0xff]  ;;  %v5717_v12 = vld [vmem:[#allocation2] sm:$0xff] }
 0x995   :  { %5819 = vmatprep.subr.mxu0 %v5726_v49  ;;  %v5721_v49 = vsel %vm3971_vm2, %v5713_v25, %v5717_v12 }
 0x996   :  { %5820 = vmatpush1.msra.mxu0 %v5725_v40 }
 0x997   :  { %6332 = vmatprep.subr.mxu0 %v5984_v18 }
 0xa35   :  { %v5607_v33 = vpop.f32.mrf.mxu0  ;;  %v5678_v14 = vpop.f32.mrf.mxu1 }
 0xa36   :  { %v5683_v30 = vadd.f32 %v5607_v33, %v5473_v54  ;;  %v5685_v45 = vadd.f32 %v5678_v14, %v5475_v11  ;;  %v5715_v14 = vld [vmem:[#allocation2 + $0xf0] sm:$0xff] }
 0xa37   :  { %v5609_v3 = vpop.f32.mrf.mxu0  ;;  %v5680_v27 = vpop.f32.mrf.mxu1 }
 0xa38   :  { %v6280_v62 = vmul.f32 -1.442695, %v5683_v30  ;;  %v5684_v16 = vadd.f32 %v5609_v3, %v5474_v17  ;;  %v5686_v21 = vadd.f32 %v5680_v27, %v5476_v57  ;;  %v5716_v17 = vld [vmem:[#allocation2 + $0xf8] sm:$0xff] }
 0xa39   :  { %v5720_v3 = vld [vmem:[#allocation2 + $0x18] sm:$0xff] }
 0xa3a   :  { %6508 = vpow2.f32 %v6280_v62  ;;  %v6281_v28 = vmul.f32 -1.442695, %v5684_v16  ;;  %v6282_v10 = vmul.f32 -1.442695, %v5686_v21  ;;  %v5724_v29 = vsel %vm8471_vm4, %v5716_v17, %v5720_v3 }
 0xa3c   :  { %6510 = vpow2.f32 %v6281_v28  ;;  %v5719_v28 = vld [vmem:[#allocation2 + $0x10] sm:$0xff] }
 0xa3d   :  { %6512 = vpow2.f32 %v6282_v10  ;;  %v5723_v0 = vsel %vm8475_vm5, %v5715_v14, %v5719_v28 }
 0xa47   :  { %v6509_v15 = vpop.eup %6508 }
 0xa48   :  { %v5690_v58 = vadd.f32 1.0, %v6509_v15 }
 0xa49   :  { %v6511_v37 = vpop.eup %6510 }
 0xa4a   :  { %6514 = vrcp.f32 %v5690_v58  ;;  %v5696_v56 = vadd.f32 1.0, %v6511_v37  ;;  %v6513_v4 = vpop.eup %6512 }
 0xa4b   :  { %6516 = vtanh.f32 %v5685_v45  ;;  %v5703_v44 = vadd.f32 1.0, %v6513_v4 }
 0xa4c   :  { %6518 = vrcp.f32 %v5696_v56 }
 0xa4d   :  { %6520 = vrcp.f32 %v5703_v44  ;;  %v5964_v44 = vld [vmem:[#allocation3 + $0x18] sm:$0xff] }
 0xa57   :  { %v6515_v34 = vpop.eup %6514 }
 0xa58   :  { %v6517_v5 = vpop.eup %6516 }
 0xa59   :  { %v6519_v9 = vpop.eup %6518  ;;  %v5707_v41 = vmul.f32 %v6517_v5, %v6515_v34 }
 0xa5a   :  { %v5706_v24 = vmul.f32 %v6519_v9, %v9229_v23  ;;  %v6521_v46 = vpop.eup %6520  ;;  %v5983_v23 = vld [vmem:[%s9403_s6 + $0x70] sm:$0xff] }
 0xa5b   :  { %v5963_v9 = vld [vmem:[#allocation3 + $0x10] sm:$0xff] }
 0xa5c   :  { %v9301_v39 = vadd.f32 %v5707_v41, %v5706_v24  ;;  %v5965_v41 = vld [vmem:[#allocation3 + $0x20] sm:$0xff]  ;;  %v5966_v24 = vld [vmem:[#allocation3 + $0x28] sm:$0xff] }
 0xa5e   :  { %6522 = vtanh.f32 %v9301_v39 }
 0xa6b   :  { %v6523_v42 = vpop.eup %6522 }
 0xa6c   :  { %v5710_v7 = vmul.f32 %v6523_v42, %v6521_v46  ;;  %v6108_v42 = vld [vmem:[#allocation12 + $0x18] sm:$0xff] }
 0xa6d   :  { %6376 = vmatprep.subr.mxu1 %v6108_v42 }
 0xa6e   :  { %5711 = vst.msk [vmem:[#allocation3 + $0x30] sm:$0xff] %vm4221_vm6, %v5710_v7  ;;  %5854 = vmatmul.mubr.f32.vlgmr.msra.gmra.mxu0 %v5710_v7  ;;  %5925 = vmatmul.mubr.f32.vlgmr.msra.gmra.mxu1 %v5710_v7 }
 0xa6f   :  { %5712 = vst.msk [vmem:[#allocation3 + $0x8] sm:$0xff] %vm4223_vm7, %v5710_v7  ;;  %6333 = vmatpush3.msra.mxu0 %v5984_v18  ;;  %6377 = vmatpush3.msra.mxu1 %v6108_v42  ;;  %v6107_v7 = vld [vmem:[#allocation12 + $0x10] sm:$0xff]  ;;  %v6106_v18 = vld [vmem:[#allocation12 + $0x8] sm:$0xff] }
 0xa70   :  { %6334 = vmatprep.subr.mxu0 %v5983_v23  ;;  %6378 = vmatprep.subr.mxu1 %v6107_v7 }
 0xa71   :  { %6335 = vmatpush3.msra.mxu0 %v5983_v23  ;;  %6379 = vmatpush3.msra.mxu1 %v6107_v7  ;;  %v6105_v23 = vld [vmem:[#allocation12] sm:$0xff] }
 0xa72   :  { %6336 = vmatprep.subr.mxu0 %v5982_v59  ;;  %6380 = vmatprep.subr.mxu1 %v6106_v18 }
 0xa73   :  { %6337 = vmatpush3.msra.mxu0 %v5982_v59  ;;  %6381 = vmatpush3.msra.mxu1 %v6106_v18  ;;  %v6286_v59 = vld [vmem:[#allocation11] ss:$0 sm:$0xff] }
 0xa74   :  { %6338 = vmatprep.subr.mxu0 %v5981_v20  ;;  %6382 = vmatprep.subr.mxu1 %v6105_v23 }
 0xa75   :  { %6339 = vmatpush3.msra.mxu0 %v5981_v20  ;;  %6383 = vmatpush3.msra.mxu1 %v6105_v23 }
 0xa76   :  { %6340 = vmatprep.subr.mxu0 %v5980_v26  ;;  %v5962_v5 = vld [vmem:[#allocation3 + $0x8] sm:$0xff] }
 0xa77   :  { %6341 = vmatpush3.msra.mxu0 %v5980_v26 }
 0xa78   :  { %6342 = vmatprep.subr.mxu0 %v5979_v51 }
 0xa79   :  { %6343 = vmatpush3.msra.mxu0 %v5979_v51 }
 0xa7a   :  { %6344 = vmatprep.subr.mxu0 %v5978_v35 }
 0xa7b   :  { %6345 = vmatpush3.msra.mxu0 %v5978_v35 }
 0xa7c   :  { %6346 = vmatprep.subr.mxu0 %v5977_v13 }
 0xa7d   :  { %6347 = vmatpush3.msra.mxu0 %v5977_v13 }
 0xa7e   :  { %6348 = vmatprep.subr.mxu0 %v5976_v19 }
 0xa7f   :  { %6349 = vmatpush3.msra.mxu0 %v5976_v19 }
 0xa80   :  { %6350 = vmatprep.subr.mxu0 %v5975_v8 }
 0xa81   :  { %6351 = vmatpush3.msra.mxu0 %v5975_v8 }
 0xa82   :  { %6352 = vmatprep.subr.mxu0 %v5974_v31 }
 0xa83   :  { %6353 = vmatpush3.msra.mxu0 %v5974_v31 }
 0xa84   :  { %6354 = vmatprep.subr.mxu0 %v5973_v32 }
 0xa85   :  { %6355 = vmatpush3.msra.mxu0 %v5973_v32 }
 0xa86   :  { %6356 = vmatprep.subr.mxu0 %v5972_v63 }
 0xa87   :  { %6357 = vmatpush3.msra.mxu0 %v5972_v63 }
 0xa88   :  { %6358 = vmatprep.subr.mxu0 %v5971_v52 }
 0xa89   :  { %6359 = vmatpush3.msra.mxu0 %v5971_v52 }
 0xa8a   :  { %6360 = vmatprep.subr.mxu0 %v5970_v38 }
 0xa8b   :  { %6361 = vmatpush3.msra.mxu0 %v5970_v38 }
 0xa8c   :  { %6362 = vmatprep.subr.mxu0 %v5969_v48 }
 0xa8d   :  { %6363 = vmatpush3.msra.mxu0 %v5969_v48 }
 0xb2e   :  { %v5855_v43 = vpop.f32.mrf.mxu0  ;;  %v5926_v33 = vpop.f32.mrf.mxu1 }
 0xb2f   :  { %v5931_v40 = vadd.f32 %v5855_v43, %v5721_v49  ;;  %v5933_v27 = vadd.f32 %v5926_v33, %v5723_v0  ;;  %v6287_v33 = vld [vmem:[#allocation14] ss:$0 sm:$0xff] }
 0xb30   :  { %v5857_v61 = vpop.f32.mrf.mxu0  ;;  %v5928_v62 = vpop.f32.mrf.mxu1 }
 0xb31   :  { %v6283_v55 = vmul.f32 -1.442695, %v5931_v40  ;;  %v5932_v54 = vadd.f32 %v5857_v61, %v5722_v50  ;;  %v5934_v16 = vadd.f32 %v5928_v62, %v5724_v29 }
 0xb33   :  { %6524 = vpow2.f32 %v6283_v55  ;;  %v6284_v30 = vmul.f32 -1.442695, %v5932_v54  ;;  %v6285_v2 = vmul.f32 -1.442695, %v5934_v16 }
 0xb35   :  { %6526 = vpow2.f32 %v6284_v30 }
 0xb36   :  { %6528 = vpow2.f32 %v6285_v2 }
 0xb40   :  { %v6525_v22 = vpop.eup %6524 }
 0xb41   :  { %v5938_v57 = vadd.f32 1.0, %v6525_v22 }
 0xb42   :  { %v6527_v21 = vpop.eup %6526 }
 0xb43   :  { %6530 = vrcp.f32 %v5938_v57  ;;  %v5944_v6 = vadd.f32 1.0, %v6527_v21  ;;  %v6529_v47 = vpop.eup %6528 }
 0xb44   :  { %6532 = vtanh.f32 %v5933_v27  ;;  %v5951_v15 = vadd.f32 1.0, %v6529_v47 }
 0xb45   :  { %6534 = vrcp.f32 %v5944_v6 }
 0xb46   :  { %6536 = vrcp.f32 %v5951_v15 }
 0xb50   :  { %v6531_v10 = vpop.eup %6530 }
 0xb51   :  { %v6533_v60 = vpop.eup %6532 }
 0xb52   :  { %v6535_v11 = vpop.eup %6534  ;;  %v5955_v45 = vmul.f32 %v6533_v60, %v6531_v10 }
 0xb53   :  { %v5954_v58 = vmul.f32 %v6535_v11, %v9301_v39  ;;  %v6537_v1 = vpop.eup %6536  ;;  %v5967_v39 = vld [vmem:[#allocation3 + $0x30] sm:$0xff] }
 0xb55   :  { %v5956_v37 = vadd.f32 %v5955_v45, %v5954_v58 }
 0xb57   :  { %6538 = vtanh.f32 %v5956_v37 }
 0xb64   :  { %v6539_v56 = vpop.eup %6538 }
 0xb65   :  { %v5958_v4 = vmul.f32 %v6539_v56, %v6537_v1 }
 0xb67   :  { %5959 = vst.msk [vmem:[#allocation3 + $0x38] sm:$0xff] %vm4221_vm6, %v5958_v4 }
 0xb68   :  { %5960 = vst.msk [vmem:[#allocation3] sm:$0xff] %vm4223_vm7, %v5958_v4 }
 0xb6e   :  { %v5968_v46 = vld [vmem:[#allocation3 + $0x38] sm:$0xff] }
 0xb6f   :  { %v5961_v34 = vld [vmem:[#allocation3] sm:$0xff] }
 0xb70   :  { %6364 = vmatprep.mubr.f32.mxu0 %v5961_v34 }
 0xb71   :  { %6365 = vmatmul.mubr.f32.vlgmr.msra.gmra.mxu0 %v5962_v5 }
 0xb72   :  { %6367 = vmatprep.mubr.f32.mxu0 %v5963_v9 }
 0xb75   :  { %6368 = vmatmul.mubr.f32.gmra.mxu0 %v5964_v44 }
 0xb76   :  { %6370 = vmatprep.mubr.f32.mxu0 %v5965_v41 }
 0xb79   :  { %6371 = vmatmul.mubr.f32.gmra.mxu0 %v5966_v24 }
 0xb7a   :  { %6373 = vmatprep.mubr.f32.mxu0 %v5967_v39 }
 0xb7d   :  { %6374 = vmatmul.mubr.f32.gmra.mxu0 %v5968_v46 }
 0xc31   :  { %v6366_v20 = vpop.f32.mrf.mxu0 }
 0xc32   :  { %v6064_v26 = vadd.f32 %v6366_v20, %v6286_v59 }
 0xc33   :  { %v6058_v51 = vpop.f32.mrf.mxu0 }
 0xc34   :  { %v6059_v35 = vadd.f32 %v6286_v59, %v6058_v51  ;;  %v6098_v8 = vmax.f32 %v6064_v26, 0.0 }
 0xc35   :  { %v6369_v13 = vpop.f32.mrf.mxu0 }
 0xc36   :  { %v6097_v19 = vmax.f32 %v6059_v35, 0.0  ;;  %v6074_v31 = vadd.f32 %v6369_v13, %v6286_v59 }
 0xc37   :  { %v6068_v32 = vpop.f32.mrf.mxu0 }
 0xc38   :  { %v6069_v63 = vadd.f32 %v6286_v59, %v6068_v32  ;;  %6384 = vmatprep.mubr.msk.f32.mxu1 %vm6116_vm8, %v6097_v19  ;;  %v6100_v48 = vmax.f32 %v6074_v31, 0.0 }
 0xc39   :  { %v6372_v52 = vpop.f32.mrf.mxu0  ;;  %6385 = vmatmul.mubr.msk.f32.vlgmr.msra.gmra.mxu1 %vm6116_vm8, %v6098_v8 }
 0xc3a   :  { %v6099_v38 = vmax.f32 %v6069_v63, 0.0  ;;  %v6084_v25 = vadd.f32 %v6372_v52, %v6286_v59 }
 0xc3b   :  { %v6078_v12 = vpop.f32.mrf.mxu0 }
 0xc3c   :  { %v6079_v36 = vadd.f32 %v6286_v59, %v6078_v12  ;;  %6387 = vmatprep.mubr.msk.f32.mxu1 %vm6116_vm8, %v6099_v38  ;;  %v6102_v40 = vmax.f32 %v6084_v25, 0.0 }
 0xc3d   :  { %v6375_v49 = vpop.f32.mrf.mxu0  ;;  %6388 = vmatmul.mubr.msk.f32.gmra.mxu1 %vm6116_vm8, %v6100_v48 }
 0xc3e   :  { %v6101_v43 = vmax.f32 %v6079_v36, 0.0  ;;  %v6094_v53 = vadd.f32 %v6375_v49, %v6286_v59 }
 0xc3f   :  { %v6088_v50 = vpop.f32.mrf.mxu0 }
 0xc40   :  { %v6089_v61 = vadd.f32 %v6286_v59, %v6088_v50  ;;  %6390 = vmatprep.mubr.msk.f32.mxu1 %vm6116_vm8, %v6101_v43  ;;  %v6104_v54 = vmax.f32 %v6094_v53, 0.0 }
 0xc41   :  { %6391 = vmatmul.mubr.msk.f32.gmra.mxu1 %vm6116_vm8, %v6102_v40 }
 0xc42   :  { %v6103_v55 = vmax.f32 %v6089_v61, 0.0 }
 0xc44   :  { %6393 = vmatprep.mubr.msk.f32.mxu1 %vm6116_vm8, %v6103_v55 }
 0xc45   :  { %6394 = vmatmul.mubr.msk.f32.gmra.mxu1 %vm6116_vm8, %v6104_v54 }
 0xcf9   :  { %v6386_v30 = vpop.f32.mrf.mxu1 }
 0xcfa   :  { %v6213_v17 = vadd.f32 %v6386_v30, %v6287_v33 }
 0xcfb   :  { %v6207_v3 = vpop.f32.mrf.mxu1 }
 0xcfc   :  { %6247 = vst [vmem:[%s9407_s10 + $0x8] sm:$0xff] %v6213_v17  ;;  %v6208_v62 = vadd.f32 %v6287_v33, %v6207_v3 }
 0xcfd   :  { %v6389_v29 = vpop.f32.mrf.mxu1 }
 0xcfe   :  { %6246 = vst [vmem:[%s9407_s10] sm:$0xff] %v6208_v62  ;;  %v6223_v16 = vadd.f32 %v6389_v29, %v6287_v33 }
 0xcff   :  { %v6217_v14 = vpop.f32.mrf.mxu1 }
 0xd00   :  { %6249 = vst [vmem:[%s9407_s10 + $0x18] sm:$0xff] %v6223_v16  ;;  %v6218_v28 = vadd.f32 %v6287_v33, %v6217_v14 }
 0xd01   :  { %v6392_v2 = vpop.f32.mrf.mxu1 }
 0xd02   :  { %6248 = vst [vmem:[%s9407_s10 + $0x10] sm:$0xff] %v6218_v28  ;;  %v6233_v0 = vadd.f32 %v6392_v2, %v6287_v33 }
 0xd03   :  { %v6227_v22 = vpop.f32.mrf.mxu1 }
 0xd04   :  { %6251 = vst [vmem:[%s9407_s10 + $0x28] sm:$0xff] %v6233_v0  ;;  %v6228_v27 = vadd.f32 %v6287_v33, %v6227_v22 }
 0xd05   :  { %v6395_v57 = vpop.f32.mrf.mxu1 }
 0xd06   :  { %6250 = vst [vmem:[%s9407_s10 + $0x20] sm:$0xff] %v6228_v27  ;;  %v6243_v21 = vadd.f32 %v6395_v57, %v6287_v33 }
 0xd07   :  { %v6237_v6 = vpop.f32.mrf.mxu1 }
 0xd08   :  { %6253 = vst [vmem:[%s9407_s10 + $0x38] sm:$0xff] %v6243_v21  ;;  %v6238_v47 = vadd.f32 %v6287_v33, %v6237_v6 }
 0xd0a   :  { %6252 = vst [vmem:[%s9407_s10 + $0x30] sm:$0xff] %v6238_v47 }
 0xd0b   :  { %6258 = vsyncpa [#allocation5], 1 }
 0xd0c   :  { %6259 = vsyncpa [#allocation7], 1 }
 0xd0d   :  { %6260 = vsyncpa [#allocation10], 1 }
 0xd0e   :  { %6261 = vsyncpa [#allocation13], 1 }

</bundles_post_ra>
